<compile_context>
chip_gen: v6e
topology: v6e:2x2x1
jax: 0.10.0
libtpu: 0.0.40
codegen_flags: <defaults>
</compile_context>

<pallas_src>
import jax
import jax.numpy as jnp
from jax.experimental import pallas as pl
from jax.experimental.pallas import tpu as pltpu

EPS = 1e-5


# -----------------------------------------------------------------------------
# per-generation knobs
# -----------------------------------------------------------------------------
def _vmem_limit_bytes():
    try:
        info = pltpu.get_tpu_info()
        cap = getattr(info, "vmem_capacity_bytes", None)
        if cap:
            # v5e/v6e (128 MiB) -> 96 MiB, v7x (64 MiB) -> 48 MiB
            return int(min(cap * 3 // 4, 96 * 1024 * 1024))
    except Exception:
        pass
    return 32 * 1024 * 1024  # safe default on every generation


def _preferred_tn():
    try:
        kind = jax.devices()[0].device_kind.lower()
        if "v5 lite" in kind or "v5e" in kind or "v5litepod" in kind:
            return 128        # v5e MXU is 128 wide
    except Exception:
        pass
    return 256                # v6e / v7x MXUs are 256 wide


_VMEM_LIMIT = _vmem_limit_bytes()
_TN_PREF = _preferred_tn()


# -----------------------------------------------------------------------------
# small helpers
# -----------------------------------------------------------------------------
def _make_divisible(v, divisor, min_value=None):
    if min_value is None:
        min_value = divisor
    new_v = max(min_value, int(v + divisor / 2) // divisor * divisor)
    if new_v < 0.9 * v:
        new_v += divisor
    return new_v


def _largest_divisor_leq(n, cap):
    for d in range(min(n, cap), 0, -1):
        if n % d == 0:
            return d
    return 1


def _pick_tile(dim, cap, align=8):
    """Largest divisor of dim <= cap that is a multiple of align; else full dim."""
    for d in range(min(dim, cap), align - 1, -1):
        if dim % d == 0 and d % align == 0:
            return d
    return dim


def _pick_tn(n):
    if n % _TN_PREF == 0:
        return _TN_PREF
    if n % 128 == 0:
        return 128
    return n           # full-dim block (no padding / slicing round trips)


def _pick_tk(k):
    if k <= 1024:
        return k
    for t in (512, 256, 128):
        if k % t == 0:
            return t
    return k


def _cparams(sem=None):
    return pltpu.CompilerParams(dimension_semantics=sem,
                                vmem_limit_bytes=_VMEM_LIMIT)


def _apply_act(y, act):
    if act == "none":
        return y
    if act == "gelu":
        # TODO(synk): torch.nn.GELU() is the exact erf GELU; tanh approximation
        # used here for guaranteed Mosaic lowering of the transcendental.
        return jax.nn.gelu(y, approximate=True)
    if act == "relu":
        return jnp.maximum(y, 0.0)
    if act == "sigmoid":
        return jax.nn.sigmoid(y)
    raise ValueError(act)


def _bn_fold(bn):
    rstd = 1.0 / jnp.sqrt(bn["var"] + EPS)
    scale = bn["gamma"] * rstd
    shift = bn["beta"] - bn["mean"] * scale
    return scale, shift


# -----------------------------------------------------------------------------
# tiled matmul kernel:  out = act(x @ w + b) [+ residual]
# -----------------------------------------------------------------------------
def matmul_bias_act(x, w, b, act="none", residual=None, out_dtype=jnp.bfloat16):
    """x:(M,K), w:(K,N), b:(N,), residual:(M,N) -> (M,N) out_dtype."""
    M, K = x.shape
    _, N = w.shape
    has_res = residual is not None

    xb = x.astype(jnp.bfloat16)                       # pre-cast once in wrapper
    wb = w.astype(jnp.bfloat16)
    b2 = b.reshape(1, N).astype(jnp.float32)
    rb = residual.astype(jnp.bfloat16) if has_res else None

    TM = _pick_tile(M, 256, 8)
    TN = _pick_tn(N)
    TK = _pick_tk(K)
    gm, gn, gk = M // TM, N // TN, K // TK

    flops = 2 * M * N * K
    trans = M * N if act in ("gelu", "sigmoid") else 0
    bytes_accessed = (M * K + K * N) * 2 + M * N * jnp.dtype(out_dtype).itemsize
    if has_res:
        bytes_accessed += M * N * 2
    cost = pl.CostEstimate(flops=flops, transcendentals=trans,
                           bytes_accessed=bytes_accessed)

    if gk == 1:
        # single K block (true for every layer here): no accumulator scratch,
        # write dot + bias + act + residual straight to the output tile.
        def kernel(*refs):
            if has_res:
                x_ref, w_ref, b_ref, r_ref, o_ref = refs
            else:
                x_ref, w_ref, b_ref, o_ref = refs
            y = jnp.dot(x_ref[...], w_ref[...],
                        preferred_element_type=jnp.float32) + b_ref[...]
            y = _apply_act(y, act)
            if has_res:
                y = y + r_ref[...].astype(jnp.float32)
            o_ref[...] = y.astype(o_ref.dtype)

        in_specs = [pl.BlockSpec((TM, TK), lambda i, j: (i, 0)),
                    pl.BlockSpec((TK, TN), lambda i, j: (0, j)),
                    pl.BlockSpec((1, TN), lambda i, j: (0, j))]
        args = [xb, wb, b2]
        if has_res:
            in_specs.append(pl.BlockSpec((TM, TN), lambda i, j: (i, j)))
            args.append(rb)
        grid = (gm, gn)
        out_spec = pl.BlockSpec((TM, TN), lambda i, j: (i, j))
        scratch = []
        sem = ("parallel", "parallel")
    else:
        def kernel(*refs):
            if has_res:
                x_ref, w_ref, b_ref, r_ref, o_ref, acc_ref = refs
            else:
                x_ref, w_ref, b_ref, o_ref, acc_ref = refs
            kk = pl.program_id(2)

            @pl.when(kk == 0)
            def _():
                acc_ref[...] = jnp.zeros_like(acc_ref)

            acc_ref[...] += jnp.dot(x_ref[...], w_ref[...],
                                    preferred_element_type=jnp.float32)

            @pl.when(kk == gk - 1)
            def _():
                y = acc_ref[...] + b_ref[...]
                y = _apply_act(y, act)
                if has_res:
                    y = y + r_ref[...].astype(jnp.float32)
                o_ref[...] = y.astype(o_ref.dtype)

        in_specs = [pl.BlockSpec((TM, TK), lambda i, j, k: (i, k)),
                    pl.BlockSpec((TK, TN), lambda i, j, k: (k, j)),
                    pl.BlockSpec((1, TN), lambda i, j, k: (0, j))]
        args = [xb, wb, b2]
        if has_res:
            in_specs.append(pl.BlockSpec((TM, TN), lambda i, j, k: (i, j)))
            args.append(rb)
        grid = (gm, gn, gk)
        out_spec = pl.BlockSpec((TM, TN), lambda i, j, k: (i, j))
        scratch = [pltpu.VMEM((TM, TN), jnp.float32)]
        sem = ("parallel", "parallel", "arbitrary")

    return pl.pallas_call(
        kernel,
        out_shape=jax.ShapeDtypeStruct((M, N), out_dtype),
        grid=grid,
        in_specs=in_specs,
        out_specs=out_spec,
        scratch_shapes=scratch,
        compiler_params=_cparams(sem),
        cost_estimate=cost,
    )(*args)


# -----------------------------------------------------------------------------
# conv helpers: stride decomposed into phase views (no 9x tap duplication in HBM)
# -----------------------------------------------------------------------------
def _pad_and_phases(x, ks, stride, pad):
    """Return (phase arrays, tap_map of (phase_idx, h0, w0), Ho, Wo)."""
    N, H, W, C = x.shape
    Ho = (H + 2 * pad - ks) // stride + 1
    Wo = (W + 2 * pad - ks) // stride + 1
    x_pad = jnp.pad(x, ((0, 0), (pad, pad), (pad, pad), (0, 0)))
    if stride == 1:
        phases = [x_pad]
        tap_map = [(0, kh, kw) for kh in range(ks) for kw in range(ks)]
    elif stride == 2:
        phases = [x_pad[:, ph::2, pw::2, :] for ph in range(2) for pw in range(2)]
        tap_map = [((kh % 2) * 2 + (kw % 2), kh // 2, kw // 2)
                   for kh in range(ks) for kw in range(ks)]
    else:
        raise ValueError(stride)
    return phases, tap_map, Ho, Wo


def _group_taps(tap_map):
    """Group taps by (phase, row offset) so each row slab is loaded once."""
    groups = {}
    for t, (p, h0, w0) in enumerate(tap_map):
        groups.setdefault((p, h0), []).append((t, w0))
    return groups


# -----------------------------------------------------------------------------
# dense Conv2d_BN (stem): gridded (batch, row tiles), register accumulation
# -----------------------------------------------------------------------------
def conv2d_bn(x, params, stride, pad, act="none"):
    N, H, W, Cin = x.shape
    ks = params["w"].shape[0]
    Cout = params["w"].shape[-1]
    scale, shift = _bn_fold(params["bn"])
    w_fold = params["w"] * scale[None, None, None, :]
    bias = shift.reshape(1, Cout).astype(jnp.float32)

    phases, tap_map, Ho, Wo = _pad_and_phases(x, ks, stride, pad)
    n_ph = len(phases)
    TH = _largest_divisor_leq(Ho, 16)
    n_ht = Ho // TH
    row_groups = _group_taps(tap_map)

    use_vpu = (ks * ks * Cin) <= 32       # tiny Cin: broadcast MACs on the VPU
    if use_vpu:
        w_k = w_fold.reshape(ks * ks, Cin, 1, Cout).astype(jnp.float32)
    else:
        w_k = w_fold.reshape(ks * ks, Cin, Cout).astype(jnp.bfloat16)

    def kernel(*refs):
        phase_refs = refs[:n_ph]
        w_ref, b_ref, o_ref = refs[n_ph:]
        r0 = pl.program_id(1) * TH
        taps = [None] * len(tap_map)
        for (p, h0), items in row_groups.items():
            rows = phase_refs[p][0, pl.ds(r0 + h0, TH), :, :]        # (TH, Wp, Cin)
            for (t, w0) in items:
                taps[t] = rows[:, w0:w0 + Wo, :]
        if use_vpu:
            acc = jnp.zeros((TH, Wo, Cout), jnp.float32)
            for t in range(len(tap_map)):
                tap = taps[t].astype(jnp.float32)
                for ci in range(Cin):
                    acc = acc + tap[:, :, ci:ci + 1] * w_ref[t, ci]  # (1,Cout) bcast
            y = _apply_act(acc + b_ref[...], act)
            o_ref[0] = y.astype(o_ref.dtype)
        else:
            # TODO(synk): a single K = ks*ks*Cin dot (lane-concat of taps) would cut
            # MXU push/drain passes ~9x once unaligned lane concat is verified.
            acc = jnp.zeros((TH * Wo, Cout), jnp.float32)
            for t in range(len(tap_map)):
                patch = taps[t].reshape(TH * Wo, Cin)
                acc = acc + jnp.dot(patch, w_ref[t],
                                    preferred_element_type=jnp.float32)
            y = _apply_act(acc + b_ref[...], act)
            o_ref[0] = y.reshape(TH, Wo, Cout).astype(o_ref.dtype)

    in_specs = [pl.BlockSpec((1,) + tuple(p.shape[1:]), lambda n, h: (n, 0, 0, 0))
                for p in phases]
    in_specs += [pl.BlockSpec(tuple(w_k.shape), lambda n, h: (0,) * w_k.ndim),
                 pl.BlockSpec(tuple(bias.shape), lambda n, h: (0, 0))]

    return pl.pallas_call(
        kernel,
        out_shape=jax.ShapeDtypeStruct((N, Ho, Wo, Cout), jnp.bfloat16),
        grid=(N, n_ht),
        in_specs=in_specs,
        out_specs=pl.BlockSpec((1, TH, Wo, Cout), lambda n, h: (n, h, 0, 0)),
        compiler_params=_cparams(("parallel", "parallel")),
    )(*phases, w_k, bias)


# -----------------------------------------------------------------------------
# depthwise conv kernel (+ optional fused dense 1x1 mix, + optional fused GAP)
# -----------------------------------------------------------------------------
def dwconv_bn_pallas(x, w_dw, bias, stride, pad, w_dense=None, want_pool=False):
    """Depthwise 3x3 conv, w_dw:(9,C), bias:(C,).  If w_dense (C,C) is given, the
    term x @ w_dense rides along (RepVGGDW).  If want_pool, also emits the
    spatial-sum (N,C) of the output (Squeeze-Excite global-average-pool)."""
    N, H, W, C = x.shape
    ks2 = w_dw.shape[0]
    ks = int(round(ks2 ** 0.5))
    phases, tap_map, Ho, Wo = _pad_and_phases(x, ks, stride, pad)
    n_ph = len(phases)
    TH = _largest_divisor_leq(Ho, 8)
    n_ht = Ho // TH
    row_groups = _group_taps(tap_map)

    w3 = w_dw.reshape(ks2, 1, C).astype(jnp.float32)
    b2 = bias.reshape(1, C).astype(jnp.float32)
    has_dense = w_dense is not None
    center_t = (ks2 - 1) // 2

    def kernel(*refs):
        phase_refs = refs[:n_ph]
        rest = list(refs[n_ph:])
        w_ref = rest.pop(0)
        b_ref = rest.pop(0)
        wd_ref = rest.pop(0) if has_dense else None
        o_ref = rest.pop(0)
        pool_ref = rest.pop(0) if want_pool else None

        h_idx = pl.program_id(1)
        r0 = h_idx * TH
        if want_pool:
            @pl.when(h_idx == 0)
            def _():
                pool_ref[...] = jnp.zeros_like(pool_ref)
            tile_pool = jnp.zeros((1, C), jnp.float32)

        # one output row at a time: the (Wo, C) accumulator stays in registers
        for r in range(TH):
            acc = jnp.zeros((Wo, C), jnp.float32)
            center = None
            for (p, h0), items in row_groups.items():
                rows = phase_refs[p][0, pl.ds(r0 + r + h0, 1), :, :]   # (1, Wp, C)
                row_f = rows[0].astype(jnp.float32)
                for (t, w0) in items:
                    acc = acc + row_f[w0:w0 + Wo, :] * w_ref[t]
                    if has_dense and t == center_t:
                        center = rows[0, w0:w0 + Wo, :]                # bf16 for MXU
            acc = acc + b_ref[...]
            if has_dense:
                # TODO(synk): for C > 128 use a grouped (g,cpg,cpg) contraction to
                # skip the block-diagonal zeros (~16x fewer MXU flops).
                acc = acc + jnp.dot(center, wd_ref[...],
                                    preferred_element_type=jnp.float32)
            if want_pool:
                tile_pool = tile_pool + jnp.sum(acc, axis=0, keepdims=True)
            o_ref[0, r] = acc.astype(o_ref.dtype)

        if want_pool:
            pool_ref[...] = pool_ref[...] + tile_pool.reshape(1, 1, C)

    in_specs = [pl.BlockSpec((1,) + tuple(p.shape[1:]), lambda n, h: (n, 0, 0, 0))
                for p in phases]
    in_specs += [pl.BlockSpec(tuple(w3.shape), lambda n, h: (0, 0, 0)),
                 pl.BlockSpec(tuple(b2.shape), lambda n, h: (0, 0))]
    args = list(phases) + [w3, b2]
    if has_dense:
        in_specs.append(pl.BlockSpec((C, C), lambda n, h: (0, 0)))
        args.append(w_dense.astype(jnp.bfloat16))

    out_shapes = [jax.ShapeDtypeStruct((N, Ho, Wo, C), jnp.bfloat16)]
    out_specs = [pl.BlockSpec((1, TH, Wo, C), lambda n, h: (n, h, 0, 0))]
    if want_pool:
        out_shapes.append(jax.ShapeDtypeStruct((N, 1, C), jnp.float32))
        out_specs.append(pl.BlockSpec((1, 1, C), lambda n, h: (n, 0, 0)))

    sem = ("parallel", "arbitrary") if want_pool else ("parallel", "parallel")
    res = pl.pallas_call(
        kernel,
        out_shape=tuple(out_shapes) if want_pool else out_shapes[0],
        grid=(N, n_ht),
        in_specs=in_specs,
        out_specs=tuple(out_specs) if want_pool else out_specs[0],
        compiler_params=_cparams(sem),
    )(*args)
    if want_pool:
        y, pool = res
        return y, pool.reshape(N, C)
    return res


def dwconv2d_bn(x, params, stride, pad, want_pool=False):
    C = x.shape[-1]
    ks = params["w"].shape[0]
    scale, shift = _bn_fold(params["bn"])
    w_eff = params["w"].reshape(ks * ks, C) * scale[None, :]
    return dwconv_bn_pallas(x, w_eff, shift, stride, pad, want_pool=want_pool)


def repvgg_dw(x, params, want_pool=False):
    """RepVGGDW forward bn(dw3x3_bn(x) + grouped1x1(x) + x) as one fused kernel:
    both BNs, the identity branch and the grouped-conv bias are folded into the
    depthwise weights/bias; the block-diagonal 1x1 mix rides along as one small
    MXU matmul inside the depthwise kernel."""
    C = x.shape[-1]
    s1, t1 = _bn_fold(params["conv"]["bn"])
    s2, t2 = _bn_fold(params["bn"])
    w_dw = params["conv"]["w"].reshape(9, C) * (s1 * s2)[None, :]
    w_dw = w_dw.at[4].add(s2)                     # identity branch -> center tap
    w_dense = params["conv1_w"] * s2[None, :]     # grouped 1x1 (block-diag dense)
    bias = s2 * (t1 + params["conv1_b"]) + t2
    return dwconv_bn_pallas(x, w_dw, bias, stride=1, pad=1,
                            w_dense=w_dense, want_pool=want_pool)


# -----------------------------------------------------------------------------
# pooling / Squeeze-Excite kernels
# -----------------------------------------------------------------------------
def global_avg_pool(x):
    """x:(N,H,W,C) bf16 -> (N,C) f32 mean over spatial."""
    N, H, W, C = x.shape
    HW = H * W
    xr = x.reshape(N, HW, C)

    def kernel(x_ref, o_ref):
        o_ref[...] = jnp.mean(x_ref[...].astype(jnp.float32), axis=1, keepdims=True)

    out = pl.pallas_call(
        kernel,
        out_shape=jax.ShapeDtypeStruct((N, 1, C), jnp.float32),
        grid=(N,),
        in_specs=[pl.BlockSpec((1, HW, C), lambda n: (n, 0, 0))],
        out_specs=pl.BlockSpec((1, 1, C), lambda n: (n, 0, 0)),
        compiler_params=_cparams(("parallel",)),
    )(xr)
    return out.reshape(N, C)


def se_gates(pool_sum, hw, params):
    """Fused SE MLP: sigmoid(relu(mean @ w1 + b1) @ w2 + b2); the /HW of the mean
    is folded into w1.  pool_sum:(N,C) f32 spatial sums -> gates (N,C) f32."""
    N, C = pool_sum.shape
    w1 = (params["w1"] / float(hw)).astype(jnp.float32)
    b1 = params["b1"].reshape(1, -1).astype(jnp.float32)
    w2 = params["w2"].astype(jnp.float32)
    b2 = params["b2"].reshape(1, -1).astype(jnp.float32)

    def kernel(p_ref, w1_ref, b1_ref, w2_ref, b2_ref, o_ref):
        h = jnp.maximum(jnp.dot(p_ref[...], w1_ref[...],
                                preferred_element_type=jnp.float32) + b1_ref[...], 0.0)
        g = jax.nn.sigmoid(jnp.dot(h, w2_ref[...],
                                   preferred_element_type=jnp.float32) + b2_ref[...])
        o_ref[...] = g

    return pl.pallas_call(
        kernel,
        out_shape=jax.ShapeDtypeStruct((N, C), jnp.float32),
        compiler_params=_cparams(),
    )(pool_sum, w1, b1, w2, b2)


def scale_channels(x, g):
    """Squeeze-Excite gating: x:(N,H,W,C) bf16 * g:(N,C) f32, bf16 out."""
    # TODO(synk): fold this gate multiply into the prologue of the following
    # pointwise matmul to save one more full-activation HBM round trip.
    N, H, W, C = x.shape
    HW = H * W
    xr = x.reshape(N, HW, C)
    g3 = g.reshape(N, 1, C).astype(jnp.float32)

    def kernel(x_ref, g_ref, o_ref):
        o_ref[...] = (x_ref[...].astype(jnp.float32) * g_ref[...]).astype(o_ref.dtype)

    out = pl.pallas_call(
        kernel,
        out_shape=jax.ShapeDtypeStruct((N, HW, C), jnp.bfloat16),
        grid=(N,),
        in_specs=[pl.BlockSpec((1, HW, C), lambda n: (n, 0, 0)),
                  pl.BlockSpec((1, 1, C), lambda n: (n, 0, 0))],
        out_specs=pl.BlockSpec((1, HW, C), lambda n: (n, 0, 0)),
        compiler_params=_cparams(("parallel",)),
    )(xr, g3)
    return out.reshape(N, H, W, C)


def se_apply(x, pool_sum, hw, se_params):
    g = se_gates(pool_sum, hw, se_params)
    return scale_channels(x, g)


# -----------------------------------------------------------------------------
# module forwards
# -----------------------------------------------------------------------------
def pwconv2d_bn(x, params, act="none", residual=None):
    N, H, W, Cin = x.shape
    Cout = params["w"].shape[-1]
    scale, shift = _bn_fold(params["bn"])
    w_eff = params["w"] * scale[None, :]
    res = residual.reshape(N * H * W, Cout) if residual is not None else None
    y = matmul_bias_act(x.reshape(N * H * W, Cin), w_eff, shift, act=act, residual=res)
    return y.reshape(N, H, W, Cout)


def channel_mixer(x, params):
    """Residual(1x1 conv_bn -> GELU -> 1x1 conv_bn); residual add fused in kernel."""
    h = pwconv2d_bn(x, params["fc1"], act="gelu")
    return pwconv2d_bn(h, params["fc2"], act="none", residual=x)


def repvit_block(x, params):
    if params["stride"] == 2:
        if params["use_se"]:
            t, psum = dwconv2d_bn(x, params["dw"], stride=2, pad=1, want_pool=True)
            t = se_apply(t, psum, t.shape[1] * t.shape[2], params["se"])
        else:
            t = dwconv2d_bn(x, params["dw"], stride=2, pad=1)
        t = pwconv2d_bn(t, params["pw"])
    else:
        if params["use_se"]:
            t, psum = repvgg_dw(x, params["repvgg"], want_pool=True)
            t = se_apply(t, psum, t.shape[1] * t.shape[2], params["se"])
        else:
            t = repvgg_dw(x, params["repvgg"])
    return channel_mixer(t, params["cm"])


def classifier_forward(x, params):
    """BN_Linear (BatchNorm1d folded into the Linear), distillation=False."""
    scale, shift = _bn_fold(params["bn"])
    w_eff = params["w"] * scale[:, None]          # w stored as (in, out)
    b_eff = params["b"] + shift @ params["w"]
    return matmul_bias_act(x, w_eff, b_eff, out_dtype=jnp.float32)


def repvit_forward(params, x_nchw):
    x = jnp.transpose(x_nchw, (0, 2, 3, 1)).astype(jnp.bfloat16)   # NCHW -> NHWC bf16
    x = conv2d_bn(x, params["patch"]["c1"], stride=2, pad=1, act="gelu")
    x = conv2d_bn(x, params["patch"]["c2"], stride=2, pad=1, act="none")
    for bp in params["blocks"]:
        x = repvit_block(x, bp)
    pooled = global_avg_pool(x)                   # adaptive_avg_pool2d(.,1).flatten(1)
    return classifier_forward(pooled, params["classifier"])


# -----------------------------------------------------------------------------
# deterministic parameter init (synthetic; eval/running-stat BN semantics)
# -----------------------------------------------------------------------------
class KeyGen:
    def __init__(self, key):
        self.key = key

    def __call__(self):
        self.key, sub = jax.random.split(self.key)
        return sub


def init_bn(kg, c):
    return dict(
        gamma=1.0 + 0.1 * jax.random.normal(kg(), (c,), jnp.float32),
        beta=0.1 * jax.random.normal(kg(), (c,), jnp.float32),
        mean=0.1 * jax.random.normal(kg(), (c,), jnp.float32),
        var=jax.random.uniform(kg(), (c,), jnp.float32, 0.5, 1.5),
    )


def init_conv_bn(kg, cin, cout, ks):
    fan_in = ks * ks * cin
    return dict(
        w=jax.random.normal(kg(), (ks, ks, cin, cout), jnp.float32) / fan_in ** 0.5,
        bn=init_bn(kg, cout),
    )


def init_dwconv_bn(kg, c, ks):
    return dict(
        w=jax.random.normal(kg(), (ks, ks, c), jnp.float32) / (ks * ks) ** 0.5,
        bn=init_bn(kg, c),
    )


def init_pwconv_bn(kg, cin, cout):
    return dict(
        w=jax.random.normal(kg(), (cin, cout), jnp.float32) / cin ** 0.5,
        bn=init_bn(kg, cout),
    )


def init_se(kg, c):
    rd = _make_divisible(int(c * 0.25), 8)
    return dict(
        w1=jax.random.normal(kg(), (c, rd), jnp.float32) / c ** 0.5,
        b1=jnp.zeros((rd,), jnp.float32),
        w2=jax.random.normal(kg(), (rd, c), jnp.float32) / rd ** 0.5,
        b2=jnp.zeros((c,), jnp.float32),
    )


def init_repvggdw(kg, ed):
    g = min(ed, 16)
    cpg = ed // g
    wg = jax.random.normal(kg(), (g, cpg, cpg), jnp.float32) / cpg ** 0.5
    W = jnp.zeros((ed, ed), jnp.float32)          # block-diagonal dense weight
    for gi in range(g):                            # of the grouped 1x1 conv
        W = W.at[gi * cpg:(gi + 1) * cpg, gi * cpg:(gi + 1) * cpg].set(wg[gi])
    return dict(
        conv=init_dwconv_bn(kg, ed, 3),
        conv1_w=W,
        conv1_b=0.1 * jax.random.normal(kg(), (ed,), jnp.float32),
        bn=init_bn(kg, ed),
    )


def init_block(kg, inp, oup, k, stride, use_se):
    assert k == 3 and stride in (1, 2)
    p = dict(stride=stride, use_se=bool(use_se))
    if stride == 2:
        p["dw"] = init_dwconv_bn(kg, inp, k)
        if use_se:
            p["se"] = init_se(kg, inp)
        p["pw"] = init_pwconv_bn(kg, inp, oup)
        p["cm"] = dict(fc1=init_pwconv_bn(kg, oup, 2 * oup),
                       fc2=init_pwconv_bn(kg, 2 * oup, oup))
    else:
        assert inp == oup
        p["repvgg"] = init_repvggdw(kg, inp)
        if use_se:
            p["se"] = init_se(kg, inp)
        p["cm"] = dict(fc1=init_pwconv_bn(kg, inp, 2 * inp),
                       fc2=init_pwconv_bn(kg, 2 * inp, oup))
    return p


def init_repvit(kg, cfgs, num_classes):
    input_channel = cfgs[0][2]
    patch = dict(c1=init_conv_bn(kg, 3, input_channel // 2, 3),
                 c2=init_conv_bn(kg, input_channel // 2, input_channel, 3))
    blocks = []
    for k, t, c, use_se, use_hs, s in cfgs:
        oup = _make_divisible(c, 8)
        blocks.append(init_block(kg, input_channel, oup, k, s, use_se))
        input_channel = oup
    cls = dict(bn=init_bn(kg, input_channel),
               w=0.02 * jax.random.normal(kg(), (input_channel, num_classes), jnp.float32),
               b=jnp.zeros((num_classes,), jnp.float32))
    return dict(patch=patch, blocks=blocks, classifier=cls)


# -----------------------------------------------------------------------------
# main
# -----------------------------------------------------------------------------
if __name__ == "__main__":
    # cfgs: [kernel, t, channels, use_SE, use_HS, stride]  (small synthetic config;
    # exercises repvgg+SE, repvgg, dw-stride2+SE and the fused SE pool paths)
    cfgs = [
        [3, 2, 16, 1, 0, 1],
        [3, 2, 16, 0, 0, 1],
        [3, 2, 32, 1, 1, 2],
        [3, 2, 32, 1, 1, 1],
    ]
    num_classes = 10

    kg = KeyGen(jax.random.PRNGKey(0))
    params = init_repvit(kg, cfgs, num_classes)

    # PyTorch-style NCHW input
    x = jax.random.normal(jax.random.PRNGKey(0), (2, 3, 16, 16), dtype=jnp.float32)

    fwd = jax.jit(lambda inp: repvit_forward(params, inp))
    out = jax.block_until_ready(fwd(x))
    assert out.shape == (2, num_classes)
    assert bool(jnp.all(jnp.isfinite(out)))
    print("KERNEL_OK")
</pallas_src>

<mosaic_0001>
module attributes {stable_mosaic.version = 11 : i64} {
  func.func @kernel(%arg0: i32, %arg1: i32, %arg2: memref<1x9x9x3xbf16, #tpu.memory_space<vmem>>, %arg3: memref<1x9x9x3xbf16, #tpu.memory_space<vmem>>, %arg4: memref<1x9x9x3xbf16, #tpu.memory_space<vmem>>, %arg5: memref<1x9x9x3xbf16, #tpu.memory_space<vmem>>, %arg6: memref<9x3x1x8xf32, #tpu.memory_space<vmem>>, %arg7: memref<1x8xf32, #tpu.memory_space<vmem>>, %arg8: memref<1x8x8x8xbf16, #tpu.memory_space<vmem>>) attributes {dimension_semantics = [#tpu.dimension_semantics<parallel>, #tpu.dimension_semantics<parallel>], iteration_bounds = array<i64: 2, 1>, scalar_prefetch = 0 : i64, scratch_operands = 0 : i64, tpu.core_type = #tpu.core_type<tc>, window_params = [{transform_indices = @transform_0, window_bounds = array<i64: 1, 9, 9, 3>}, {transform_indices = @transform_1, window_bounds = array<i64: 1, 9, 9, 3>}, {transform_indices = @transform_2, window_bounds = array<i64: 1, 9, 9, 3>}, {transform_indices = @transform_3, window_bounds = array<i64: 1, 9, 9, 3>}, {pipeline_mode = #tpu.pipeline_mode<synchronous>, transform_indices = @transform_4, window_bounds = array<i64: 9, 3, 1, 8>}, {pipeline_mode = #tpu.pipeline_mode<synchronous>, transform_indices = @transform_5, window_bounds = array<i64: 1, 8>}, {transform_indices = @transform_6, window_bounds = array<i64: 1, 8, 8, 8>}]} {
    %c8_i32 = arith.constant 8 : i32
    %0 = arith.muli %arg1, %c8_i32 : i32
    %c0_i32 = arith.constant 0 : i32
    %1 = arith.addi %0, %c0_i32 : i32
    %c0 = arith.constant 0 : index
    %2 = arith.index_cast %1 : i32 to index
    %c0_0 = arith.constant 0 : index
    %c0_1 = arith.constant 0 : index
    %3 = vector.load %arg2[%c0, %2, %c0_0, %c0_1] : memref<1x9x9x3xbf16, #tpu.memory_space<vmem>>, vector<1x8x9x3xbf16>
    %4 = vector.shape_cast %3 : vector<1x8x9x3xbf16> to vector<8x9x3xbf16>
    %5 = vector.extract_strided_slice %4 {offsets = [0, 0, 0], sizes = [8, 8, 3], strides = [1, 1, 1]} : vector<8x9x3xbf16> to vector<8x8x3xbf16>
    %6 = vector.extract_strided_slice %4 {offsets = [0, 1, 0], sizes = [8, 8, 3], strides = [1, 1, 1]} : vector<8x9x3xbf16> to vector<8x8x3xbf16>
    %c0_i32_2 = arith.constant 0 : i32
    %7 = arith.addi %0, %c0_i32_2 : i32
    %c0_3 = arith.constant 0 : index
    %8 = arith.index_cast %7 : i32 to index
    %c0_4 = arith.constant 0 : index
    %c0_5 = arith.constant 0 : index
    %9 = vector.load %arg3[%c0_3, %8, %c0_4, %c0_5] : memref<1x9x9x3xbf16, #tpu.memory_space<vmem>>, vector<1x8x9x3xbf16>
    %10 = vector.shape_cast %9 : vector<1x8x9x3xbf16> to vector<8x9x3xbf16>
    %11 = vector.extract_strided_slice %10 {offsets = [0, 0, 0], sizes = [8, 8, 3], strides = [1, 1, 1]} : vector<8x9x3xbf16> to vector<8x8x3xbf16>
    %c0_i32_6 = arith.constant 0 : i32
    %12 = arith.addi %0, %c0_i32_6 : i32
    %c0_7 = arith.constant 0 : index
    %13 = arith.index_cast %12 : i32 to index
    %c0_8 = arith.constant 0 : index
    %c0_9 = arith.constant 0 : index
    %14 = vector.load %arg4[%c0_7, %13, %c0_8, %c0_9] : memref<1x9x9x3xbf16, #tpu.memory_space<vmem>>, vector<1x8x9x3xbf16>
    %15 = vector.shape_cast %14 : vector<1x8x9x3xbf16> to vector<8x9x3xbf16>
    %16 = vector.extract_strided_slice %15 {offsets = [0, 0, 0], sizes = [8, 8, 3], strides = [1, 1, 1]} : vector<8x9x3xbf16> to vector<8x8x3xbf16>
    %17 = vector.extract_strided_slice %15 {offsets = [0, 1, 0], sizes = [8, 8, 3], strides = [1, 1, 1]} : vector<8x9x3xbf16> to vector<8x8x3xbf16>
    %c0_i32_10 = arith.constant 0 : i32
    %18 = arith.addi %0, %c0_i32_10 : i32
    %c0_11 = arith.constant 0 : index
    %19 = arith.index_cast %18 : i32 to index
    %c0_12 = arith.constant 0 : index
    %c0_13 = arith.constant 0 : index
    %20 = vector.load %arg5[%c0_11, %19, %c0_12, %c0_13] : memref<1x9x9x3xbf16, #tpu.memory_space<vmem>>, vector<1x8x9x3xbf16>
    %21 = vector.shape_cast %20 : vector<1x8x9x3xbf16> to vector<8x9x3xbf16>
    %22 = vector.extract_strided_slice %21 {offsets = [0, 0, 0], sizes = [8, 8, 3], strides = [1, 1, 1]} : vector<8x9x3xbf16> to vector<8x8x3xbf16>
    %c1_i32 = arith.constant 1 : i32
    %23 = arith.addi %0, %c1_i32 : i32
    %c0_14 = arith.constant 0 : index
    %24 = arith.index_cast %23 : i32 to index
    %c0_15 = arith.constant 0 : index
    %c0_16 = arith.constant 0 : index
    %25 = vector.load %arg2[%c0_14, %24, %c0_15, %c0_16] : memref<1x9x9x3xbf16, #tpu.memory_space<vmem>>, vector<1x8x9x3xbf16>
    %26 = vector.shape_cast %25 : vector<1x8x9x3xbf16> to vector<8x9x3xbf16>
    %27 = vector.extract_strided_slice %26 {offsets = [0, 0, 0], sizes = [8, 8, 3], strides = [1, 1, 1]} : vector<8x9x3xbf16> to vector<8x8x3xbf16>
    %28 = vector.extract_strided_slice %26 {offsets = [0, 1, 0], sizes = [8, 8, 3], strides = [1, 1, 1]} : vector<8x9x3xbf16> to vector<8x8x3xbf16>
    %c1_i32_17 = arith.constant 1 : i32
    %29 = arith.addi %0, %c1_i32_17 : i32
    %c0_18 = arith.constant 0 : index
    %30 = arith.index_cast %29 : i32 to index
    %c0_19 = arith.constant 0 : index
    %c0_20 = arith.constant 0 : index
    %31 = vector.load %arg3[%c0_18, %30, %c0_19, %c0_20] : memref<1x9x9x3xbf16, #tpu.memory_space<vmem>>, vector<1x8x9x3xbf16>
    %32 = vector.shape_cast %31 : vector<1x8x9x3xbf16> to vector<8x9x3xbf16>
    %33 = vector.extract_strided_slice %32 {offsets = [0, 0, 0], sizes = [8, 8, 3], strides = [1, 1, 1]} : vector<8x9x3xbf16> to vector<8x8x3xbf16>
    %cst = arith.constant 0.000000e+00 : f32
    %34 = vector.broadcast %cst : f32 to vector<8x8x8xf32>
    %35 = arith.extf %5 : vector<8x8x3xbf16> to vector<8x8x3xf32>
    %36 = vector.extract_strided_slice %35 {offsets = [0, 0, 0], sizes = [8, 8, 1], strides = [1, 1, 1]} : vector<8x8x3xf32> to vector<8x8x1xf32>
    %c0_21 = arith.constant 0 : index
    %c0_22 = arith.constant 0 : index
    %c0_23 = arith.constant 0 : index
    %c0_24 = arith.constant 0 : index
    %37 = vector.load %arg6[%c0_21, %c0_22, %c0_23, %c0_24] : memref<9x3x1x8xf32, #tpu.memory_space<vmem>>, vector<1x1x1x8xf32>
    %38 = vector.shape_cast %37 : vector<1x1x1x8xf32> to vector<1x8xf32>
    %39 = vector.shape_cast %38 : vector<1x8xf32> to vector<1x1x8xf32>
    %40 = vector.broadcast %36 : vector<8x8x1xf32> to vector<8x8x8xf32>
    %41 = vector.broadcast %39 : vector<1x1x8xf32> to vector<8x8x8xf32>
    %42 = arith.mulf %40, %41 : vector<8x8x8xf32>
    %43 = arith.addf %34, %42 : vector<8x8x8xf32>
    %44 = vector.extract_strided_slice %35 {offsets = [0, 0, 1], sizes = [8, 8, 1], strides = [1, 1, 1]} : vector<8x8x3xf32> to vector<8x8x1xf32>
    %c0_25 = arith.constant 0 : index
    %c1 = arith.constant 1 : index
    %c0_26 = arith.constant 0 : index
    %c0_27 = arith.constant 0 : index
    %45 = vector.load %arg6[%c0_25, %c1, %c0_26, %c0_27] : memref<9x3x1x8xf32, #tpu.memory_space<vmem>>, vector<1x1x1x8xf32>
    %46 = vector.shape_cast %45 : vector<1x1x1x8xf32> to vector<1x8xf32>
    %47 = vector.shape_cast %46 : vector<1x8xf32> to vector<1x1x8xf32>
    %48 = vector.broadcast %44 : vector<8x8x1xf32> to vector<8x8x8xf32>
    %49 = vector.broadcast %47 : vector<1x1x8xf32> to vector<8x8x8xf32>
    %50 = arith.mulf %48, %49 : vector<8x8x8xf32>
    %51 = arith.addf %43, %50 : vector<8x8x8xf32>
    %52 = vector.extract_strided_slice %35 {offsets = [0, 0, 2], sizes = [8, 8, 1], strides = [1, 1, 1]} : vector<8x8x3xf32> to vector<8x8x1xf32>
    %c0_28 = arith.constant 0 : index
    %c2 = arith.constant 2 : index
    %c0_29 = arith.constant 0 : index
    %c0_30 = arith.constant 0 : index
    %53 = vector.load %arg6[%c0_28, %c2, %c0_29, %c0_30] : memref<9x3x1x8xf32, #tpu.memory_space<vmem>>, vector<1x1x1x8xf32>
    %54 = vector.shape_cast %53 : vector<1x1x1x8xf32> to vector<1x8xf32>
    %55 = vector.shape_cast %54 : vector<1x8xf32> to vector<1x1x8xf32>
    %56 = vector.broadcast %52 : vector<8x8x1xf32> to vector<8x8x8xf32>
    %57 = vector.broadcast %55 : vector<1x1x8xf32> to vector<8x8x8xf32>
    %58 = arith.mulf %56, %57 : vector<8x8x8xf32>
    %59 = arith.addf %51, %58 : vector<8x8x8xf32>
    %60 = arith.extf %11 : vector<8x8x3xbf16> to vector<8x8x3xf32>
    %61 = vector.extract_strided_slice %60 {offsets = [0, 0, 0], sizes = [8, 8, 1], strides = [1, 1, 1]} : vector<8x8x3xf32> to vector<8x8x1xf32>
    %c1_31 = arith.constant 1 : index
    %c0_32 = arith.constant 0 : index
    %c0_33 = arith.constant 0 : index
    %c0_34 = arith.constant 0 : index
    %62 = vector.load %arg6[%c1_31, %c0_32, %c0_33, %c0_34] : memref<9x3x1x8xf32, #tpu.memory_space<vmem>>, vector<1x1x1x8xf32>
    %63 = vector.shape_cast %62 : vector<1x1x1x8xf32> to vector<1x8xf32>
    %64 = vector.shape_cast %63 : vector<1x8xf32> to vector<1x1x8xf32>
    %65 = vector.broadcast %61 : vector<8x8x1xf32> to vector<8x8x8xf32>
    %66 = vector.broadcast %64 : vector<1x1x8xf32> to vector<8x8x8xf32>
    %67 = arith.mulf %65, %66 : vector<8x8x8xf32>
    %68 = arith.addf %59, %67 : vector<8x8x8xf32>
    %69 = vector.extract_strided_slice %60 {offsets = [0, 0, 1], sizes = [8, 8, 1], strides = [1, 1, 1]} : vector<8x8x3xf32> to vector<8x8x1xf32>
    %c1_35 = arith.constant 1 : index
    %c1_36 = arith.constant 1 : index
    %c0_37 = arith.constant 0 : index
    %c0_38 = arith.constant 0 : index
    %70 = vector.load %arg6[%c1_35, %c1_36, %c0_37, %c0_38] : memref<9x3x1x8xf32, #tpu.memory_space<vmem>>, vector<1x1x1x8xf32>
    %71 = vector.shape_cast %70 : vector<1x1x1x8xf32> to vector<1x8xf32>
    %72 = vector.shape_cast %71 : vector<1x8xf32> to vector<1x1x8xf32>
    %73 = vector.broadcast %69 : vector<8x8x1xf32> to vector<8x8x8xf32>
    %74 = vector.broadcast %72 : vector<1x1x8xf32> to vector<8x8x8xf32>
    %75 = arith.mulf %73, %74 : vector<8x8x8xf32>
    %76 = arith.addf %68, %75 : vector<8x8x8xf32>
    %77 = vector.extract_strided_slice %60 {offsets = [0, 0, 2], sizes = [8, 8, 1], strides = [1, 1, 1]} : vector<8x8x3xf32> to vector<8x8x1xf32>
    %c1_39 = arith.constant 1 : index
    %c2_40 = arith.constant 2 : index
    %c0_41 = arith.constant 0 : index
    %c0_42 = arith.constant 0 : index
    %78 = vector.load %arg6[%c1_39, %c2_40, %c0_41, %c0_42] : memref<9x3x1x8xf32, #tpu.memory_space<vmem>>, vector<1x1x1x8xf32>
    %79 = vector.shape_cast %78 : vector<1x1x1x8xf32> to vector<1x8xf32>
    %80 = vector.shape_cast %79 : vector<1x8xf32> to vector<1x1x8xf32>
    %81 = vector.broadcast %77 : vector<8x8x1xf32> to vector<8x8x8xf32>
    %82 = vector.broadcast %80 : vector<1x1x8xf32> to vector<8x8x8xf32>
    %83 = arith.mulf %81, %82 : vector<8x8x8xf32>
    %84 = arith.addf %76, %83 : vector<8x8x8xf32>
    %85 = arith.extf %6 : vector<8x8x3xbf16> to vector<8x8x3xf32>
    %86 = vector.extract_strided_slice %85 {offsets = [0, 0, 0], sizes = [8, 8, 1], strides = [1, 1, 1]} : vector<8x8x3xf32> to vector<8x8x1xf32>
    %c2_43 = arith.constant 2 : index
    %c0_44 = arith.constant 0 : index
    %c0_45 = arith.constant 0 : index
    %c0_46 = arith.constant 0 : index
    %87 = vector.load %arg6[%c2_43, %c0_44, %c0_45, %c0_46] : memref<9x3x1x8xf32, #tpu.memory_space<vmem>>, vector<1x1x1x8xf32>
    %88 = vector.shape_cast %87 : vector<1x1x1x8xf32> to vector<1x8xf32>
    %89 = vector.shape_cast %88 : vector<1x8xf32> to vector<1x1x8xf32>
    %90 = vector.broadcast %86 : vector<8x8x1xf32> to vector<8x8x8xf32>
    %91 = vector.broadcast %89 : vector<1x1x8xf32> to vector<8x8x8xf32>
    %92 = arith.mulf %90, %91 : vector<8x8x8xf32>
    %93 = arith.addf %84, %92 : vector<8x8x8xf32>
    %94 = vector.extract_strided_slice %85 {offsets = [0, 0, 1], sizes = [8, 8, 1], strides = [1, 1, 1]} : vector<8x8x3xf32> to vector<8x8x1xf32>
    %c2_47 = arith.constant 2 : index
    %c1_48 = arith.constant 1 : index
    %c0_49 = arith.constant 0 : index
    %c0_50 = arith.constant 0 : index
    %95 = vector.load %arg6[%c2_47, %c1_48, %c0_49, %c0_50] : memref<9x3x1x8xf32, #tpu.memory_space<vmem>>, vector<1x1x1x8xf32>
    %96 = vector.shape_cast %95 : vector<1x1x1x8xf32> to vector<1x8xf32>
    %97 = vector.shape_cast %96 : vector<1x8xf32> to vector<1x1x8xf32>
    %98 = vector.broadcast %94 : vector<8x8x1xf32> to vector<8x8x8xf32>
    %99 = vector.broadcast %97 : vector<1x1x8xf32> to vector<8x8x8xf32>
    %100 = arith.mulf %98, %99 : vector<8x8x8xf32>
    %101 = arith.addf %93, %100 : vector<8x8x8xf32>
    %102 = vector.extract_strided_slice %85 {offsets = [0, 0, 2], sizes = [8, 8, 1], strides = [1, 1, 1]} : vector<8x8x3xf32> to vector<8x8x1xf32>
    %c2_51 = arith.constant 2 : index
    %c2_52 = arith.constant 2 : index
    %c0_53 = arith.constant 0 : index
    %c0_54 = arith.constant 0 : index
    %103 = vector.load %arg6[%c2_51, %c2_52, %c0_53, %c0_54] : memref<9x3x1x8xf32, #tpu.memory_space<vmem>>, vector<1x1x1x8xf32>
    %104 = vector.shape_cast %103 : vector<1x1x1x8xf32> to vector<1x8xf32>
    %105 = vector.shape_cast %104 : vector<1x8xf32> to vector<1x1x8xf32>
    %106 = vector.broadcast %102 : vector<8x8x1xf32> to vector<8x8x8xf32>
    %107 = vector.broadcast %105 : vector<1x1x8xf32> to vector<8x8x8xf32>
    %108 = arith.mulf %106, %107 : vector<8x8x8xf32>
    %109 = arith.addf %101, %108 : vector<8x8x8xf32>
    %110 = arith.extf %16 : vector<8x8x3xbf16> to vector<8x8x3xf32>
    %111 = vector.extract_strided_slice %110 {offsets = [0, 0, 0], sizes = [8, 8, 1], strides = [1, 1, 1]} : vector<8x8x3xf32> to vector<8x8x1xf32>
    %c3 = arith.constant 3 : index
    %c0_55 = arith.constant 0 : index
    %c0_56 = arith.constant 0 : index
    %c0_57 = arith.constant 0 : index
    %112 = vector.load %arg6[%c3, %c0_55, %c0_56, %c0_57] : memref<9x3x1x8xf32, #tpu.memory_space<vmem>>, vector<1x1x1x8xf32>
    %113 = vector.shape_cast %112 : vector<1x1x1x8xf32> to vector<1x8xf32>
    %114 = vector.shape_cast %113 : vector<1x8xf32> to vector<1x1x8xf32>
    %115 = vector.broadcast %111 : vector<8x8x1xf32> to vector<8x8x8xf32>
    %116 = vector.broadcast %114 : vector<1x1x8xf32> to vector<8x8x8xf32>
    %117 = arith.mulf %115, %116 : vector<8x8x8xf32>
    %118 = arith.addf %109, %117 : vector<8x8x8xf32>
    %119 = vector.extract_strided_slice %110 {offsets = [0, 0, 1], sizes = [8, 8, 1], strides = [1, 1, 1]} : vector<8x8x3xf32> to vector<8x8x1xf32>
    %c3_58 = arith.constant 3 : index
    %c1_59 = arith.constant 1 : index
    %c0_60 = arith.constant 0 : index
    %c0_61 = arith.constant 0 : index
    %120 = vector.load %arg6[%c3_58, %c1_59, %c0_60, %c0_61] : memref<9x3x1x8xf32, #tpu.memory_space<vmem>>, vector<1x1x1x8xf32>
    %121 = vector.shape_cast %120 : vector<1x1x1x8xf32> to vector<1x8xf32>
    %122 = vector.shape_cast %121 : vector<1x8xf32> to vector<1x1x8xf32>
    %123 = vector.broadcast %119 : vector<8x8x1xf32> to vector<8x8x8xf32>
    %124 = vector.broadcast %122 : vector<1x1x8xf32> to vector<8x8x8xf32>
    %125 = arith.mulf %123, %124 : vector<8x8x8xf32>
    %126 = arith.addf %118, %125 : vector<8x8x8xf32>
    %127 = vector.extract_strided_slice %110 {offsets = [0, 0, 2], sizes = [8, 8, 1], strides = [1, 1, 1]} : vector<8x8x3xf32> to vector<8x8x1xf32>
    %c3_62 = arith.constant 3 : index
    %c2_63 = arith.constant 2 : index
    %c0_64 = arith.constant 0 : index
    %c0_65 = arith.constant 0 : index
    %128 = vector.load %arg6[%c3_62, %c2_63, %c0_64, %c0_65] : memref<9x3x1x8xf32, #tpu.memory_space<vmem>>, vector<1x1x1x8xf32>
    %129 = vector.shape_cast %128 : vector<1x1x1x8xf32> to vector<1x8xf32>
    %130 = vector.shape_cast %129 : vector<1x8xf32> to vector<1x1x8xf32>
    %131 = vector.broadcast %127 : vector<8x8x1xf32> to vector<8x8x8xf32>
    %132 = vector.broadcast %130 : vector<1x1x8xf32> to vector<8x8x8xf32>
    %133 = arith.mulf %131, %132 : vector<8x8x8xf32>
    %134 = arith.addf %126, %133 : vector<8x8x8xf32>
    %135 = arith.extf %22 : vector<8x8x3xbf16> to vector<8x8x3xf32>
    %136 = vector.extract_strided_slice %135 {offsets = [0, 0, 0], sizes = [8, 8, 1], strides = [1, 1, 1]} : vector<8x8x3xf32> to vector<8x8x1xf32>
    %c4 = arith.constant 4 : index
    %c0_66 = arith.constant 0 : index
    %c0_67 = arith.constant 0 : index
    %c0_68 = arith.constant 0 : index
    %137 = vector.load %arg6[%c4, %c0_66, %c0_67, %c0_68] : memref<9x3x1x8xf32, #tpu.memory_space<vmem>>, vector<1x1x1x8xf32>
    %138 = vector.shape_cast %137 : vector<1x1x1x8xf32> to vector<1x8xf32>
    %139 = vector.shape_cast %138 : vector<1x8xf32> to vector<1x1x8xf32>
    %140 = vector.broadcast %136 : vector<8x8x1xf32> to vector<8x8x8xf32>
    %141 = vector.broadcast %139 : vector<1x1x8xf32> to vector<8x8x8xf32>
    %142 = arith.mulf %140, %141 : vector<8x8x8xf32>
    %143 = arith.addf %134, %142 : vector<8x8x8xf32>
    %144 = vector.extract_strided_slice %135 {offsets = [0, 0, 1], sizes = [8, 8, 1], strides = [1, 1, 1]} : vector<8x8x3xf32> to vector<8x8x1xf32>
    %c4_69 = arith.constant 4 : index
    %c1_70 = arith.constant 1 : index
    %c0_71 = arith.constant 0 : index
    %c0_72 = arith.constant 0 : index
    %145 = vector.load %arg6[%c4_69, %c1_70, %c0_71, %c0_72] : memref<9x3x1x8xf32, #tpu.memory_space<vmem>>, vector<1x1x1x8xf32>
    %146 = vector.shape_cast %145 : vector<1x1x1x8xf32> to vector<1x8xf32>
    %147 = vector.shape_cast %146 : vector<1x8xf32> to vector<1x1x8xf32>
    %148 = vector.broadcast %144 : vector<8x8x1xf32> to vector<8x8x8xf32>
    %149 = vector.broadcast %147 : vector<1x1x8xf32> to vector<8x8x8xf32>
    %150 = arith.mulf %148, %149 : vector<8x8x8xf32>
    %151 = arith.addf %143, %150 : vector<8x8x8xf32>
    %152 = vector.extract_strided_slice %135 {offsets = [0, 0, 2], sizes = [8, 8, 1], strides = [1, 1, 1]} : vector<8x8x3xf32> to vector<8x8x1xf32>
    %c4_73 = arith.constant 4 : index
    %c2_74 = arith.constant 2 : index
    %c0_75 = arith.constant 0 : index
    %c0_76 = arith.constant 0 : index
    %153 = vector.load %arg6[%c4_73, %c2_74, %c0_75, %c0_76] : memref<9x3x1x8xf32, #tpu.memory_space<vmem>>, vector<1x1x1x8xf32>
    %154 = vector.shape_cast %153 : vector<1x1x1x8xf32> to vector<1x8xf32>
    %155 = vector.shape_cast %154 : vector<1x8xf32> to vector<1x1x8xf32>
    %156 = vector.broadcast %152 : vector<8x8x1xf32> to vector<8x8x8xf32>
    %157 = vector.broadcast %155 : vector<1x1x8xf32> to vector<8x8x8xf32>
    %158 = arith.mulf %156, %157 : vector<8x8x8xf32>
    %159 = arith.addf %151, %158 : vector<8x8x8xf32>
    %160 = arith.extf %17 : vector<8x8x3xbf16> to vector<8x8x3xf32>
    %161 = vector.extract_strided_slice %160 {offsets = [0, 0, 0], sizes = [8, 8, 1], strides = [1, 1, 1]} : vector<8x8x3xf32> to vector<8x8x1xf32>
    %c5 = arith.constant 5 : index
    %c0_77 = arith.constant 0 : index
    %c0_78 = arith.constant 0 : index
    %c0_79 = arith.constant 0 : index
    %162 = vector.load %arg6[%c5, %c0_77, %c0_78, %c0_79] : memref<9x3x1x8xf32, #tpu.memory_space<vmem>>, vector<1x1x1x8xf32>
    %163 = vector.shape_cast %162 : vector<1x1x1x8xf32> to vector<1x8xf32>
    %164 = vector.shape_cast %163 : vector<1x8xf32> to vector<1x1x8xf32>
    %165 = vector.broadcast %161 : vector<8x8x1xf32> to vector<8x8x8xf32>
    %166 = vector.broadcast %164 : vector<1x1x8xf32> to vector<8x8x8xf32>
    %167 = arith.mulf %165, %166 : vector<8x8x8xf32>
    %168 = arith.addf %159, %167 : vector<8x8x8xf32>
    %169 = vector.extract_strided_slice %160 {offsets = [0, 0, 1], sizes = [8, 8, 1], strides = [1, 1, 1]} : vector<8x8x3xf32> to vector<8x8x1xf32>
    %c5_80 = arith.constant 5 : index
    %c1_81 = arith.constant 1 : index
    %c0_82 = arith.constant 0 : index
    %c0_83 = arith.constant 0 : index
    %170 = vector.load %arg6[%c5_80, %c1_81, %c0_82, %c0_83] : memref<9x3x1x8xf32, #tpu.memory_space<vmem>>, vector<1x1x1x8xf32>
    %171 = vector.shape_cast %170 : vector<1x1x1x8xf32> to vector<1x8xf32>
    %172 = vector.shape_cast %171 : vector<1x8xf32> to vector<1x1x8xf32>
    %173 = vector.broadcast %169 : vector<8x8x1xf32> to vector<8x8x8xf32>
    %174 = vector.broadcast %172 : vector<1x1x8xf32> to vector<8x8x8xf32>
    %175 = arith.mulf %173, %174 : vector<8x8x8xf32>
    %176 = arith.addf %168, %175 : vector<8x8x8xf32>
    %177 = vector.extract_strided_slice %160 {offsets = [0, 0, 2], sizes = [8, 8, 1], strides = [1, 1, 1]} : vector<8x8x3xf32> to vector<8x8x1xf32>
    %c5_84 = arith.constant 5 : index
    %c2_85 = arith.constant 2 : index
    %c0_86 = arith.constant 0 : index
    %c0_87 = arith.constant 0 : index
    %178 = vector.load %arg6[%c5_84, %c2_85, %c0_86, %c0_87] : memref<9x3x1x8xf32, #tpu.memory_space<vmem>>, vector<1x1x1x8xf32>
    %179 = vector.shape_cast %178 : vector<1x1x1x8xf32> to vector<1x8xf32>
    %180 = vector.shape_cast %179 : vector<1x8xf32> to vector<1x1x8xf32>
    %181 = vector.broadcast %177 : vector<8x8x1xf32> to vector<8x8x8xf32>
    %182 = vector.broadcast %180 : vector<1x1x8xf32> to vector<8x8x8xf32>
    %183 = arith.mulf %181, %182 : vector<8x8x8xf32>
    %184 = arith.addf %176, %183 : vector<8x8x8xf32>
    %185 = arith.extf %27 : vector<8x8x3xbf16> to vector<8x8x3xf32>
    %186 = vector.extract_strided_slice %185 {offsets = [0, 0, 0], sizes = [8, 8, 1], strides = [1, 1, 1]} : vector<8x8x3xf32> to vector<8x8x1xf32>
    %c6 = arith.constant 6 : index
    %c0_88 = arith.constant 0 : index
    %c0_89 = arith.constant 0 : index
    %c0_90 = arith.constant 0 : index
    %187 = vector.load %arg6[%c6, %c0_88, %c0_89, %c0_90] : memref<9x3x1x8xf32, #tpu.memory_space<vmem>>, vector<1x1x1x8xf32>
    %188 = vector.shape_cast %187 : vector<1x1x1x8xf32> to vector<1x8xf32>
    %189 = vector.shape_cast %188 : vector<1x8xf32> to vector<1x1x8xf32>
    %190 = vector.broadcast %186 : vector<8x8x1xf32> to vector<8x8x8xf32>
    %191 = vector.broadcast %189 : vector<1x1x8xf32> to vector<8x8x8xf32>
    %192 = arith.mulf %190, %191 : vector<8x8x8xf32>
    %193 = arith.addf %184, %192 : vector<8x8x8xf32>
    %194 = vector.extract_strided_slice %185 {offsets = [0, 0, 1], sizes = [8, 8, 1], strides = [1, 1, 1]} : vector<8x8x3xf32> to vector<8x8x1xf32>
    %c6_91 = arith.constant 6 : index
    %c1_92 = arith.constant 1 : index
    %c0_93 = arith.constant 0 : index
    %c0_94 = arith.constant 0 : index
    %195 = vector.load %arg6[%c6_91, %c1_92, %c0_93, %c0_94] : memref<9x3x1x8xf32, #tpu.memory_space<vmem>>, vector<1x1x1x8xf32>
    %196 = vector.shape_cast %195 : vector<1x1x1x8xf32> to vector<1x8xf32>
    %197 = vector.shape_cast %196 : vector<1x8xf32> to vector<1x1x8xf32>
    %198 = vector.broadcast %194 : vector<8x8x1xf32> to vector<8x8x8xf32>
    %199 = vector.broadcast %197 : vector<1x1x8xf32> to vector<8x8x8xf32>
    %200 = arith.mulf %198, %199 : vector<8x8x8xf32>
    %201 = arith.addf %193, %200 : vector<8x8x8xf32>
    %202 = vector.extract_strided_slice %185 {offsets = [0, 0, 2], sizes = [8, 8, 1], strides = [1, 1, 1]} : vector<8x8x3xf32> to vector<8x8x1xf32>
    %c6_95 = arith.constant 6 : index
    %c2_96 = arith.constant 2 : index
    %c0_97 = arith.constant 0 : index
    %c0_98 = arith.constant 0 : index
    %203 = vector.load %arg6[%c6_95, %c2_96, %c0_97, %c0_98] : memref<9x3x1x8xf32, #tpu.memory_space<vmem>>, vector<1x1x1x8xf32>
    %204 = vector.shape_cast %203 : vector<1x1x1x8xf32> to vector<1x8xf32>
    %205 = vector.shape_cast %204 : vector<1x8xf32> to vector<1x1x8xf32>
    %206 = vector.broadcast %202 : vector<8x8x1xf32> to vector<8x8x8xf32>
    %207 = vector.broadcast %205 : vector<1x1x8xf32> to vector<8x8x8xf32>
    %208 = arith.mulf %206, %207 : vector<8x8x8xf32>
    %209 = arith.addf %201, %208 : vector<8x8x8xf32>
    %210 = arith.extf %33 : vector<8x8x3xbf16> to vector<8x8x3xf32>
    %211 = vector.extract_strided_slice %210 {offsets = [0, 0, 0], sizes = [8, 8, 1], strides = [1, 1, 1]} : vector<8x8x3xf32> to vector<8x8x1xf32>
    %c7 = arith.constant 7 : index
    %c0_99 = arith.constant 0 : index
    %c0_100 = arith.constant 0 : index
    %c0_101 = arith.constant 0 : index
    %212 = vector.load %arg6[%c7, %c0_99, %c0_100, %c0_101] : memref<9x3x1x8xf32, #tpu.memory_space<vmem>>, vector<1x1x1x8xf32>
    %213 = vector.shape_cast %212 : vector<1x1x1x8xf32> to vector<1x8xf32>
    %214 = vector.shape_cast %213 : vector<1x8xf32> to vector<1x1x8xf32>
    %215 = vector.broadcast %211 : vector<8x8x1xf32> to vector<8x8x8xf32>
    %216 = vector.broadcast %214 : vector<1x1x8xf32> to vector<8x8x8xf32>
    %217 = arith.mulf %215, %216 : vector<8x8x8xf32>
    %218 = arith.addf %209, %217 : vector<8x8x8xf32>
    %219 = vector.extract_strided_slice %210 {offsets = [0, 0, 1], sizes = [8, 8, 1], strides = [1, 1, 1]} : vector<8x8x3xf32> to vector<8x8x1xf32>
    %c7_102 = arith.constant 7 : index
    %c1_103 = arith.constant 1 : index
    %c0_104 = arith.constant 0 : index
    %c0_105 = arith.constant 0 : index
    %220 = vector.load %arg6[%c7_102, %c1_103, %c0_104, %c0_105] : memref<9x3x1x8xf32, #tpu.memory_space<vmem>>, vector<1x1x1x8xf32>
    %221 = vector.shape_cast %220 : vector<1x1x1x8xf32> to vector<1x8xf32>
    %222 = vector.shape_cast %221 : vector<1x8xf32> to vector<1x1x8xf32>
    %223 = vector.broadcast %219 : vector<8x8x1xf32> to vector<8x8x8xf32>
    %224 = vector.broadcast %222 : vector<1x1x8xf32> to vector<8x8x8xf32>
    %225 = arith.mulf %223, %224 : vector<8x8x8xf32>
    %226 = arith.addf %218, %225 : vector<8x8x8xf32>
    %227 = vector.extract_strided_slice %210 {offsets = [0, 0, 2], sizes = [8, 8, 1], strides = [1, 1, 1]} : vector<8x8x3xf32> to vector<8x8x1xf32>
    %c7_106 = arith.constant 7 : index
    %c2_107 = arith.constant 2 : index
    %c0_108 = arith.constant 0 : index
    %c0_109 = arith.constant 0 : index
    %228 = vector.load %arg6[%c7_106, %c2_107, %c0_108, %c0_109] : memref<9x3x1x8xf32, #tpu.memory_space<vmem>>, vector<1x1x1x8xf32>
    %229 = vector.shape_cast %228 : vector<1x1x1x8xf32> to vector<1x8xf32>
    %230 = vector.shape_cast %229 : vector<1x8xf32> to vector<1x1x8xf32>
    %231 = vector.broadcast %227 : vector<8x8x1xf32> to vector<8x8x8xf32>
    %232 = vector.broadcast %230 : vector<1x1x8xf32> to vector<8x8x8xf32>
    %233 = arith.mulf %231, %232 : vector<8x8x8xf32>
    %234 = arith.addf %226, %233 : vector<8x8x8xf32>
    %235 = arith.extf %28 : vector<8x8x3xbf16> to vector<8x8x3xf32>
    %236 = vector.extract_strided_slice %235 {offsets = [0, 0, 0], sizes = [8, 8, 1], strides = [1, 1, 1]} : vector<8x8x3xf32> to vector<8x8x1xf32>
    %c8 = arith.constant 8 : index
    %c0_110 = arith.constant 0 : index
    %c0_111 = arith.constant 0 : index
    %c0_112 = arith.constant 0 : index
    %237 = vector.load %arg6[%c8, %c0_110, %c0_111, %c0_112] : memref<9x3x1x8xf32, #tpu.memory_space<vmem>>, vector<1x1x1x8xf32>
    %238 = vector.shape_cast %237 : vector<1x1x1x8xf32> to vector<1x8xf32>
    %239 = vector.shape_cast %238 : vector<1x8xf32> to vector<1x1x8xf32>
    %240 = vector.broadcast %236 : vector<8x8x1xf32> to vector<8x8x8xf32>
    %241 = vector.broadcast %239 : vector<1x1x8xf32> to vector<8x8x8xf32>
    %242 = arith.mulf %240, %241 : vector<8x8x8xf32>
    %243 = arith.addf %234, %242 : vector<8x8x8xf32>
    %244 = vector.extract_strided_slice %235 {offsets = [0, 0, 1], sizes = [8, 8, 1], strides = [1, 1, 1]} : vector<8x8x3xf32> to vector<8x8x1xf32>
    %c8_113 = arith.constant 8 : index
    %c1_114 = arith.constant 1 : index
    %c0_115 = arith.constant 0 : index
    %c0_116 = arith.constant 0 : index
    %245 = vector.load %arg6[%c8_113, %c1_114, %c0_115, %c0_116] : memref<9x3x1x8xf32, #tpu.memory_space<vmem>>, vector<1x1x1x8xf32>
    %246 = vector.shape_cast %245 : vector<1x1x1x8xf32> to vector<1x8xf32>
    %247 = vector.shape_cast %246 : vector<1x8xf32> to vector<1x1x8xf32>
    %248 = vector.broadcast %244 : vector<8x8x1xf32> to vector<8x8x8xf32>
    %249 = vector.broadcast %247 : vector<1x1x8xf32> to vector<8x8x8xf32>
    %250 = arith.mulf %248, %249 : vector<8x8x8xf32>
    %251 = arith.addf %243, %250 : vector<8x8x8xf32>
    %252 = vector.extract_strided_slice %235 {offsets = [0, 0, 2], sizes = [8, 8, 1], strides = [1, 1, 1]} : vector<8x8x3xf32> to vector<8x8x1xf32>
    %c8_117 = arith.constant 8 : index
    %c2_118 = arith.constant 2 : index
    %c0_119 = arith.constant 0 : index
    %c0_120 = arith.constant 0 : index
    %253 = vector.load %arg6[%c8_117, %c2_118, %c0_119, %c0_120] : memref<9x3x1x8xf32, #tpu.memory_space<vmem>>, vector<1x1x1x8xf32>
    %254 = vector.shape_cast %253 : vector<1x1x1x8xf32> to vector<1x8xf32>
    %255 = vector.shape_cast %254 : vector<1x8xf32> to vector<1x1x8xf32>
    %256 = vector.broadcast %252 : vector<8x8x1xf32> to vector<8x8x8xf32>
    %257 = vector.broadcast %255 : vector<1x1x8xf32> to vector<8x8x8xf32>
    %258 = arith.mulf %256, %257 : vector<8x8x8xf32>
    %259 = arith.addf %251, %258 : vector<8x8x8xf32>
    %c0_121 = arith.constant 0 : index
    %c0_122 = arith.constant 0 : index
    %260 = vector.load %arg7[%c0_121, %c0_122] : memref<1x8xf32, #tpu.memory_space<vmem>>, vector<1x8xf32>
    %261 = vector.shape_cast %260 : vector<1x8xf32> to vector<1x1x8xf32>
    %262 = vector.broadcast %261 : vector<1x1x8xf32> to vector<8x8x8xf32>
    %263 = arith.addf %259, %262 : vector<8x8x8xf32>
    %264 = arith.mulf %263, %263 : vector<8x8x8xf32>
    %265 = arith.mulf %263, %264 : vector<8x8x8xf32>
    %cst_123 = arith.constant 4.471500e-02 : f32
    %266 = vector.broadcast %cst_123 : f32 to vector<8x8x8xf32>
    %267 = arith.mulf %266, %265 : vector<8x8x8xf32>
    %268 = arith.addf %263, %267 : vector<8x8x8xf32>
    %cst_124 = arith.constant 0.797884583 : f32
    %269 = vector.broadcast %cst_124 : f32 to vector<8x8x8xf32>
    %270 = arith.mulf %269, %268 : vector<8x8x8xf32>
    %271 = math.tanh %270 : vector<8x8x8xf32>
    %cst_125 = arith.constant 1.000000e+00 : f32
    %272 = vector.broadcast %cst_125 : f32 to vector<8x8x8xf32>
    %273 = arith.addf %272, %271 : vector<8x8x8xf32>
    %cst_126 = arith.constant 5.000000e-01 : f32
    %274 = vector.broadcast %cst_126 : f32 to vector<8x8x8xf32>
    %275 = arith.mulf %274, %273 : vector<8x8x8xf32>
    %276 = arith.mulf %263, %275 : vector<8x8x8xf32>
    %277 = arith.truncf %276 : vector<8x8x8xf32> to vector<8x8x8xbf16>
    %c0_127 = arith.constant 0 : index
    %c0_128 = arith.constant 0 : index
    %c0_129 = arith.constant 0 : index
    %c0_130 = arith.constant 0 : index
    %278 = vector.load %arg8[%c0_127, %c0_128, %c0_129, %c0_130] : memref<1x8x8x8xbf16, #tpu.memory_space<vmem>>, vector<1x8x8x8xbf16>
    %279 = vector.shape_cast %278 : vector<1x8x8x8xbf16> to vector<8x8x8xbf16>
    %280 = vector.shape_cast %277 : vector<8x8x8xbf16> to vector<1x8x8x8xbf16>
    tpu.vector_store %arg8[%c0_127, %c0_128, %c0_129, %c0_130], %280 {strides = array<i32>} : memref<1x8x8x8xbf16, #tpu.memory_space<vmem>>, vector<1x8x8x8xbf16>,
    return
  }
  func.func @transform_0(%arg0: i32, %arg1: i32) -> (i32, i32, i32, i32) {
    %c0_i32 = arith.constant 0 : i32
    %c0_i32_0 = arith.constant 0 : i32
    %c0_i32_1 = arith.constant 0 : i32
    %c0_i32_2 = arith.constant 0 : i32
    return %arg0, %c0_i32, %c0_i32_0, %c0_i32_1 : i32, i32, i32, i32
  }
  func.func @transform_1(%arg0: i32, %arg1: i32) -> (i32, i32, i32, i32) {
    %c0_i32 = arith.constant 0 : i32
    %c0_i32_0 = arith.constant 0 : i32
    %c0_i32_1 = arith.constant 0 : i32
    %c0_i32_2 = arith.constant 0 : i32
    return %arg0, %c0_i32, %c0_i32_0, %c0_i32_1 : i32, i32, i32, i32
  }
  func.func @transform_2(%arg0: i32, %arg1: i32) -> (i32, i32, i32, i32) {
    %c0_i32 = arith.constant 0 : i32
    %c0_i32_0 = arith.constant 0 : i32
    %c0_i32_1 = arith.constant 0 : i32
    %c0_i32_2 = arith.constant 0 : i32
    return %arg0, %c0_i32, %c0_i32_0, %c0_i32_1 : i32, i32, i32, i32
  }
  func.func @transform_3(%arg0: i32, %arg1: i32) -> (i32, i32, i32, i32) {
    %c0_i32 = arith.constant 0 : i32
    %c0_i32_0 = arith.constant 0 : i32
    %c0_i32_1 = arith.constant 0 : i32
    %c0_i32_2 = arith.constant 0 : i32
    return %arg0, %c0_i32, %c0_i32_0, %c0_i32_1 : i32, i32, i32, i32
  }
  func.func @transform_4(%arg0: i32, %arg1: i32) -> (i32, i32, i32, i32) {
    %c0_i32 = arith.constant 0 : i32
    %c0_i32_0 = arith.constant 0 : i32
    %c0_i32_1 = arith.constant 0 : i32
    %c0_i32_2 = arith.constant 0 : i32
    %c0_i32_3 = arith.constant 0 : i32
    return %c0_i32, %c0_i32_0, %c0_i32_1, %c0_i32_2 : i32, i32, i32, i32
  }
  func.func @transform_5(%arg0: i32, %arg1: i32) -> (i32, i32) {
    %c0_i32 = arith.constant 0 : i32
    %c0_i32_0 = arith.constant 0 : i32
    %c0_i32_1 = arith.constant 0 : i32
    return %c0_i32, %c0_i32_0 : i32, i32
  }
  func.func @transform_6(%arg0: i32, %arg1: i32) -> (i32, i32, i32, i32) {
    %c0_i32 = arith.constant 0 : i32
    %c0_i32_0 = arith.constant 0 : i32
    %c0_i32_1 = arith.constant 0 : i32
    return %arg0, %arg1, %c0_i32, %c0_i32_0 : i32, i32, i32, i32
  }
}

module attributes {stable_mosaic.version = 11 : i64} {
  func.func @kernel(%arg0: i32, %arg1: i32, %arg2: memref<1x5x5x8xbf16, #tpu.memory_space<vmem>>, %arg3: memref<1x5x5x8xbf16, #tpu.memory_space<vmem>>, %arg4: memref<1x5x5x8xbf16, #tpu.memory_space<vmem>>, %arg5: memref<1x5x5x8xbf16, #tpu.memory_space<vmem>>, %arg6: memref<9x8x16xbf16, #tpu.memory_space<vmem>>, %arg7: memref<1x16xf32, #tpu.memory_space<vmem>>, %arg8: memref<1x4x4x16xbf16, #tpu.memory_space<vmem>>) attributes {dimension_semantics = [#tpu.dimension_semantics<parallel>, #tpu.dimension_semantics<parallel>], iteration_bounds = array<i64: 2, 1>, scalar_prefetch = 0 : i64, scratch_operands = 0 : i64, tpu.core_type = #tpu.core_type<tc>, window_params = [{transform_indices = @transform_0, window_bounds = array<i64: 1, 5, 5, 8>}, {transform_indices = @transform_1, window_bounds = array<i64: 1, 5, 5, 8>}, {transform_indices = @transform_2, window_bounds = array<i64: 1, 5, 5, 8>}, {transform_indices = @transform_3, window_bounds = array<i64: 1, 5, 5, 8>}, {pipeline_mode = #tpu.pipeline_mode<synchronous>, transform_indices = @transform_4, window_bounds = array<i64: 9, 8, 16>}, {pipeline_mode = #tpu.pipeline_mode<synchronous>, transform_indices = @transform_5, window_bounds = array<i64: 1, 16>}, {transform_indices = @transform_6, window_bounds = array<i64: 1, 4, 4, 16>}]} {
    %c4_i32 = arith.constant 4 : i32
    %0 = arith.muli %arg1, %c4_i32 : i32
    %c0_i32 = arith.constant 0 : i32
    %1 = arith.addi %0, %c0_i32 : i32
    %c0 = arith.constant 0 : index
    %2 = arith.index_cast %1 : i32 to index
    %c0_0 = arith.constant 0 : index
    %c0_1 = arith.constant 0 : index
    %3 = vector.load %arg2[%c0, %2, %c0_0, %c0_1] : memref<1x5x5x8xbf16, #tpu.memory_space<vmem>>, vector<1x4x5x8xbf16>
    %4 = vector.shape_cast %3 : vector<1x4x5x8xbf16> to vector<4x5x8xbf16>
    %5 = vector.extract_strided_slice %4 {offsets = [0, 0, 0], sizes = [4, 4, 8], strides = [1, 1, 1]} : vector<4x5x8xbf16> to vector<4x4x8xbf16>
    %6 = vector.extract_strided_slice %4 {offsets = [0, 1, 0], sizes = [4, 4, 8], strides = [1, 1, 1]} : vector<4x5x8xbf16> to vector<4x4x8xbf16>
    %c0_i32_2 = arith.constant 0 : i32
    %7 = arith.addi %0, %c0_i32_2 : i32
    %c0_3 = arith.constant 0 : index
    %8 = arith.index_cast %7 : i32 to index
    %c0_4 = arith.constant 0 : index
    %c0_5 = arith.constant 0 : index
    %9 = vector.load %arg3[%c0_3, %8, %c0_4, %c0_5] : memref<1x5x5x8xbf16, #tpu.memory_space<vmem>>, vector<1x4x5x8xbf16>
    %10 = vector.shape_cast %9 : vector<1x4x5x8xbf16> to vector<4x5x8xbf16>
    %11 = vector.extract_strided_slice %10 {offsets = [0, 0, 0], sizes = [4, 4, 8], strides = [1, 1, 1]} : vector<4x5x8xbf16> to vector<4x4x8xbf16>
    %c0_i32_6 = arith.constant 0 : i32
    %12 = arith.addi %0, %c0_i32_6 : i32
    %c0_7 = arith.constant 0 : index
    %13 = arith.index_cast %12 : i32 to index
    %c0_8 = arith.constant 0 : index
    %c0_9 = arith.constant 0 : index
    %14 = vector.load %arg4[%c0_7, %13, %c0_8, %c0_9] : memref<1x5x5x8xbf16, #tpu.memory_space<vmem>>, vector<1x4x5x8xbf16>
    %15 = vector.shape_cast %14 : vector<1x4x5x8xbf16> to vector<4x5x8xbf16>
    %16 = vector.extract_strided_slice %15 {offsets = [0, 0, 0], sizes = [4, 4, 8], strides = [1, 1, 1]} : vector<4x5x8xbf16> to vector<4x4x8xbf16>
    %17 = vector.extract_strided_slice %15 {offsets = [0, 1, 0], sizes = [4, 4, 8], strides = [1, 1, 1]} : vector<4x5x8xbf16> to vector<4x4x8xbf16>
    %c0_i32_10 = arith.constant 0 : i32
    %18 = arith.addi %0, %c0_i32_10 : i32
    %c0_11 = arith.constant 0 : index
    %19 = arith.index_cast %18 : i32 to index
    %c0_12 = arith.constant 0 : index
    %c0_13 = arith.constant 0 : index
    %20 = vector.load %arg5[%c0_11, %19, %c0_12, %c0_13] : memref<1x5x5x8xbf16, #tpu.memory_space<vmem>>, vector<1x4x5x8xbf16>
    %21 = vector.shape_cast %20 : vector<1x4x5x8xbf16> to vector<4x5x8xbf16>
    %22 = vector.extract_strided_slice %21 {offsets = [0, 0, 0], sizes = [4, 4, 8], strides = [1, 1, 1]} : vector<4x5x8xbf16> to vector<4x4x8xbf16>
    %c1_i32 = arith.constant 1 : i32
    %23 = arith.addi %0, %c1_i32 : i32
    %c0_14 = arith.constant 0 : index
    %24 = arith.index_cast %23 : i32 to index
    %c0_15 = arith.constant 0 : index
    %c0_16 = arith.constant 0 : index
    %25 = vector.load %arg2[%c0_14, %24, %c0_15, %c0_16] : memref<1x5x5x8xbf16, #tpu.memory_space<vmem>>, vector<1x4x5x8xbf16>
    %26 = vector.shape_cast %25 : vector<1x4x5x8xbf16> to vector<4x5x8xbf16>
    %27 = vector.extract_strided_slice %26 {offsets = [0, 0, 0], sizes = [4, 4, 8], strides = [1, 1, 1]} : vector<4x5x8xbf16> to vector<4x4x8xbf16>
    %28 = vector.extract_strided_slice %26 {offsets = [0, 1, 0], sizes = [4, 4, 8], strides = [1, 1, 1]} : vector<4x5x8xbf16> to vector<4x4x8xbf16>
    %c1_i32_17 = arith.constant 1 : i32
    %29 = arith.addi %0, %c1_i32_17 : i32
    %c0_18 = arith.constant 0 : index
    %30 = arith.index_cast %29 : i32 to index
    %c0_19 = arith.constant 0 : index
    %c0_20 = arith.constant 0 : index
    %31 = vector.load %arg3[%c0_18, %30, %c0_19, %c0_20] : memref<1x5x5x8xbf16, #tpu.memory_space<vmem>>, vector<1x4x5x8xbf16>
    %32 = vector.shape_cast %31 : vector<1x4x5x8xbf16> to vector<4x5x8xbf16>
    %33 = vector.extract_strided_slice %32 {offsets = [0, 0, 0], sizes = [4, 4, 8], strides = [1, 1, 1]} : vector<4x5x8xbf16> to vector<4x4x8xbf16>
    %cst = arith.constant 0.000000e+00 : f32
    %34 = vector.broadcast %cst : f32 to vector<16x16xf32>
    %35 = vector.shape_cast %5 : vector<4x4x8xbf16> to vector<16x8xbf16>
    %c0_21 = arith.constant 0 : index
    %c0_22 = arith.constant 0 : index
    %c0_23 = arith.constant 0 : index
    %36 = vector.load %arg6[%c0_21, %c0_22, %c0_23] : memref<9x8x16xbf16, #tpu.memory_space<vmem>>, vector<1x8x16xbf16>
    %37 = vector.shape_cast %36 : vector<1x8x16xbf16> to vector<8x16xbf16>
    %cst_24 = arith.constant dense<0.000000e+00> : vector<16x16xf32>
    %38 = tpu.matmul %35, %37, %cst_24 {dimension_numbers = #tpu.dot_dimension_numbers<[1], [0], [0], [1], [0, 0, 1, 1], [], []>} : vector<16x8xbf16>, vector<8x16xbf16>, vector<16x16xf32> -> vector<16x16xf32>
    %39 = arith.addf %34, %38 : vector<16x16xf32>
    %40 = vector.shape_cast %11 : vector<4x4x8xbf16> to vector<16x8xbf16>
    %c1 = arith.constant 1 : index
    %c0_25 = arith.constant 0 : index
    %c0_26 = arith.constant 0 : index
    %41 = vector.load %arg6[%c1, %c0_25, %c0_26] : memref<9x8x16xbf16, #tpu.memory_space<vmem>>, vector<1x8x16xbf16>
    %42 = vector.shape_cast %41 : vector<1x8x16xbf16> to vector<8x16xbf16>
    %cst_27 = arith.constant dense<0.000000e+00> : vector<16x16xf32>
    %43 = tpu.matmul %40, %42, %cst_27 {dimension_numbers = #tpu.dot_dimension_numbers<[1], [0], [0], [1], [0, 0, 1, 1], [], []>} : vector<16x8xbf16>, vector<8x16xbf16>, vector<16x16xf32> -> vector<16x16xf32>
    %44 = arith.addf %39, %43 : vector<16x16xf32>
    %45 = vector.shape_cast %6 : vector<4x4x8xbf16> to vector<16x8xbf16>
    %c2 = arith.constant 2 : index
    %c0_28 = arith.constant 0 : index
    %c0_29 = arith.constant 0 : index
    %46 = vector.load %arg6[%c2, %c0_28, %c0_29] : memref<9x8x16xbf16, #tpu.memory_space<vmem>>, vector<1x8x16xbf16>
    %47 = vector.shape_cast %46 : vector<1x8x16xbf16> to vector<8x16xbf16>
    %cst_30 = arith.constant dense<0.000000e+00> : vector<16x16xf32>
    %48 = tpu.matmul %45, %47, %cst_30 {dimension_numbers = #tpu.dot_dimension_numbers<[1], [0], [0], [1], [0, 0, 1, 1], [], []>} : vector<16x8xbf16>, vector<8x16xbf16>, vector<16x16xf32> -> vector<16x16xf32>
    %49 = arith.addf %44, %48 : vector<16x16xf32>
    %50 = vector.shape_cast %16 : vector<4x4x8xbf16> to vector<16x8xbf16>
    %c3 = arith.constant 3 : index
    %c0_31 = arith.constant 0 : index
    %c0_32 = arith.constant 0 : index
    %51 = vector.load %arg6[%c3, %c0_31, %c0_32] : memref<9x8x16xbf16, #tpu.memory_space<vmem>>, vector<1x8x16xbf16>
    %52 = vector.shape_cast %51 : vector<1x8x16xbf16> to vector<8x16xbf16>
    %cst_33 = arith.constant dense<0.000000e+00> : vector<16x16xf32>
    %53 = tpu.matmul %50, %52, %cst_33 {dimension_numbers = #tpu.dot_dimension_numbers<[1], [0], [0], [1], [0, 0, 1, 1], [], []>} : vector<16x8xbf16>, vector<8x16xbf16>, vector<16x16xf32> -> vector<16x16xf32>
    %54 = arith.addf %49, %53 : vector<16x16xf32>
    %55 = vector.shape_cast %22 : vector<4x4x8xbf16> to vector<16x8xbf16>
    %c4 = arith.constant 4 : index
    %c0_34 = arith.constant 0 : index
    %c0_35 = arith.constant 0 : index
    %56 = vector.load %arg6[%c4, %c0_34, %c0_35] : memref<9x8x16xbf16, #tpu.memory_space<vmem>>, vector<1x8x16xbf16>
    %57 = vector.shape_cast %56 : vector<1x8x16xbf16> to vector<8x16xbf16>
    %cst_36 = arith.constant dense<0.000000e+00> : vector<16x16xf32>
    %58 = tpu.matmul %55, %57, %cst_36 {dimension_numbers = #tpu.dot_dimension_numbers<[1], [0], [0], [1], [0, 0, 1, 1], [], []>} : vector<16x8xbf16>, vector<8x16xbf16>, vector<16x16xf32> -> vector<16x16xf32>
    %59 = arith.addf %54, %58 : vector<16x16xf32>
    %60 = vector.shape_cast %17 : vector<4x4x8xbf16> to vector<16x8xbf16>
    %c5 = arith.constant 5 : index
    %c0_37 = arith.constant 0 : index
    %c0_38 = arith.constant 0 : index
    %61 = vector.load %arg6[%c5, %c0_37, %c0_38] : memref<9x8x16xbf16, #tpu.memory_space<vmem>>, vector<1x8x16xbf16>
    %62 = vector.shape_cast %61 : vector<1x8x16xbf16> to vector<8x16xbf16>
    %cst_39 = arith.constant dense<0.000000e+00> : vector<16x16xf32>
    %63 = tpu.matmul %60, %62, %cst_39 {dimension_numbers = #tpu.dot_dimension_numbers<[1], [0], [0], [1], [0, 0, 1, 1], [], []>} : vector<16x8xbf16>, vector<8x16xbf16>, vector<16x16xf32> -> vector<16x16xf32>
    %64 = arith.addf %59, %63 : vector<16x16xf32>
    %65 = vector.shape_cast %27 : vector<4x4x8xbf16> to vector<16x8xbf16>
    %c6 = arith.constant 6 : index
    %c0_40 = arith.constant 0 : index
    %c0_41 = arith.constant 0 : index
    %66 = vector.load %arg6[%c6, %c0_40, %c0_41] : memref<9x8x16xbf16, #tpu.memory_space<vmem>>, vector<1x8x16xbf16>
    %67 = vector.shape_cast %66 : vector<1x8x16xbf16> to vector<8x16xbf16>
    %cst_42 = arith.constant dense<0.000000e+00> : vector<16x16xf32>
    %68 = tpu.matmul %65, %67, %cst_42 {dimension_numbers = #tpu.dot_dimension_numbers<[1], [0], [0], [1], [0, 0, 1, 1], [], []>} : vector<16x8xbf16>, vector<8x16xbf16>, vector<16x16xf32> -> vector<16x16xf32>
    %69 = arith.addf %64, %68 : vector<16x16xf32>
    %70 = vector.shape_cast %33 : vector<4x4x8xbf16> to vector<16x8xbf16>
    %c7 = arith.constant 7 : index
    %c0_43 = arith.constant 0 : index
    %c0_44 = arith.constant 0 : index
    %71 = vector.load %arg6[%c7, %c0_43, %c0_44] : memref<9x8x16xbf16, #tpu.memory_space<vmem>>, vector<1x8x16xbf16>
    %72 = vector.shape_cast %71 : vector<1x8x16xbf16> to vector<8x16xbf16>
    %cst_45 = arith.constant dense<0.000000e+00> : vector<16x16xf32>
    %73 = tpu.matmul %70, %72, %cst_45 {dimension_numbers = #tpu.dot_dimension_numbers<[1], [0], [0], [1], [0, 0, 1, 1], [], []>} : vector<16x8xbf16>, vector<8x16xbf16>, vector<16x16xf32> -> vector<16x16xf32>
    %74 = arith.addf %69, %73 : vector<16x16xf32>
    %75 = vector.shape_cast %28 : vector<4x4x8xbf16> to vector<16x8xbf16>
    %c8 = arith.constant 8 : index
    %c0_46 = arith.constant 0 : index
    %c0_47 = arith.constant 0 : index
    %76 = vector.load %arg6[%c8, %c0_46, %c0_47] : memref<9x8x16xbf16, #tpu.memory_space<vmem>>, vector<1x8x16xbf16>
    %77 = vector.shape_cast %76 : vector<1x8x16xbf16> to vector<8x16xbf16>
    %cst_48 = arith.constant dense<0.000000e+00> : vector<16x16xf32>
    %78 = tpu.matmul %75, %77, %cst_48 {dimension_numbers = #tpu.dot_dimension_numbers<[1], [0], [0], [1], [0, 0, 1, 1], [], []>} : vector<16x8xbf16>, vector<8x16xbf16>, vector<16x16xf32> -> vector<16x16xf32>
    %79 = arith.addf %74, %78 : vector<16x16xf32>
    %c0_49 = arith.constant 0 : index
    %c0_50 = arith.constant 0 : index
    %80 = vector.load %arg7[%c0_49, %c0_50] : memref<1x16xf32, #tpu.memory_space<vmem>>, vector<1x16xf32>
    %81 = vector.broadcast %80 : vector<1x16xf32> to vector<16x16xf32>
    %82 = arith.addf %79, %81 : vector<16x16xf32>
    %83 = vector.shape_cast %82 : vector<16x16xf32> to vector<4x4x16xf32>
    %84 = arith.truncf %83 : vector<4x4x16xf32> to vector<4x4x16xbf16>
    %c0_51 = arith.constant 0 : index
    %c0_52 = arith.constant 0 : index
    %c0_53 = arith.constant 0 : index
    %c0_54 = arith.constant 0 : index
    %85 = vector.load %arg8[%c0_51, %c0_52, %c0_53, %c0_54] : memref<1x4x4x16xbf16, #tpu.memory_space<vmem>>, vector<1x4x4x16xbf16>
    %86 = vector.shape_cast %85 : vector<1x4x4x16xbf16> to vector<4x4x16xbf16>
    %87 = vector.shape_cast %84 : vector<4x4x16xbf16> to vector<1x4x4x16xbf16>
    tpu.vector_store %arg8[%c0_51, %c0_52, %c0_53, %c0_54], %87 {strides = array<i32>} : memref<1x4x4x16xbf16, #tpu.memory_space<vmem>>, vector<1x4x4x16xbf16>,
    return
  }
  func.func @transform_0(%arg0: i32, %arg1: i32) -> (i32, i32, i32, i32) {
    %c0_i32 = arith.constant 0 : i32
    %c0_i32_0 = arith.constant 0 : i32
    %c0_i32_1 = arith.constant 0 : i32
    %c0_i32_2 = arith.constant 0 : i32
    return %arg0, %c0_i32, %c0_i32_0, %c0_i32_1 : i32, i32, i32, i32
  }
  func.func @transform_1(%arg0: i32, %arg1: i32) -> (i32, i32, i32, i32) {
    %c0_i32 = arith.constant 0 : i32
    %c0_i32_0 = arith.constant 0 : i32
    %c0_i32_1 = arith.constant 0 : i32
    %c0_i32_2 = arith.constant 0 : i32
    return %arg0, %c0_i32, %c0_i32_0, %c0_i32_1 : i32, i32, i32, i32
  }
  func.func @transform_2(%arg0: i32, %arg1: i32) -> (i32, i32, i32, i32) {
    %c0_i32 = arith.constant 0 : i32
    %c0_i32_0 = arith.constant 0 : i32
    %c0_i32_1 = arith.constant 0 : i32
    %c0_i32_2 = arith.constant 0 : i32
    return %arg0, %c0_i32, %c0_i32_0, %c0_i32_1 : i32, i32, i32, i32
  }
  func.func @transform_3(%arg0: i32, %arg1: i32) -> (i32, i32, i32, i32) {
    %c0_i32 = arith.constant 0 : i32
    %c0_i32_0 = arith.constant 0 : i32
    %c0_i32_1 = arith.constant 0 : i32
    %c0_i32_2 = arith.constant 0 : i32
    return %arg0, %c0_i32, %c0_i32_0, %c0_i32_1 : i32, i32, i32, i32
  }
  func.func @transform_4(%arg0: i32, %arg1: i32) -> (i32, i32, i32) {
    %c0_i32 = arith.constant 0 : i32
    %c0_i32_0 = arith.constant 0 : i32
    %c0_i32_1 = arith.constant 0 : i32
    %c0_i32_2 = arith.constant 0 : i32
    return %c0_i32, %c0_i32_0, %c0_i32_1 : i32, i32, i32
  }
  func.func @transform_5(%arg0: i32, %arg1: i32) -> (i32, i32) {
    %c0_i32 = arith.constant 0 : i32
    %c0_i32_0 = arith.constant 0 : i32
    %c0_i32_1 = arith.constant 0 : i32
    return %c0_i32, %c0_i32_0 : i32, i32
  }
  func.func @transform_6(%arg0: i32, %arg1: i32) -> (i32, i32, i32, i32) {
    %c0_i32 = arith.constant 0 : i32
    %c0_i32_0 = arith.constant 0 : i32
    %c0_i32_1 = arith.constant 0 : i32
    return %arg0, %arg1, %c0_i32, %c0_i32_0 : i32, i32, i32, i32
  }
}

module attributes {stable_mosaic.version = 11 : i64} {
  func.func @kernel(%arg0: memref<2x16xf32, #tpu.memory_space<vmem>>, %arg1: memref<16x8xf32, #tpu.memory_space<vmem>>, %arg2: memref<1x8xf32, #tpu.memory_space<vmem>>, %arg3: memref<8x16xf32, #tpu.memory_space<vmem>>, %arg4: memref<1x16xf32, #tpu.memory_space<vmem>>, %arg5: memref<2x16xf32, #tpu.memory_space<vmem>>) attributes {dimension_semantics = [], scalar_prefetch = 0 : i64, scratch_operands = 0 : i64, tpu.core_type = #tpu.core_type<tc>} {
    %c0 = arith.constant 0 : index
    %c0_0 = arith.constant 0 : index
    %0 = vector.load %arg0[%c0, %c0_0] : memref<2x16xf32, #tpu.memory_space<vmem>>, vector<2x16xf32>
    %c0_1 = arith.constant 0 : index
    %c0_2 = arith.constant 0 : index
    %1 = vector.load %arg1[%c0_1, %c0_2] : memref<16x8xf32, #tpu.memory_space<vmem>>, vector<16x8xf32>
    %cst = arith.constant dense<0.000000e+00> : vector<2x8xf32>
    %2 = tpu.matmul %0, %1, %cst {dimension_numbers = #tpu.dot_dimension_numbers<[1], [0], [0], [1], [0, 0, 1, 1], [], []>} : vector<2x16xf32>, vector<16x8xf32>, vector<2x8xf32> -> vector<2x8xf32>
    %c0_3 = arith.constant 0 : index
    %c0_4 = arith.constant 0 : index
    %3 = vector.load %arg2[%c0_3, %c0_4] : memref<1x8xf32, #tpu.memory_space<vmem>>, vector<1x8xf32>
    %4 = vector.broadcast %3 : vector<1x8xf32> to vector<2x8xf32>
    %5 = arith.addf %2, %4 : vector<2x8xf32>
    %cst_5 = arith.constant 0.000000e+00 : f32
    %6 = vector.broadcast %cst_5 : f32 to vector<2x8xf32>
    %7 = arith.maximumf %5, %6 : vector<2x8xf32>
    %c0_6 = arith.constant 0 : index
    %c0_7 = arith.constant 0 : index
    %8 = vector.load %arg3[%c0_6, %c0_7] : memref<8x16xf32, #tpu.memory_space<vmem>>, vector<8x16xf32>
    %cst_8 = arith.constant dense<0.000000e+00> : vector<2x16xf32>
    %9 = tpu.matmul %7, %8, %cst_8 {dimension_numbers = #tpu.dot_dimension_numbers<[1], [0], [0], [1], [0, 0, 1, 1], [], []>} : vector<2x8xf32>, vector<8x16xf32>, vector<2x16xf32> -> vector<2x16xf32>
    %c0_9 = arith.constant 0 : index
    %c0_10 = arith.constant 0 : index
    %10 = vector.load %arg4[%c0_9, %c0_10] : memref<1x16xf32, #tpu.memory_space<vmem>>, vector<1x16xf32>
    %11 = vector.broadcast %10 : vector<1x16xf32> to vector<2x16xf32>
    %12 = arith.addf %9, %11 : vector<2x16xf32>
    %13 = arith.negf %12 : vector<2x16xf32>
    %14 = math.exp %13 : vector<2x16xf32>
    %cst_11 = arith.constant 1.000000e+00 : f32
    %15 = vector.broadcast %cst_11 : f32 to vector<2x16xf32>
    %16 = arith.addf %15, %14 : vector<2x16xf32>
    %17 = arith.divf %15, %16 : vector<2x16xf32>
    %c0_12 = arith.constant 0 : index
    %c0_13 = arith.constant 0 : index
    %18 = vector.load %arg5[%c0_12, %c0_13] : memref<2x16xf32, #tpu.memory_space<vmem>>, vector<2x16xf32>
    tpu.vector_store %arg5[%c0_12, %c0_13], %17 {strides = array<i32>} : memref<2x16xf32, #tpu.memory_space<vmem>>, vector<2x16xf32>,
    return
  }
}

module attributes {stable_mosaic.version = 11 : i64} {
  func.func @kernel(%arg0: i32, %arg1: i32, %arg2: memref<1x6x6x16xbf16, #tpu.memory_space<vmem>>, %arg3: memref<9x1x16xf32, #tpu.memory_space<vmem>>, %arg4: memref<1x16xf32, #tpu.memory_space<vmem>>, %arg5: memref<16x16xbf16, #tpu.memory_space<vmem>>, %arg6: memref<1x4x4x16xbf16, #tpu.memory_space<vmem>>, %arg7: memref<1x1x16xf32, #tpu.memory_space<vmem>>) attributes {dimension_semantics = [#tpu.dimension_semantics<parallel>, #tpu.dimension_semantics<arbitrary>], iteration_bounds = array<i64: 2, 1>, scalar_prefetch = 0 : i64, scratch_operands = 0 : i64, tpu.core_type = #tpu.core_type<tc>, window_params = [{transform_indices = @transform_0, window_bounds = array<i64: 1, 6, 6, 16>}, {pipeline_mode = #tpu.pipeline_mode<synchronous>, transform_indices = @transform_1, window_bounds = array<i64: 9, 1, 16>}, {pipeline_mode = #tpu.pipeline_mode<synchronous>, transform_indices = @transform_2, window_bounds = array<i64: 1, 16>}, {pipeline_mode = #tpu.pipeline_mode<synchronous>, transform_indices = @transform_3, window_bounds = array<i64: 16, 16>}, {transform_indices = @transform_4, window_bounds = array<i64: 1, 4, 4, 16>}, {transform_indices = @transform_5, window_bounds = array<i64: 1, 1, 16>}]} {
    %c4_i32 = arith.constant 4 : i32
    %0 = arith.muli %arg1, %c4_i32 : i32
    %c0_i32 = arith.constant 0 : i32
    %1 = arith.cmpi eq, %arg1, %c0_i32 : i32
    %2 = arith.extui %1 : i1 to i32
    %c0_i32_0 = arith.constant 0 : i32
    %3 = arith.cmpi ne, %2, %c0_i32_0 : i32
    scf.if %3 {
      %cst_207 = arith.constant 0.000000e+00 : f32
      %373 = vector.broadcast %cst_207 : f32 to vector<1x1x16xf32>
      %c0_208 = arith.constant 0 : index
      %c0_209 = arith.constant 0 : index
      %c0_210 = arith.constant 0 : index
      %374 = vector.load %arg7[%c0_208, %c0_209, %c0_210] : memref<1x1x16xf32, #tpu.memory_space<vmem>>, vector<1x1x16xf32>
      tpu.vector_store %arg7[%c0_208, %c0_209, %c0_210], %373 {strides = array<i32>} : memref<1x1x16xf32, #tpu.memory_space<vmem>>, vector<1x1x16xf32>,
    } else {
    }
    %cst = arith.constant 0.000000e+00 : f32
    %4 = vector.broadcast %cst : f32 to vector<1x16xf32>
    %cst_1 = arith.constant 0.000000e+00 : f32
    %5 = vector.broadcast %cst_1 : f32 to vector<4x16xf32>
    %c0_i32_2 = arith.constant 0 : i32
    %6 = arith.addi %0, %c0_i32_2 : i32
    %c0_i32_3 = arith.constant 0 : i32
    %7 = arith.addi %6, %c0_i32_3 : i32
    %c0 = arith.constant 0 : index
    %8 = arith.index_cast %7 : i32 to index
    %c0_4 = arith.constant 0 : index
    %c0_5 = arith.constant 0 : index
    %9 = vector.load %arg2[%c0, %8, %c0_4, %c0_5] : memref<1x6x6x16xbf16, #tpu.memory_space<vmem>>, vector<1x1x6x16xbf16>
    %10 = vector.shape_cast %9 : vector<1x1x6x16xbf16> to vector<1x6x16xbf16>
    %11 = vector.shape_cast %10 : vector<1x6x16xbf16> to vector<6x16xbf16>
    %12 = arith.extf %11 : vector<6x16xbf16> to vector<6x16xf32>
    %13 = vector.extract_strided_slice %12 {offsets = [0, 0], sizes = [4, 16], strides = [1, 1]} : vector<6x16xf32> to vector<4x16xf32>
    %c0_6 = arith.constant 0 : index
    %c0_7 = arith.constant 0 : index
    %c0_8 = arith.constant 0 : index
    %14 = vector.load %arg3[%c0_6, %c0_7, %c0_8] : memref<9x1x16xf32, #tpu.memory_space<vmem>>, vector<1x1x16xf32>
    %15 = vector.shape_cast %14 : vector<1x1x16xf32> to vector<1x16xf32>
    %16 = vector.broadcast %15 : vector<1x16xf32> to vector<4x16xf32>
    %17 = arith.mulf %13, %16 : vector<4x16xf32>
    %18 = arith.addf %5, %17 : vector<4x16xf32>
    %19 = vector.extract_strided_slice %12 {offsets = [1, 0], sizes = [4, 16], strides = [1, 1]} : vector<6x16xf32> to vector<4x16xf32>
    %c1 = arith.constant 1 : index
    %c0_9 = arith.constant 0 : index
    %c0_10 = arith.constant 0 : index
    %20 = vector.load %arg3[%c1, %c0_9, %c0_10] : memref<9x1x16xf32, #tpu.memory_space<vmem>>, vector<1x1x16xf32>
    %21 = vector.shape_cast %20 : vector<1x1x16xf32> to vector<1x16xf32>
    %22 = vector.broadcast %21 : vector<1x16xf32> to vector<4x16xf32>
    %23 = arith.mulf %19, %22 : vector<4x16xf32>
    %24 = arith.addf %18, %23 : vector<4x16xf32>
    %25 = vector.extract_strided_slice %12 {offsets = [2, 0], sizes = [4, 16], strides = [1, 1]} : vector<6x16xf32> to vector<4x16xf32>
    %c2 = arith.constant 2 : index
    %c0_11 = arith.constant 0 : index
    %c0_12 = arith.constant 0 : index
    %26 = vector.load %arg3[%c2, %c0_11, %c0_12] : memref<9x1x16xf32, #tpu.memory_space<vmem>>, vector<1x1x16xf32>
    %27 = vector.shape_cast %26 : vector<1x1x16xf32> to vector<1x16xf32>
    %28 = vector.broadcast %27 : vector<1x16xf32> to vector<4x16xf32>
    %29 = arith.mulf %25, %28 : vector<4x16xf32>
    %30 = arith.addf %24, %29 : vector<4x16xf32>
    %c0_i32_13 = arith.constant 0 : i32
    %31 = arith.addi %0, %c0_i32_13 : i32
    %c1_i32 = arith.constant 1 : i32
    %32 = arith.addi %31, %c1_i32 : i32
    %c0_14 = arith.constant 0 : index
    %33 = arith.index_cast %32 : i32 to index
    %c0_15 = arith.constant 0 : index
    %c0_16 = arith.constant 0 : index
    %34 = vector.load %arg2[%c0_14, %33, %c0_15, %c0_16] : memref<1x6x6x16xbf16, #tpu.memory_space<vmem>>, vector<1x1x6x16xbf16>
    %35 = vector.shape_cast %34 : vector<1x1x6x16xbf16> to vector<1x6x16xbf16>
    %36 = vector.shape_cast %35 : vector<1x6x16xbf16> to vector<6x16xbf16>
    %37 = arith.extf %36 : vector<6x16xbf16> to vector<6x16xf32>
    %38 = vector.extract_strided_slice %37 {offsets = [0, 0], sizes = [4, 16], strides = [1, 1]} : vector<6x16xf32> to vector<4x16xf32>
    %c3 = arith.constant 3 : index
    %c0_17 = arith.constant 0 : index
    %c0_18 = arith.constant 0 : index
    %39 = vector.load %arg3[%c3, %c0_17, %c0_18] : memref<9x1x16xf32, #tpu.memory_space<vmem>>, vector<1x1x16xf32>
    %40 = vector.shape_cast %39 : vector<1x1x16xf32> to vector<1x16xf32>
    %41 = vector.broadcast %40 : vector<1x16xf32> to vector<4x16xf32>
    %42 = arith.mulf %38, %41 : vector<4x16xf32>
    %43 = arith.addf %30, %42 : vector<4x16xf32>
    %44 = vector.extract_strided_slice %37 {offsets = [1, 0], sizes = [4, 16], strides = [1, 1]} : vector<6x16xf32> to vector<4x16xf32>
    %c4 = arith.constant 4 : index
    %c0_19 = arith.constant 0 : index
    %c0_20 = arith.constant 0 : index
    %45 = vector.load %arg3[%c4, %c0_19, %c0_20] : memref<9x1x16xf32, #tpu.memory_space<vmem>>, vector<1x1x16xf32>
    %46 = vector.shape_cast %45 : vector<1x1x16xf32> to vector<1x16xf32>
    %47 = vector.broadcast %46 : vector<1x16xf32> to vector<4x16xf32>
    %48 = arith.mulf %44, %47 : vector<4x16xf32>
    %49 = arith.addf %43, %48 : vector<4x16xf32>
    %50 = vector.extract_strided_slice %35 {offsets = [0, 1, 0], sizes = [1, 4, 16], strides = [1, 1, 1]} : vector<1x6x16xbf16> to vector<1x4x16xbf16>
    %51 = vector.shape_cast %50 : vector<1x4x16xbf16> to vector<4x16xbf16>
    %52 = vector.extract_strided_slice %37 {offsets = [2, 0], sizes = [4, 16], strides = [1, 1]} : vector<6x16xf32> to vector<4x16xf32>
    %c5 = arith.constant 5 : index
    %c0_21 = arith.constant 0 : index
    %c0_22 = arith.constant 0 : index
    %53 = vector.load %arg3[%c5, %c0_21, %c0_22] : memref<9x1x16xf32, #tpu.memory_space<vmem>>, vector<1x1x16xf32>
    %54 = vector.shape_cast %53 : vector<1x1x16xf32> to vector<1x16xf32>
    %55 = vector.broadcast %54 : vector<1x16xf32> to vector<4x16xf32>
    %56 = arith.mulf %52, %55 : vector<4x16xf32>
    %57 = arith.addf %49, %56 : vector<4x16xf32>
    %c0_i32_23 = arith.constant 0 : i32
    %58 = arith.addi %0, %c0_i32_23 : i32
    %c2_i32 = arith.constant 2 : i32
    %59 = arith.addi %58, %c2_i32 : i32
    %c0_24 = arith.constant 0 : index
    %60 = arith.index_cast %59 : i32 to index
    %c0_25 = arith.constant 0 : index
    %c0_26 = arith.constant 0 : index
    %61 = vector.load %arg2[%c0_24, %60, %c0_25, %c0_26] : memref<1x6x6x16xbf16, #tpu.memory_space<vmem>>, vector<1x1x6x16xbf16>
    %62 = vector.shape_cast %61 : vector<1x1x6x16xbf16> to vector<1x6x16xbf16>
    %63 = vector.shape_cast %62 : vector<1x6x16xbf16> to vector<6x16xbf16>
    %64 = arith.extf %63 : vector<6x16xbf16> to vector<6x16xf32>
    %65 = vector.extract_strided_slice %64 {offsets = [0, 0], sizes = [4, 16], strides = [1, 1]} : vector<6x16xf32> to vector<4x16xf32>
    %c6 = arith.constant 6 : index
    %c0_27 = arith.constant 0 : index
    %c0_28 = arith.constant 0 : index
    %66 = vector.load %arg3[%c6, %c0_27, %c0_28] : memref<9x1x16xf32, #tpu.memory_space<vmem>>, vector<1x1x16xf32>
    %67 = vector.shape_cast %66 : vector<1x1x16xf32> to vector<1x16xf32>
    %68 = vector.broadcast %67 : vector<1x16xf32> to vector<4x16xf32>
    %69 = arith.mulf %65, %68 : vector<4x16xf32>
    %70 = arith.addf %57, %69 : vector<4x16xf32>
    %71 = vector.extract_strided_slice %64 {offsets = [1, 0], sizes = [4, 16], strides = [1, 1]} : vector<6x16xf32> to vector<4x16xf32>
    %c7 = arith.constant 7 : index
    %c0_29 = arith.constant 0 : index
    %c0_30 = arith.constant 0 : index
    %72 = vector.load %arg3[%c7, %c0_29, %c0_30] : memref<9x1x16xf32, #tpu.memory_space<vmem>>, vector<1x1x16xf32>
    %73 = vector.shape_cast %72 : vector<1x1x16xf32> to vector<1x16xf32>
    %74 = vector.broadcast %73 : vector<1x16xf32> to vector<4x16xf32>
    %75 = arith.mulf %71, %74 : vector<4x16xf32>
    %76 = arith.addf %70, %75 : vector<4x16xf32>
    %77 = vector.extract_strided_slice %64 {offsets = [2, 0], sizes = [4, 16], strides = [1, 1]} : vector<6x16xf32> to vector<4x16xf32>
    %c8 = arith.constant 8 : index
    %c0_31 = arith.constant 0 : index
    %c0_32 = arith.constant 0 : index
    %78 = vector.load %arg3[%c8, %c0_31, %c0_32] : memref<9x1x16xf32, #tpu.memory_space<vmem>>, vector<1x1x16xf32>
    %79 = vector.shape_cast %78 : vector<1x1x16xf32> to vector<1x16xf32>
    %80 = vector.broadcast %79 : vector<1x16xf32> to vector<4x16xf32>
    %81 = arith.mulf %77, %80 : vector<4x16xf32>
    %82 = arith.addf %76, %81 : vector<4x16xf32>
    %c0_33 = arith.constant 0 : index
    %c0_34 = arith.constant 0 : index
    %83 = vector.load %arg4[%c0_33, %c0_34] : memref<1x16xf32, #tpu.memory_space<vmem>>, vector<1x16xf32>
    %84 = vector.broadcast %83 : vector<1x16xf32> to vector<4x16xf32>
    %85 = arith.addf %82, %84 : vector<4x16xf32>
    %c0_35 = arith.constant 0 : index
    %c0_36 = arith.constant 0 : index
    %86 = vector.load %arg5[%c0_35, %c0_36] : memref<16x16xbf16, #tpu.memory_space<vmem>>, vector<16x16xbf16>
    %cst_37 = arith.constant dense<0.000000e+00> : vector<4x16xf32>
    %87 = tpu.matmul %51, %86, %cst_37 {dimension_numbers = #tpu.dot_dimension_numbers<[1], [0], [0], [1], [0, 0, 1, 1], [], []>} : vector<4x16xbf16>, vector<16x16xbf16>, vector<4x16xf32> -> vector<4x16xf32>
    %88 = arith.addf %85, %87 : vector<4x16xf32>
    %cst_38 = arith.constant dense<0.000000e+00> : vector<16xf32>
    %89 = vector.multi_reduction <add>, %88, %cst_38 [0] : vector<4x16xf32> to vector<16xf32>
    %90 = vector.shape_cast %89 : vector<16xf32> to vector<1x16xf32>
    %91 = arith.addf %4, %90 : vector<1x16xf32>
    %92 = arith.truncf %88 : vector<4x16xf32> to vector<4x16xbf16>
    %c0_39 = arith.constant 0 : index
    %c0_40 = arith.constant 0 : index
    %c0_41 = arith.constant 0 : index
    %c0_42 = arith.constant 0 : index
    %93 = vector.load %arg6[%c0_39, %c0_40, %c0_41, %c0_42] : memref<1x4x4x16xbf16, #tpu.memory_space<vmem>>, vector<1x1x4x16xbf16>
    %94 = vector.shape_cast %93 : vector<1x1x4x16xbf16> to vector<4x16xbf16>
    %95 = vector.shape_cast %92 : vector<4x16xbf16> to vector<1x1x4x16xbf16>
    tpu.vector_store %arg6[%c0_39, %c0_40, %c0_41, %c0_42], %95 {strides = array<i32>} : memref<1x4x4x16xbf16, #tpu.memory_space<vmem>>, vector<1x1x4x16xbf16>,
    %cst_43 = arith.constant 0.000000e+00 : f32
    %96 = vector.broadcast %cst_43 : f32 to vector<4x16xf32>
    %c1_i32_44 = arith.constant 1 : i32
    %97 = arith.addi %0, %c1_i32_44 : i32
    %c0_i32_45 = arith.constant 0 : i32
    %98 = arith.addi %97, %c0_i32_45 : i32
    %c0_46 = arith.constant 0 : index
    %99 = arith.index_cast %98 : i32 to index
    %c0_47 = arith.constant 0 : index
    %c0_48 = arith.constant 0 : index
    %100 = vector.load %arg2[%c0_46, %99, %c0_47, %c0_48] : memref<1x6x6x16xbf16, #tpu.memory_space<vmem>>, vector<1x1x6x16xbf16>
    %101 = vector.shape_cast %100 : vector<1x1x6x16xbf16> to vector<1x6x16xbf16>
    %102 = vector.shape_cast %101 : vector<1x6x16xbf16> to vector<6x16xbf16>
    %103 = arith.extf %102 : vector<6x16xbf16> to vector<6x16xf32>
    %104 = vector.extract_strided_slice %103 {offsets = [0, 0], sizes = [4, 16], strides = [1, 1]} : vector<6x16xf32> to vector<4x16xf32>
    %c0_49 = arith.constant 0 : index
    %c0_50 = arith.constant 0 : index
    %c0_51 = arith.constant 0 : index
    %105 = vector.load %arg3[%c0_49, %c0_50, %c0_51] : memref<9x1x16xf32, #tpu.memory_space<vmem>>, vector<1x1x16xf32>
    %106 = vector.shape_cast %105 : vector<1x1x16xf32> to vector<1x16xf32>
    %107 = vector.broadcast %106 : vector<1x16xf32> to vector<4x16xf32>
    %108 = arith.mulf %104, %107 : vector<4x16xf32>
    %109 = arith.addf %96, %108 : vector<4x16xf32>
    %110 = vector.extract_strided_slice %103 {offsets = [1, 0], sizes = [4, 16], strides = [1, 1]} : vector<6x16xf32> to vector<4x16xf32>
    %c1_52 = arith.constant 1 : index
    %c0_53 = arith.constant 0 : index
    %c0_54 = arith.constant 0 : index
    %111 = vector.load %arg3[%c1_52, %c0_53, %c0_54] : memref<9x1x16xf32, #tpu.memory_space<vmem>>, vector<1x1x16xf32>
    %112 = vector.shape_cast %111 : vector<1x1x16xf32> to vector<1x16xf32>
    %113 = vector.broadcast %112 : vector<1x16xf32> to vector<4x16xf32>
    %114 = arith.mulf %110, %113 : vector<4x16xf32>
    %115 = arith.addf %109, %114 : vector<4x16xf32>
    %116 = vector.extract_strided_slice %103 {offsets = [2, 0], sizes = [4, 16], strides = [1, 1]} : vector<6x16xf32> to vector<4x16xf32>
    %c2_55 = arith.constant 2 : index
    %c0_56 = arith.constant 0 : index
    %c0_57 = arith.constant 0 : index
    %117 = vector.load %arg3[%c2_55, %c0_56, %c0_57] : memref<9x1x16xf32, #tpu.memory_space<vmem>>, vector<1x1x16xf32>
    %118 = vector.shape_cast %117 : vector<1x1x16xf32> to vector<1x16xf32>
    %119 = vector.broadcast %118 : vector<1x16xf32> to vector<4x16xf32>
    %120 = arith.mulf %116, %119 : vector<4x16xf32>
    %121 = arith.addf %115, %120 : vector<4x16xf32>
    %c1_i32_58 = arith.constant 1 : i32
    %122 = arith.addi %0, %c1_i32_58 : i32
    %c1_i32_59 = arith.constant 1 : i32
    %123 = arith.addi %122, %c1_i32_59 : i32
    %c0_60 = arith.constant 0 : index
    %124 = arith.index_cast %123 : i32 to index
    %c0_61 = arith.constant 0 : index
    %c0_62 = arith.constant 0 : index
    %125 = vector.load %arg2[%c0_60, %124, %c0_61, %c0_62] : memref<1x6x6x16xbf16, #tpu.memory_space<vmem>>, vector<1x1x6x16xbf16>
    %126 = vector.shape_cast %125 : vector<1x1x6x16xbf16> to vector<1x6x16xbf16>
    %127 = vector.shape_cast %126 : vector<1x6x16xbf16> to vector<6x16xbf16>
    %128 = arith.extf %127 : vector<6x16xbf16> to vector<6x16xf32>
    %129 = vector.extract_strided_slice %128 {offsets = [0, 0], sizes = [4, 16], strides = [1, 1]} : vector<6x16xf32> to vector<4x16xf32>
    %c3_63 = arith.constant 3 : index
    %c0_64 = arith.constant 0 : index
    %c0_65 = arith.constant 0 : index
    %130 = vector.load %arg3[%c3_63, %c0_64, %c0_65] : memref<9x1x16xf32, #tpu.memory_space<vmem>>, vector<1x1x16xf32>
    %131 = vector.shape_cast %130 : vector<1x1x16xf32> to vector<1x16xf32>
    %132 = vector.broadcast %131 : vector<1x16xf32> to vector<4x16xf32>
    %133 = arith.mulf %129, %132 : vector<4x16xf32>
    %134 = arith.addf %121, %133 : vector<4x16xf32>
    %135 = vector.extract_strided_slice %128 {offsets = [1, 0], sizes = [4, 16], strides = [1, 1]} : vector<6x16xf32> to vector<4x16xf32>
    %c4_66 = arith.constant 4 : index
    %c0_67 = arith.constant 0 : index
    %c0_68 = arith.constant 0 : index
    %136 = vector.load %arg3[%c4_66, %c0_67, %c0_68] : memref<9x1x16xf32, #tpu.memory_space<vmem>>, vector<1x1x16xf32>
    %137 = vector.shape_cast %136 : vector<1x1x16xf32> to vector<1x16xf32>
    %138 = vector.broadcast %137 : vector<1x16xf32> to vector<4x16xf32>
    %139 = arith.mulf %135, %138 : vector<4x16xf32>
    %140 = arith.addf %134, %139 : vector<4x16xf32>
    %141 = vector.extract_strided_slice %126 {offsets = [0, 1, 0], sizes = [1, 4, 16], strides = [1, 1, 1]} : vector<1x6x16xbf16> to vector<1x4x16xbf16>
    %142 = vector.shape_cast %141 : vector<1x4x16xbf16> to vector<4x16xbf16>
    %143 = vector.extract_strided_slice %128 {offsets = [2, 0], sizes = [4, 16], strides = [1, 1]} : vector<6x16xf32> to vector<4x16xf32>
    %c5_69 = arith.constant 5 : index
    %c0_70 = arith.constant 0 : index
    %c0_71 = arith.constant 0 : index
    %144 = vector.load %arg3[%c5_69, %c0_70, %c0_71] : memref<9x1x16xf32, #tpu.memory_space<vmem>>, vector<1x1x16xf32>
    %145 = vector.shape_cast %144 : vector<1x1x16xf32> to vector<1x16xf32>
    %146 = vector.broadcast %145 : vector<1x16xf32> to vector<4x16xf32>
    %147 = arith.mulf %143, %146 : vector<4x16xf32>
    %148 = arith.addf %140, %147 : vector<4x16xf32>
    %c1_i32_72 = arith.constant 1 : i32
    %149 = arith.addi %0, %c1_i32_72 : i32
    %c2_i32_73 = arith.constant 2 : i32
    %150 = arith.addi %149, %c2_i32_73 : i32
    %c0_74 = arith.constant 0 : index
    %151 = arith.index_cast %150 : i32 to index
    %c0_75 = arith.constant 0 : index
    %c0_76 = arith.constant 0 : index
    %152 = vector.load %arg2[%c0_74, %151, %c0_75, %c0_76] : memref<1x6x6x16xbf16, #tpu.memory_space<vmem>>, vector<1x1x6x16xbf16>
    %153 = vector.shape_cast %152 : vector<1x1x6x16xbf16> to vector<1x6x16xbf16>
    %154 = vector.shape_cast %153 : vector<1x6x16xbf16> to vector<6x16xbf16>
    %155 = arith.extf %154 : vector<6x16xbf16> to vector<6x16xf32>
    %156 = vector.extract_strided_slice %155 {offsets = [0, 0], sizes = [4, 16], strides = [1, 1]} : vector<6x16xf32> to vector<4x16xf32>
    %c6_77 = arith.constant 6 : index
    %c0_78 = arith.constant 0 : index
    %c0_79 = arith.constant 0 : index
    %157 = vector.load %arg3[%c6_77, %c0_78, %c0_79] : memref<9x1x16xf32, #tpu.memory_space<vmem>>, vector<1x1x16xf32>
    %158 = vector.shape_cast %157 : vector<1x1x16xf32> to vector<1x16xf32>
    %159 = vector.broadcast %158 : vector<1x16xf32> to vector<4x16xf32>
    %160 = arith.mulf %156, %159 : vector<4x16xf32>
    %161 = arith.addf %148, %160 : vector<4x16xf32>
    %162 = vector.extract_strided_slice %155 {offsets = [1, 0], sizes = [4, 16], strides = [1, 1]} : vector<6x16xf32> to vector<4x16xf32>
    %c7_80 = arith.constant 7 : index
    %c0_81 = arith.constant 0 : index
    %c0_82 = arith.constant 0 : index
    %163 = vector.load %arg3[%c7_80, %c0_81, %c0_82] : memref<9x1x16xf32, #tpu.memory_space<vmem>>, vector<1x1x16xf32>
    %164 = vector.shape_cast %163 : vector<1x1x16xf32> to vector<1x16xf32>
    %165 = vector.broadcast %164 : vector<1x16xf32> to vector<4x16xf32>
    %166 = arith.mulf %162, %165 : vector<4x16xf32>
    %167 = arith.addf %161, %166 : vector<4x16xf32>
    %168 = vector.extract_strided_slice %155 {offsets = [2, 0], sizes = [4, 16], strides = [1, 1]} : vector<6x16xf32> to vector<4x16xf32>
    %c8_83 = arith.constant 8 : index
    %c0_84 = arith.constant 0 : index
    %c0_85 = arith.constant 0 : index
    %169 = vector.load %arg3[%c8_83, %c0_84, %c0_85] : memref<9x1x16xf32, #tpu.memory_space<vmem>>, vector<1x1x16xf32>
    %170 = vector.shape_cast %169 : vector<1x1x16xf32> to vector<1x16xf32>
    %171 = vector.broadcast %170 : vector<1x16xf32> to vector<4x16xf32>
    %172 = arith.mulf %168, %171 : vector<4x16xf32>
    %173 = arith.addf %167, %172 : vector<4x16xf32>
    %c0_86 = arith.constant 0 : index
    %c0_87 = arith.constant 0 : index
    %174 = vector.load %arg4[%c0_86, %c0_87] : memref<1x16xf32, #tpu.memory_space<vmem>>, vector<1x16xf32>
    %175 = vector.broadcast %174 : vector<1x16xf32> to vector<4x16xf32>
    %176 = arith.addf %173, %175 : vector<4x16xf32>
    %c0_88 = arith.constant 0 : index
    %c0_89 = arith.constant 0 : index
    %177 = vector.load %arg5[%c0_88, %c0_89] : memref<16x16xbf16, #tpu.memory_space<vmem>>, vector<16x16xbf16>
    %cst_90 = arith.constant dense<0.000000e+00> : vector<4x16xf32>
    %178 = tpu.matmul %142, %177, %cst_90 {dimension_numbers = #tpu.dot_dimension_numbers<[1], [0], [0], [1], [0, 0, 1, 1], [], []>} : vector<4x16xbf16>, vector<16x16xbf16>, vector<4x16xf32> -> vector<4x16xf32>
    %179 = arith.addf %176, %178 : vector<4x16xf32>
    %cst_91 = arith.constant dense<0.000000e+00> : vector<16xf32>
    %180 = vector.multi_reduction <add>, %179, %cst_91 [0] : vector<4x16xf32> to vector<16xf32>
    %181 = vector.shape_cast %180 : vector<16xf32> to vector<1x16xf32>
    %182 = arith.addf %91, %181 : vector<1x16xf32>
    %183 = arith.truncf %179 : vector<4x16xf32> to vector<4x16xbf16>
    %c0_92 = arith.constant 0 : index
    %c1_93 = arith.constant 1 : index
    %c0_94 = arith.constant 0 : index
    %c0_95 = arith.constant 0 : index
    %184 = vector.load %arg6[%c0_92, %c1_93, %c0_94, %c0_95] : memref<1x4x4x16xbf16, #tpu.memory_space<vmem>>, vector<1x1x4x16xbf16>
    %185 = vector.shape_cast %184 : vector<1x1x4x16xbf16> to vector<4x16xbf16>
    %186 = vector.shape_cast %183 : vector<4x16xbf16> to vector<1x1x4x16xbf16>
    tpu.vector_store %arg6[%c0_92, %c1_93, %c0_94, %c0_95], %186 {strides = array<i32>} : memref<1x4x4x16xbf16, #tpu.memory_space<vmem>>, vector<1x1x4x16xbf16>,
    %cst_96 = arith.constant 0.000000e+00 : f32
    %187 = vector.broadcast %cst_96 : f32 to vector<4x16xf32>
    %c2_i32_97 = arith.constant 2 : i32
    %188 = arith.addi %0, %c2_i32_97 : i32
    %c0_i32_98 = arith.constant 0 : i32
    %189 = arith.addi %188, %c0_i32_98 : i32
    %c0_99 = arith.constant 0 : index
    %190 = arith.index_cast %189 : i32 to index
    %c0_100 = arith.constant 0 : index
    %c0_101 = arith.constant 0 : index
    %191 = vector.load %arg2[%c0_99, %190, %c0_100, %c0_101] : memref<1x6x6x16xbf16, #tpu.memory_space<vmem>>, vector<1x1x6x16xbf16>
    %192 = vector.shape_cast %191 : vector<1x1x6x16xbf16> to vector<1x6x16xbf16>
    %193 = vector.shape_cast %192 : vector<1x6x16xbf16> to vector<6x16xbf16>
    %194 = arith.extf %193 : vector<6x16xbf16> to vector<6x16xf32>
    %195 = vector.extract_strided_slice %194 {offsets = [0, 0], sizes = [4, 16], strides = [1, 1]} : vector<6x16xf32> to vector<4x16xf32>
    %c0_102 = arith.constant 0 : index
    %c0_103 = arith.constant 0 : index
    %c0_104 = arith.constant 0 : index
    %196 = vector.load %arg3[%c0_102, %c0_103, %c0_104] : memref<9x1x16xf32, #tpu.memory_space<vmem>>, vector<1x1x16xf32>
    %197 = vector.shape_cast %196 : vector<1x1x16xf32> to vector<1x16xf32>
    %198 = vector.broadcast %197 : vector<1x16xf32> to vector<4x16xf32>
    %199 = arith.mulf %195, %198 : vector<4x16xf32>
    %200 = arith.addf %187, %199 : vector<4x16xf32>
    %201 = vector.extract_strided_slice %194 {offsets = [1, 0], sizes = [4, 16], strides = [1, 1]} : vector<6x16xf32> to vector<4x16xf32>
    %c1_105 = arith.constant 1 : index
    %c0_106 = arith.constant 0 : index
    %c0_107 = arith.constant 0 : index
    %202 = vector.load %arg3[%c1_105, %c0_106, %c0_107] : memref<9x1x16xf32, #tpu.memory_space<vmem>>, vector<1x1x16xf32>
    %203 = vector.shape_cast %202 : vector<1x1x16xf32> to vector<1x16xf32>
    %204 = vector.broadcast %203 : vector<1x16xf32> to vector<4x16xf32>
    %205 = arith.mulf %201, %204 : vector<4x16xf32>
    %206 = arith.addf %200, %205 : vector<4x16xf32>
    %207 = vector.extract_strided_slice %194 {offsets = [2, 0], sizes = [4, 16], strides = [1, 1]} : vector<6x16xf32> to vector<4x16xf32>
    %c2_108 = arith.constant 2 : index
    %c0_109 = arith.constant 0 : index
    %c0_110 = arith.constant 0 : index
    %208 = vector.load %arg3[%c2_108, %c0_109, %c0_110] : memref<9x1x16xf32, #tpu.memory_space<vmem>>, vector<1x1x16xf32>
    %209 = vector.shape_cast %208 : vector<1x1x16xf32> to vector<1x16xf32>
    %210 = vector.broadcast %209 : vector<1x16xf32> to vector<4x16xf32>
    %211 = arith.mulf %207, %210 : vector<4x16xf32>
    %212 = arith.addf %206, %211 : vector<4x16xf32>
    %c2_i32_111 = arith.constant 2 : i32
    %213 = arith.addi %0, %c2_i32_111 : i32
    %c1_i32_112 = arith.constant 1 : i32
    %214 = arith.addi %213, %c1_i32_112 : i32
    %c0_113 = arith.constant 0 : index
    %215 = arith.index_cast %214 : i32 to index
    %c0_114 = arith.constant 0 : index
    %c0_115 = arith.constant 0 : index
    %216 = vector.load %arg2[%c0_113, %215, %c0_114, %c0_115] : memref<1x6x6x16xbf16, #tpu.memory_space<vmem>>, vector<1x1x6x16xbf16>
    %217 = vector.shape_cast %216 : vector<1x1x6x16xbf16> to vector<1x6x16xbf16>
    %218 = vector.shape_cast %217 : vector<1x6x16xbf16> to vector<6x16xbf16>
    %219 = arith.extf %218 : vector<6x16xbf16> to vector<6x16xf32>
    %220 = vector.extract_strided_slice %219 {offsets = [0, 0], sizes = [4, 16], strides = [1, 1]} : vector<6x16xf32> to vector<4x16xf32>
    %c3_116 = arith.constant 3 : index
    %c0_117 = arith.constant 0 : index
    %c0_118 = arith.constant 0 : index
    %221 = vector.load %arg3[%c3_116, %c0_117, %c0_118] : memref<9x1x16xf32, #tpu.memory_space<vmem>>, vector<1x1x16xf32>
    %222 = vector.shape_cast %221 : vector<1x1x16xf32> to vector<1x16xf32>
    %223 = vector.broadcast %222 : vector<1x16xf32> to vector<4x16xf32>
    %224 = arith.mulf %220, %223 : vector<4x16xf32>
    %225 = arith.addf %212, %224 : vector<4x16xf32>
    %226 = vector.extract_strided_slice %219 {offsets = [1, 0], sizes = [4, 16], strides = [1, 1]} : vector<6x16xf32> to vector<4x16xf32>
    %c4_119 = arith.constant 4 : index
    %c0_120 = arith.constant 0 : index
    %c0_121 = arith.constant 0 : index
    %227 = vector.load %arg3[%c4_119, %c0_120, %c0_121] : memref<9x1x16xf32, #tpu.memory_space<vmem>>, vector<1x1x16xf32>
    %228 = vector.shape_cast %227 : vector<1x1x16xf32> to vector<1x16xf32>
    %229 = vector.broadcast %228 : vector<1x16xf32> to vector<4x16xf32>
    %230 = arith.mulf %226, %229 : vector<4x16xf32>
    %231 = arith.addf %225, %230 : vector<4x16xf32>
    %232 = vector.extract_strided_slice %217 {offsets = [0, 1, 0], sizes = [1, 4, 16], strides = [1, 1, 1]} : vector<1x6x16xbf16> to vector<1x4x16xbf16>
    %233 = vector.shape_cast %232 : vector<1x4x16xbf16> to vector<4x16xbf16>
    %234 = vector.extract_strided_slice %219 {offsets = [2, 0], sizes = [4, 16], strides = [1, 1]} : vector<6x16xf32> to vector<4x16xf32>
    %c5_122 = arith.constant 5 : index
    %c0_123 = arith.constant 0 : index
    %c0_124 = arith.constant 0 : index
    %235 = vector.load %arg3[%c5_122, %c0_123, %c0_124] : memref<9x1x16xf32, #tpu.memory_space<vmem>>, vector<1x1x16xf32>
    %236 = vector.shape_cast %235 : vector<1x1x16xf32> to vector<1x16xf32>
    %237 = vector.broadcast %236 : vector<1x16xf32> to vector<4x16xf32>
    %238 = arith.mulf %234, %237 : vector<4x16xf32>
    %239 = arith.addf %231, %238 : vector<4x16xf32>
    %c2_i32_125 = arith.constant 2 : i32
    %240 = arith.addi %0, %c2_i32_125 : i32
    %c2_i32_126 = arith.constant 2 : i32
    %241 = arith.addi %240, %c2_i32_126 : i32
    %c0_127 = arith.constant 0 : index
    %242 = arith.index_cast %241 : i32 to index
    %c0_128 = arith.constant 0 : index
    %c0_129 = arith.constant 0 : index
    %243 = vector.load %arg2[%c0_127, %242, %c0_128, %c0_129] : memref<1x6x6x16xbf16, #tpu.memory_space<vmem>>, vector<1x1x6x16xbf16>
    %244 = vector.shape_cast %243 : vector<1x1x6x16xbf16> to vector<1x6x16xbf16>
    %245 = vector.shape_cast %244 : vector<1x6x16xbf16> to vector<6x16xbf16>
    %246 = arith.extf %245 : vector<6x16xbf16> to vector<6x16xf32>
    %247 = vector.extract_strided_slice %246 {offsets = [0, 0], sizes = [4, 16], strides = [1, 1]} : vector<6x16xf32> to vector<4x16xf32>
    %c6_130 = arith.constant 6 : index
    %c0_131 = arith.constant 0 : index
    %c0_132 = arith.constant 0 : index
    %248 = vector.load %arg3[%c6_130, %c0_131, %c0_132] : memref<9x1x16xf32, #tpu.memory_space<vmem>>, vector<1x1x16xf32>
    %249 = vector.shape_cast %248 : vector<1x1x16xf32> to vector<1x16xf32>
    %250 = vector.broadcast %249 : vector<1x16xf32> to vector<4x16xf32>
    %251 = arith.mulf %247, %250 : vector<4x16xf32>
    %252 = arith.addf %239, %251 : vector<4x16xf32>
    %253 = vector.extract_strided_slice %246 {offsets = [1, 0], sizes = [4, 16], strides = [1, 1]} : vector<6x16xf32> to vector<4x16xf32>
    %c7_133 = arith.constant 7 : index
    %c0_134 = arith.constant 0 : index
    %c0_135 = arith.constant 0 : index
    %254 = vector.load %arg3[%c7_133, %c0_134, %c0_135] : memref<9x1x16xf32, #tpu.memory_space<vmem>>, vector<1x1x16xf32>
    %255 = vector.shape_cast %254 : vector<1x1x16xf32> to vector<1x16xf32>
    %256 = vector.broadcast %255 : vector<1x16xf32> to vector<4x16xf32>
    %257 = arith.mulf %253, %256 : vector<4x16xf32>
    %258 = arith.addf %252, %257 : vector<4x16xf32>
    %259 = vector.extract_strided_slice %246 {offsets = [2, 0], sizes = [4, 16], strides = [1, 1]} : vector<6x16xf32> to vector<4x16xf32>
    %c8_136 = arith.constant 8 : index
    %c0_137 = arith.constant 0 : index
    %c0_138 = arith.constant 0 : index
    %260 = vector.load %arg3[%c8_136, %c0_137, %c0_138] : memref<9x1x16xf32, #tpu.memory_space<vmem>>, vector<1x1x16xf32>
    %261 = vector.shape_cast %260 : vector<1x1x16xf32> to vector<1x16xf32>
    %262 = vector.broadcast %261 : vector<1x16xf32> to vector<4x16xf32>
    %263 = arith.mulf %259, %262 : vector<4x16xf32>
    %264 = arith.addf %258, %263 : vector<4x16xf32>
    %c0_139 = arith.constant 0 : index
    %c0_140 = arith.constant 0 : index
    %265 = vector.load %arg4[%c0_139, %c0_140] : memref<1x16xf32, #tpu.memory_space<vmem>>, vector<1x16xf32>
    %266 = vector.broadcast %265 : vector<1x16xf32> to vector<4x16xf32>
    %267 = arith.addf %264, %266 : vector<4x16xf32>
    %c0_141 = arith.constant 0 : index
    %c0_142 = arith.constant 0 : index
    %268 = vector.load %arg5[%c0_141, %c0_142] : memref<16x16xbf16, #tpu.memory_space<vmem>>, vector<16x16xbf16>
    %cst_143 = arith.constant dense<0.000000e+00> : vector<4x16xf32>
    %269 = tpu.matmul %233, %268, %cst_143 {dimension_numbers = #tpu.dot_dimension_numbers<[1], [0], [0], [1], [0, 0, 1, 1], [], []>} : vector<4x16xbf16>, vector<16x16xbf16>, vector<4x16xf32> -> vector<4x16xf32>
    %270 = arith.addf %267, %269 : vector<4x16xf32>
    %cst_144 = arith.constant dense<0.000000e+00> : vector<16xf32>
    %271 = vector.multi_reduction <add>, %270, %cst_144 [0] : vector<4x16xf32> to vector<16xf32>
    %272 = vector.shape_cast %271 : vector<16xf32> to vector<1x16xf32>
    %273 = arith.addf %182, %272 : vector<1x16xf32>
    %274 = arith.truncf %270 : vector<4x16xf32> to vector<4x16xbf16>
    %c0_145 = arith.constant 0 : index
    %c2_146 = arith.constant 2 : index
    %c0_147 = arith.constant 0 : index
    %c0_148 = arith.constant 0 : index
    %275 = vector.load %arg6[%c0_145, %c2_146, %c0_147, %c0_148] : memref<1x4x4x16xbf16, #tpu.memory_space<vmem>>, vector<1x1x4x16xbf16>
    %276 = vector.shape_cast %275 : vector<1x1x4x16xbf16> to vector<4x16xbf16>
    %277 = vector.shape_cast %274 : vector<4x16xbf16> to vector<1x1x4x16xbf16>
    tpu.vector_store %arg6[%c0_145, %c2_146, %c0_147, %c0_148], %277 {strides = array<i32>} : memref<1x4x4x16xbf16, #tpu.memory_space<vmem>>, vector<1x1x4x16xbf16>,
    %cst_149 = arith.constant 0.000000e+00 : f32
    %278 = vector.broadcast %cst_149 : f32 to vector<4x16xf32>
    %c3_i32 = arith.constant 3 : i32
    %279 = arith.addi %0, %c3_i32 : i32
    %c0_i32_150 = arith.constant 0 : i32
    %280 = arith.addi %279, %c0_i32_150 : i32
    %c0_151 = arith.constant 0 : index
    %281 = arith.index_cast %280 : i32 to index
    %c0_152 = arith.constant 0 : index
    %c0_153 = arith.constant 0 : index
    %282 = vector.load %arg2[%c0_151, %281, %c0_152, %c0_153] : memref<1x6x6x16xbf16, #tpu.memory_space<vmem>>, vector<1x1x6x16xbf16>
    %283 = vector.shape_cast %282 : vector<1x1x6x16xbf16> to vector<1x6x16xbf16>
    %284 = vector.shape_cast %283 : vector<1x6x16xbf16> to vector<6x16xbf16>
    %285 = arith.extf %284 : vector<6x16xbf16> to vector<6x16xf32>
    %286 = vector.extract_strided_slice %285 {offsets = [0, 0], sizes = [4, 16], strides = [1, 1]} : vector<6x16xf32> to vector<4x16xf32>
    %c0_154 = arith.constant 0 : index
    %c0_155 = arith.constant 0 : index
    %c0_156 = arith.constant 0 : index
    %287 = vector.load %arg3[%c0_154, %c0_155, %c0_156] : memref<9x1x16xf32, #tpu.memory_space<vmem>>, vector<1x1x16xf32>
    %288 = vector.shape_cast %287 : vector<1x1x16xf32> to vector<1x16xf32>
    %289 = vector.broadcast %288 : vector<1x16xf32> to vector<4x16xf32>
    %290 = arith.mulf %286, %289 : vector<4x16xf32>
    %291 = arith.addf %278, %290 : vector<4x16xf32>
    %292 = vector.extract_strided_slice %285 {offsets = [1, 0], sizes = [4, 16], strides = [1, 1]} : vector<6x16xf32> to vector<4x16xf32>
    %c1_157 = arith.constant 1 : index
    %c0_158 = arith.constant 0 : index
    %c0_159 = arith.constant 0 : index
    %293 = vector.load %arg3[%c1_157, %c0_158, %c0_159] : memref<9x1x16xf32, #tpu.memory_space<vmem>>, vector<1x1x16xf32>
    %294 = vector.shape_cast %293 : vector<1x1x16xf32> to vector<1x16xf32>
    %295 = vector.broadcast %294 : vector<1x16xf32> to vector<4x16xf32>
    %296 = arith.mulf %292, %295 : vector<4x16xf32>
    %297 = arith.addf %291, %296 : vector<4x16xf32>
    %298 = vector.extract_strided_slice %285 {offsets = [2, 0], sizes = [4, 16], strides = [1, 1]} : vector<6x16xf32> to vector<4x16xf32>
    %c2_160 = arith.constant 2 : index
    %c0_161 = arith.constant 0 : index
    %c0_162 = arith.constant 0 : index
    %299 = vector.load %arg3[%c2_160, %c0_161, %c0_162] : memref<9x1x16xf32, #tpu.memory_space<vmem>>, vector<1x1x16xf32>
    %300 = vector.shape_cast %299 : vector<1x1x16xf32> to vector<1x16xf32>
    %301 = vector.broadcast %300 : vector<1x16xf32> to vector<4x16xf32>
    %302 = arith.mulf %298, %301 : vector<4x16xf32>
    %303 = arith.addf %297, %302 : vector<4x16xf32>
    %c3_i32_163 = arith.constant 3 : i32
    %304 = arith.addi %0, %c3_i32_163 : i32
    %c1_i32_164 = arith.constant 1 : i32
    %305 = arith.addi %304, %c1_i32_164 : i32
    %c0_165 = arith.constant 0 : index
    %306 = arith.index_cast %305 : i32 to index
    %c0_166 = arith.constant 0 : index
    %c0_167 = arith.constant 0 : index
    %307 = vector.load %arg2[%c0_165, %306, %c0_166, %c0_167] : memref<1x6x6x16xbf16, #tpu.memory_space<vmem>>, vector<1x1x6x16xbf16>
    %308 = vector.shape_cast %307 : vector<1x1x6x16xbf16> to vector<1x6x16xbf16>
    %309 = vector.shape_cast %308 : vector<1x6x16xbf16> to vector<6x16xbf16>
    %310 = arith.extf %309 : vector<6x16xbf16> to vector<6x16xf32>
    %311 = vector.extract_strided_slice %310 {offsets = [0, 0], sizes = [4, 16], strides = [1, 1]} : vector<6x16xf32> to vector<4x16xf32>
    %c3_168 = arith.constant 3 : index
    %c0_169 = arith.constant 0 : index
    %c0_170 = arith.constant 0 : index
    %312 = vector.load %arg3[%c3_168, %c0_169, %c0_170] : memref<9x1x16xf32, #tpu.memory_space<vmem>>, vector<1x1x16xf32>
    %313 = vector.shape_cast %312 : vector<1x1x16xf32> to vector<1x16xf32>
    %314 = vector.broadcast %313 : vector<1x16xf32> to vector<4x16xf32>
    %315 = arith.mulf %311, %314 : vector<4x16xf32>
    %316 = arith.addf %303, %315 : vector<4x16xf32>
    %317 = vector.extract_strided_slice %310 {offsets = [1, 0], sizes = [4, 16], strides = [1, 1]} : vector<6x16xf32> to vector<4x16xf32>
    %c4_171 = arith.constant 4 : index
    %c0_172 = arith.constant 0 : index
    %c0_173 = arith.constant 0 : index
    %318 = vector.load %arg3[%c4_171, %c0_172, %c0_173] : memref<9x1x16xf32, #tpu.memory_space<vmem>>, vector<1x1x16xf32>
    %319 = vector.shape_cast %318 : vector<1x1x16xf32> to vector<1x16xf32>
    %320 = vector.broadcast %319 : vector<1x16xf32> to vector<4x16xf32>
    %321 = arith.mulf %317, %320 : vector<4x16xf32>
    %322 = arith.addf %316, %321 : vector<4x16xf32>
    %323 = vector.extract_strided_slice %308 {offsets = [0, 1, 0], sizes = [1, 4, 16], strides = [1, 1, 1]} : vector<1x6x16xbf16> to vector<1x4x16xbf16>
    %324 = vector.shape_cast %323 : vector<1x4x16xbf16> to vector<4x16xbf16>
    %325 = vector.extract_strided_slice %310 {offsets = [2, 0], sizes = [4, 16], strides = [1, 1]} : vector<6x16xf32> to vector<4x16xf32>
    %c5_174 = arith.constant 5 : index
    %c0_175 = arith.constant 0 : index
    %c0_176 = arith.constant 0 : index
    %326 = vector.load %arg3[%c5_174, %c0_175, %c0_176] : memref<9x1x16xf32, #tpu.memory_space<vmem>>, vector<1x1x16xf32>
    %327 = vector.shape_cast %326 : vector<1x1x16xf32> to vector<1x16xf32>
    %328 = vector.broadcast %327 : vector<1x16xf32> to vector<4x16xf32>
    %329 = arith.mulf %325, %328 : vector<4x16xf32>
    %330 = arith.addf %322, %329 : vector<4x16xf32>
    %c3_i32_177 = arith.constant 3 : i32
    %331 = arith.addi %0, %c3_i32_177 : i32
    %c2_i32_178 = arith.constant 2 : i32
    %332 = arith.addi %331, %c2_i32_178 : i32
    %c0_179 = arith.constant 0 : index
    %333 = arith.index_cast %332 : i32 to index
    %c0_180 = arith.constant 0 : index
    %c0_181 = arith.constant 0 : index
    %334 = vector.load %arg2[%c0_179, %333, %c0_180, %c0_181] : memref<1x6x6x16xbf16, #tpu.memory_space<vmem>>, vector<1x1x6x16xbf16>
    %335 = vector.shape_cast %334 : vector<1x1x6x16xbf16> to vector<1x6x16xbf16>
    %336 = vector.shape_cast %335 : vector<1x6x16xbf16> to vector<6x16xbf16>
    %337 = arith.extf %336 : vector<6x16xbf16> to vector<6x16xf32>
    %338 = vector.extract_strided_slice %337 {offsets = [0, 0], sizes = [4, 16], strides = [1, 1]} : vector<6x16xf32> to vector<4x16xf32>
    %c6_182 = arith.constant 6 : index
    %c0_183 = arith.constant 0 : index
    %c0_184 = arith.constant 0 : index
    %339 = vector.load %arg3[%c6_182, %c0_183, %c0_184] : memref<9x1x16xf32, #tpu.memory_space<vmem>>, vector<1x1x16xf32>
    %340 = vector.shape_cast %339 : vector<1x1x16xf32> to vector<1x16xf32>
    %341 = vector.broadcast %340 : vector<1x16xf32> to vector<4x16xf32>
    %342 = arith.mulf %338, %341 : vector<4x16xf32>
    %343 = arith.addf %330, %342 : vector<4x16xf32>
    %344 = vector.extract_strided_slice %337 {offsets = [1, 0], sizes = [4, 16], strides = [1, 1]} : vector<6x16xf32> to vector<4x16xf32>
    %c7_185 = arith.constant 7 : index
    %c0_186 = arith.constant 0 : index
    %c0_187 = arith.constant 0 : index
    %345 = vector.load %arg3[%c7_185, %c0_186, %c0_187] : memref<9x1x16xf32, #tpu.memory_space<vmem>>, vector<1x1x16xf32>
    %346 = vector.shape_cast %345 : vector<1x1x16xf32> to vector<1x16xf32>
    %347 = vector.broadcast %346 : vector<1x16xf32> to vector<4x16xf32>
    %348 = arith.mulf %344, %347 : vector<4x16xf32>
    %349 = arith.addf %343, %348 : vector<4x16xf32>
    %350 = vector.extract_strided_slice %337 {offsets = [2, 0], sizes = [4, 16], strides = [1, 1]} : vector<6x16xf32> to vector<4x16xf32>
    %c8_188 = arith.constant 8 : index
    %c0_189 = arith.constant 0 : index
    %c0_190 = arith.constant 0 : index
    %351 = vector.load %arg3[%c8_188, %c0_189, %c0_190] : memref<9x1x16xf32, #tpu.memory_space<vmem>>, vector<1x1x16xf32>
    %352 = vector.shape_cast %351 : vector<1x1x16xf32> to vector<1x16xf32>
    %353 = vector.broadcast %352 : vector<1x16xf32> to vector<4x16xf32>
    %354 = arith.mulf %350, %353 : vector<4x16xf32>
    %355 = arith.addf %349, %354 : vector<4x16xf32>
    %c0_191 = arith.constant 0 : index
    %c0_192 = arith.constant 0 : index
    %356 = vector.load %arg4[%c0_191, %c0_192] : memref<1x16xf32, #tpu.memory_space<vmem>>, vector<1x16xf32>
    %357 = vector.broadcast %356 : vector<1x16xf32> to vector<4x16xf32>
    %358 = arith.addf %355, %357 : vector<4x16xf32>
    %c0_193 = arith.constant 0 : index
    %c0_194 = arith.constant 0 : index
    %359 = vector.load %arg5[%c0_193, %c0_194] : memref<16x16xbf16, #tpu.memory_space<vmem>>, vector<16x16xbf16>
    %cst_195 = arith.constant dense<0.000000e+00> : vector<4x16xf32>
    %360 = tpu.matmul %324, %359, %cst_195 {dimension_numbers = #tpu.dot_dimension_numbers<[1], [0], [0], [1], [0, 0, 1, 1], [], []>} : vector<4x16xbf16>, vector<16x16xbf16>, vector<4x16xf32> -> vector<4x16xf32>
    %361 = arith.addf %358, %360 : vector<4x16xf32>
    %cst_196 = arith.constant dense<0.000000e+00> : vector<16xf32>
    %362 = vector.multi_reduction <add>, %361, %cst_196 [0] : vector<4x16xf32> to vector<16xf32>
    %363 = vector.shape_cast %362 : vector<16xf32> to vector<1x16xf32>
    %364 = arith.addf %273, %363 : vector<1x16xf32>
    %365 = arith.truncf %361 : vector<4x16xf32> to vector<4x16xbf16>
    %c0_197 = arith.constant 0 : index
    %c3_198 = arith.constant 3 : index
    %c0_199 = arith.constant 0 : index
    %c0_200 = arith.constant 0 : index
    %366 = vector.load %arg6[%c0_197, %c3_198, %c0_199, %c0_200] : memref<1x4x4x16xbf16, #tpu.memory_space<vmem>>, vector<1x1x4x16xbf16>
    %367 = vector.shape_cast %366 : vector<1x1x4x16xbf16> to vector<4x16xbf16>
    %368 = vector.shape_cast %365 : vector<4x16xbf16> to vector<1x1x4x16xbf16>
    tpu.vector_store %arg6[%c0_197, %c3_198, %c0_199, %c0_200], %368 {strides = array<i32>} : memref<1x4x4x16xbf16, #tpu.memory_space<vmem>>, vector<1x1x4x16xbf16>,
    %c0_201 = arith.constant 0 : index
    %c0_202 = arith.constant 0 : index
    %c0_203 = arith.constant 0 : index
    %369 = vector.load %arg7[%c0_201, %c0_202, %c0_203] : memref<1x1x16xf32, #tpu.memory_space<vmem>>, vector<1x1x16xf32>
    %370 = vector.shape_cast %364 : vector<1x16xf32> to vector<1x1x16xf32>
    %371 = arith.addf %369, %370 : vector<1x1x16xf32>
    %c0_204 = arith.constant 0 : index
    %c0_205 = arith.constant 0 : index
    %c0_206 = arith.constant 0 : index
    %372 = vector.load %arg7[%c0_204, %c0_205, %c0_206] : memref<1x1x16xf32, #tpu.memory_space<vmem>>, vector<1x1x16xf32>
    tpu.vector_store %arg7[%c0_204, %c0_205, %c0_206], %371 {strides = array<i32>} : memref<1x1x16xf32, #tpu.memory_space<vmem>>, vector<1x1x16xf32>,
    return
  }
  func.func @transform_0(%arg0: i32, %arg1: i32) -> (i32, i32, i32, i32) {
    %c0_i32 = arith.constant 0 : i32
    %c0_i32_0 = arith.constant 0 : i32
    %c0_i32_1 = arith.constant 0 : i32
    %c0_i32_2 = arith.constant 0 : i32
    return %arg0, %c0_i32, %c0_i32_0, %c0_i32_1 : i32, i32, i32, i32
  }
  func.func @transform_1(%arg0: i32, %arg1: i32) -> (i32, i32, i32) {
    %c0_i32 = arith.constant 0 : i32
    %c0_i32_0 = arith.constant 0 : i32
    %c0_i32_1 = arith.constant 0 : i32
    %c0_i32_2 = arith.constant 0 : i32
    return %c0_i32, %c0_i32_0, %c0_i32_1 : i32, i32, i32
  }
  func.func @transform_2(%arg0: i32, %arg1: i32) -> (i32, i32) {
    %c0_i32 = arith.constant 0 : i32
    %c0_i32_0 = arith.constant 0 : i32
    %c0_i32_1 = arith.constant 0 : i32
    return %c0_i32, %c0_i32_0 : i32, i32
  }
  func.func @transform_3(%arg0: i32, %arg1: i32) -> (i32, i32) {
    %c0_i32 = arith.constant 0 : i32
    %c0_i32_0 = arith.constant 0 : i32
    %c0_i32_1 = arith.constant 0 : i32
    return %c0_i32, %c0_i32_0 : i32, i32
  }
  func.func @transform_4(%arg0: i32, %arg1: i32) -> (i32, i32, i32, i32) {
    %c0_i32 = arith.constant 0 : i32
    %c0_i32_0 = arith.constant 0 : i32
    %c0_i32_1 = arith.constant 0 : i32
    return %arg0, %arg1, %c0_i32, %c0_i32_0 : i32, i32, i32, i32
  }
  func.func @transform_5(%arg0: i32, %arg1: i32) -> (i32, i32, i32) {
    %c0_i32 = arith.constant 0 : i32
    %c0_i32_0 = arith.constant 0 : i32
    %c0_i32_1 = arith.constant 0 : i32
    return %arg0, %c0_i32, %c0_i32_0 : i32, i32, i32
  }
}

module attributes {stable_mosaic.version = 11 : i64} {
  func.func @kernel(%arg0: i32, %arg1: memref<1x16x16xbf16, #tpu.memory_space<vmem>>, %arg2: memref<1x1x16xf32, #tpu.memory_space<vmem>>, %arg3: memref<1x16x16xbf16, #tpu.memory_space<vmem>>) attributes {dimension_semantics = [#tpu.dimension_semantics<parallel>], iteration_bounds = array<i64: 2>, scalar_prefetch = 0 : i64, scratch_operands = 0 : i64, tpu.core_type = #tpu.core_type<tc>, window_params = [{transform_indices = @transform_0, window_bounds = array<i64: 1, 16, 16>}, {transform_indices = @transform_1, window_bounds = array<i64: 1, 1, 16>}, {transform_indices = @transform_2, window_bounds = array<i64: 1, 16, 16>}]} {
    %c0 = arith.constant 0 : index
    %c0_0 = arith.constant 0 : index
    %c0_1 = arith.constant 0 : index
    %0 = vector.load %arg1[%c0, %c0_0, %c0_1] : memref<1x16x16xbf16, #tpu.memory_space<vmem>>, vector<1x16x16xbf16>
    %1 = arith.extf %0 : vector<1x16x16xbf16> to vector<1x16x16xf32>
    %c0_2 = arith.constant 0 : index
    %c0_3 = arith.constant 0 : index
    %c0_4 = arith.constant 0 : index
    %2 = vector.load %arg2[%c0_2, %c0_3, %c0_4] : memref<1x1x16xf32, #tpu.memory_space<vmem>>, vector<1x1x16xf32>
    %3 = vector.broadcast %2 : vector<1x1x16xf32> to vector<1x16x16xf32>
    %4 = arith.mulf %1, %3 : vector<1x16x16xf32>
    %5 = arith.truncf %4 : vector<1x16x16xf32> to vector<1x16x16xbf16>
    %c0_5 = arith.constant 0 : index
    %c0_6 = arith.constant 0 : index
    %c0_7 = arith.constant 0 : index
    %6 = vector.load %arg3[%c0_5, %c0_6, %c0_7] : memref<1x16x16xbf16, #tpu.memory_space<vmem>>, vector<1x16x16xbf16>
    tpu.vector_store %arg3[%c0_5, %c0_6, %c0_7], %5 {strides = array<i32>} : memref<1x16x16xbf16, #tpu.memory_space<vmem>>, vector<1x16x16xbf16>,
    return
  }
  func.func @transform_0(%arg0: i32) -> (i32, i32, i32) {
    %c0_i32 = arith.constant 0 : i32
    %c0_i32_0 = arith.constant 0 : i32
    %c0_i32_1 = arith.constant 0 : i32
    return %arg0, %c0_i32, %c0_i32_0 : i32, i32, i32
  }
  func.func @transform_1(%arg0: i32) -> (i32, i32, i32) {
    %c0_i32 = arith.constant 0 : i32
    %c0_i32_0 = arith.constant 0 : i32
    %c0_i32_1 = arith.constant 0 : i32
    return %arg0, %c0_i32, %c0_i32_0 : i32, i32, i32
  }
  func.func @transform_2(%arg0: i32) -> (i32, i32, i32) {
    %c0_i32 = arith.constant 0 : i32
    %c0_i32_0 = arith.constant 0 : i32
    %c0_i32_1 = arith.constant 0 : i32
    return %arg0, %c0_i32, %c0_i32_0 : i32, i32, i32
  }
}

module attributes {stable_mosaic.version = 11 : i64} {
  func.func @kernel(%arg0: i32, %arg1: i32, %arg2: memref<32x32xbf16, #tpu.memory_space<vmem>>, %arg3: memref<32x16xbf16, #tpu.memory_space<vmem>>, %arg4: memref<1x16xf32, #tpu.memory_space<vmem>>, %arg5: memref<32x16xbf16, #tpu.memory_space<vmem>>, %arg6: memref<32x16xbf16, #tpu.memory_space<vmem>>) attributes {dimension_semantics = [#tpu.dimension_semantics<parallel>, #tpu.dimension_semantics<parallel>], iteration_bounds = array<i64: 1, 1>, scalar_prefetch = 0 : i64, scratch_operands = 0 : i64, tpu.core_type = #tpu.core_type<tc>, window_params = [{transform_indices = @transform_0, window_bounds = array<i64: 32, 32>}, {transform_indices = @transform_1, window_bounds = array<i64: 32, 16>}, {transform_indices = @transform_2, window_bounds = array<i64: 1, 16>}, {transform_indices = @transform_3, window_bounds = array<i64: 32, 16>}, {transform_indices = @transform_4, window_bounds = array<i64: 32, 16>}]} {
    %c0 = arith.constant 0 : index
    %c0_0 = arith.constant 0 : index
    %0 = vector.load %arg2[%c0, %c0_0] : memref<32x32xbf16, #tpu.memory_space<vmem>>, vector<32x32xbf16>
    %c0_1 = arith.constant 0 : index
    %c0_2 = arith.constant 0 : index
    %1 = vector.load %arg3[%c0_1, %c0_2] : memref<32x16xbf16, #tpu.memory_space<vmem>>, vector<32x16xbf16>
    %cst = arith.constant dense<0.000000e+00> : vector<32x16xf32>
    %2 = tpu.matmul %0, %1, %cst {dimension_numbers = #tpu.dot_dimension_numbers<[1], [0], [0], [1], [0, 0, 1, 1], [], []>} : vector<32x32xbf16>, vector<32x16xbf16>, vector<32x16xf32> -> vector<32x16xf32>
    %c0_3 = arith.constant 0 : index
    %c0_4 = arith.constant 0 : index
    %3 = vector.load %arg4[%c0_3, %c0_4] : memref<1x16xf32, #tpu.memory_space<vmem>>, vector<1x16xf32>
    %4 = vector.broadcast %3 : vector<1x16xf32> to vector<32x16xf32>
    %5 = arith.addf %2, %4 : vector<32x16xf32>
    %c0_5 = arith.constant 0 : index
    %c0_6 = arith.constant 0 : index
    %6 = vector.load %arg5[%c0_5, %c0_6] : memref<32x16xbf16, #tpu.memory_space<vmem>>, vector<32x16xbf16>
    %7 = arith.extf %6 : vector<32x16xbf16> to vector<32x16xf32>
    %8 = arith.addf %5, %7 : vector<32x16xf32>
    %9 = arith.truncf %8 : vector<32x16xf32> to vector<32x16xbf16>
    %c0_7 = arith.constant 0 : index
    %c0_8 = arith.constant 0 : index
    %10 = vector.load %arg6[%c0_7, %c0_8] : memref<32x16xbf16, #tpu.memory_space<vmem>>, vector<32x16xbf16>
    tpu.vector_store %arg6[%c0_7, %c0_8], %9 {strides = array<i32>} : memref<32x16xbf16, #tpu.memory_space<vmem>>, vector<32x16xbf16>,
    return
  }
  func.func @transform_0(%arg0: i32, %arg1: i32) -> (i32, i32) {
    %c0_i32 = arith.constant 0 : i32
    %c0_i32_0 = arith.constant 0 : i32
    return %arg0, %c0_i32 : i32, i32
  }
  func.func @transform_1(%arg0: i32, %arg1: i32) -> (i32, i32) {
    %c0_i32 = arith.constant 0 : i32
    %c0_i32_0 = arith.constant 0 : i32
    return %c0_i32, %arg1 : i32, i32
  }
  func.func @transform_2(%arg0: i32, %arg1: i32) -> (i32, i32) {
    %c0_i32 = arith.constant 0 : i32
    %c0_i32_0 = arith.constant 0 : i32
    return %c0_i32, %arg1 : i32, i32
  }
  func.func @transform_3(%arg0: i32, %arg1: i32) -> (i32, i32) {
    %c0_i32 = arith.constant 0 : i32
    return %arg0, %arg1 : i32, i32
  }
  func.func @transform_4(%arg0: i32, %arg1: i32) -> (i32, i32) {
    %c0_i32 = arith.constant 0 : i32
    return %arg0, %arg1 : i32, i32
  }
}

module attributes {stable_mosaic.version = 11 : i64} {
  func.func @kernel(%arg0: i32, %arg1: i32, %arg2: memref<32x16xbf16, #tpu.memory_space<vmem>>, %arg3: memref<16x32xbf16, #tpu.memory_space<vmem>>, %arg4: memref<1x32xf32, #tpu.memory_space<vmem>>, %arg5: memref<32x32xbf16, #tpu.memory_space<vmem>>) attributes {dimension_semantics = [#tpu.dimension_semantics<parallel>, #tpu.dimension_semantics<parallel>], iteration_bounds = array<i64: 1, 1>, scalar_prefetch = 0 : i64, scratch_operands = 0 : i64, tpu.core_type = #tpu.core_type<tc>, window_params = [{transform_indices = @transform_0, window_bounds = array<i64: 32, 16>}, {transform_indices = @transform_1, window_bounds = array<i64: 16, 32>}, {transform_indices = @transform_2, window_bounds = array<i64: 1, 32>}, {transform_indices = @transform_3, window_bounds = array<i64: 32, 32>}]} {
    %c0 = arith.constant 0 : index
    %c0_0 = arith.constant 0 : index
    %0 = vector.load %arg2[%c0, %c0_0] : memref<32x16xbf16, #tpu.memory_space<vmem>>, vector<32x16xbf16>
    %c0_1 = arith.constant 0 : index
    %c0_2 = arith.constant 0 : index
    %1 = vector.load %arg3[%c0_1, %c0_2] : memref<16x32xbf16, #tpu.memory_space<vmem>>, vector<16x32xbf16>
    %cst = arith.constant dense<0.000000e+00> : vector<32x32xf32>
    %2 = tpu.matmul %0, %1, %cst {dimension_numbers = #tpu.dot_dimension_numbers<[1], [0], [0], [1], [0, 0, 1, 1], [], []>} : vector<32x16xbf16>, vector<16x32xbf16>, vector<32x32xf32> -> vector<32x32xf32>
    %c0_3 = arith.constant 0 : index
    %c0_4 = arith.constant 0 : index
    %3 = vector.load %arg4[%c0_3, %c0_4] : memref<1x32xf32, #tpu.memory_space<vmem>>, vector<1x32xf32>
    %4 = vector.broadcast %3 : vector<1x32xf32> to vector<32x32xf32>
    %5 = arith.addf %2, %4 : vector<32x32xf32>
    %6 = arith.mulf %5, %5 : vector<32x32xf32>
    %7 = arith.mulf %5, %6 : vector<32x32xf32>
    %cst_5 = arith.constant 4.471500e-02 : f32
    %8 = vector.broadcast %cst_5 : f32 to vector<32x32xf32>
    %9 = arith.mulf %8, %7 : vector<32x32xf32>
    %10 = arith.addf %5, %9 : vector<32x32xf32>
    %cst_6 = arith.constant 0.797884583 : f32
    %11 = vector.broadcast %cst_6 : f32 to vector<32x32xf32>
    %12 = arith.mulf %11, %10 : vector<32x32xf32>
    %13 = math.tanh %12 : vector<32x32xf32>
    %cst_7 = arith.constant 1.000000e+00 : f32
    %14 = vector.broadcast %cst_7 : f32 to vector<32x32xf32>
    %15 = arith.addf %14, %13 : vector<32x32xf32>
    %cst_8 = arith.constant 5.000000e-01 : f32
    %16 = vector.broadcast %cst_8 : f32 to vector<32x32xf32>
    %17 = arith.mulf %16, %15 : vector<32x32xf32>
    %18 = arith.mulf %5, %17 : vector<32x32xf32>
    %19 = arith.truncf %18 : vector<32x32xf32> to vector<32x32xbf16>
    %c0_9 = arith.constant 0 : index
    %c0_10 = arith.constant 0 : index
    %20 = vector.load %arg5[%c0_9, %c0_10] : memref<32x32xbf16, #tpu.memory_space<vmem>>, vector<32x32xbf16>
    tpu.vector_store %arg5[%c0_9, %c0_10], %19 {strides = array<i32>} : memref<32x32xbf16, #tpu.memory_space<vmem>>, vector<32x32xbf16>,
    return
  }
  func.func @transform_0(%arg0: i32, %arg1: i32) -> (i32, i32) {
    %c0_i32 = arith.constant 0 : i32
    %c0_i32_0 = arith.constant 0 : i32
    return %arg0, %c0_i32 : i32, i32
  }
  func.func @transform_1(%arg0: i32, %arg1: i32) -> (i32, i32) {
    %c0_i32 = arith.constant 0 : i32
    %c0_i32_0 = arith.constant 0 : i32
    return %c0_i32, %arg1 : i32, i32
  }
  func.func @transform_2(%arg0: i32, %arg1: i32) -> (i32, i32) {
    %c0_i32 = arith.constant 0 : i32
    %c0_i32_0 = arith.constant 0 : i32
    return %c0_i32, %arg1 : i32, i32
  }
  func.func @transform_3(%arg0: i32, %arg1: i32) -> (i32, i32) {
    %c0_i32 = arith.constant 0 : i32
    return %arg0, %arg1 : i32, i32
  }
}

module attributes {stable_mosaic.version = 11 : i64} {
  func.func @kernel(%arg0: i32, %arg1: i32, %arg2: memref<1x6x6x16xbf16, #tpu.memory_space<vmem>>, %arg3: memref<9x1x16xf32, #tpu.memory_space<vmem>>, %arg4: memref<1x16xf32, #tpu.memory_space<vmem>>, %arg5: memref<16x16xbf16, #tpu.memory_space<vmem>>, %arg6: memref<1x4x4x16xbf16, #tpu.memory_space<vmem>>) attributes {dimension_semantics = [#tpu.dimension_semantics<parallel>, #tpu.dimension_semantics<parallel>], iteration_bounds = array<i64: 2, 1>, scalar_prefetch = 0 : i64, scratch_operands = 0 : i64, tpu.core_type = #tpu.core_type<tc>, window_params = [{transform_indices = @transform_0, window_bounds = array<i64: 1, 6, 6, 16>}, {pipeline_mode = #tpu.pipeline_mode<synchronous>, transform_indices = @transform_1, window_bounds = array<i64: 9, 1, 16>}, {pipeline_mode = #tpu.pipeline_mode<synchronous>, transform_indices = @transform_2, window_bounds = array<i64: 1, 16>}, {pipeline_mode = #tpu.pipeline_mode<synchronous>, transform_indices = @transform_3, window_bounds = array<i64: 16, 16>}, {transform_indices = @transform_4, window_bounds = array<i64: 1, 4, 4, 16>}]} {
    %c4_i32 = arith.constant 4 : i32
    %0 = arith.muli %arg1, %c4_i32 : i32
    %cst = arith.constant 0.000000e+00 : f32
    %1 = vector.broadcast %cst : f32 to vector<4x16xf32>
    %c0_i32 = arith.constant 0 : i32
    %2 = arith.addi %0, %c0_i32 : i32
    %c0_i32_0 = arith.constant 0 : i32
    %3 = arith.addi %2, %c0_i32_0 : i32
    %c0 = arith.constant 0 : index
    %4 = arith.index_cast %3 : i32 to index
    %c0_1 = arith.constant 0 : index
    %c0_2 = arith.constant 0 : index
    %5 = vector.load %arg2[%c0, %4, %c0_1, %c0_2] : memref<1x6x6x16xbf16, #tpu.memory_space<vmem>>, vector<1x1x6x16xbf16>
    %6 = vector.shape_cast %5 : vector<1x1x6x16xbf16> to vector<1x6x16xbf16>
    %7 = vector.shape_cast %6 : vector<1x6x16xbf16> to vector<6x16xbf16>
    %8 = arith.extf %7 : vector<6x16xbf16> to vector<6x16xf32>
    %9 = vector.extract_strided_slice %8 {offsets = [0, 0], sizes = [4, 16], strides = [1, 1]} : vector<6x16xf32> to vector<4x16xf32>
    %c0_3 = arith.constant 0 : index
    %c0_4 = arith.constant 0 : index
    %c0_5 = arith.constant 0 : index
    %10 = vector.load %arg3[%c0_3, %c0_4, %c0_5] : memref<9x1x16xf32, #tpu.memory_space<vmem>>, vector<1x1x16xf32>
    %11 = vector.shape_cast %10 : vector<1x1x16xf32> to vector<1x16xf32>
    %12 = vector.broadcast %11 : vector<1x16xf32> to vector<4x16xf32>
    %13 = arith.mulf %9, %12 : vector<4x16xf32>
    %14 = arith.addf %1, %13 : vector<4x16xf32>
    %15 = vector.extract_strided_slice %8 {offsets = [1, 0], sizes = [4, 16], strides = [1, 1]} : vector<6x16xf32> to vector<4x16xf32>
    %c1 = arith.constant 1 : index
    %c0_6 = arith.constant 0 : index
    %c0_7 = arith.constant 0 : index
    %16 = vector.load %arg3[%c1, %c0_6, %c0_7] : memref<9x1x16xf32, #tpu.memory_space<vmem>>, vector<1x1x16xf32>
    %17 = vector.shape_cast %16 : vector<1x1x16xf32> to vector<1x16xf32>
    %18 = vector.broadcast %17 : vector<1x16xf32> to vector<4x16xf32>
    %19 = arith.mulf %15, %18 : vector<4x16xf32>
    %20 = arith.addf %14, %19 : vector<4x16xf32>
    %21 = vector.extract_strided_slice %8 {offsets = [2, 0], sizes = [4, 16], strides = [1, 1]} : vector<6x16xf32> to vector<4x16xf32>
    %c2 = arith.constant 2 : index
    %c0_8 = arith.constant 0 : index
    %c0_9 = arith.constant 0 : index
    %22 = vector.load %arg3[%c2, %c0_8, %c0_9] : memref<9x1x16xf32, #tpu.memory_space<vmem>>, vector<1x1x16xf32>
    %23 = vector.shape_cast %22 : vector<1x1x16xf32> to vector<1x16xf32>
    %24 = vector.broadcast %23 : vector<1x16xf32> to vector<4x16xf32>
    %25 = arith.mulf %21, %24 : vector<4x16xf32>
    %26 = arith.addf %20, %25 : vector<4x16xf32>
    %c0_i32_10 = arith.constant 0 : i32
    %27 = arith.addi %0, %c0_i32_10 : i32
    %c1_i32 = arith.constant 1 : i32
    %28 = arith.addi %27, %c1_i32 : i32
    %c0_11 = arith.constant 0 : index
    %29 = arith.index_cast %28 : i32 to index
    %c0_12 = arith.constant 0 : index
    %c0_13 = arith.constant 0 : index
    %30 = vector.load %arg2[%c0_11, %29, %c0_12, %c0_13] : memref<1x6x6x16xbf16, #tpu.memory_space<vmem>>, vector<1x1x6x16xbf16>
    %31 = vector.shape_cast %30 : vector<1x1x6x16xbf16> to vector<1x6x16xbf16>
    %32 = vector.shape_cast %31 : vector<1x6x16xbf16> to vector<6x16xbf16>
    %33 = arith.extf %32 : vector<6x16xbf16> to vector<6x16xf32>
    %34 = vector.extract_strided_slice %33 {offsets = [0, 0], sizes = [4, 16], strides = [1, 1]} : vector<6x16xf32> to vector<4x16xf32>
    %c3 = arith.constant 3 : index
    %c0_14 = arith.constant 0 : index
    %c0_15 = arith.constant 0 : index
    %35 = vector.load %arg3[%c3, %c0_14, %c0_15] : memref<9x1x16xf32, #tpu.memory_space<vmem>>, vector<1x1x16xf32>
    %36 = vector.shape_cast %35 : vector<1x1x16xf32> to vector<1x16xf32>
    %37 = vector.broadcast %36 : vector<1x16xf32> to vector<4x16xf32>
    %38 = arith.mulf %34, %37 : vector<4x16xf32>
    %39 = arith.addf %26, %38 : vector<4x16xf32>
    %40 = vector.extract_strided_slice %33 {offsets = [1, 0], sizes = [4, 16], strides = [1, 1]} : vector<6x16xf32> to vector<4x16xf32>
    %c4 = arith.constant 4 : index
    %c0_16 = arith.constant 0 : index
    %c0_17 = arith.constant 0 : index
    %41 = vector.load %arg3[%c4, %c0_16, %c0_17] : memref<9x1x16xf32, #tpu.memory_space<vmem>>, vector<1x1x16xf32>
    %42 = vector.shape_cast %41 : vector<1x1x16xf32> to vector<1x16xf32>
    %43 = vector.broadcast %42 : vector<1x16xf32> to vector<4x16xf32>
    %44 = arith.mulf %40, %43 : vector<4x16xf32>
    %45 = arith.addf %39, %44 : vector<4x16xf32>
    %46 = vector.extract_strided_slice %31 {offsets = [0, 1, 0], sizes = [1, 4, 16], strides = [1, 1, 1]} : vector<1x6x16xbf16> to vector<1x4x16xbf16>
    %47 = vector.shape_cast %46 : vector<1x4x16xbf16> to vector<4x16xbf16>
    %48 = vector.extract_strided_slice %33 {offsets = [2, 0], sizes = [4, 16], strides = [1, 1]} : vector<6x16xf32> to vector<4x16xf32>
    %c5 = arith.constant 5 : index
    %c0_18 = arith.constant 0 : index
    %c0_19 = arith.constant 0 : index
    %49 = vector.load %arg3[%c5, %c0_18, %c0_19] : memref<9x1x16xf32, #tpu.memory_space<vmem>>, vector<1x1x16xf32>
    %50 = vector.shape_cast %49 : vector<1x1x16xf32> to vector<1x16xf32>
    %51 = vector.broadcast %50 : vector<1x16xf32> to vector<4x16xf32>
    %52 = arith.mulf %48, %51 : vector<4x16xf32>
    %53 = arith.addf %45, %52 : vector<4x16xf32>
    %c0_i32_20 = arith.constant 0 : i32
    %54 = arith.addi %0, %c0_i32_20 : i32
    %c2_i32 = arith.constant 2 : i32
    %55 = arith.addi %54, %c2_i32 : i32
    %c0_21 = arith.constant 0 : index
    %56 = arith.index_cast %55 : i32 to index
    %c0_22 = arith.constant 0 : index
    %c0_23 = arith.constant 0 : index
    %57 = vector.load %arg2[%c0_21, %56, %c0_22, %c0_23] : memref<1x6x6x16xbf16, #tpu.memory_space<vmem>>, vector<1x1x6x16xbf16>
    %58 = vector.shape_cast %57 : vector<1x1x6x16xbf16> to vector<1x6x16xbf16>
    %59 = vector.shape_cast %58 : vector<1x6x16xbf16> to vector<6x16xbf16>
    %60 = arith.extf %59 : vector<6x16xbf16> to vector<6x16xf32>
    %61 = vector.extract_strided_slice %60 {offsets = [0, 0], sizes = [4, 16], strides = [1, 1]} : vector<6x16xf32> to vector<4x16xf32>
    %c6 = arith.constant 6 : index
    %c0_24 = arith.constant 0 : index
    %c0_25 = arith.constant 0 : index
    %62 = vector.load %arg3[%c6, %c0_24, %c0_25] : memref<9x1x16xf32, #tpu.memory_space<vmem>>, vector<1x1x16xf32>
    %63 = vector.shape_cast %62 : vector<1x1x16xf32> to vector<1x16xf32>
    %64 = vector.broadcast %63 : vector<1x16xf32> to vector<4x16xf32>
    %65 = arith.mulf %61, %64 : vector<4x16xf32>
    %66 = arith.addf %53, %65 : vector<4x16xf32>
    %67 = vector.extract_strided_slice %60 {offsets = [1, 0], sizes = [4, 16], strides = [1, 1]} : vector<6x16xf32> to vector<4x16xf32>
    %c7 = arith.constant 7 : index
    %c0_26 = arith.constant 0 : index
    %c0_27 = arith.constant 0 : index
    %68 = vector.load %arg3[%c7, %c0_26, %c0_27] : memref<9x1x16xf32, #tpu.memory_space<vmem>>, vector<1x1x16xf32>
    %69 = vector.shape_cast %68 : vector<1x1x16xf32> to vector<1x16xf32>
    %70 = vector.broadcast %69 : vector<1x16xf32> to vector<4x16xf32>
    %71 = arith.mulf %67, %70 : vector<4x16xf32>
    %72 = arith.addf %66, %71 : vector<4x16xf32>
    %73 = vector.extract_strided_slice %60 {offsets = [2, 0], sizes = [4, 16], strides = [1, 1]} : vector<6x16xf32> to vector<4x16xf32>
    %c8 = arith.constant 8 : index
    %c0_28 = arith.constant 0 : index
    %c0_29 = arith.constant 0 : index
    %74 = vector.load %arg3[%c8, %c0_28, %c0_29] : memref<9x1x16xf32, #tpu.memory_space<vmem>>, vector<1x1x16xf32>
    %75 = vector.shape_cast %74 : vector<1x1x16xf32> to vector<1x16xf32>
    %76 = vector.broadcast %75 : vector<1x16xf32> to vector<4x16xf32>
    %77 = arith.mulf %73, %76 : vector<4x16xf32>
    %78 = arith.addf %72, %77 : vector<4x16xf32>
    %c0_30 = arith.constant 0 : index
    %c0_31 = arith.constant 0 : index
    %79 = vector.load %arg4[%c0_30, %c0_31] : memref<1x16xf32, #tpu.memory_space<vmem>>, vector<1x16xf32>
    %80 = vector.broadcast %79 : vector<1x16xf32> to vector<4x16xf32>
    %81 = arith.addf %78, %80 : vector<4x16xf32>
    %c0_32 = arith.constant 0 : index
    %c0_33 = arith.constant 0 : index
    %82 = vector.load %arg5[%c0_32, %c0_33] : memref<16x16xbf16, #tpu.memory_space<vmem>>, vector<16x16xbf16>
    %cst_34 = arith.constant dense<0.000000e+00> : vector<4x16xf32>
    %83 = tpu.matmul %47, %82, %cst_34 {dimension_numbers = #tpu.dot_dimension_numbers<[1], [0], [0], [1], [0, 0, 1, 1], [], []>} : vector<4x16xbf16>, vector<16x16xbf16>, vector<4x16xf32> -> vector<4x16xf32>
    %84 = arith.addf %81, %83 : vector<4x16xf32>
    %85 = arith.truncf %84 : vector<4x16xf32> to vector<4x16xbf16>
    %c0_35 = arith.constant 0 : index
    %c0_36 = arith.constant 0 : index
    %c0_37 = arith.constant 0 : index
    %c0_38 = arith.constant 0 : index
    %86 = vector.load %arg6[%c0_35, %c0_36, %c0_37, %c0_38] : memref<1x4x4x16xbf16, #tpu.memory_space<vmem>>, vector<1x1x4x16xbf16>
    %87 = vector.shape_cast %86 : vector<1x1x4x16xbf16> to vector<4x16xbf16>
    %88 = vector.shape_cast %85 : vector<4x16xbf16> to vector<1x1x4x16xbf16>
    tpu.vector_store %arg6[%c0_35, %c0_36, %c0_37, %c0_38], %88 {strides = array<i32>} : memref<1x4x4x16xbf16, #tpu.memory_space<vmem>>, vector<1x1x4x16xbf16>,
    %cst_39 = arith.constant 0.000000e+00 : f32
    %89 = vector.broadcast %cst_39 : f32 to vector<4x16xf32>
    %c1_i32_40 = arith.constant 1 : i32
    %90 = arith.addi %0, %c1_i32_40 : i32
    %c0_i32_41 = arith.constant 0 : i32
    %91 = arith.addi %90, %c0_i32_41 : i32
    %c0_42 = arith.constant 0 : index
    %92 = arith.index_cast %91 : i32 to index
    %c0_43 = arith.constant 0 : index
    %c0_44 = arith.constant 0 : index
    %93 = vector.load %arg2[%c0_42, %92, %c0_43, %c0_44] : memref<1x6x6x16xbf16, #tpu.memory_space<vmem>>, vector<1x1x6x16xbf16>
    %94 = vector.shape_cast %93 : vector<1x1x6x16xbf16> to vector<1x6x16xbf16>
    %95 = vector.shape_cast %94 : vector<1x6x16xbf16> to vector<6x16xbf16>
    %96 = arith.extf %95 : vector<6x16xbf16> to vector<6x16xf32>
    %97 = vector.extract_strided_slice %96 {offsets = [0, 0], sizes = [4, 16], strides = [1, 1]} : vector<6x16xf32> to vector<4x16xf32>
    %c0_45 = arith.constant 0 : index
    %c0_46 = arith.constant 0 : index
    %c0_47 = arith.constant 0 : index
    %98 = vector.load %arg3[%c0_45, %c0_46, %c0_47] : memref<9x1x16xf32, #tpu.memory_space<vmem>>, vector<1x1x16xf32>
    %99 = vector.shape_cast %98 : vector<1x1x16xf32> to vector<1x16xf32>
    %100 = vector.broadcast %99 : vector<1x16xf32> to vector<4x16xf32>
    %101 = arith.mulf %97, %100 : vector<4x16xf32>
    %102 = arith.addf %89, %101 : vector<4x16xf32>
    %103 = vector.extract_strided_slice %96 {offsets = [1, 0], sizes = [4, 16], strides = [1, 1]} : vector<6x16xf32> to vector<4x16xf32>
    %c1_48 = arith.constant 1 : index
    %c0_49 = arith.constant 0 : index
    %c0_50 = arith.constant 0 : index
    %104 = vector.load %arg3[%c1_48, %c0_49, %c0_50] : memref<9x1x16xf32, #tpu.memory_space<vmem>>, vector<1x1x16xf32>
    %105 = vector.shape_cast %104 : vector<1x1x16xf32> to vector<1x16xf32>
    %106 = vector.broadcast %105 : vector<1x16xf32> to vector<4x16xf32>
    %107 = arith.mulf %103, %106 : vector<4x16xf32>
    %108 = arith.addf %102, %107 : vector<4x16xf32>
    %109 = vector.extract_strided_slice %96 {offsets = [2, 0], sizes = [4, 16], strides = [1, 1]} : vector<6x16xf32> to vector<4x16xf32>
    %c2_51 = arith.constant 2 : index
    %c0_52 = arith.constant 0 : index
    %c0_53 = arith.constant 0 : index
    %110 = vector.load %arg3[%c2_51, %c0_52, %c0_53] : memref<9x1x16xf32, #tpu.memory_space<vmem>>, vector<1x1x16xf32>
    %111 = vector.shape_cast %110 : vector<1x1x16xf32> to vector<1x16xf32>
    %112 = vector.broadcast %111 : vector<1x16xf32> to vector<4x16xf32>
    %113 = arith.mulf %109, %112 : vector<4x16xf32>
    %114 = arith.addf %108, %113 : vector<4x16xf32>
    %c1_i32_54 = arith.constant 1 : i32
    %115 = arith.addi %0, %c1_i32_54 : i32
    %c1_i32_55 = arith.constant 1 : i32
    %116 = arith.addi %115, %c1_i32_55 : i32
    %c0_56 = arith.constant 0 : index
    %117 = arith.index_cast %116 : i32 to index
    %c0_57 = arith.constant 0 : index
    %c0_58 = arith.constant 0 : index
    %118 = vector.load %arg2[%c0_56, %117, %c0_57, %c0_58] : memref<1x6x6x16xbf16, #tpu.memory_space<vmem>>, vector<1x1x6x16xbf16>
    %119 = vector.shape_cast %118 : vector<1x1x6x16xbf16> to vector<1x6x16xbf16>
    %120 = vector.shape_cast %119 : vector<1x6x16xbf16> to vector<6x16xbf16>
    %121 = arith.extf %120 : vector<6x16xbf16> to vector<6x16xf32>
    %122 = vector.extract_strided_slice %121 {offsets = [0, 0], sizes = [4, 16], strides = [1, 1]} : vector<6x16xf32> to vector<4x16xf32>
    %c3_59 = arith.constant 3 : index
    %c0_60 = arith.constant 0 : index
    %c0_61 = arith.constant 0 : index
    %123 = vector.load %arg3[%c3_59, %c0_60, %c0_61] : memref<9x1x16xf32, #tpu.memory_space<vmem>>, vector<1x1x16xf32>
    %124 = vector.shape_cast %123 : vector<1x1x16xf32> to vector<1x16xf32>
    %125 = vector.broadcast %124 : vector<1x16xf32> to vector<4x16xf32>
    %126 = arith.mulf %122, %125 : vector<4x16xf32>
    %127 = arith.addf %114, %126 : vector<4x16xf32>
    %128 = vector.extract_strided_slice %121 {offsets = [1, 0], sizes = [4, 16], strides = [1, 1]} : vector<6x16xf32> to vector<4x16xf32>
    %c4_62 = arith.constant 4 : index
    %c0_63 = arith.constant 0 : index
    %c0_64 = arith.constant 0 : index
    %129 = vector.load %arg3[%c4_62, %c0_63, %c0_64] : memref<9x1x16xf32, #tpu.memory_space<vmem>>, vector<1x1x16xf32>
    %130 = vector.shape_cast %129 : vector<1x1x16xf32> to vector<1x16xf32>
    %131 = vector.broadcast %130 : vector<1x16xf32> to vector<4x16xf32>
    %132 = arith.mulf %128, %131 : vector<4x16xf32>
    %133 = arith.addf %127, %132 : vector<4x16xf32>
    %134 = vector.extract_strided_slice %119 {offsets = [0, 1, 0], sizes = [1, 4, 16], strides = [1, 1, 1]} : vector<1x6x16xbf16> to vector<1x4x16xbf16>
    %135 = vector.shape_cast %134 : vector<1x4x16xbf16> to vector<4x16xbf16>
    %136 = vector.extract_strided_slice %121 {offsets = [2, 0], sizes = [4, 16], strides = [1, 1]} : vector<6x16xf32> to vector<4x16xf32>
    %c5_65 = arith.constant 5 : index
    %c0_66 = arith.constant 0 : index
    %c0_67 = arith.constant 0 : index
    %137 = vector.load %arg3[%c5_65, %c0_66, %c0_67] : memref<9x1x16xf32, #tpu.memory_space<vmem>>, vector<1x1x16xf32>
    %138 = vector.shape_cast %137 : vector<1x1x16xf32> to vector<1x16xf32>
    %139 = vector.broadcast %138 : vector<1x16xf32> to vector<4x16xf32>
    %140 = arith.mulf %136, %139 : vector<4x16xf32>
    %141 = arith.addf %133, %140 : vector<4x16xf32>
    %c1_i32_68 = arith.constant 1 : i32
    %142 = arith.addi %0, %c1_i32_68 : i32
    %c2_i32_69 = arith.constant 2 : i32
    %143 = arith.addi %142, %c2_i32_69 : i32
    %c0_70 = arith.constant 0 : index
    %144 = arith.index_cast %143 : i32 to index
    %c0_71 = arith.constant 0 : index
    %c0_72 = arith.constant 0 : index
    %145 = vector.load %arg2[%c0_70, %144, %c0_71, %c0_72] : memref<1x6x6x16xbf16, #tpu.memory_space<vmem>>, vector<1x1x6x16xbf16>
    %146 = vector.shape_cast %145 : vector<1x1x6x16xbf16> to vector<1x6x16xbf16>
    %147 = vector.shape_cast %146 : vector<1x6x16xbf16> to vector<6x16xbf16>
    %148 = arith.extf %147 : vector<6x16xbf16> to vector<6x16xf32>
    %149 = vector.extract_strided_slice %148 {offsets = [0, 0], sizes = [4, 16], strides = [1, 1]} : vector<6x16xf32> to vector<4x16xf32>
    %c6_73 = arith.constant 6 : index
    %c0_74 = arith.constant 0 : index
    %c0_75 = arith.constant 0 : index
    %150 = vector.load %arg3[%c6_73, %c0_74, %c0_75] : memref<9x1x16xf32, #tpu.memory_space<vmem>>, vector<1x1x16xf32>
    %151 = vector.shape_cast %150 : vector<1x1x16xf32> to vector<1x16xf32>
    %152 = vector.broadcast %151 : vector<1x16xf32> to vector<4x16xf32>
    %153 = arith.mulf %149, %152 : vector<4x16xf32>
    %154 = arith.addf %141, %153 : vector<4x16xf32>
    %155 = vector.extract_strided_slice %148 {offsets = [1, 0], sizes = [4, 16], strides = [1, 1]} : vector<6x16xf32> to vector<4x16xf32>
    %c7_76 = arith.constant 7 : index
    %c0_77 = arith.constant 0 : index
    %c0_78 = arith.constant 0 : index
    %156 = vector.load %arg3[%c7_76, %c0_77, %c0_78] : memref<9x1x16xf32, #tpu.memory_space<vmem>>, vector<1x1x16xf32>
    %157 = vector.shape_cast %156 : vector<1x1x16xf32> to vector<1x16xf32>
    %158 = vector.broadcast %157 : vector<1x16xf32> to vector<4x16xf32>
    %159 = arith.mulf %155, %158 : vector<4x16xf32>
    %160 = arith.addf %154, %159 : vector<4x16xf32>
    %161 = vector.extract_strided_slice %148 {offsets = [2, 0], sizes = [4, 16], strides = [1, 1]} : vector<6x16xf32> to vector<4x16xf32>
    %c8_79 = arith.constant 8 : index
    %c0_80 = arith.constant 0 : index
    %c0_81 = arith.constant 0 : index
    %162 = vector.load %arg3[%c8_79, %c0_80, %c0_81] : memref<9x1x16xf32, #tpu.memory_space<vmem>>, vector<1x1x16xf32>
    %163 = vector.shape_cast %162 : vector<1x1x16xf32> to vector<1x16xf32>
    %164 = vector.broadcast %163 : vector<1x16xf32> to vector<4x16xf32>
    %165 = arith.mulf %161, %164 : vector<4x16xf32>
    %166 = arith.addf %160, %165 : vector<4x16xf32>
    %c0_82 = arith.constant 0 : index
    %c0_83 = arith.constant 0 : index
    %167 = vector.load %arg4[%c0_82, %c0_83] : memref<1x16xf32, #tpu.memory_space<vmem>>, vector<1x16xf32>
    %168 = vector.broadcast %167 : vector<1x16xf32> to vector<4x16xf32>
    %169 = arith.addf %166, %168 : vector<4x16xf32>
    %c0_84 = arith.constant 0 : index
    %c0_85 = arith.constant 0 : index
    %170 = vector.load %arg5[%c0_84, %c0_85] : memref<16x16xbf16, #tpu.memory_space<vmem>>, vector<16x16xbf16>
    %cst_86 = arith.constant dense<0.000000e+00> : vector<4x16xf32>
    %171 = tpu.matmul %135, %170, %cst_86 {dimension_numbers = #tpu.dot_dimension_numbers<[1], [0], [0], [1], [0, 0, 1, 1], [], []>} : vector<4x16xbf16>, vector<16x16xbf16>, vector<4x16xf32> -> vector<4x16xf32>
    %172 = arith.addf %169, %171 : vector<4x16xf32>
    %173 = arith.truncf %172 : vector<4x16xf32> to vector<4x16xbf16>
    %c0_87 = arith.constant 0 : index
    %c1_88 = arith.constant 1 : index
    %c0_89 = arith.constant 0 : index
    %c0_90 = arith.constant 0 : index
    %174 = vector.load %arg6[%c0_87, %c1_88, %c0_89, %c0_90] : memref<1x4x4x16xbf16, #tpu.memory_space<vmem>>, vector<1x1x4x16xbf16>
    %175 = vector.shape_cast %174 : vector<1x1x4x16xbf16> to vector<4x16xbf16>
    %176 = vector.shape_cast %173 : vector<4x16xbf16> to vector<1x1x4x16xbf16>
    tpu.vector_store %arg6[%c0_87, %c1_88, %c0_89, %c0_90], %176 {strides = array<i32>} : memref<1x4x4x16xbf16, #tpu.memory_space<vmem>>, vector<1x1x4x16xbf16>,
    %cst_91 = arith.constant 0.000000e+00 : f32
    %177 = vector.broadcast %cst_91 : f32 to vector<4x16xf32>
    %c2_i32_92 = arith.constant 2 : i32
    %178 = arith.addi %0, %c2_i32_92 : i32
    %c0_i32_93 = arith.constant 0 : i32
    %179 = arith.addi %178, %c0_i32_93 : i32
    %c0_94 = arith.constant 0 : index
    %180 = arith.index_cast %179 : i32 to index
    %c0_95 = arith.constant 0 : index
    %c0_96 = arith.constant 0 : index
    %181 = vector.load %arg2[%c0_94, %180, %c0_95, %c0_96] : memref<1x6x6x16xbf16, #tpu.memory_space<vmem>>, vector<1x1x6x16xbf16>
    %182 = vector.shape_cast %181 : vector<1x1x6x16xbf16> to vector<1x6x16xbf16>
    %183 = vector.shape_cast %182 : vector<1x6x16xbf16> to vector<6x16xbf16>
    %184 = arith.extf %183 : vector<6x16xbf16> to vector<6x16xf32>
    %185 = vector.extract_strided_slice %184 {offsets = [0, 0], sizes = [4, 16], strides = [1, 1]} : vector<6x16xf32> to vector<4x16xf32>
    %c0_97 = arith.constant 0 : index
    %c0_98 = arith.constant 0 : index
    %c0_99 = arith.constant 0 : index
    %186 = vector.load %arg3[%c0_97, %c0_98, %c0_99] : memref<9x1x16xf32, #tpu.memory_space<vmem>>, vector<1x1x16xf32>
    %187 = vector.shape_cast %186 : vector<1x1x16xf32> to vector<1x16xf32>
    %188 = vector.broadcast %187 : vector<1x16xf32> to vector<4x16xf32>
    %189 = arith.mulf %185, %188 : vector<4x16xf32>
    %190 = arith.addf %177, %189 : vector<4x16xf32>
    %191 = vector.extract_strided_slice %184 {offsets = [1, 0], sizes = [4, 16], strides = [1, 1]} : vector<6x16xf32> to vector<4x16xf32>
    %c1_100 = arith.constant 1 : index
    %c0_101 = arith.constant 0 : index
    %c0_102 = arith.constant 0 : index
    %192 = vector.load %arg3[%c1_100, %c0_101, %c0_102] : memref<9x1x16xf32, #tpu.memory_space<vmem>>, vector<1x1x16xf32>
    %193 = vector.shape_cast %192 : vector<1x1x16xf32> to vector<1x16xf32>
    %194 = vector.broadcast %193 : vector<1x16xf32> to vector<4x16xf32>
    %195 = arith.mulf %191, %194 : vector<4x16xf32>
    %196 = arith.addf %190, %195 : vector<4x16xf32>
    %197 = vector.extract_strided_slice %184 {offsets = [2, 0], sizes = [4, 16], strides = [1, 1]} : vector<6x16xf32> to vector<4x16xf32>
    %c2_103 = arith.constant 2 : index
    %c0_104 = arith.constant 0 : index
    %c0_105 = arith.constant 0 : index
    %198 = vector.load %arg3[%c2_103, %c0_104, %c0_105] : memref<9x1x16xf32, #tpu.memory_space<vmem>>, vector<1x1x16xf32>
    %199 = vector.shape_cast %198 : vector<1x1x16xf32> to vector<1x16xf32>
    %200 = vector.broadcast %199 : vector<1x16xf32> to vector<4x16xf32>
    %201 = arith.mulf %197, %200 : vector<4x16xf32>
    %202 = arith.addf %196, %201 : vector<4x16xf32>
    %c2_i32_106 = arith.constant 2 : i32
    %203 = arith.addi %0, %c2_i32_106 : i32
    %c1_i32_107 = arith.constant 1 : i32
    %204 = arith.addi %203, %c1_i32_107 : i32
    %c0_108 = arith.constant 0 : index
    %205 = arith.index_cast %204 : i32 to index
    %c0_109 = arith.constant 0 : index
    %c0_110 = arith.constant 0 : index
    %206 = vector.load %arg2[%c0_108, %205, %c0_109, %c0_110] : memref<1x6x6x16xbf16, #tpu.memory_space<vmem>>, vector<1x1x6x16xbf16>
    %207 = vector.shape_cast %206 : vector<1x1x6x16xbf16> to vector<1x6x16xbf16>
    %208 = vector.shape_cast %207 : vector<1x6x16xbf16> to vector<6x16xbf16>
    %209 = arith.extf %208 : vector<6x16xbf16> to vector<6x16xf32>
    %210 = vector.extract_strided_slice %209 {offsets = [0, 0], sizes = [4, 16], strides = [1, 1]} : vector<6x16xf32> to vector<4x16xf32>
    %c3_111 = arith.constant 3 : index
    %c0_112 = arith.constant 0 : index
    %c0_113 = arith.constant 0 : index
    %211 = vector.load %arg3[%c3_111, %c0_112, %c0_113] : memref<9x1x16xf32, #tpu.memory_space<vmem>>, vector<1x1x16xf32>
    %212 = vector.shape_cast %211 : vector<1x1x16xf32> to vector<1x16xf32>
    %213 = vector.broadcast %212 : vector<1x16xf32> to vector<4x16xf32>
    %214 = arith.mulf %210, %213 : vector<4x16xf32>
    %215 = arith.addf %202, %214 : vector<4x16xf32>
    %216 = vector.extract_strided_slice %209 {offsets = [1, 0], sizes = [4, 16], strides = [1, 1]} : vector<6x16xf32> to vector<4x16xf32>
    %c4_114 = arith.constant 4 : index
    %c0_115 = arith.constant 0 : index
    %c0_116 = arith.constant 0 : index
    %217 = vector.load %arg3[%c4_114, %c0_115, %c0_116] : memref<9x1x16xf32, #tpu.memory_space<vmem>>, vector<1x1x16xf32>
    %218 = vector.shape_cast %217 : vector<1x1x16xf32> to vector<1x16xf32>
    %219 = vector.broadcast %218 : vector<1x16xf32> to vector<4x16xf32>
    %220 = arith.mulf %216, %219 : vector<4x16xf32>
    %221 = arith.addf %215, %220 : vector<4x16xf32>
    %222 = vector.extract_strided_slice %207 {offsets = [0, 1, 0], sizes = [1, 4, 16], strides = [1, 1, 1]} : vector<1x6x16xbf16> to vector<1x4x16xbf16>
    %223 = vector.shape_cast %222 : vector<1x4x16xbf16> to vector<4x16xbf16>
    %224 = vector.extract_strided_slice %209 {offsets = [2, 0], sizes = [4, 16], strides = [1, 1]} : vector<6x16xf32> to vector<4x16xf32>
    %c5_117 = arith.constant 5 : index
    %c0_118 = arith.constant 0 : index
    %c0_119 = arith.constant 0 : index
    %225 = vector.load %arg3[%c5_117, %c0_118, %c0_119] : memref<9x1x16xf32, #tpu.memory_space<vmem>>, vector<1x1x16xf32>
    %226 = vector.shape_cast %225 : vector<1x1x16xf32> to vector<1x16xf32>
    %227 = vector.broadcast %226 : vector<1x16xf32> to vector<4x16xf32>
    %228 = arith.mulf %224, %227 : vector<4x16xf32>
    %229 = arith.addf %221, %228 : vector<4x16xf32>
    %c2_i32_120 = arith.constant 2 : i32
    %230 = arith.addi %0, %c2_i32_120 : i32
    %c2_i32_121 = arith.constant 2 : i32
    %231 = arith.addi %230, %c2_i32_121 : i32
    %c0_122 = arith.constant 0 : index
    %232 = arith.index_cast %231 : i32 to index
    %c0_123 = arith.constant 0 : index
    %c0_124 = arith.constant 0 : index
    %233 = vector.load %arg2[%c0_122, %232, %c0_123, %c0_124] : memref<1x6x6x16xbf16, #tpu.memory_space<vmem>>, vector<1x1x6x16xbf16>
    %234 = vector.shape_cast %233 : vector<1x1x6x16xbf16> to vector<1x6x16xbf16>
    %235 = vector.shape_cast %234 : vector<1x6x16xbf16> to vector<6x16xbf16>
    %236 = arith.extf %235 : vector<6x16xbf16> to vector<6x16xf32>
    %237 = vector.extract_strided_slice %236 {offsets = [0, 0], sizes = [4, 16], strides = [1, 1]} : vector<6x16xf32> to vector<4x16xf32>
    %c6_125 = arith.constant 6 : index
    %c0_126 = arith.constant 0 : index
    %c0_127 = arith.constant 0 : index
    %238 = vector.load %arg3[%c6_125, %c0_126, %c0_127] : memref<9x1x16xf32, #tpu.memory_space<vmem>>, vector<1x1x16xf32>
    %239 = vector.shape_cast %238 : vector<1x1x16xf32> to vector<1x16xf32>
    %240 = vector.broadcast %239 : vector<1x16xf32> to vector<4x16xf32>
    %241 = arith.mulf %237, %240 : vector<4x16xf32>
    %242 = arith.addf %229, %241 : vector<4x16xf32>
    %243 = vector.extract_strided_slice %236 {offsets = [1, 0], sizes = [4, 16], strides = [1, 1]} : vector<6x16xf32> to vector<4x16xf32>
    %c7_128 = arith.constant 7 : index
    %c0_129 = arith.constant 0 : index
    %c0_130 = arith.constant 0 : index
    %244 = vector.load %arg3[%c7_128, %c0_129, %c0_130] : memref<9x1x16xf32, #tpu.memory_space<vmem>>, vector<1x1x16xf32>
    %245 = vector.shape_cast %244 : vector<1x1x16xf32> to vector<1x16xf32>
    %246 = vector.broadcast %245 : vector<1x16xf32> to vector<4x16xf32>
    %247 = arith.mulf %243, %246 : vector<4x16xf32>
    %248 = arith.addf %242, %247 : vector<4x16xf32>
    %249 = vector.extract_strided_slice %236 {offsets = [2, 0], sizes = [4, 16], strides = [1, 1]} : vector<6x16xf32> to vector<4x16xf32>
    %c8_131 = arith.constant 8 : index
    %c0_132 = arith.constant 0 : index
    %c0_133 = arith.constant 0 : index
    %250 = vector.load %arg3[%c8_131, %c0_132, %c0_133] : memref<9x1x16xf32, #tpu.memory_space<vmem>>, vector<1x1x16xf32>
    %251 = vector.shape_cast %250 : vector<1x1x16xf32> to vector<1x16xf32>
    %252 = vector.broadcast %251 : vector<1x16xf32> to vector<4x16xf32>
    %253 = arith.mulf %249, %252 : vector<4x16xf32>
    %254 = arith.addf %248, %253 : vector<4x16xf32>
    %c0_134 = arith.constant 0 : index
    %c0_135 = arith.constant 0 : index
    %255 = vector.load %arg4[%c0_134, %c0_135] : memref<1x16xf32, #tpu.memory_space<vmem>>, vector<1x16xf32>
    %256 = vector.broadcast %255 : vector<1x16xf32> to vector<4x16xf32>
    %257 = arith.addf %254, %256 : vector<4x16xf32>
    %c0_136 = arith.constant 0 : index
    %c0_137 = arith.constant 0 : index
    %258 = vector.load %arg5[%c0_136, %c0_137] : memref<16x16xbf16, #tpu.memory_space<vmem>>, vector<16x16xbf16>
    %cst_138 = arith.constant dense<0.000000e+00> : vector<4x16xf32>
    %259 = tpu.matmul %223, %258, %cst_138 {dimension_numbers = #tpu.dot_dimension_numbers<[1], [0], [0], [1], [0, 0, 1, 1], [], []>} : vector<4x16xbf16>, vector<16x16xbf16>, vector<4x16xf32> -> vector<4x16xf32>
    %260 = arith.addf %257, %259 : vector<4x16xf32>
    %261 = arith.truncf %260 : vector<4x16xf32> to vector<4x16xbf16>
    %c0_139 = arith.constant 0 : index
    %c2_140 = arith.constant 2 : index
    %c0_141 = arith.constant 0 : index
    %c0_142 = arith.constant 0 : index
    %262 = vector.load %arg6[%c0_139, %c2_140, %c0_141, %c0_142] : memref<1x4x4x16xbf16, #tpu.memory_space<vmem>>, vector<1x1x4x16xbf16>
    %263 = vector.shape_cast %262 : vector<1x1x4x16xbf16> to vector<4x16xbf16>
    %264 = vector.shape_cast %261 : vector<4x16xbf16> to vector<1x1x4x16xbf16>
    tpu.vector_store %arg6[%c0_139, %c2_140, %c0_141, %c0_142], %264 {strides = array<i32>} : memref<1x4x4x16xbf16, #tpu.memory_space<vmem>>, vector<1x1x4x16xbf16>,
    %cst_143 = arith.constant 0.000000e+00 : f32
    %265 = vector.broadcast %cst_143 : f32 to vector<4x16xf32>
    %c3_i32 = arith.constant 3 : i32
    %266 = arith.addi %0, %c3_i32 : i32
    %c0_i32_144 = arith.constant 0 : i32
    %267 = arith.addi %266, %c0_i32_144 : i32
    %c0_145 = arith.constant 0 : index
    %268 = arith.index_cast %267 : i32 to index
    %c0_146 = arith.constant 0 : index
    %c0_147 = arith.constant 0 : index
    %269 = vector.load %arg2[%c0_145, %268, %c0_146, %c0_147] : memref<1x6x6x16xbf16, #tpu.memory_space<vmem>>, vector<1x1x6x16xbf16>
    %270 = vector.shape_cast %269 : vector<1x1x6x16xbf16> to vector<1x6x16xbf16>
    %271 = vector.shape_cast %270 : vector<1x6x16xbf16> to vector<6x16xbf16>
    %272 = arith.extf %271 : vector<6x16xbf16> to vector<6x16xf32>
    %273 = vector.extract_strided_slice %272 {offsets = [0, 0], sizes = [4, 16], strides = [1, 1]} : vector<6x16xf32> to vector<4x16xf32>
    %c0_148 = arith.constant 0 : index
    %c0_149 = arith.constant 0 : index
    %c0_150 = arith.constant 0 : index
    %274 = vector.load %arg3[%c0_148, %c0_149, %c0_150] : memref<9x1x16xf32, #tpu.memory_space<vmem>>, vector<1x1x16xf32>
    %275 = vector.shape_cast %274 : vector<1x1x16xf32> to vector<1x16xf32>
    %276 = vector.broadcast %275 : vector<1x16xf32> to vector<4x16xf32>
    %277 = arith.mulf %273, %276 : vector<4x16xf32>
    %278 = arith.addf %265, %277 : vector<4x16xf32>
    %279 = vector.extract_strided_slice %272 {offsets = [1, 0], sizes = [4, 16], strides = [1, 1]} : vector<6x16xf32> to vector<4x16xf32>
    %c1_151 = arith.constant 1 : index
    %c0_152 = arith.constant 0 : index
    %c0_153 = arith.constant 0 : index
    %280 = vector.load %arg3[%c1_151, %c0_152, %c0_153] : memref<9x1x16xf32, #tpu.memory_space<vmem>>, vector<1x1x16xf32>
    %281 = vector.shape_cast %280 : vector<1x1x16xf32> to vector<1x16xf32>
    %282 = vector.broadcast %281 : vector<1x16xf32> to vector<4x16xf32>
    %283 = arith.mulf %279, %282 : vector<4x16xf32>
    %284 = arith.addf %278, %283 : vector<4x16xf32>
    %285 = vector.extract_strided_slice %272 {offsets = [2, 0], sizes = [4, 16], strides = [1, 1]} : vector<6x16xf32> to vector<4x16xf32>
    %c2_154 = arith.constant 2 : index
    %c0_155 = arith.constant 0 : index
    %c0_156 = arith.constant 0 : index
    %286 = vector.load %arg3[%c2_154, %c0_155, %c0_156] : memref<9x1x16xf32, #tpu.memory_space<vmem>>, vector<1x1x16xf32>
    %287 = vector.shape_cast %286 : vector<1x1x16xf32> to vector<1x16xf32>
    %288 = vector.broadcast %287 : vector<1x16xf32> to vector<4x16xf32>
    %289 = arith.mulf %285, %288 : vector<4x16xf32>
    %290 = arith.addf %284, %289 : vector<4x16xf32>
    %c3_i32_157 = arith.constant 3 : i32
    %291 = arith.addi %0, %c3_i32_157 : i32
    %c1_i32_158 = arith.constant 1 : i32
    %292 = arith.addi %291, %c1_i32_158 : i32
    %c0_159 = arith.constant 0 : index
    %293 = arith.index_cast %292 : i32 to index
    %c0_160 = arith.constant 0 : index
    %c0_161 = arith.constant 0 : index
    %294 = vector.load %arg2[%c0_159, %293, %c0_160, %c0_161] : memref<1x6x6x16xbf16, #tpu.memory_space<vmem>>, vector<1x1x6x16xbf16>
    %295 = vector.shape_cast %294 : vector<1x1x6x16xbf16> to vector<1x6x16xbf16>
    %296 = vector.shape_cast %295 : vector<1x6x16xbf16> to vector<6x16xbf16>
    %297 = arith.extf %296 : vector<6x16xbf16> to vector<6x16xf32>
    %298 = vector.extract_strided_slice %297 {offsets = [0, 0], sizes = [4, 16], strides = [1, 1]} : vector<6x16xf32> to vector<4x16xf32>
    %c3_162 = arith.constant 3 : index
    %c0_163 = arith.constant 0 : index
    %c0_164 = arith.constant 0 : index
    %299 = vector.load %arg3[%c3_162, %c0_163, %c0_164] : memref<9x1x16xf32, #tpu.memory_space<vmem>>, vector<1x1x16xf32>
    %300 = vector.shape_cast %299 : vector<1x1x16xf32> to vector<1x16xf32>
    %301 = vector.broadcast %300 : vector<1x16xf32> to vector<4x16xf32>
    %302 = arith.mulf %298, %301 : vector<4x16xf32>
    %303 = arith.addf %290, %302 : vector<4x16xf32>
    %304 = vector.extract_strided_slice %297 {offsets = [1, 0], sizes = [4, 16], strides = [1, 1]} : vector<6x16xf32> to vector<4x16xf32>
    %c4_165 = arith.constant 4 : index
    %c0_166 = arith.constant 0 : index
    %c0_167 = arith.constant 0 : index
    %305 = vector.load %arg3[%c4_165, %c0_166, %c0_167] : memref<9x1x16xf32, #tpu.memory_space<vmem>>, vector<1x1x16xf32>
    %306 = vector.shape_cast %305 : vector<1x1x16xf32> to vector<1x16xf32>
    %307 = vector.broadcast %306 : vector<1x16xf32> to vector<4x16xf32>
    %308 = arith.mulf %304, %307 : vector<4x16xf32>
    %309 = arith.addf %303, %308 : vector<4x16xf32>
    %310 = vector.extract_strided_slice %295 {offsets = [0, 1, 0], sizes = [1, 4, 16], strides = [1, 1, 1]} : vector<1x6x16xbf16> to vector<1x4x16xbf16>
    %311 = vector.shape_cast %310 : vector<1x4x16xbf16> to vector<4x16xbf16>
    %312 = vector.extract_strided_slice %297 {offsets = [2, 0], sizes = [4, 16], strides = [1, 1]} : vector<6x16xf32> to vector<4x16xf32>
    %c5_168 = arith.constant 5 : index
    %c0_169 = arith.constant 0 : index
    %c0_170 = arith.constant 0 : index
    %313 = vector.load %arg3[%c5_168, %c0_169, %c0_170] : memref<9x1x16xf32, #tpu.memory_space<vmem>>, vector<1x1x16xf32>
    %314 = vector.shape_cast %313 : vector<1x1x16xf32> to vector<1x16xf32>
    %315 = vector.broadcast %314 : vector<1x16xf32> to vector<4x16xf32>
    %316 = arith.mulf %312, %315 : vector<4x16xf32>
    %317 = arith.addf %309, %316 : vector<4x16xf32>
    %c3_i32_171 = arith.constant 3 : i32
    %318 = arith.addi %0, %c3_i32_171 : i32
    %c2_i32_172 = arith.constant 2 : i32
    %319 = arith.addi %318, %c2_i32_172 : i32
    %c0_173 = arith.constant 0 : index
    %320 = arith.index_cast %319 : i32 to index
    %c0_174 = arith.constant 0 : index
    %c0_175 = arith.constant 0 : index
    %321 = vector.load %arg2[%c0_173, %320, %c0_174, %c0_175] : memref<1x6x6x16xbf16, #tpu.memory_space<vmem>>, vector<1x1x6x16xbf16>
    %322 = vector.shape_cast %321 : vector<1x1x6x16xbf16> to vector<1x6x16xbf16>
    %323 = vector.shape_cast %322 : vector<1x6x16xbf16> to vector<6x16xbf16>
    %324 = arith.extf %323 : vector<6x16xbf16> to vector<6x16xf32>
    %325 = vector.extract_strided_slice %324 {offsets = [0, 0], sizes = [4, 16], strides = [1, 1]} : vector<6x16xf32> to vector<4x16xf32>
    %c6_176 = arith.constant 6 : index
    %c0_177 = arith.constant 0 : index
    %c0_178 = arith.constant 0 : index
    %326 = vector.load %arg3[%c6_176, %c0_177, %c0_178] : memref<9x1x16xf32, #tpu.memory_space<vmem>>, vector<1x1x16xf32>
    %327 = vector.shape_cast %326 : vector<1x1x16xf32> to vector<1x16xf32>
    %328 = vector.broadcast %327 : vector<1x16xf32> to vector<4x16xf32>
    %329 = arith.mulf %325, %328 : vector<4x16xf32>
    %330 = arith.addf %317, %329 : vector<4x16xf32>
    %331 = vector.extract_strided_slice %324 {offsets = [1, 0], sizes = [4, 16], strides = [1, 1]} : vector<6x16xf32> to vector<4x16xf32>
    %c7_179 = arith.constant 7 : index
    %c0_180 = arith.constant 0 : index
    %c0_181 = arith.constant 0 : index
    %332 = vector.load %arg3[%c7_179, %c0_180, %c0_181] : memref<9x1x16xf32, #tpu.memory_space<vmem>>, vector<1x1x16xf32>
    %333 = vector.shape_cast %332 : vector<1x1x16xf32> to vector<1x16xf32>
    %334 = vector.broadcast %333 : vector<1x16xf32> to vector<4x16xf32>
    %335 = arith.mulf %331, %334 : vector<4x16xf32>
    %336 = arith.addf %330, %335 : vector<4x16xf32>
    %337 = vector.extract_strided_slice %324 {offsets = [2, 0], sizes = [4, 16], strides = [1, 1]} : vector<6x16xf32> to vector<4x16xf32>
    %c8_182 = arith.constant 8 : index
    %c0_183 = arith.constant 0 : index
    %c0_184 = arith.constant 0 : index
    %338 = vector.load %arg3[%c8_182, %c0_183, %c0_184] : memref<9x1x16xf32, #tpu.memory_space<vmem>>, vector<1x1x16xf32>
    %339 = vector.shape_cast %338 : vector<1x1x16xf32> to vector<1x16xf32>
    %340 = vector.broadcast %339 : vector<1x16xf32> to vector<4x16xf32>
    %341 = arith.mulf %337, %340 : vector<4x16xf32>
    %342 = arith.addf %336, %341 : vector<4x16xf32>
    %c0_185 = arith.constant 0 : index
    %c0_186 = arith.constant 0 : index
    %343 = vector.load %arg4[%c0_185, %c0_186] : memref<1x16xf32, #tpu.memory_space<vmem>>, vector<1x16xf32>
    %344 = vector.broadcast %343 : vector<1x16xf32> to vector<4x16xf32>
    %345 = arith.addf %342, %344 : vector<4x16xf32>
    %c0_187 = arith.constant 0 : index
    %c0_188 = arith.constant 0 : index
    %346 = vector.load %arg5[%c0_187, %c0_188] : memref<16x16xbf16, #tpu.memory_space<vmem>>, vector<16x16xbf16>
    %cst_189 = arith.constant dense<0.000000e+00> : vector<4x16xf32>
    %347 = tpu.matmul %311, %346, %cst_189 {dimension_numbers = #tpu.dot_dimension_numbers<[1], [0], [0], [1], [0, 0, 1, 1], [], []>} : vector<4x16xbf16>, vector<16x16xbf16>, vector<4x16xf32> -> vector<4x16xf32>
    %348 = arith.addf %345, %347 : vector<4x16xf32>
    %349 = arith.truncf %348 : vector<4x16xf32> to vector<4x16xbf16>
    %c0_190 = arith.constant 0 : index
    %c3_191 = arith.constant 3 : index
    %c0_192 = arith.constant 0 : index
    %c0_193 = arith.constant 0 : index
    %350 = vector.load %arg6[%c0_190, %c3_191, %c0_192, %c0_193] : memref<1x4x4x16xbf16, #tpu.memory_space<vmem>>, vector<1x1x4x16xbf16>
    %351 = vector.shape_cast %350 : vector<1x1x4x16xbf16> to vector<4x16xbf16>
    %352 = vector.shape_cast %349 : vector<4x16xbf16> to vector<1x1x4x16xbf16>
    tpu.vector_store %arg6[%c0_190, %c3_191, %c0_192, %c0_193], %352 {strides = array<i32>} : memref<1x4x4x16xbf16, #tpu.memory_space<vmem>>, vector<1x1x4x16xbf16>,
    return
  }
  func.func @transform_0(%arg0: i32, %arg1: i32) -> (i32, i32, i32, i32) {
    %c0_i32 = arith.constant 0 : i32
    %c0_i32_0 = arith.constant 0 : i32
    %c0_i32_1 = arith.constant 0 : i32
    %c0_i32_2 = arith.constant 0 : i32
    return %arg0, %c0_i32, %c0_i32_0, %c0_i32_1 : i32, i32, i32, i32
  }
  func.func @transform_1(%arg0: i32, %arg1: i32) -> (i32, i32, i32) {
    %c0_i32 = arith.constant 0 : i32
    %c0_i32_0 = arith.constant 0 : i32
    %c0_i32_1 = arith.constant 0 : i32
    %c0_i32_2 = arith.constant 0 : i32
    return %c0_i32, %c0_i32_0, %c0_i32_1 : i32, i32, i32
  }
  func.func @transform_2(%arg0: i32, %arg1: i32) -> (i32, i32) {
    %c0_i32 = arith.constant 0 : i32
    %c0_i32_0 = arith.constant 0 : i32
    %c0_i32_1 = arith.constant 0 : i32
    return %c0_i32, %c0_i32_0 : i32, i32
  }
  func.func @transform_3(%arg0: i32, %arg1: i32) -> (i32, i32) {
    %c0_i32 = arith.constant 0 : i32
    %c0_i32_0 = arith.constant 0 : i32
    %c0_i32_1 = arith.constant 0 : i32
    return %c0_i32, %c0_i32_0 : i32, i32
  }
  func.func @transform_4(%arg0: i32, %arg1: i32) -> (i32, i32, i32, i32) {
    %c0_i32 = arith.constant 0 : i32
    %c0_i32_0 = arith.constant 0 : i32
    %c0_i32_1 = arith.constant 0 : i32
    return %arg0, %arg1, %c0_i32, %c0_i32_0 : i32, i32, i32, i32
  }
}

module attributes {stable_mosaic.version = 11 : i64} {
  func.func @kernel(%arg0: i32, %arg1: i32, %arg2: memref<1x3x3x16xbf16, #tpu.memory_space<vmem>>, %arg3: memref<1x3x3x16xbf16, #tpu.memory_space<vmem>>, %arg4: memref<1x3x3x16xbf16, #tpu.memory_space<vmem>>, %arg5: memref<1x3x3x16xbf16, #tpu.memory_space<vmem>>, %arg6: memref<9x1x16xf32, #tpu.memory_space<vmem>>, %arg7: memref<1x16xf32, #tpu.memory_space<vmem>>, %arg8: memref<1x2x2x16xbf16, #tpu.memory_space<vmem>>, %arg9: memref<1x1x16xf32, #tpu.memory_space<vmem>>) attributes {dimension_semantics = [#tpu.dimension_semantics<parallel>, #tpu.dimension_semantics<arbitrary>], iteration_bounds = array<i64: 2, 1>, scalar_prefetch = 0 : i64, scratch_operands = 0 : i64, tpu.core_type = #tpu.core_type<tc>, window_params = [{transform_indices = @transform_0, window_bounds = array<i64: 1, 3, 3, 16>}, {transform_indices = @transform_1, window_bounds = array<i64: 1, 3, 3, 16>}, {transform_indices = @transform_2, window_bounds = array<i64: 1, 3, 3, 16>}, {transform_indices = @transform_3, window_bounds = array<i64: 1, 3, 3, 16>}, {pipeline_mode = #tpu.pipeline_mode<synchronous>, transform_indices = @transform_4, window_bounds = array<i64: 9, 1, 16>}, {pipeline_mode = #tpu.pipeline_mode<synchronous>, transform_indices = @transform_5, window_bounds = array<i64: 1, 16>}, {transform_indices = @transform_6, window_bounds = array<i64: 1, 2, 2, 16>}, {transform_indices = @transform_7, window_bounds = array<i64: 1, 1, 16>}]} {
    %c2_i32 = arith.constant 2 : i32
    %0 = arith.muli %arg1, %c2_i32 : i32
    %c0_i32 = arith.constant 0 : i32
    %1 = arith.cmpi eq, %arg1, %c0_i32 : i32
    %2 = arith.extui %1 : i1 to i32
    %c0_i32_0 = arith.constant 0 : i32
    %3 = arith.cmpi ne, %2, %c0_i32_0 : i32
    scf.if %3 {
      %cst_127 = arith.constant 0.000000e+00 : f32
      %223 = vector.broadcast %cst_127 : f32 to vector<1x1x16xf32>
      %c0_128 = arith.constant 0 : index
      %c0_129 = arith.constant 0 : index
      %c0_130 = arith.constant 0 : index
      %224 = vector.load %arg9[%c0_128, %c0_129, %c0_130] : memref<1x1x16xf32, #tpu.memory_space<vmem>>, vector<1x1x16xf32>
      tpu.vector_store %arg9[%c0_128, %c0_129, %c0_130], %223 {strides = array<i32>} : memref<1x1x16xf32, #tpu.memory_space<vmem>>, vector<1x1x16xf32>,
    } else {
    }
    %cst = arith.constant 0.000000e+00 : f32
    %4 = vector.broadcast %cst : f32 to vector<1x16xf32>
    %cst_1 = arith.constant 0.000000e+00 : f32
    %5 = vector.broadcast %cst_1 : f32 to vector<2x16xf32>
    %c0_i32_2 = arith.constant 0 : i32
    %6 = arith.addi %0, %c0_i32_2 : i32
    %c0_i32_3 = arith.constant 0 : i32
    %7 = arith.addi %6, %c0_i32_3 : i32
    %c0 = arith.constant 0 : index
    %8 = arith.index_cast %7 : i32 to index
    %c0_4 = arith.constant 0 : index
    %c0_5 = arith.constant 0 : index
    %9 = vector.load %arg2[%c0, %8, %c0_4, %c0_5] : memref<1x3x3x16xbf16, #tpu.memory_space<vmem>>, vector<1x1x3x16xbf16>
    %10 = vector.shape_cast %9 : vector<1x1x3x16xbf16> to vector<1x3x16xbf16>
    %11 = vector.shape_cast %10 : vector<1x3x16xbf16> to vector<3x16xbf16>
    %12 = arith.extf %11 : vector<3x16xbf16> to vector<3x16xf32>
    %13 = vector.extract_strided_slice %12 {offsets = [0, 0], sizes = [2, 16], strides = [1, 1]} : vector<3x16xf32> to vector<2x16xf32>
    %c0_6 = arith.constant 0 : index
    %c0_7 = arith.constant 0 : index
    %c0_8 = arith.constant 0 : index
    %14 = vector.load %arg6[%c0_6, %c0_7, %c0_8] : memref<9x1x16xf32, #tpu.memory_space<vmem>>, vector<1x1x16xf32>
    %15 = vector.shape_cast %14 : vector<1x1x16xf32> to vector<1x16xf32>
    %16 = vector.broadcast %15 : vector<1x16xf32> to vector<2x16xf32>
    %17 = arith.mulf %13, %16 : vector<2x16xf32>
    %18 = arith.addf %5, %17 : vector<2x16xf32>
    %19 = vector.extract_strided_slice %12 {offsets = [1, 0], sizes = [2, 16], strides = [1, 1]} : vector<3x16xf32> to vector<2x16xf32>
    %c2 = arith.constant 2 : index
    %c0_9 = arith.constant 0 : index
    %c0_10 = arith.constant 0 : index
    %20 = vector.load %arg6[%c2, %c0_9, %c0_10] : memref<9x1x16xf32, #tpu.memory_space<vmem>>, vector<1x1x16xf32>
    %21 = vector.shape_cast %20 : vector<1x1x16xf32> to vector<1x16xf32>
    %22 = vector.broadcast %21 : vector<1x16xf32> to vector<2x16xf32>
    %23 = arith.mulf %19, %22 : vector<2x16xf32>
    %24 = arith.addf %18, %23 : vector<2x16xf32>
    %c0_i32_11 = arith.constant 0 : i32
    %25 = arith.addi %0, %c0_i32_11 : i32
    %c0_i32_12 = arith.constant 0 : i32
    %26 = arith.addi %25, %c0_i32_12 : i32
    %c0_13 = arith.constant 0 : index
    %27 = arith.index_cast %26 : i32 to index
    %c0_14 = arith.constant 0 : index
    %c0_15 = arith.constant 0 : index
    %28 = vector.load %arg3[%c0_13, %27, %c0_14, %c0_15] : memref<1x3x3x16xbf16, #tpu.memory_space<vmem>>, vector<1x1x3x16xbf16>
    %29 = vector.shape_cast %28 : vector<1x1x3x16xbf16> to vector<1x3x16xbf16>
    %30 = vector.shape_cast %29 : vector<1x3x16xbf16> to vector<3x16xbf16>
    %31 = arith.extf %30 : vector<3x16xbf16> to vector<3x16xf32>
    %32 = vector.extract_strided_slice %31 {offsets = [0, 0], sizes = [2, 16], strides = [1, 1]} : vector<3x16xf32> to vector<2x16xf32>
    %c1 = arith.constant 1 : index
    %c0_16 = arith.constant 0 : index
    %c0_17 = arith.constant 0 : index
    %33 = vector.load %arg6[%c1, %c0_16, %c0_17] : memref<9x1x16xf32, #tpu.memory_space<vmem>>, vector<1x1x16xf32>
    %34 = vector.shape_cast %33 : vector<1x1x16xf32> to vector<1x16xf32>
    %35 = vector.broadcast %34 : vector<1x16xf32> to vector<2x16xf32>
    %36 = arith.mulf %32, %35 : vector<2x16xf32>
    %37 = arith.addf %24, %36 : vector<2x16xf32>
    %c0_i32_18 = arith.constant 0 : i32
    %38 = arith.addi %0, %c0_i32_18 : i32
    %c0_i32_19 = arith.constant 0 : i32
    %39 = arith.addi %38, %c0_i32_19 : i32
    %c0_20 = arith.constant 0 : index
    %40 = arith.index_cast %39 : i32 to index
    %c0_21 = arith.constant 0 : index
    %c0_22 = arith.constant 0 : index
    %41 = vector.load %arg4[%c0_20, %40, %c0_21, %c0_22] : memref<1x3x3x16xbf16, #tpu.memory_space<vmem>>, vector<1x1x3x16xbf16>
    %42 = vector.shape_cast %41 : vector<1x1x3x16xbf16> to vector<1x3x16xbf16>
    %43 = vector.shape_cast %42 : vector<1x3x16xbf16> to vector<3x16xbf16>
    %44 = arith.extf %43 : vector<3x16xbf16> to vector<3x16xf32>
    %45 = vector.extract_strided_slice %44 {offsets = [0, 0], sizes = [2, 16], strides = [1, 1]} : vector<3x16xf32> to vector<2x16xf32>
    %c3 = arith.constant 3 : index
    %c0_23 = arith.constant 0 : index
    %c0_24 = arith.constant 0 : index
    %46 = vector.load %arg6[%c3, %c0_23, %c0_24] : memref<9x1x16xf32, #tpu.memory_space<vmem>>, vector<1x1x16xf32>
    %47 = vector.shape_cast %46 : vector<1x1x16xf32> to vector<1x16xf32>
    %48 = vector.broadcast %47 : vector<1x16xf32> to vector<2x16xf32>
    %49 = arith.mulf %45, %48 : vector<2x16xf32>
    %50 = arith.addf %37, %49 : vector<2x16xf32>
    %51 = vector.extract_strided_slice %44 {offsets = [1, 0], sizes = [2, 16], strides = [1, 1]} : vector<3x16xf32> to vector<2x16xf32>
    %c5 = arith.constant 5 : index
    %c0_25 = arith.constant 0 : index
    %c0_26 = arith.constant 0 : index
    %52 = vector.load %arg6[%c5, %c0_25, %c0_26] : memref<9x1x16xf32, #tpu.memory_space<vmem>>, vector<1x1x16xf32>
    %53 = vector.shape_cast %52 : vector<1x1x16xf32> to vector<1x16xf32>
    %54 = vector.broadcast %53 : vector<1x16xf32> to vector<2x16xf32>
    %55 = arith.mulf %51, %54 : vector<2x16xf32>
    %56 = arith.addf %50, %55 : vector<2x16xf32>
    %c0_i32_27 = arith.constant 0 : i32
    %57 = arith.addi %0, %c0_i32_27 : i32
    %c0_i32_28 = arith.constant 0 : i32
    %58 = arith.addi %57, %c0_i32_28 : i32
    %c0_29 = arith.constant 0 : index
    %59 = arith.index_cast %58 : i32 to index
    %c0_30 = arith.constant 0 : index
    %c0_31 = arith.constant 0 : index
    %60 = vector.load %arg5[%c0_29, %59, %c0_30, %c0_31] : memref<1x3x3x16xbf16, #tpu.memory_space<vmem>>, vector<1x1x3x16xbf16>
    %61 = vector.shape_cast %60 : vector<1x1x3x16xbf16> to vector<1x3x16xbf16>
    %62 = vector.shape_cast %61 : vector<1x3x16xbf16> to vector<3x16xbf16>
    %63 = arith.extf %62 : vector<3x16xbf16> to vector<3x16xf32>
    %64 = vector.extract_strided_slice %63 {offsets = [0, 0], sizes = [2, 16], strides = [1, 1]} : vector<3x16xf32> to vector<2x16xf32>
    %c4 = arith.constant 4 : index
    %c0_32 = arith.constant 0 : index
    %c0_33 = arith.constant 0 : index
    %65 = vector.load %arg6[%c4, %c0_32, %c0_33] : memref<9x1x16xf32, #tpu.memory_space<vmem>>, vector<1x1x16xf32>
    %66 = vector.shape_cast %65 : vector<1x1x16xf32> to vector<1x16xf32>
    %67 = vector.broadcast %66 : vector<1x16xf32> to vector<2x16xf32>
    %68 = arith.mulf %64, %67 : vector<2x16xf32>
    %69 = arith.addf %56, %68 : vector<2x16xf32>
    %c0_i32_34 = arith.constant 0 : i32
    %70 = arith.addi %0, %c0_i32_34 : i32
    %c1_i32 = arith.constant 1 : i32
    %71 = arith.addi %70, %c1_i32 : i32
    %c0_35 = arith.constant 0 : index
    %72 = arith.index_cast %71 : i32 to index
    %c0_36 = arith.constant 0 : index
    %c0_37 = arith.constant 0 : index
    %73 = vector.load %arg2[%c0_35, %72, %c0_36, %c0_37] : memref<1x3x3x16xbf16, #tpu.memory_space<vmem>>, vector<1x1x3x16xbf16>
    %74 = vector.shape_cast %73 : vector<1x1x3x16xbf16> to vector<1x3x16xbf16>
    %75 = vector.shape_cast %74 : vector<1x3x16xbf16> to vector<3x16xbf16>
    %76 = arith.extf %75 : vector<3x16xbf16> to vector<3x16xf32>
    %77 = vector.extract_strided_slice %76 {offsets = [0, 0], sizes = [2, 16], strides = [1, 1]} : vector<3x16xf32> to vector<2x16xf32>
    %c6 = arith.constant 6 : index
    %c0_38 = arith.constant 0 : index
    %c0_39 = arith.constant 0 : index
    %78 = vector.load %arg6[%c6, %c0_38, %c0_39] : memref<9x1x16xf32, #tpu.memory_space<vmem>>, vector<1x1x16xf32>
    %79 = vector.shape_cast %78 : vector<1x1x16xf32> to vector<1x16xf32>
    %80 = vector.broadcast %79 : vector<1x16xf32> to vector<2x16xf32>
    %81 = arith.mulf %77, %80 : vector<2x16xf32>
    %82 = arith.addf %69, %81 : vector<2x16xf32>
    %83 = vector.extract_strided_slice %76 {offsets = [1, 0], sizes = [2, 16], strides = [1, 1]} : vector<3x16xf32> to vector<2x16xf32>
    %c8 = arith.constant 8 : index
    %c0_40 = arith.constant 0 : index
    %c0_41 = arith.constant 0 : index
    %84 = vector.load %arg6[%c8, %c0_40, %c0_41] : memref<9x1x16xf32, #tpu.memory_space<vmem>>, vector<1x1x16xf32>
    %85 = vector.shape_cast %84 : vector<1x1x16xf32> to vector<1x16xf32>
    %86 = vector.broadcast %85 : vector<1x16xf32> to vector<2x16xf32>
    %87 = arith.mulf %83, %86 : vector<2x16xf32>
    %88 = arith.addf %82, %87 : vector<2x16xf32>
    %c0_i32_42 = arith.constant 0 : i32
    %89 = arith.addi %0, %c0_i32_42 : i32
    %c1_i32_43 = arith.constant 1 : i32
    %90 = arith.addi %89, %c1_i32_43 : i32
    %c0_44 = arith.constant 0 : index
    %91 = arith.index_cast %90 : i32 to index
    %c0_45 = arith.constant 0 : index
    %c0_46 = arith.constant 0 : index
    %92 = vector.load %arg3[%c0_44, %91, %c0_45, %c0_46] : memref<1x3x3x16xbf16, #tpu.memory_space<vmem>>, vector<1x1x3x16xbf16>
    %93 = vector.shape_cast %92 : vector<1x1x3x16xbf16> to vector<1x3x16xbf16>
    %94 = vector.shape_cast %93 : vector<1x3x16xbf16> to vector<3x16xbf16>
    %95 = arith.extf %94 : vector<3x16xbf16> to vector<3x16xf32>
    %96 = vector.extract_strided_slice %95 {offsets = [0, 0], sizes = [2, 16], strides = [1, 1]} : vector<3x16xf32> to vector<2x16xf32>
    %c7 = arith.constant 7 : index
    %c0_47 = arith.constant 0 : index
    %c0_48 = arith.constant 0 : index
    %97 = vector.load %arg6[%c7, %c0_47, %c0_48] : memref<9x1x16xf32, #tpu.memory_space<vmem>>, vector<1x1x16xf32>
    %98 = vector.shape_cast %97 : vector<1x1x16xf32> to vector<1x16xf32>
    %99 = vector.broadcast %98 : vector<1x16xf32> to vector<2x16xf32>
    %100 = arith.mulf %96, %99 : vector<2x16xf32>
    %101 = arith.addf %88, %100 : vector<2x16xf32>
    %c0_49 = arith.constant 0 : index
    %c0_50 = arith.constant 0 : index
    %102 = vector.load %arg7[%c0_49, %c0_50] : memref<1x16xf32, #tpu.memory_space<vmem>>, vector<1x16xf32>
    %103 = vector.broadcast %102 : vector<1x16xf32> to vector<2x16xf32>
    %104 = arith.addf %101, %103 : vector<2x16xf32>
    %cst_51 = arith.constant dense<0.000000e+00> : vector<16xf32>
    %105 = vector.multi_reduction <add>, %104, %cst_51 [0] : vector<2x16xf32> to vector<16xf32>
    %106 = vector.shape_cast %105 : vector<16xf32> to vector<1x16xf32>
    %107 = arith.addf %4, %106 : vector<1x16xf32>
    %108 = arith.truncf %104 : vector<2x16xf32> to vector<2x16xbf16>
    %c0_52 = arith.constant 0 : index
    %c0_53 = arith.constant 0 : index
    %c0_54 = arith.constant 0 : index
    %c0_55 = arith.constant 0 : index
    %109 = vector.load %arg8[%c0_52, %c0_53, %c0_54, %c0_55] : memref<1x2x2x16xbf16, #tpu.memory_space<vmem>>, vector<1x1x2x16xbf16>
    %110 = vector.shape_cast %109 : vector<1x1x2x16xbf16> to vector<2x16xbf16>
    %111 = vector.shape_cast %108 : vector<2x16xbf16> to vector<1x1x2x16xbf16>
    tpu.vector_store %arg8[%c0_52, %c0_53, %c0_54, %c0_55], %111 {strides = array<i32>} : memref<1x2x2x16xbf16, #tpu.memory_space<vmem>>, vector<1x1x2x16xbf16>,
    %cst_56 = arith.constant 0.000000e+00 : f32
    %112 = vector.broadcast %cst_56 : f32 to vector<2x16xf32>
    %c1_i32_57 = arith.constant 1 : i32
    %113 = arith.addi %0, %c1_i32_57 : i32
    %c0_i32_58 = arith.constant 0 : i32
    %114 = arith.addi %113, %c0_i32_58 : i32
    %c0_59 = arith.constant 0 : index
    %115 = arith.index_cast %114 : i32 to index
    %c0_60 = arith.constant 0 : index
    %c0_61 = arith.constant 0 : index
    %116 = vector.load %arg2[%c0_59, %115, %c0_60, %c0_61] : memref<1x3x3x16xbf16, #tpu.memory_space<vmem>>, vector<1x1x3x16xbf16>
    %117 = vector.shape_cast %116 : vector<1x1x3x16xbf16> to vector<1x3x16xbf16>
    %118 = vector.shape_cast %117 : vector<1x3x16xbf16> to vector<3x16xbf16>
    %119 = arith.extf %118 : vector<3x16xbf16> to vector<3x16xf32>
    %120 = vector.extract_strided_slice %119 {offsets = [0, 0], sizes = [2, 16], strides = [1, 1]} : vector<3x16xf32> to vector<2x16xf32>
    %c0_62 = arith.constant 0 : index
    %c0_63 = arith.constant 0 : index
    %c0_64 = arith.constant 0 : index
    %121 = vector.load %arg6[%c0_62, %c0_63, %c0_64] : memref<9x1x16xf32, #tpu.memory_space<vmem>>, vector<1x1x16xf32>
    %122 = vector.shape_cast %121 : vector<1x1x16xf32> to vector<1x16xf32>
    %123 = vector.broadcast %122 : vector<1x16xf32> to vector<2x16xf32>
    %124 = arith.mulf %120, %123 : vector<2x16xf32>
    %125 = arith.addf %112, %124 : vector<2x16xf32>
    %126 = vector.extract_strided_slice %119 {offsets = [1, 0], sizes = [2, 16], strides = [1, 1]} : vector<3x16xf32> to vector<2x16xf32>
    %c2_65 = arith.constant 2 : index
    %c0_66 = arith.constant 0 : index
    %c0_67 = arith.constant 0 : index
    %127 = vector.load %arg6[%c2_65, %c0_66, %c0_67] : memref<9x1x16xf32, #tpu.memory_space<vmem>>, vector<1x1x16xf32>
    %128 = vector.shape_cast %127 : vector<1x1x16xf32> to vector<1x16xf32>
    %129 = vector.broadcast %128 : vector<1x16xf32> to vector<2x16xf32>
    %130 = arith.mulf %126, %129 : vector<2x16xf32>
    %131 = arith.addf %125, %130 : vector<2x16xf32>
    %c1_i32_68 = arith.constant 1 : i32
    %132 = arith.addi %0, %c1_i32_68 : i32
    %c0_i32_69 = arith.constant 0 : i32
    %133 = arith.addi %132, %c0_i32_69 : i32
    %c0_70 = arith.constant 0 : index
    %134 = arith.index_cast %133 : i32 to index
    %c0_71 = arith.constant 0 : index
    %c0_72 = arith.constant 0 : index
    %135 = vector.load %arg3[%c0_70, %134, %c0_71, %c0_72] : memref<1x3x3x16xbf16, #tpu.memory_space<vmem>>, vector<1x1x3x16xbf16>
    %136 = vector.shape_cast %135 : vector<1x1x3x16xbf16> to vector<1x3x16xbf16>
    %137 = vector.shape_cast %136 : vector<1x3x16xbf16> to vector<3x16xbf16>
    %138 = arith.extf %137 : vector<3x16xbf16> to vector<3x16xf32>
    %139 = vector.extract_strided_slice %138 {offsets = [0, 0], sizes = [2, 16], strides = [1, 1]} : vector<3x16xf32> to vector<2x16xf32>
    %c1_73 = arith.constant 1 : index
    %c0_74 = arith.constant 0 : index
    %c0_75 = arith.constant 0 : index
    %140 = vector.load %arg6[%c1_73, %c0_74, %c0_75] : memref<9x1x16xf32, #tpu.memory_space<vmem>>, vector<1x1x16xf32>
    %141 = vector.shape_cast %140 : vector<1x1x16xf32> to vector<1x16xf32>
    %142 = vector.broadcast %141 : vector<1x16xf32> to vector<2x16xf32>
    %143 = arith.mulf %139, %142 : vector<2x16xf32>
    %144 = arith.addf %131, %143 : vector<2x16xf32>
    %c1_i32_76 = arith.constant 1 : i32
    %145 = arith.addi %0, %c1_i32_76 : i32
    %c0_i32_77 = arith.constant 0 : i32
    %146 = arith.addi %145, %c0_i32_77 : i32
    %c0_78 = arith.constant 0 : index
    %147 = arith.index_cast %146 : i32 to index
    %c0_79 = arith.constant 0 : index
    %c0_80 = arith.constant 0 : index
    %148 = vector.load %arg4[%c0_78, %147, %c0_79, %c0_80] : memref<1x3x3x16xbf16, #tpu.memory_space<vmem>>, vector<1x1x3x16xbf16>
    %149 = vector.shape_cast %148 : vector<1x1x3x16xbf16> to vector<1x3x16xbf16>
    %150 = vector.shape_cast %149 : vector<1x3x16xbf16> to vector<3x16xbf16>
    %151 = arith.extf %150 : vector<3x16xbf16> to vector<3x16xf32>
    %152 = vector.extract_strided_slice %151 {offsets = [0, 0], sizes = [2, 16], strides = [1, 1]} : vector<3x16xf32> to vector<2x16xf32>
    %c3_81 = arith.constant 3 : index
    %c0_82 = arith.constant 0 : index
    %c0_83 = arith.constant 0 : index
    %153 = vector.load %arg6[%c3_81, %c0_82, %c0_83] : memref<9x1x16xf32, #tpu.memory_space<vmem>>, vector<1x1x16xf32>
    %154 = vector.shape_cast %153 : vector<1x1x16xf32> to vector<1x16xf32>
    %155 = vector.broadcast %154 : vector<1x16xf32> to vector<2x16xf32>
    %156 = arith.mulf %152, %155 : vector<2x16xf32>
    %157 = arith.addf %144, %156 : vector<2x16xf32>
    %158 = vector.extract_strided_slice %151 {offsets = [1, 0], sizes = [2, 16], strides = [1, 1]} : vector<3x16xf32> to vector<2x16xf32>
    %c5_84 = arith.constant 5 : index
    %c0_85 = arith.constant 0 : index
    %c0_86 = arith.constant 0 : index
    %159 = vector.load %arg6[%c5_84, %c0_85, %c0_86] : memref<9x1x16xf32, #tpu.memory_space<vmem>>, vector<1x1x16xf32>
    %160 = vector.shape_cast %159 : vector<1x1x16xf32> to vector<1x16xf32>
    %161 = vector.broadcast %160 : vector<1x16xf32> to vector<2x16xf32>
    %162 = arith.mulf %158, %161 : vector<2x16xf32>
    %163 = arith.addf %157, %162 : vector<2x16xf32>
    %c1_i32_87 = arith.constant 1 : i32
    %164 = arith.addi %0, %c1_i32_87 : i32
    %c0_i32_88 = arith.constant 0 : i32
    %165 = arith.addi %164, %c0_i32_88 : i32
    %c0_89 = arith.constant 0 : index
    %166 = arith.index_cast %165 : i32 to index
    %c0_90 = arith.constant 0 : index
    %c0_91 = arith.constant 0 : index
    %167 = vector.load %arg5[%c0_89, %166, %c0_90, %c0_91] : memref<1x3x3x16xbf16, #tpu.memory_space<vmem>>, vector<1x1x3x16xbf16>
    %168 = vector.shape_cast %167 : vector<1x1x3x16xbf16> to vector<1x3x16xbf16>
    %169 = vector.shape_cast %168 : vector<1x3x16xbf16> to vector<3x16xbf16>
    %170 = arith.extf %169 : vector<3x16xbf16> to vector<3x16xf32>
    %171 = vector.extract_strided_slice %170 {offsets = [0, 0], sizes = [2, 16], strides = [1, 1]} : vector<3x16xf32> to vector<2x16xf32>
    %c4_92 = arith.constant 4 : index
    %c0_93 = arith.constant 0 : index
    %c0_94 = arith.constant 0 : index
    %172 = vector.load %arg6[%c4_92, %c0_93, %c0_94] : memref<9x1x16xf32, #tpu.memory_space<vmem>>, vector<1x1x16xf32>
    %173 = vector.shape_cast %172 : vector<1x1x16xf32> to vector<1x16xf32>
    %174 = vector.broadcast %173 : vector<1x16xf32> to vector<2x16xf32>
    %175 = arith.mulf %171, %174 : vector<2x16xf32>
    %176 = arith.addf %163, %175 : vector<2x16xf32>
    %c1_i32_95 = arith.constant 1 : i32
    %177 = arith.addi %0, %c1_i32_95 : i32
    %c1_i32_96 = arith.constant 1 : i32
    %178 = arith.addi %177, %c1_i32_96 : i32
    %c0_97 = arith.constant 0 : index
    %179 = arith.index_cast %178 : i32 to index
    %c0_98 = arith.constant 0 : index
    %c0_99 = arith.constant 0 : index
    %180 = vector.load %arg2[%c0_97, %179, %c0_98, %c0_99] : memref<1x3x3x16xbf16, #tpu.memory_space<vmem>>, vector<1x1x3x16xbf16>
    %181 = vector.shape_cast %180 : vector<1x1x3x16xbf16> to vector<1x3x16xbf16>
    %182 = vector.shape_cast %181 : vector<1x3x16xbf16> to vector<3x16xbf16>
    %183 = arith.extf %182 : vector<3x16xbf16> to vector<3x16xf32>
    %184 = vector.extract_strided_slice %183 {offsets = [0, 0], sizes = [2, 16], strides = [1, 1]} : vector<3x16xf32> to vector<2x16xf32>
    %c6_100 = arith.constant 6 : index
    %c0_101 = arith.constant 0 : index
    %c0_102 = arith.constant 0 : index
    %185 = vector.load %arg6[%c6_100, %c0_101, %c0_102] : memref<9x1x16xf32, #tpu.memory_space<vmem>>, vector<1x1x16xf32>
    %186 = vector.shape_cast %185 : vector<1x1x16xf32> to vector<1x16xf32>
    %187 = vector.broadcast %186 : vector<1x16xf32> to vector<2x16xf32>
    %188 = arith.mulf %184, %187 : vector<2x16xf32>
    %189 = arith.addf %176, %188 : vector<2x16xf32>
    %190 = vector.extract_strided_slice %183 {offsets = [1, 0], sizes = [2, 16], strides = [1, 1]} : vector<3x16xf32> to vector<2x16xf32>
    %c8_103 = arith.constant 8 : index
    %c0_104 = arith.constant 0 : index
    %c0_105 = arith.constant 0 : index
    %191 = vector.load %arg6[%c8_103, %c0_104, %c0_105] : memref<9x1x16xf32, #tpu.memory_space<vmem>>, vector<1x1x16xf32>
    %192 = vector.shape_cast %191 : vector<1x1x16xf32> to vector<1x16xf32>
    %193 = vector.broadcast %192 : vector<1x16xf32> to vector<2x16xf32>
    %194 = arith.mulf %190, %193 : vector<2x16xf32>
    %195 = arith.addf %189, %194 : vector<2x16xf32>
    %c1_i32_106 = arith.constant 1 : i32
    %196 = arith.addi %0, %c1_i32_106 : i32
    %c1_i32_107 = arith.constant 1 : i32
    %197 = arith.addi %196, %c1_i32_107 : i32
    %c0_108 = arith.constant 0 : index
    %198 = arith.index_cast %197 : i32 to index
    %c0_109 = arith.constant 0 : index
    %c0_110 = arith.constant 0 : index
    %199 = vector.load %arg3[%c0_108, %198, %c0_109, %c0_110] : memref<1x3x3x16xbf16, #tpu.memory_space<vmem>>, vector<1x1x3x16xbf16>
    %200 = vector.shape_cast %199 : vector<1x1x3x16xbf16> to vector<1x3x16xbf16>
    %201 = vector.shape_cast %200 : vector<1x3x16xbf16> to vector<3x16xbf16>
    %202 = arith.extf %201 : vector<3x16xbf16> to vector<3x16xf32>
    %203 = vector.extract_strided_slice %202 {offsets = [0, 0], sizes = [2, 16], strides = [1, 1]} : vector<3x16xf32> to vector<2x16xf32>
    %c7_111 = arith.constant 7 : index
    %c0_112 = arith.constant 0 : index
    %c0_113 = arith.constant 0 : index
    %204 = vector.load %arg6[%c7_111, %c0_112, %c0_113] : memref<9x1x16xf32, #tpu.memory_space<vmem>>, vector<1x1x16xf32>
    %205 = vector.shape_cast %204 : vector<1x1x16xf32> to vector<1x16xf32>
    %206 = vector.broadcast %205 : vector<1x16xf32> to vector<2x16xf32>
    %207 = arith.mulf %203, %206 : vector<2x16xf32>
    %208 = arith.addf %195, %207 : vector<2x16xf32>
    %c0_114 = arith.constant 0 : index
    %c0_115 = arith.constant 0 : index
    %209 = vector.load %arg7[%c0_114, %c0_115] : memref<1x16xf32, #tpu.memory_space<vmem>>, vector<1x16xf32>
    %210 = vector.broadcast %209 : vector<1x16xf32> to vector<2x16xf32>
    %211 = arith.addf %208, %210 : vector<2x16xf32>
    %cst_116 = arith.constant dense<0.000000e+00> : vector<16xf32>
    %212 = vector.multi_reduction <add>, %211, %cst_116 [0] : vector<2x16xf32> to vector<16xf32>
    %213 = vector.shape_cast %212 : vector<16xf32> to vector<1x16xf32>
    %214 = arith.addf %107, %213 : vector<1x16xf32>
    %215 = arith.truncf %211 : vector<2x16xf32> to vector<2x16xbf16>
    %c0_117 = arith.constant 0 : index
    %c1_118 = arith.constant 1 : index
    %c0_119 = arith.constant 0 : index
    %c0_120 = arith.constant 0 : index
    %216 = vector.load %arg8[%c0_117, %c1_118, %c0_119, %c0_120] : memref<1x2x2x16xbf16, #tpu.memory_space<vmem>>, vector<1x1x2x16xbf16>
    %217 = vector.shape_cast %216 : vector<1x1x2x16xbf16> to vector<2x16xbf16>
    %218 = vector.shape_cast %215 : vector<2x16xbf16> to vector<1x1x2x16xbf16>
    tpu.vector_store %arg8[%c0_117, %c1_118, %c0_119, %c0_120], %218 {strides = array<i32>} : memref<1x2x2x16xbf16, #tpu.memory_space<vmem>>, vector<1x1x2x16xbf16>,
    %c0_121 = arith.constant 0 : index
    %c0_122 = arith.constant 0 : index
    %c0_123 = arith.constant 0 : index
    %219 = vector.load %arg9[%c0_121, %c0_122, %c0_123] : memref<1x1x16xf32, #tpu.memory_space<vmem>>, vector<1x1x16xf32>
    %220 = vector.shape_cast %214 : vector<1x16xf32> to vector<1x1x16xf32>
    %221 = arith.addf %219, %220 : vector<1x1x16xf32>
    %c0_124 = arith.constant 0 : index
    %c0_125 = arith.constant 0 : index
    %c0_126 = arith.constant 0 : index
    %222 = vector.load %arg9[%c0_124, %c0_125, %c0_126] : memref<1x1x16xf32, #tpu.memory_space<vmem>>, vector<1x1x16xf32>
    tpu.vector_store %arg9[%c0_124, %c0_125, %c0_126], %221 {strides = array<i32>} : memref<1x1x16xf32, #tpu.memory_space<vmem>>, vector<1x1x16xf32>,
    return
  }
  func.func @transform_0(%arg0: i32, %arg1: i32) -> (i32, i32, i32, i32) {
    %c0_i32 = arith.constant 0 : i32
    %c0_i32_0 = arith.constant 0 : i32
    %c0_i32_1 = arith.constant 0 : i32
    %c0_i32_2 = arith.constant 0 : i32
    return %arg0, %c0_i32, %c0_i32_0, %c0_i32_1 : i32, i32, i32, i32
  }
  func.func @transform_1(%arg0: i32, %arg1: i32) -> (i32, i32, i32, i32) {
    %c0_i32 = arith.constant 0 : i32
    %c0_i32_0 = arith.constant 0 : i32
    %c0_i32_1 = arith.constant 0 : i32
    %c0_i32_2 = arith.constant 0 : i32
    return %arg0, %c0_i32, %c0_i32_0, %c0_i32_1 : i32, i32, i32, i32
  }
  func.func @transform_2(%arg0: i32, %arg1: i32) -> (i32, i32, i32, i32) {
    %c0_i32 = arith.constant 0 : i32
    %c0_i32_0 = arith.constant 0 : i32
    %c0_i32_1 = arith.constant 0 : i32
    %c0_i32_2 = arith.constant 0 : i32
    return %arg0, %c0_i32, %c0_i32_0, %c0_i32_1 : i32, i32, i32, i32
  }
  func.func @transform_3(%arg0: i32, %arg1: i32) -> (i32, i32, i32, i32) {
    %c0_i32 = arith.constant 0 : i32
    %c0_i32_0 = arith.constant 0 : i32
    %c0_i32_1 = arith.constant 0 : i32
    %c0_i32_2 = arith.constant 0 : i32
    return %arg0, %c0_i32, %c0_i32_0, %c0_i32_1 : i32, i32, i32, i32
  }
  func.func @transform_4(%arg0: i32, %arg1: i32) -> (i32, i32, i32) {
    %c0_i32 = arith.constant 0 : i32
    %c0_i32_0 = arith.constant 0 : i32
    %c0_i32_1 = arith.constant 0 : i32
    %c0_i32_2 = arith.constant 0 : i32
    return %c0_i32, %c0_i32_0, %c0_i32_1 : i32, i32, i32
  }
  func.func @transform_5(%arg0: i32, %arg1: i32) -> (i32, i32) {
    %c0_i32 = arith.constant 0 : i32
    %c0_i32_0 = arith.constant 0 : i32
    %c0_i32_1 = arith.constant 0 : i32
    return %c0_i32, %c0_i32_0 : i32, i32
  }
  func.func @transform_6(%arg0: i32, %arg1: i32) -> (i32, i32, i32, i32) {
    %c0_i32 = arith.constant 0 : i32
    %c0_i32_0 = arith.constant 0 : i32
    %c0_i32_1 = arith.constant 0 : i32
    return %arg0, %arg1, %c0_i32, %c0_i32_0 : i32, i32, i32, i32
  }
  func.func @transform_7(%arg0: i32, %arg1: i32) -> (i32, i32, i32) {
    %c0_i32 = arith.constant 0 : i32
    %c0_i32_0 = arith.constant 0 : i32
    %c0_i32_1 = arith.constant 0 : i32
    return %arg0, %c0_i32, %c0_i32_0 : i32, i32, i32
  }
}

module attributes {stable_mosaic.version = 11 : i64} {
  func.func @kernel(%arg0: i32, %arg1: memref<1x4x16xbf16, #tpu.memory_space<vmem>>, %arg2: memref<1x1x16xf32, #tpu.memory_space<vmem>>, %arg3: memref<1x4x16xbf16, #tpu.memory_space<vmem>>) attributes {dimension_semantics = [#tpu.dimension_semantics<parallel>], iteration_bounds = array<i64: 2>, scalar_prefetch = 0 : i64, scratch_operands = 0 : i64, tpu.core_type = #tpu.core_type<tc>, window_params = [{transform_indices = @transform_0, window_bounds = array<i64: 1, 4, 16>}, {transform_indices = @transform_1, window_bounds = array<i64: 1, 1, 16>}, {transform_indices = @transform_2, window_bounds = array<i64: 1, 4, 16>}]} {
    %c0 = arith.constant 0 : index
    %c0_0 = arith.constant 0 : index
    %c0_1 = arith.constant 0 : index
    %0 = vector.load %arg1[%c0, %c0_0, %c0_1] : memref<1x4x16xbf16, #tpu.memory_space<vmem>>, vector<1x4x16xbf16>
    %1 = arith.extf %0 : vector<1x4x16xbf16> to vector<1x4x16xf32>
    %c0_2 = arith.constant 0 : index
    %c0_3 = arith.constant 0 : index
    %c0_4 = arith.constant 0 : index
    %2 = vector.load %arg2[%c0_2, %c0_3, %c0_4] : memref<1x1x16xf32, #tpu.memory_space<vmem>>, vector<1x1x16xf32>
    %3 = vector.broadcast %2 : vector<1x1x16xf32> to vector<1x4x16xf32>
    %4 = arith.mulf %1, %3 : vector<1x4x16xf32>
    %5 = arith.truncf %4 : vector<1x4x16xf32> to vector<1x4x16xbf16>
    %c0_5 = arith.constant 0 : index
    %c0_6 = arith.constant 0 : index
    %c0_7 = arith.constant 0 : index
    %6 = vector.load %arg3[%c0_5, %c0_6, %c0_7] : memref<1x4x16xbf16, #tpu.memory_space<vmem>>, vector<1x4x16xbf16>
    tpu.vector_store %arg3[%c0_5, %c0_6, %c0_7], %5 {strides = array<i32>} : memref<1x4x16xbf16, #tpu.memory_space<vmem>>, vector<1x4x16xbf16>,
    return
  }
  func.func @transform_0(%arg0: i32) -> (i32, i32, i32) {
    %c0_i32 = arith.constant 0 : i32
    %c0_i32_0 = arith.constant 0 : i32
    %c0_i32_1 = arith.constant 0 : i32
    return %arg0, %c0_i32, %c0_i32_0 : i32, i32, i32
  }
  func.func @transform_1(%arg0: i32) -> (i32, i32, i32) {
    %c0_i32 = arith.constant 0 : i32
    %c0_i32_0 = arith.constant 0 : i32
    %c0_i32_1 = arith.constant 0 : i32
    return %arg0, %c0_i32, %c0_i32_0 : i32, i32, i32
  }
  func.func @transform_2(%arg0: i32) -> (i32, i32, i32) {
    %c0_i32 = arith.constant 0 : i32
    %c0_i32_0 = arith.constant 0 : i32
    %c0_i32_1 = arith.constant 0 : i32
    return %arg0, %c0_i32, %c0_i32_0 : i32, i32, i32
  }
}

module attributes {stable_mosaic.version = 11 : i64} {
  func.func @kernel(%arg0: i32, %arg1: i32, %arg2: memref<8x16xbf16, #tpu.memory_space<vmem>>, %arg3: memref<16x32xbf16, #tpu.memory_space<vmem>>, %arg4: memref<1x32xf32, #tpu.memory_space<vmem>>, %arg5: memref<8x32xbf16, #tpu.memory_space<vmem>>) attributes {dimension_semantics = [#tpu.dimension_semantics<parallel>, #tpu.dimension_semantics<parallel>], iteration_bounds = array<i64: 1, 1>, scalar_prefetch = 0 : i64, scratch_operands = 0 : i64, tpu.core_type = #tpu.core_type<tc>, window_params = [{transform_indices = @transform_0, window_bounds = array<i64: 8, 16>}, {transform_indices = @transform_1, window_bounds = array<i64: 16, 32>}, {transform_indices = @transform_2, window_bounds = array<i64: 1, 32>}, {transform_indices = @transform_3, window_bounds = array<i64: 8, 32>}]} {
    %c0 = arith.constant 0 : index
    %c0_0 = arith.constant 0 : index
    %0 = vector.load %arg2[%c0, %c0_0] : memref<8x16xbf16, #tpu.memory_space<vmem>>, vector<8x16xbf16>
    %c0_1 = arith.constant 0 : index
    %c0_2 = arith.constant 0 : index
    %1 = vector.load %arg3[%c0_1, %c0_2] : memref<16x32xbf16, #tpu.memory_space<vmem>>, vector<16x32xbf16>
    %cst = arith.constant dense<0.000000e+00> : vector<8x32xf32>
    %2 = tpu.matmul %0, %1, %cst {dimension_numbers = #tpu.dot_dimension_numbers<[1], [0], [0], [1], [0, 0, 1, 1], [], []>} : vector<8x16xbf16>, vector<16x32xbf16>, vector<8x32xf32> -> vector<8x32xf32>
    %c0_3 = arith.constant 0 : index
    %c0_4 = arith.constant 0 : index
    %3 = vector.load %arg4[%c0_3, %c0_4] : memref<1x32xf32, #tpu.memory_space<vmem>>, vector<1x32xf32>
    %4 = vector.broadcast %3 : vector<1x32xf32> to vector<8x32xf32>
    %5 = arith.addf %2, %4 : vector<8x32xf32>
    %6 = arith.truncf %5 : vector<8x32xf32> to vector<8x32xbf16>
    %c0_5 = arith.constant 0 : index
    %c0_6 = arith.constant 0 : index
    %7 = vector.load %arg5[%c0_5, %c0_6] : memref<8x32xbf16, #tpu.memory_space<vmem>>, vector<8x32xbf16>
    tpu.vector_store %arg5[%c0_5, %c0_6], %6 {strides = array<i32>} : memref<8x32xbf16, #tpu.memory_space<vmem>>, vector<8x32xbf16>,
    return
  }
  func.func @transform_0(%arg0: i32, %arg1: i32) -> (i32, i32) {
    %c0_i32 = arith.constant 0 : i32
    %c0_i32_0 = arith.constant 0 : i32
    return %arg0, %c0_i32 : i32, i32
  }
  func.func @transform_1(%arg0: i32, %arg1: i32) -> (i32, i32) {
    %c0_i32 = arith.constant 0 : i32
    %c0_i32_0 = arith.constant 0 : i32
    return %c0_i32, %arg1 : i32, i32
  }
  func.func @transform_2(%arg0: i32, %arg1: i32) -> (i32, i32) {
    %c0_i32 = arith.constant 0 : i32
    %c0_i32_0 = arith.constant 0 : i32
    return %c0_i32, %arg1 : i32, i32
  }
  func.func @transform_3(%arg0: i32, %arg1: i32) -> (i32, i32) {
    %c0_i32 = arith.constant 0 : i32
    return %arg0, %arg1 : i32, i32
  }
}

module attributes {stable_mosaic.version = 11 : i64} {
  func.func @kernel(%arg0: i32, %arg1: i32, %arg2: memref<8x64xbf16, #tpu.memory_space<vmem>>, %arg3: memref<64x32xbf16, #tpu.memory_space<vmem>>, %arg4: memref<1x32xf32, #tpu.memory_space<vmem>>, %arg5: memref<8x32xbf16, #tpu.memory_space<vmem>>, %arg6: memref<8x32xbf16, #tpu.memory_space<vmem>>) attributes {dimension_semantics = [#tpu.dimension_semantics<parallel>, #tpu.dimension_semantics<parallel>], iteration_bounds = array<i64: 1, 1>, scalar_prefetch = 0 : i64, scratch_operands = 0 : i64, tpu.core_type = #tpu.core_type<tc>, window_params = [{transform_indices = @transform_0, window_bounds = array<i64: 8, 64>}, {transform_indices = @transform_1, window_bounds = array<i64: 64, 32>}, {transform_indices = @transform_2, window_bounds = array<i64: 1, 32>}, {transform_indices = @transform_3, window_bounds = array<i64: 8, 32>}, {transform_indices = @transform_4, window_bounds = array<i64: 8, 32>}]} {
    %c0 = arith.constant 0 : index
    %c0_0 = arith.constant 0 : index
    %0 = vector.load %arg2[%c0, %c0_0] : memref<8x64xbf16, #tpu.memory_space<vmem>>, vector<8x64xbf16>
    %c0_1 = arith.constant 0 : index
    %c0_2 = arith.constant 0 : index
    %1 = vector.load %arg3[%c0_1, %c0_2] : memref<64x32xbf16, #tpu.memory_space<vmem>>, vector<64x32xbf16>
    %cst = arith.constant dense<0.000000e+00> : vector<8x32xf32>
    %2 = tpu.matmul %0, %1, %cst {dimension_numbers = #tpu.dot_dimension_numbers<[1], [0], [0], [1], [0, 0, 1, 1], [], []>} : vector<8x64xbf16>, vector<64x32xbf16>, vector<8x32xf32> -> vector<8x32xf32>
    %c0_3 = arith.constant 0 : index
    %c0_4 = arith.constant 0 : index
    %3 = vector.load %arg4[%c0_3, %c0_4] : memref<1x32xf32, #tpu.memory_space<vmem>>, vector<1x32xf32>
    %4 = vector.broadcast %3 : vector<1x32xf32> to vector<8x32xf32>
    %5 = arith.addf %2, %4 : vector<8x32xf32>
    %c0_5 = arith.constant 0 : index
    %c0_6 = arith.constant 0 : index
    %6 = vector.load %arg5[%c0_5, %c0_6] : memref<8x32xbf16, #tpu.memory_space<vmem>>, vector<8x32xbf16>
    %7 = arith.extf %6 : vector<8x32xbf16> to vector<8x32xf32>
    %8 = arith.addf %5, %7 : vector<8x32xf32>
    %9 = arith.truncf %8 : vector<8x32xf32> to vector<8x32xbf16>
    %c0_7 = arith.constant 0 : index
    %c0_8 = arith.constant 0 : index
    %10 = vector.load %arg6[%c0_7, %c0_8] : memref<8x32xbf16, #tpu.memory_space<vmem>>, vector<8x32xbf16>
    tpu.vector_store %arg6[%c0_7, %c0_8], %9 {strides = array<i32>} : memref<8x32xbf16, #tpu.memory_space<vmem>>, vector<8x32xbf16>,
    return
  }
  func.func @transform_0(%arg0: i32, %arg1: i32) -> (i32, i32) {
    %c0_i32 = arith.constant 0 : i32
    %c0_i32_0 = arith.constant 0 : i32
    return %arg0, %c0_i32 : i32, i32
  }
  func.func @transform_1(%arg0: i32, %arg1: i32) -> (i32, i32) {
    %c0_i32 = arith.constant 0 : i32
    %c0_i32_0 = arith.constant 0 : i32
    return %c0_i32, %arg1 : i32, i32
  }
  func.func @transform_2(%arg0: i32, %arg1: i32) -> (i32, i32) {
    %c0_i32 = arith.constant 0 : i32
    %c0_i32_0 = arith.constant 0 : i32
    return %c0_i32, %arg1 : i32, i32
  }
  func.func @transform_3(%arg0: i32, %arg1: i32) -> (i32, i32) {
    %c0_i32 = arith.constant 0 : i32
    return %arg0, %arg1 : i32, i32
  }
  func.func @transform_4(%arg0: i32, %arg1: i32) -> (i32, i32) {
    %c0_i32 = arith.constant 0 : i32
    return %arg0, %arg1 : i32, i32
  }
}

module attributes {stable_mosaic.version = 11 : i64} {
  func.func @kernel(%arg0: i32, %arg1: i32, %arg2: memref<1x4x4x32xbf16, #tpu.memory_space<vmem>>, %arg3: memref<9x1x32xf32, #tpu.memory_space<vmem>>, %arg4: memref<1x32xf32, #tpu.memory_space<vmem>>, %arg5: memref<32x32xbf16, #tpu.memory_space<vmem>>, %arg6: memref<1x2x2x32xbf16, #tpu.memory_space<vmem>>, %arg7: memref<1x1x32xf32, #tpu.memory_space<vmem>>) attributes {dimension_semantics = [#tpu.dimension_semantics<parallel>, #tpu.dimension_semantics<arbitrary>], iteration_bounds = array<i64: 2, 1>, scalar_prefetch = 0 : i64, scratch_operands = 0 : i64, tpu.core_type = #tpu.core_type<tc>, window_params = [{transform_indices = @transform_0, window_bounds = array<i64: 1, 4, 4, 32>}, {pipeline_mode = #tpu.pipeline_mode<synchronous>, transform_indices = @transform_1, window_bounds = array<i64: 9, 1, 32>}, {pipeline_mode = #tpu.pipeline_mode<synchronous>, transform_indices = @transform_2, window_bounds = array<i64: 1, 32>}, {pipeline_mode = #tpu.pipeline_mode<synchronous>, transform_indices = @transform_3, window_bounds = array<i64: 32, 32>}, {transform_indices = @transform_4, window_bounds = array<i64: 1, 2, 2, 32>}, {transform_indices = @transform_5, window_bounds = array<i64: 1, 1, 32>}]} {
    %c2_i32 = arith.constant 2 : i32
    %0 = arith.muli %arg1, %c2_i32 : i32
    %c0_i32 = arith.constant 0 : i32
    %1 = arith.cmpi eq, %arg1, %c0_i32 : i32
    %2 = arith.extui %1 : i1 to i32
    %c0_i32_0 = arith.constant 0 : i32
    %3 = arith.cmpi ne, %2, %c0_i32_0 : i32
    scf.if %3 {
      %cst_103 = arith.constant 0.000000e+00 : f32
      %191 = vector.broadcast %cst_103 : f32 to vector<1x1x32xf32>
      %c0_104 = arith.constant 0 : index
      %c0_105 = arith.constant 0 : index
      %c0_106 = arith.constant 0 : index
      %192 = vector.load %arg7[%c0_104, %c0_105, %c0_106] : memref<1x1x32xf32, #tpu.memory_space<vmem>>, vector<1x1x32xf32>
      tpu.vector_store %arg7[%c0_104, %c0_105, %c0_106], %191 {strides = array<i32>} : memref<1x1x32xf32, #tpu.memory_space<vmem>>, vector<1x1x32xf32>,
    } else {
    }
    %cst = arith.constant 0.000000e+00 : f32
    %4 = vector.broadcast %cst : f32 to vector<1x32xf32>
    %cst_1 = arith.constant 0.000000e+00 : f32
    %5 = vector.broadcast %cst_1 : f32 to vector<2x32xf32>
    %c0_i32_2 = arith.constant 0 : i32
    %6 = arith.addi %0, %c0_i32_2 : i32
    %c0_i32_3 = arith.constant 0 : i32
    %7 = arith.addi %6, %c0_i32_3 : i32
    %c0 = arith.constant 0 : index
    %8 = arith.index_cast %7 : i32 to index
    %c0_4 = arith.constant 0 : index
    %c0_5 = arith.constant 0 : index
    %9 = vector.load %arg2[%c0, %8, %c0_4, %c0_5] : memref<1x4x4x32xbf16, #tpu.memory_space<vmem>>, vector<1x1x4x32xbf16>
    %10 = vector.shape_cast %9 : vector<1x1x4x32xbf16> to vector<1x4x32xbf16>
    %11 = vector.shape_cast %10 : vector<1x4x32xbf16> to vector<4x32xbf16>
    %12 = arith.extf %11 : vector<4x32xbf16> to vector<4x32xf32>
    %13 = vector.extract_strided_slice %12 {offsets = [0, 0], sizes = [2, 32], strides = [1, 1]} : vector<4x32xf32> to vector<2x32xf32>
    %c0_6 = arith.constant 0 : index
    %c0_7 = arith.constant 0 : index
    %c0_8 = arith.constant 0 : index
    %14 = vector.load %arg3[%c0_6, %c0_7, %c0_8] : memref<9x1x32xf32, #tpu.memory_space<vmem>>, vector<1x1x32xf32>
    %15 = vector.shape_cast %14 : vector<1x1x32xf32> to vector<1x32xf32>
    %16 = vector.broadcast %15 : vector<1x32xf32> to vector<2x32xf32>
    %17 = arith.mulf %13, %16 : vector<2x32xf32>
    %18 = arith.addf %5, %17 : vector<2x32xf32>
    %19 = vector.extract_strided_slice %12 {offsets = [1, 0], sizes = [2, 32], strides = [1, 1]} : vector<4x32xf32> to vector<2x32xf32>
    %c1 = arith.constant 1 : index
    %c0_9 = arith.constant 0 : index
    %c0_10 = arith.constant 0 : index
    %20 = vector.load %arg3[%c1, %c0_9, %c0_10] : memref<9x1x32xf32, #tpu.memory_space<vmem>>, vector<1x1x32xf32>
    %21 = vector.shape_cast %20 : vector<1x1x32xf32> to vector<1x32xf32>
    %22 = vector.broadcast %21 : vector<1x32xf32> to vector<2x32xf32>
    %23 = arith.mulf %19, %22 : vector<2x32xf32>
    %24 = arith.addf %18, %23 : vector<2x32xf32>
    %25 = vector.extract_strided_slice %12 {offsets = [2, 0], sizes = [2, 32], strides = [1, 1]} : vector<4x32xf32> to vector<2x32xf32>
    %c2 = arith.constant 2 : index
    %c0_11 = arith.constant 0 : index
    %c0_12 = arith.constant 0 : index
    %26 = vector.load %arg3[%c2, %c0_11, %c0_12] : memref<9x1x32xf32, #tpu.memory_space<vmem>>, vector<1x1x32xf32>
    %27 = vector.shape_cast %26 : vector<1x1x32xf32> to vector<1x32xf32>
    %28 = vector.broadcast %27 : vector<1x32xf32> to vector<2x32xf32>
    %29 = arith.mulf %25, %28 : vector<2x32xf32>
    %30 = arith.addf %24, %29 : vector<2x32xf32>
    %c0_i32_13 = arith.constant 0 : i32
    %31 = arith.addi %0, %c0_i32_13 : i32
    %c1_i32 = arith.constant 1 : i32
    %32 = arith.addi %31, %c1_i32 : i32
    %c0_14 = arith.constant 0 : index
    %33 = arith.index_cast %32 : i32 to index
    %c0_15 = arith.constant 0 : index
    %c0_16 = arith.constant 0 : index
    %34 = vector.load %arg2[%c0_14, %33, %c0_15, %c0_16] : memref<1x4x4x32xbf16, #tpu.memory_space<vmem>>, vector<1x1x4x32xbf16>
    %35 = vector.shape_cast %34 : vector<1x1x4x32xbf16> to vector<1x4x32xbf16>
    %36 = vector.shape_cast %35 : vector<1x4x32xbf16> to vector<4x32xbf16>
    %37 = arith.extf %36 : vector<4x32xbf16> to vector<4x32xf32>
    %38 = vector.extract_strided_slice %37 {offsets = [0, 0], sizes = [2, 32], strides = [1, 1]} : vector<4x32xf32> to vector<2x32xf32>
    %c3 = arith.constant 3 : index
    %c0_17 = arith.constant 0 : index
    %c0_18 = arith.constant 0 : index
    %39 = vector.load %arg3[%c3, %c0_17, %c0_18] : memref<9x1x32xf32, #tpu.memory_space<vmem>>, vector<1x1x32xf32>
    %40 = vector.shape_cast %39 : vector<1x1x32xf32> to vector<1x32xf32>
    %41 = vector.broadcast %40 : vector<1x32xf32> to vector<2x32xf32>
    %42 = arith.mulf %38, %41 : vector<2x32xf32>
    %43 = arith.addf %30, %42 : vector<2x32xf32>
    %44 = vector.extract_strided_slice %37 {offsets = [1, 0], sizes = [2, 32], strides = [1, 1]} : vector<4x32xf32> to vector<2x32xf32>
    %c4 = arith.constant 4 : index
    %c0_19 = arith.constant 0 : index
    %c0_20 = arith.constant 0 : index
    %45 = vector.load %arg3[%c4, %c0_19, %c0_20] : memref<9x1x32xf32, #tpu.memory_space<vmem>>, vector<1x1x32xf32>
    %46 = vector.shape_cast %45 : vector<1x1x32xf32> to vector<1x32xf32>
    %47 = vector.broadcast %46 : vector<1x32xf32> to vector<2x32xf32>
    %48 = arith.mulf %44, %47 : vector<2x32xf32>
    %49 = arith.addf %43, %48 : vector<2x32xf32>
    %50 = vector.extract_strided_slice %35 {offsets = [0, 1, 0], sizes = [1, 2, 32], strides = [1, 1, 1]} : vector<1x4x32xbf16> to vector<1x2x32xbf16>
    %51 = vector.shape_cast %50 : vector<1x2x32xbf16> to vector<2x32xbf16>
    %52 = vector.extract_strided_slice %37 {offsets = [2, 0], sizes = [2, 32], strides = [1, 1]} : vector<4x32xf32> to vector<2x32xf32>
    %c5 = arith.constant 5 : index
    %c0_21 = arith.constant 0 : index
    %c0_22 = arith.constant 0 : index
    %53 = vector.load %arg3[%c5, %c0_21, %c0_22] : memref<9x1x32xf32, #tpu.memory_space<vmem>>, vector<1x1x32xf32>
    %54 = vector.shape_cast %53 : vector<1x1x32xf32> to vector<1x32xf32>
    %55 = vector.broadcast %54 : vector<1x32xf32> to vector<2x32xf32>
    %56 = arith.mulf %52, %55 : vector<2x32xf32>
    %57 = arith.addf %49, %56 : vector<2x32xf32>
    %c0_i32_23 = arith.constant 0 : i32
    %58 = arith.addi %0, %c0_i32_23 : i32
    %c2_i32_24 = arith.constant 2 : i32
    %59 = arith.addi %58, %c2_i32_24 : i32
    %c0_25 = arith.constant 0 : index
    %60 = arith.index_cast %59 : i32 to index
    %c0_26 = arith.constant 0 : index
    %c0_27 = arith.constant 0 : index
    %61 = vector.load %arg2[%c0_25, %60, %c0_26, %c0_27] : memref<1x4x4x32xbf16, #tpu.memory_space<vmem>>, vector<1x1x4x32xbf16>
    %62 = vector.shape_cast %61 : vector<1x1x4x32xbf16> to vector<1x4x32xbf16>
    %63 = vector.shape_cast %62 : vector<1x4x32xbf16> to vector<4x32xbf16>
    %64 = arith.extf %63 : vector<4x32xbf16> to vector<4x32xf32>
    %65 = vector.extract_strided_slice %64 {offsets = [0, 0], sizes = [2, 32], strides = [1, 1]} : vector<4x32xf32> to vector<2x32xf32>
    %c6 = arith.constant 6 : index
    %c0_28 = arith.constant 0 : index
    %c0_29 = arith.constant 0 : index
    %66 = vector.load %arg3[%c6, %c0_28, %c0_29] : memref<9x1x32xf32, #tpu.memory_space<vmem>>, vector<1x1x32xf32>
    %67 = vector.shape_cast %66 : vector<1x1x32xf32> to vector<1x32xf32>
    %68 = vector.broadcast %67 : vector<1x32xf32> to vector<2x32xf32>
    %69 = arith.mulf %65, %68 : vector<2x32xf32>
    %70 = arith.addf %57, %69 : vector<2x32xf32>
    %71 = vector.extract_strided_slice %64 {offsets = [1, 0], sizes = [2, 32], strides = [1, 1]} : vector<4x32xf32> to vector<2x32xf32>
    %c7 = arith.constant 7 : index
    %c0_30 = arith.constant 0 : index
    %c0_31 = arith.constant 0 : index
    %72 = vector.load %arg3[%c7, %c0_30, %c0_31] : memref<9x1x32xf32, #tpu.memory_space<vmem>>, vector<1x1x32xf32>
    %73 = vector.shape_cast %72 : vector<1x1x32xf32> to vector<1x32xf32>
    %74 = vector.broadcast %73 : vector<1x32xf32> to vector<2x32xf32>
    %75 = arith.mulf %71, %74 : vector<2x32xf32>
    %76 = arith.addf %70, %75 : vector<2x32xf32>
    %77 = vector.extract_strided_slice %64 {offsets = [2, 0], sizes = [2, 32], strides = [1, 1]} : vector<4x32xf32> to vector<2x32xf32>
    %c8 = arith.constant 8 : index
    %c0_32 = arith.constant 0 : index
    %c0_33 = arith.constant 0 : index
    %78 = vector.load %arg3[%c8, %c0_32, %c0_33] : memref<9x1x32xf32, #tpu.memory_space<vmem>>, vector<1x1x32xf32>
    %79 = vector.shape_cast %78 : vector<1x1x32xf32> to vector<1x32xf32>
    %80 = vector.broadcast %79 : vector<1x32xf32> to vector<2x32xf32>
    %81 = arith.mulf %77, %80 : vector<2x32xf32>
    %82 = arith.addf %76, %81 : vector<2x32xf32>
    %c0_34 = arith.constant 0 : index
    %c0_35 = arith.constant 0 : index
    %83 = vector.load %arg4[%c0_34, %c0_35] : memref<1x32xf32, #tpu.memory_space<vmem>>, vector<1x32xf32>
    %84 = vector.broadcast %83 : vector<1x32xf32> to vector<2x32xf32>
    %85 = arith.addf %82, %84 : vector<2x32xf32>
    %c0_36 = arith.constant 0 : index
    %c0_37 = arith.constant 0 : index
    %86 = vector.load %arg5[%c0_36, %c0_37] : memref<32x32xbf16, #tpu.memory_space<vmem>>, vector<32x32xbf16>
    %cst_38 = arith.constant dense<0.000000e+00> : vector<2x32xf32>
    %87 = tpu.matmul %51, %86, %cst_38 {dimension_numbers = #tpu.dot_dimension_numbers<[1], [0], [0], [1], [0, 0, 1, 1], [], []>} : vector<2x32xbf16>, vector<32x32xbf16>, vector<2x32xf32> -> vector<2x32xf32>
    %88 = arith.addf %85, %87 : vector<2x32xf32>
    %cst_39 = arith.constant dense<0.000000e+00> : vector<32xf32>
    %89 = vector.multi_reduction <add>, %88, %cst_39 [0] : vector<2x32xf32> to vector<32xf32>
    %90 = vector.shape_cast %89 : vector<32xf32> to vector<1x32xf32>
    %91 = arith.addf %4, %90 : vector<1x32xf32>
    %92 = arith.truncf %88 : vector<2x32xf32> to vector<2x32xbf16>
    %c0_40 = arith.constant 0 : index
    %c0_41 = arith.constant 0 : index
    %c0_42 = arith.constant 0 : index
    %c0_43 = arith.constant 0 : index
    %93 = vector.load %arg6[%c0_40, %c0_41, %c0_42, %c0_43] : memref<1x2x2x32xbf16, #tpu.memory_space<vmem>>, vector<1x1x2x32xbf16>
    %94 = vector.shape_cast %93 : vector<1x1x2x32xbf16> to vector<2x32xbf16>
    %95 = vector.shape_cast %92 : vector<2x32xbf16> to vector<1x1x2x32xbf16>
    tpu.vector_store %arg6[%c0_40, %c0_41, %c0_42, %c0_43], %95 {strides = array<i32>} : memref<1x2x2x32xbf16, #tpu.memory_space<vmem>>, vector<1x1x2x32xbf16>,
    %cst_44 = arith.constant 0.000000e+00 : f32
    %96 = vector.broadcast %cst_44 : f32 to vector<2x32xf32>
    %c1_i32_45 = arith.constant 1 : i32
    %97 = arith.addi %0, %c1_i32_45 : i32
    %c0_i32_46 = arith.constant 0 : i32
    %98 = arith.addi %97, %c0_i32_46 : i32
    %c0_47 = arith.constant 0 : index
    %99 = arith.index_cast %98 : i32 to index
    %c0_48 = arith.constant 0 : index
    %c0_49 = arith.constant 0 : index
    %100 = vector.load %arg2[%c0_47, %99, %c0_48, %c0_49] : memref<1x4x4x32xbf16, #tpu.memory_space<vmem>>, vector<1x1x4x32xbf16>
    %101 = vector.shape_cast %100 : vector<1x1x4x32xbf16> to vector<1x4x32xbf16>
    %102 = vector.shape_cast %101 : vector<1x4x32xbf16> to vector<4x32xbf16>
    %103 = arith.extf %102 : vector<4x32xbf16> to vector<4x32xf32>
    %104 = vector.extract_strided_slice %103 {offsets = [0, 0], sizes = [2, 32], strides = [1, 1]} : vector<4x32xf32> to vector<2x32xf32>
    %c0_50 = arith.constant 0 : index
    %c0_51 = arith.constant 0 : index
    %c0_52 = arith.constant 0 : index
    %105 = vector.load %arg3[%c0_50, %c0_51, %c0_52] : memref<9x1x32xf32, #tpu.memory_space<vmem>>, vector<1x1x32xf32>
    %106 = vector.shape_cast %105 : vector<1x1x32xf32> to vector<1x32xf32>
    %107 = vector.broadcast %106 : vector<1x32xf32> to vector<2x32xf32>
    %108 = arith.mulf %104, %107 : vector<2x32xf32>
    %109 = arith.addf %96, %108 : vector<2x32xf32>
    %110 = vector.extract_strided_slice %103 {offsets = [1, 0], sizes = [2, 32], strides = [1, 1]} : vector<4x32xf32> to vector<2x32xf32>
    %c1_53 = arith.constant 1 : index
    %c0_54 = arith.constant 0 : index
    %c0_55 = arith.constant 0 : index
    %111 = vector.load %arg3[%c1_53, %c0_54, %c0_55] : memref<9x1x32xf32, #tpu.memory_space<vmem>>, vector<1x1x32xf32>
    %112 = vector.shape_cast %111 : vector<1x1x32xf32> to vector<1x32xf32>
    %113 = vector.broadcast %112 : vector<1x32xf32> to vector<2x32xf32>
    %114 = arith.mulf %110, %113 : vector<2x32xf32>
    %115 = arith.addf %109, %114 : vector<2x32xf32>
    %116 = vector.extract_strided_slice %103 {offsets = [2, 0], sizes = [2, 32], strides = [1, 1]} : vector<4x32xf32> to vector<2x32xf32>
    %c2_56 = arith.constant 2 : index
    %c0_57 = arith.constant 0 : index
    %c0_58 = arith.constant 0 : index
    %117 = vector.load %arg3[%c2_56, %c0_57, %c0_58] : memref<9x1x32xf32, #tpu.memory_space<vmem>>, vector<1x1x32xf32>
    %118 = vector.shape_cast %117 : vector<1x1x32xf32> to vector<1x32xf32>
    %119 = vector.broadcast %118 : vector<1x32xf32> to vector<2x32xf32>
    %120 = arith.mulf %116, %119 : vector<2x32xf32>
    %121 = arith.addf %115, %120 : vector<2x32xf32>
    %c1_i32_59 = arith.constant 1 : i32
    %122 = arith.addi %0, %c1_i32_59 : i32
    %c1_i32_60 = arith.constant 1 : i32
    %123 = arith.addi %122, %c1_i32_60 : i32
    %c0_61 = arith.constant 0 : index
    %124 = arith.index_cast %123 : i32 to index
    %c0_62 = arith.constant 0 : index
    %c0_63 = arith.constant 0 : index
    %125 = vector.load %arg2[%c0_61, %124, %c0_62, %c0_63] : memref<1x4x4x32xbf16, #tpu.memory_space<vmem>>, vector<1x1x4x32xbf16>
    %126 = vector.shape_cast %125 : vector<1x1x4x32xbf16> to vector<1x4x32xbf16>
    %127 = vector.shape_cast %126 : vector<1x4x32xbf16> to vector<4x32xbf16>
    %128 = arith.extf %127 : vector<4x32xbf16> to vector<4x32xf32>
    %129 = vector.extract_strided_slice %128 {offsets = [0, 0], sizes = [2, 32], strides = [1, 1]} : vector<4x32xf32> to vector<2x32xf32>
    %c3_64 = arith.constant 3 : index
    %c0_65 = arith.constant 0 : index
    %c0_66 = arith.constant 0 : index
    %130 = vector.load %arg3[%c3_64, %c0_65, %c0_66] : memref<9x1x32xf32, #tpu.memory_space<vmem>>, vector<1x1x32xf32>
    %131 = vector.shape_cast %130 : vector<1x1x32xf32> to vector<1x32xf32>
    %132 = vector.broadcast %131 : vector<1x32xf32> to vector<2x32xf32>
    %133 = arith.mulf %129, %132 : vector<2x32xf32>
    %134 = arith.addf %121, %133 : vector<2x32xf32>
    %135 = vector.extract_strided_slice %128 {offsets = [1, 0], sizes = [2, 32], strides = [1, 1]} : vector<4x32xf32> to vector<2x32xf32>
    %c4_67 = arith.constant 4 : index
    %c0_68 = arith.constant 0 : index
    %c0_69 = arith.constant 0 : index
    %136 = vector.load %arg3[%c4_67, %c0_68, %c0_69] : memref<9x1x32xf32, #tpu.memory_space<vmem>>, vector<1x1x32xf32>
    %137 = vector.shape_cast %136 : vector<1x1x32xf32> to vector<1x32xf32>
    %138 = vector.broadcast %137 : vector<1x32xf32> to vector<2x32xf32>
    %139 = arith.mulf %135, %138 : vector<2x32xf32>
    %140 = arith.addf %134, %139 : vector<2x32xf32>
    %141 = vector.extract_strided_slice %126 {offsets = [0, 1, 0], sizes = [1, 2, 32], strides = [1, 1, 1]} : vector<1x4x32xbf16> to vector<1x2x32xbf16>
    %142 = vector.shape_cast %141 : vector<1x2x32xbf16> to vector<2x32xbf16>
    %143 = vector.extract_strided_slice %128 {offsets = [2, 0], sizes = [2, 32], strides = [1, 1]} : vector<4x32xf32> to vector<2x32xf32>
    %c5_70 = arith.constant 5 : index
    %c0_71 = arith.constant 0 : index
    %c0_72 = arith.constant 0 : index
    %144 = vector.load %arg3[%c5_70, %c0_71, %c0_72] : memref<9x1x32xf32, #tpu.memory_space<vmem>>, vector<1x1x32xf32>
    %145 = vector.shape_cast %144 : vector<1x1x32xf32> to vector<1x32xf32>
    %146 = vector.broadcast %145 : vector<1x32xf32> to vector<2x32xf32>
    %147 = arith.mulf %143, %146 : vector<2x32xf32>
    %148 = arith.addf %140, %147 : vector<2x32xf32>
    %c1_i32_73 = arith.constant 1 : i32
    %149 = arith.addi %0, %c1_i32_73 : i32
    %c2_i32_74 = arith.constant 2 : i32
    %150 = arith.addi %149, %c2_i32_74 : i32
    %c0_75 = arith.constant 0 : index
    %151 = arith.index_cast %150 : i32 to index
    %c0_76 = arith.constant 0 : index
    %c0_77 = arith.constant 0 : index
    %152 = vector.load %arg2[%c0_75, %151, %c0_76, %c0_77] : memref<1x4x4x32xbf16, #tpu.memory_space<vmem>>, vector<1x1x4x32xbf16>
    %153 = vector.shape_cast %152 : vector<1x1x4x32xbf16> to vector<1x4x32xbf16>
    %154 = vector.shape_cast %153 : vector<1x4x32xbf16> to vector<4x32xbf16>
    %155 = arith.extf %154 : vector<4x32xbf16> to vector<4x32xf32>
    %156 = vector.extract_strided_slice %155 {offsets = [0, 0], sizes = [2, 32], strides = [1, 1]} : vector<4x32xf32> to vector<2x32xf32>
    %c6_78 = arith.constant 6 : index
    %c0_79 = arith.constant 0 : index
    %c0_80 = arith.constant 0 : index
    %157 = vector.load %arg3[%c6_78, %c0_79, %c0_80] : memref<9x1x32xf32, #tpu.memory_space<vmem>>, vector<1x1x32xf32>
    %158 = vector.shape_cast %157 : vector<1x1x32xf32> to vector<1x32xf32>
    %159 = vector.broadcast %158 : vector<1x32xf32> to vector<2x32xf32>
    %160 = arith.mulf %156, %159 : vector<2x32xf32>
    %161 = arith.addf %148, %160 : vector<2x32xf32>
    %162 = vector.extract_strided_slice %155 {offsets = [1, 0], sizes = [2, 32], strides = [1, 1]} : vector<4x32xf32> to vector<2x32xf32>
    %c7_81 = arith.constant 7 : index
    %c0_82 = arith.constant 0 : index
    %c0_83 = arith.constant 0 : index
    %163 = vector.load %arg3[%c7_81, %c0_82, %c0_83] : memref<9x1x32xf32, #tpu.memory_space<vmem>>, vector<1x1x32xf32>
    %164 = vector.shape_cast %163 : vector<1x1x32xf32> to vector<1x32xf32>
    %165 = vector.broadcast %164 : vector<1x32xf32> to vector<2x32xf32>
    %166 = arith.mulf %162, %165 : vector<2x32xf32>
    %167 = arith.addf %161, %166 : vector<2x32xf32>
    %168 = vector.extract_strided_slice %155 {offsets = [2, 0], sizes = [2, 32], strides = [1, 1]} : vector<4x32xf32> to vector<2x32xf32>
    %c8_84 = arith.constant 8 : index
    %c0_85 = arith.constant 0 : index
    %c0_86 = arith.constant 0 : index
    %169 = vector.load %arg3[%c8_84, %c0_85, %c0_86] : memref<9x1x32xf32, #tpu.memory_space<vmem>>, vector<1x1x32xf32>
    %170 = vector.shape_cast %169 : vector<1x1x32xf32> to vector<1x32xf32>
    %171 = vector.broadcast %170 : vector<1x32xf32> to vector<2x32xf32>
    %172 = arith.mulf %168, %171 : vector<2x32xf32>
    %173 = arith.addf %167, %172 : vector<2x32xf32>
    %c0_87 = arith.constant 0 : index
    %c0_88 = arith.constant 0 : index
    %174 = vector.load %arg4[%c0_87, %c0_88] : memref<1x32xf32, #tpu.memory_space<vmem>>, vector<1x32xf32>
    %175 = vector.broadcast %174 : vector<1x32xf32> to vector<2x32xf32>
    %176 = arith.addf %173, %175 : vector<2x32xf32>
    %c0_89 = arith.constant 0 : index
    %c0_90 = arith.constant 0 : index
    %177 = vector.load %arg5[%c0_89, %c0_90] : memref<32x32xbf16, #tpu.memory_space<vmem>>, vector<32x32xbf16>
    %cst_91 = arith.constant dense<0.000000e+00> : vector<2x32xf32>
    %178 = tpu.matmul %142, %177, %cst_91 {dimension_numbers = #tpu.dot_dimension_numbers<[1], [0], [0], [1], [0, 0, 1, 1], [], []>} : vector<2x32xbf16>, vector<32x32xbf16>, vector<2x32xf32> -> vector<2x32xf32>
    %179 = arith.addf %176, %178 : vector<2x32xf32>
    %cst_92 = arith.constant dense<0.000000e+00> : vector<32xf32>
    %180 = vector.multi_reduction <add>, %179, %cst_92 [0] : vector<2x32xf32> to vector<32xf32>
    %181 = vector.shape_cast %180 : vector<32xf32> to vector<1x32xf32>
    %182 = arith.addf %91, %181 : vector<1x32xf32>
    %183 = arith.truncf %179 : vector<2x32xf32> to vector<2x32xbf16>
    %c0_93 = arith.constant 0 : index
    %c1_94 = arith.constant 1 : index
    %c0_95 = arith.constant 0 : index
    %c0_96 = arith.constant 0 : index
    %184 = vector.load %arg6[%c0_93, %c1_94, %c0_95, %c0_96] : memref<1x2x2x32xbf16, #tpu.memory_space<vmem>>, vector<1x1x2x32xbf16>
    %185 = vector.shape_cast %184 : vector<1x1x2x32xbf16> to vector<2x32xbf16>
    %186 = vector.shape_cast %183 : vector<2x32xbf16> to vector<1x1x2x32xbf16>
    tpu.vector_store %arg6[%c0_93, %c1_94, %c0_95, %c0_96], %186 {strides = array<i32>} : memref<1x2x2x32xbf16, #tpu.memory_space<vmem>>, vector<1x1x2x32xbf16>,
    %c0_97 = arith.constant 0 : index
    %c0_98 = arith.constant 0 : index
    %c0_99 = arith.constant 0 : index
    %187 = vector.load %arg7[%c0_97, %c0_98, %c0_99] : memref<1x1x32xf32, #tpu.memory_space<vmem>>, vector<1x1x32xf32>
    %188 = vector.shape_cast %182 : vector<1x32xf32> to vector<1x1x32xf32>
    %189 = arith.addf %187, %188 : vector<1x1x32xf32>
    %c0_100 = arith.constant 0 : index
    %c0_101 = arith.constant 0 : index
    %c0_102 = arith.constant 0 : index
    %190 = vector.load %arg7[%c0_100, %c0_101, %c0_102] : memref<1x1x32xf32, #tpu.memory_space<vmem>>, vector<1x1x32xf32>
    tpu.vector_store %arg7[%c0_100, %c0_101, %c0_102], %189 {strides = array<i32>} : memref<1x1x32xf32, #tpu.memory_space<vmem>>, vector<1x1x32xf32>,
    return
  }
  func.func @transform_0(%arg0: i32, %arg1: i32) -> (i32, i32, i32, i32) {
    %c0_i32 = arith.constant 0 : i32
    %c0_i32_0 = arith.constant 0 : i32
    %c0_i32_1 = arith.constant 0 : i32
    %c0_i32_2 = arith.constant 0 : i32
    return %arg0, %c0_i32, %c0_i32_0, %c0_i32_1 : i32, i32, i32, i32
  }
  func.func @transform_1(%arg0: i32, %arg1: i32) -> (i32, i32, i32) {
    %c0_i32 = arith.constant 0 : i32
    %c0_i32_0 = arith.constant 0 : i32
    %c0_i32_1 = arith.constant 0 : i32
    %c0_i32_2 = arith.constant 0 : i32
    return %c0_i32, %c0_i32_0, %c0_i32_1 : i32, i32, i32
  }
  func.func @transform_2(%arg0: i32, %arg1: i32) -> (i32, i32) {
    %c0_i32 = arith.constant 0 : i32
    %c0_i32_0 = arith.constant 0 : i32
    %c0_i32_1 = arith.constant 0 : i32
    return %c0_i32, %c0_i32_0 : i32, i32
  }
  func.func @transform_3(%arg0: i32, %arg1: i32) -> (i32, i32) {
    %c0_i32 = arith.constant 0 : i32
    %c0_i32_0 = arith.constant 0 : i32
    %c0_i32_1 = arith.constant 0 : i32
    return %c0_i32, %c0_i32_0 : i32, i32
  }
  func.func @transform_4(%arg0: i32, %arg1: i32) -> (i32, i32, i32, i32) {
    %c0_i32 = arith.constant 0 : i32
    %c0_i32_0 = arith.constant 0 : i32
    %c0_i32_1 = arith.constant 0 : i32
    return %arg0, %arg1, %c0_i32, %c0_i32_0 : i32, i32, i32, i32
  }
  func.func @transform_5(%arg0: i32, %arg1: i32) -> (i32, i32, i32) {
    %c0_i32 = arith.constant 0 : i32
    %c0_i32_0 = arith.constant 0 : i32
    %c0_i32_1 = arith.constant 0 : i32
    return %arg0, %c0_i32, %c0_i32_0 : i32, i32, i32
  }
}

module attributes {stable_mosaic.version = 11 : i64} {
  func.func @kernel(%arg0: i32, %arg1: i32, %arg2: memref<8x32xbf16, #tpu.memory_space<vmem>>, %arg3: memref<32x64xbf16, #tpu.memory_space<vmem>>, %arg4: memref<1x64xf32, #tpu.memory_space<vmem>>, %arg5: memref<8x64xbf16, #tpu.memory_space<vmem>>) attributes {dimension_semantics = [#tpu.dimension_semantics<parallel>, #tpu.dimension_semantics<parallel>], iteration_bounds = array<i64: 1, 1>, scalar_prefetch = 0 : i64, scratch_operands = 0 : i64, tpu.core_type = #tpu.core_type<tc>, window_params = [{transform_indices = @transform_0, window_bounds = array<i64: 8, 32>}, {transform_indices = @transform_1, window_bounds = array<i64: 32, 64>}, {transform_indices = @transform_2, window_bounds = array<i64: 1, 64>}, {transform_indices = @transform_3, window_bounds = array<i64: 8, 64>}]} {
    %c0 = arith.constant 0 : index
    %c0_0 = arith.constant 0 : index
    %0 = vector.load %arg2[%c0, %c0_0] : memref<8x32xbf16, #tpu.memory_space<vmem>>, vector<8x32xbf16>
    %c0_1 = arith.constant 0 : index
    %c0_2 = arith.constant 0 : index
    %1 = vector.load %arg3[%c0_1, %c0_2] : memref<32x64xbf16, #tpu.memory_space<vmem>>, vector<32x64xbf16>
    %cst = arith.constant dense<0.000000e+00> : vector<8x64xf32>
    %2 = tpu.matmul %0, %1, %cst {dimension_numbers = #tpu.dot_dimension_numbers<[1], [0], [0], [1], [0, 0, 1, 1], [], []>} : vector<8x32xbf16>, vector<32x64xbf16>, vector<8x64xf32> -> vector<8x64xf32>
    %c0_3 = arith.constant 0 : index
    %c0_4 = arith.constant 0 : index
    %3 = vector.load %arg4[%c0_3, %c0_4] : memref<1x64xf32, #tpu.memory_space<vmem>>, vector<1x64xf32>
    %4 = vector.broadcast %3 : vector<1x64xf32> to vector<8x64xf32>
    %5 = arith.addf %2, %4 : vector<8x64xf32>
    %6 = arith.mulf %5, %5 : vector<8x64xf32>
    %7 = arith.mulf %5, %6 : vector<8x64xf32>
    %cst_5 = arith.constant 4.471500e-02 : f32
    %8 = vector.broadcast %cst_5 : f32 to vector<8x64xf32>
    %9 = arith.mulf %8, %7 : vector<8x64xf32>
    %10 = arith.addf %5, %9 : vector<8x64xf32>
    %cst_6 = arith.constant 0.797884583 : f32
    %11 = vector.broadcast %cst_6 : f32 to vector<8x64xf32>
    %12 = arith.mulf %11, %10 : vector<8x64xf32>
    %13 = math.tanh %12 : vector<8x64xf32>
    %cst_7 = arith.constant 1.000000e+00 : f32
    %14 = vector.broadcast %cst_7 : f32 to vector<8x64xf32>
    %15 = arith.addf %14, %13 : vector<8x64xf32>
    %cst_8 = arith.constant 5.000000e-01 : f32
    %16 = vector.broadcast %cst_8 : f32 to vector<8x64xf32>
    %17 = arith.mulf %16, %15 : vector<8x64xf32>
    %18 = arith.mulf %5, %17 : vector<8x64xf32>
    %19 = arith.truncf %18 : vector<8x64xf32> to vector<8x64xbf16>
    %c0_9 = arith.constant 0 : index
    %c0_10 = arith.constant 0 : index
    %20 = vector.load %arg5[%c0_9, %c0_10] : memref<8x64xbf16, #tpu.memory_space<vmem>>, vector<8x64xbf16>
    tpu.vector_store %arg5[%c0_9, %c0_10], %19 {strides = array<i32>} : memref<8x64xbf16, #tpu.memory_space<vmem>>, vector<8x64xbf16>,
    return
  }
  func.func @transform_0(%arg0: i32, %arg1: i32) -> (i32, i32) {
    %c0_i32 = arith.constant 0 : i32
    %c0_i32_0 = arith.constant 0 : i32
    return %arg0, %c0_i32 : i32, i32
  }
  func.func @transform_1(%arg0: i32, %arg1: i32) -> (i32, i32) {
    %c0_i32 = arith.constant 0 : i32
    %c0_i32_0 = arith.constant 0 : i32
    return %c0_i32, %arg1 : i32, i32
  }
  func.func @transform_2(%arg0: i32, %arg1: i32) -> (i32, i32) {
    %c0_i32 = arith.constant 0 : i32
    %c0_i32_0 = arith.constant 0 : i32
    return %c0_i32, %arg1 : i32, i32
  }
  func.func @transform_3(%arg0: i32, %arg1: i32) -> (i32, i32) {
    %c0_i32 = arith.constant 0 : i32
    return %arg0, %arg1 : i32, i32
  }
}

module attributes {stable_mosaic.version = 11 : i64} {
  func.func @kernel(%arg0: memref<2x32xf32, #tpu.memory_space<vmem>>, %arg1: memref<32x8xf32, #tpu.memory_space<vmem>>, %arg2: memref<1x8xf32, #tpu.memory_space<vmem>>, %arg3: memref<8x32xf32, #tpu.memory_space<vmem>>, %arg4: memref<1x32xf32, #tpu.memory_space<vmem>>, %arg5: memref<2x32xf32, #tpu.memory_space<vmem>>) attributes {dimension_semantics = [], scalar_prefetch = 0 : i64, scratch_operands = 0 : i64, tpu.core_type = #tpu.core_type<tc>} {
    %c0 = arith.constant 0 : index
    %c0_0 = arith.constant 0 : index
    %0 = vector.load %arg0[%c0, %c0_0] : memref<2x32xf32, #tpu.memory_space<vmem>>, vector<2x32xf32>
    %c0_1 = arith.constant 0 : index
    %c0_2 = arith.constant 0 : index
    %1 = vector.load %arg1[%c0_1, %c0_2] : memref<32x8xf32, #tpu.memory_space<vmem>>, vector<32x8xf32>
    %cst = arith.constant dense<0.000000e+00> : vector<2x8xf32>
    %2 = tpu.matmul %0, %1, %cst {dimension_numbers = #tpu.dot_dimension_numbers<[1], [0], [0], [1], [0, 0, 1, 1], [], []>} : vector<2x32xf32>, vector<32x8xf32>, vector<2x8xf32> -> vector<2x8xf32>
    %c0_3 = arith.constant 0 : index
    %c0_4 = arith.constant 0 : index
    %3 = vector.load %arg2[%c0_3, %c0_4] : memref<1x8xf32, #tpu.memory_space<vmem>>, vector<1x8xf32>
    %4 = vector.broadcast %3 : vector<1x8xf32> to vector<2x8xf32>
    %5 = arith.addf %2, %4 : vector<2x8xf32>
    %cst_5 = arith.constant 0.000000e+00 : f32
    %6 = vector.broadcast %cst_5 : f32 to vector<2x8xf32>
    %7 = arith.maximumf %5, %6 : vector<2x8xf32>
    %c0_6 = arith.constant 0 : index
    %c0_7 = arith.constant 0 : index
    %8 = vector.load %arg3[%c0_6, %c0_7] : memref<8x32xf32, #tpu.memory_space<vmem>>, vector<8x32xf32>
    %cst_8 = arith.constant dense<0.000000e+00> : vector<2x32xf32>
    %9 = tpu.matmul %7, %8, %cst_8 {dimension_numbers = #tpu.dot_dimension_numbers<[1], [0], [0], [1], [0, 0, 1, 1], [], []>} : vector<2x8xf32>, vector<8x32xf32>, vector<2x32xf32> -> vector<2x32xf32>
    %c0_9 = arith.constant 0 : index
    %c0_10 = arith.constant 0 : index
    %10 = vector.load %arg4[%c0_9, %c0_10] : memref<1x32xf32, #tpu.memory_space<vmem>>, vector<1x32xf32>
    %11 = vector.broadcast %10 : vector<1x32xf32> to vector<2x32xf32>
    %12 = arith.addf %9, %11 : vector<2x32xf32>
    %13 = arith.negf %12 : vector<2x32xf32>
    %14 = math.exp %13 : vector<2x32xf32>
    %cst_11 = arith.constant 1.000000e+00 : f32
    %15 = vector.broadcast %cst_11 : f32 to vector<2x32xf32>
    %16 = arith.addf %15, %14 : vector<2x32xf32>
    %17 = arith.divf %15, %16 : vector<2x32xf32>
    %c0_12 = arith.constant 0 : index
    %c0_13 = arith.constant 0 : index
    %18 = vector.load %arg5[%c0_12, %c0_13] : memref<2x32xf32, #tpu.memory_space<vmem>>, vector<2x32xf32>
    tpu.vector_store %arg5[%c0_12, %c0_13], %17 {strides = array<i32>} : memref<2x32xf32, #tpu.memory_space<vmem>>, vector<2x32xf32>,
    return
  }
}

module attributes {stable_mosaic.version = 11 : i64} {
  func.func @kernel(%arg0: i32, %arg1: memref<1x4x32xbf16, #tpu.memory_space<vmem>>, %arg2: memref<1x1x32xf32, #tpu.memory_space<vmem>>, %arg3: memref<1x4x32xbf16, #tpu.memory_space<vmem>>) attributes {dimension_semantics = [#tpu.dimension_semantics<parallel>], iteration_bounds = array<i64: 2>, scalar_prefetch = 0 : i64, scratch_operands = 0 : i64, tpu.core_type = #tpu.core_type<tc>, window_params = [{transform_indices = @transform_0, window_bounds = array<i64: 1, 4, 32>}, {transform_indices = @transform_1, window_bounds = array<i64: 1, 1, 32>}, {transform_indices = @transform_2, window_bounds = array<i64: 1, 4, 32>}]} {
    %c0 = arith.constant 0 : index
    %c0_0 = arith.constant 0 : index
    %c0_1 = arith.constant 0 : index
    %0 = vector.load %arg1[%c0, %c0_0, %c0_1] : memref<1x4x32xbf16, #tpu.memory_space<vmem>>, vector<1x4x32xbf16>
    %1 = arith.extf %0 : vector<1x4x32xbf16> to vector<1x4x32xf32>
    %c0_2 = arith.constant 0 : index
    %c0_3 = arith.constant 0 : index
    %c0_4 = arith.constant 0 : index
    %2 = vector.load %arg2[%c0_2, %c0_3, %c0_4] : memref<1x1x32xf32, #tpu.memory_space<vmem>>, vector<1x1x32xf32>
    %3 = vector.broadcast %2 : vector<1x1x32xf32> to vector<1x4x32xf32>
    %4 = arith.mulf %1, %3 : vector<1x4x32xf32>
    %5 = arith.truncf %4 : vector<1x4x32xf32> to vector<1x4x32xbf16>
    %c0_5 = arith.constant 0 : index
    %c0_6 = arith.constant 0 : index
    %c0_7 = arith.constant 0 : index
    %6 = vector.load %arg3[%c0_5, %c0_6, %c0_7] : memref<1x4x32xbf16, #tpu.memory_space<vmem>>, vector<1x4x32xbf16>
    tpu.vector_store %arg3[%c0_5, %c0_6, %c0_7], %5 {strides = array<i32>} : memref<1x4x32xbf16, #tpu.memory_space<vmem>>, vector<1x4x32xbf16>,
    return
  }
  func.func @transform_0(%arg0: i32) -> (i32, i32, i32) {
    %c0_i32 = arith.constant 0 : i32
    %c0_i32_0 = arith.constant 0 : i32
    %c0_i32_1 = arith.constant 0 : i32
    return %arg0, %c0_i32, %c0_i32_0 : i32, i32, i32
  }
  func.func @transform_1(%arg0: i32) -> (i32, i32, i32) {
    %c0_i32 = arith.constant 0 : i32
    %c0_i32_0 = arith.constant 0 : i32
    %c0_i32_1 = arith.constant 0 : i32
    return %arg0, %c0_i32, %c0_i32_0 : i32, i32, i32
  }
  func.func @transform_2(%arg0: i32) -> (i32, i32, i32) {
    %c0_i32 = arith.constant 0 : i32
    %c0_i32_0 = arith.constant 0 : i32
    %c0_i32_1 = arith.constant 0 : i32
    return %arg0, %c0_i32, %c0_i32_0 : i32, i32, i32
  }
}

module attributes {stable_mosaic.version = 11 : i64} {
  func.func @kernel(%arg0: i32, %arg1: memref<1x4x32xbf16, #tpu.memory_space<vmem>>, %arg2: memref<1x1x32xf32, #tpu.memory_space<vmem>>) attributes {dimension_semantics = [#tpu.dimension_semantics<parallel>], iteration_bounds = array<i64: 2>, scalar_prefetch = 0 : i64, scratch_operands = 0 : i64, tpu.core_type = #tpu.core_type<tc>, window_params = [{transform_indices = @transform_0, window_bounds = array<i64: 1, 4, 32>}, {transform_indices = @transform_1, window_bounds = array<i64: 1, 1, 32>}]} {
    %c0 = arith.constant 0 : index
    %c0_0 = arith.constant 0 : index
    %c0_1 = arith.constant 0 : index
    %0 = vector.load %arg1[%c0, %c0_0, %c0_1] : memref<1x4x32xbf16, #tpu.memory_space<vmem>>, vector<1x4x32xbf16>
    %1 = arith.extf %0 : vector<1x4x32xbf16> to vector<1x4x32xf32>
    %cst = arith.constant dense<0.000000e+00> : vector<1x32xf32>
    %2 = vector.multi_reduction <add>, %1, %cst [1] : vector<1x4x32xf32> to vector<1x32xf32>
    %3 = vector.shape_cast %2 : vector<1x32xf32> to vector<1x1x32xf32>
    %cst_2 = arith.constant 4.000000e+00 : f32
    %4 = vector.broadcast %cst_2 : f32 to vector<1x1x32xf32>
    %5 = arith.divf %3, %4 : vector<1x1x32xf32>
    %c0_3 = arith.constant 0 : index
    %c0_4 = arith.constant 0 : index
    %c0_5 = arith.constant 0 : index
    %6 = vector.load %arg2[%c0_3, %c0_4, %c0_5] : memref<1x1x32xf32, #tpu.memory_space<vmem>>, vector<1x1x32xf32>
    tpu.vector_store %arg2[%c0_3, %c0_4, %c0_5], %5 {strides = array<i32>} : memref<1x1x32xf32, #tpu.memory_space<vmem>>, vector<1x1x32xf32>,
    return
  }
  func.func @transform_0(%arg0: i32) -> (i32, i32, i32) {
    %c0_i32 = arith.constant 0 : i32
    %c0_i32_0 = arith.constant 0 : i32
    %c0_i32_1 = arith.constant 0 : i32
    return %arg0, %c0_i32, %c0_i32_0 : i32, i32, i32
  }
  func.func @transform_1(%arg0: i32) -> (i32, i32, i32) {
    %c0_i32 = arith.constant 0 : i32
    %c0_i32_0 = arith.constant 0 : i32
    %c0_i32_1 = arith.constant 0 : i32
    return %arg0, %c0_i32, %c0_i32_0 : i32, i32, i32
  }
}

module attributes {stable_mosaic.version = 11 : i64} {
  func.func @kernel(%arg0: i32, %arg1: i32, %arg2: memref<2x32xbf16, #tpu.memory_space<vmem>>, %arg3: memref<32x10xbf16, #tpu.memory_space<vmem>>, %arg4: memref<1x10xf32, #tpu.memory_space<vmem>>, %arg5: memref<2x10xf32, #tpu.memory_space<vmem>>) attributes {dimension_semantics = [#tpu.dimension_semantics<parallel>, #tpu.dimension_semantics<parallel>], iteration_bounds = array<i64: 1, 1>, scalar_prefetch = 0 : i64, scratch_operands = 0 : i64, tpu.core_type = #tpu.core_type<tc>, window_params = [{transform_indices = @transform_0, window_bounds = array<i64: 2, 32>}, {transform_indices = @transform_1, window_bounds = array<i64: 32, 10>}, {transform_indices = @transform_2, window_bounds = array<i64: 1, 10>}, {transform_indices = @transform_3, window_bounds = array<i64: 2, 10>}]} {
    %c0 = arith.constant 0 : index
    %c0_0 = arith.constant 0 : index
    %0 = vector.load %arg2[%c0, %c0_0] : memref<2x32xbf16, #tpu.memory_space<vmem>>, vector<2x32xbf16>
    %c0_1 = arith.constant 0 : index
    %c0_2 = arith.constant 0 : index
    %1 = vector.load %arg3[%c0_1, %c0_2] : memref<32x10xbf16, #tpu.memory_space<vmem>>, vector<32x10xbf16>
    %cst = arith.constant dense<0.000000e+00> : vector<2x10xf32>
    %2 = tpu.matmul %0, %1, %cst {dimension_numbers = #tpu.dot_dimension_numbers<[1], [0], [0], [1], [0, 0, 1, 1], [], []>} : vector<2x32xbf16>, vector<32x10xbf16>, vector<2x10xf32> -> vector<2x10xf32>
    %c0_3 = arith.constant 0 : index
    %c0_4 = arith.constant 0 : index
    %3 = vector.load %arg4[%c0_3, %c0_4] : memref<1x10xf32, #tpu.memory_space<vmem>>, vector<1x10xf32>
    %4 = vector.broadcast %3 : vector<1x10xf32> to vector<2x10xf32>
    %5 = arith.addf %2, %4 : vector<2x10xf32>
    %c0_5 = arith.constant 0 : index
    %c0_6 = arith.constant 0 : index
    %6 = vector.load %arg5[%c0_5, %c0_6] : memref<2x10xf32, #tpu.memory_space<vmem>>, vector<2x10xf32>
    tpu.vector_store %arg5[%c0_5, %c0_6], %5 {strides = array<i32>} : memref<2x10xf32, #tpu.memory_space<vmem>>, vector<2x10xf32>,
    return
  }
  func.func @transform_0(%arg0: i32, %arg1: i32) -> (i32, i32) {
    %c0_i32 = arith.constant 0 : i32
    %c0_i32_0 = arith.constant 0 : i32
    return %arg0, %c0_i32 : i32, i32
  }
  func.func @transform_1(%arg0: i32, %arg1: i32) -> (i32, i32) {
    %c0_i32 = arith.constant 0 : i32
    %c0_i32_0 = arith.constant 0 : i32
    return %c0_i32, %arg1 : i32, i32
  }
  func.func @transform_2(%arg0: i32, %arg1: i32) -> (i32, i32) {
    %c0_i32 = arith.constant 0 : i32
    %c0_i32_0 = arith.constant 0 : i32
    return %c0_i32, %arg1 : i32, i32
  }
  func.func @transform_3(%arg0: i32, %arg1: i32) -> (i32, i32) {
    %c0_i32 = arith.constant 0 : i32
    return %arg0, %arg1 : i32, i32
  }
}

</mosaic_0001>

<bundles_post_ra>
// kernel: _lambda_.26
= control target key start
LH: loop header
LB: loop body
LE: loop exit
PB: predicated region body
PF: predicated region fallthrough
CT: control target
= control target key end

     0   :  { %v227_v0 = vmov 0.0   ;;  %vm228_vm0 = vmmov 0   ;;  %vm30_vm1 = vcmask 130048   ;;  %vm113_vm2 = vcmask 64512   ;;  %s280_s1 = inlined_call_operand.vmem [shape: f32[16,8], index: 1, kind: input, shape index: {}]   ;;  %s281_s0 = inlined_call_operand.vmem [shape: f32[2,16], index: 0, kind: input, shape index: {}]   ;;  %s282_s3 = inlined_call_operand.vmem [shape: f32[8,16], index: 3, kind: input, shape index: {}]   ;;  %s283_s2 = inlined_call_operand.vmem [shape: f32[1,8], index: 2, kind: input, shape index: {}]   ;;  %s284_s4 = inlined_call_operand.vmem [shape: f32[1,16], index: 4, kind: input, shape index: {}]   ;;  %s285_s5 = inlined_call_operand.vmem [shape: f32[2,16], index: 5, kind: output, shape index: {}]  }
   0x1   :  { %209 = vmatprep.subr.mxu0 %v227_v0  ;;  %v22_v1 = vld [vmem:[%s280_s1 + $0x8] sm:$0xff]  ;;  %v21_v2 = vld [vmem:[%s280_s1] sm:$0xff]  ;;  %213 = vmatprep.mubr.msk.f32.mxu0 %vm228_vm0, %v227_v0  ;;  %vm193_vm3 = vcmask 123904  }
   0x2   :  { %210 = vmatpush3.msra.mxu0 %v22_v1  ;;  %v20_v3 = vld [vmem:[%s281_s0] sm:$0x3]  ;;  %216 = vmatprep.subr.mxu1 %v227_v0 }
   0x3   :  { %211 = vmatprep.subr.mxu0 %v227_v0  ;;  %218 = vmatprep.mubr.msk.f32.mxu1 %vm228_vm0, %v227_v0  ;;  %v105_v4 = vld [vmem:[%s282_s3] sm:$0xff] }
   0x4   :  { %212 = vmatpush3.msra.mxu0 %v21_v2  ;;  %217 = vmatpush3.msra.mxu1 %v105_v4  ;;  %v199_v5 = vld [vmem:[%s283_s2] ss:$0 sm:$0xff] }
   0x5   :  { %214 = vmatmul.mubr.msk.f32.vlgmr.msra.gmra.mxu0 %vm30_vm1, %v20_v3  ;;  %v201_v10 = vld [vmem:[%s284_s4] ss:$0 sm:$0xff] }
  0xc5   :  { %v100_v6 = vpop.f32.mrf.mxu0 }
  0xc6   :  { %v101_v7 = vadd.f32 %v199_v5, %v100_v6 }
  0xc7   :  { %v215_v8 = vpop.f32.mrf.mxu0 }
  0xc8   :  { %v104_v9 = vmax.f32 %v101_v7, 0.0 }
  0xca   :  { %219 = vmatmul.mubr.msk.f32.vlgmr.msra.gmra.mxu1 %vm113_vm2, %v104_v9 }
 0x18a   :  { %v183_v11 = vpop.f32.mrf.mxu1 }
 0x18b   :  { %v184_v12 = vadd.f32 %v201_v10, %v183_v11 }
 0x18c   :  { %v220_v13 = vpop.f32.mrf.mxu1 }
 0x18d   :  { %v203_v14 = vmul.f32 -1.442695, %v184_v12 }
 0x18f   :  { %223 = vpow2.f32 %v203_v14 }
 0x19c   :  { %v224_v15 = vpop.eup %223 }
 0x19d   :  { %v190_v16 = vadd.f32 1.0, %v224_v15 }
 0x19f   :  { %225 = vrcp.f32 %v190_v16 }
 0x1ac   :  { %v226_v17 = vpop.eup %225 }
 0x1ad   :  { %194 = vst.msk [vmem:[%s285_s5] sm:$0x3] %vm193_vm3, %v226_v17 }

// kernel: _lambda_.24
= control target key start
LH: loop header
LB: loop body
LE: loop exit
PB: predicated region body
PF: predicated region fallthrough
CT: control target
= control target key end

     0   :  { %s1655_s21 = smov 0   ;;  %s1657_s22 = smov 0   ;;  %s1896_s0 = inlined_call_operand.vmem [shape: bf16[2,5,5,8], index: 0, kind: input, shape index: {}]   ;;  %s1897_s1 = inlined_call_operand.vmem [shape: bf16[2,5,5,8], index: 1, kind: input, shape index: {}]   ;;  %s1898_s2 = inlined_call_operand.vmem [shape: bf16[2,5,5,8], index: 2, kind: input, shape index: {}]   ;;  %s1899_s3 = inlined_call_operand.vmem [shape: bf16[2,5,5,8], index: 3, kind: input, shape index: {}]   ;;  %s1900_s4 = inlined_call_operand.vmem [shape: bf16[9,8,16], index: 4, kind: input, shape index: {}]   ;;  %s1901_s5 = inlined_call_operand.vmem [shape: f32[1,16], index: 5, kind: input, shape index: {}]   ;;  %s1902_s6 = inlined_call_operand.vmem [shape: bf16[2,4,4,16], index: 6, kind: output, shape index: {}]  }
   0x1   :  { %s1659_s23 = smov 0  }
   0x2 LB: > { %s28_s24 = sadd.s32 1, %s1611_s22  ;;  %p1439_p0 = scmp.ge.s32.totalorder %s1615_s23, 1  ;;  %s1615_s23 = sphi %s1659_s23, %s16_s23   ;;  %s1611_s22 = sphi %s1657_s22, %s1910_s22   ;;  %s1607_s21 = sphi %s1655_s21, %s1909_s21  }
   0x3   : > { %p30_p1 = scmp.ge.s32.totalorder %s28_s24, 2  ;;  %p256_p2 = scmp.lt.s32.totalorder %s1615_s23, 3 }
   0x5   : > { %s1912_s24 = smov (%p30_p1, %s28_s24), 0  ;;  %p257_p3 = pnand %p1439_p0, %p256_p2 }
   0x6   : > { %p305_p4 = scmp.lt.s32.totalorder (!%p257_p3), %s1607_s21, 1 }
   0x7   : > { %260 = sbr.rel (%p257_p3) target bundleno = 275 (0x113), region = 44 }
   0xc   : > { %v1454_v0 = vld [vmem:[%s1900_s4 + $0x4] sm:$0xf]  ;;  %vm402_vm0 = vcmask 1043456   ;;  %v374_v1 = vld [vmem:[%s1900_s4] sm:$0xf]  ;;  %v386_v2 = vlaneseq  ;;  %v1617_v3 = vmov 0.0  }
   0xd   : > { %1493 = vmatprep.subr.bf16.mxu0 %v1617_v3  ;;  %1499 = vmatprep.subr.bf16.mxu1 %v1617_v3  ;;  %v404_v4 = vsel %vm402_vm0, %v1454_v0, 0  ;;  %v472_v5 = vsel %vm402_vm0, %v374_v1, 0  ;;  %v1618_v6 = vmov 1983009808   ;;  %v1457_v8 = vld [vmem:[%s1900_s4 + $0x8] sm:$0xf] }
   0xe   : > { %1494 = vmatpush3.bf16.msra.mxu0 %v404_v4  ;;  %1500 = vmatpush3.bf16.msra.mxu1 %v472_v5  ;;  %v384_v7 = vunpack.c.l.s4 %v1618_v6  ;;  %v1459_v9 = vld [vmem:[%s1900_s4 + $0xc] sm:$0xf]  ;;  %vm1619_vm1 = vmmov 0   ;;  %s1914_s21 = smov (!%p305_p4, %s1607_s21), 1  ;;  %v387_v10 = vshrl.u32 %v386_v2, 7  ;;  %vm398_vm2 = vcmask 64512  }
   0xf   : > { %1495 = vmatprep.mubr.msk.bf16.mxu0 %vm1619_vm1, %v1617_v3  ;;  %1501 = vmatprep.mubr.msk.bf16.mxu1 %vm1619_vm1, %v1617_v3  ;;  %v633_v12 = vsel %vm402_vm0, %v1457_v8, 0  ;;  %vm547_vm3 = vsmask.f32 1280  ;;  %s1699_s9 = smul.u32 20, %s1914_s21  ;;  %v1702_v13 = vsel %vm402_vm0, %v1459_v9, 0  ;;  %s1474_s14 = sshll.u32 %s1914_s21, 3 }
  0x10   : > { %v385_v11 = vunpack.c.0.s8 %v384_v7  ;;  %1505 = vmatprep.subr.bf16.mxu0 %v1617_v3  ;;  %1511 = vmatprep.subr.bf16.mxu1 %v1617_v3  ;;  %v1461_v14 = vld [vmem:[%s1900_s4 + $0x10] sm:$0xf]  ;;  %v1463_v15 = vld [vmem:[%s1900_s4 + $0x14] sm:$0xf]  ;;  %vm548_vm4 = vsmask.f32 3336  ;;  %s333_s17 = scalar_lea.vmem %s1902_s6, %s1474_s14 }
  0x11   : > { %vm550_vm5 = vsmask.f32 5392  ;;  %v1465_v16 = vld [vmem:[%s1900_s4 + $0x18] sm:$0xf]  ;;  %s1717_s18 = scalar_lea.vmem %s1897_s1, %s1699_s9  ;;  %s1725_s25 = scalar_lea.vmem %s1896_s0, %s1699_s9  ;;  %v1728_v18 = vsel %vm402_vm0, %v1461_v14, 0  ;;  %v1731_v19 = vsel %vm402_vm0, %v1463_v15, 0  ;;  %vm1756_vm7 = vmor %vm547_vm3, %vm548_vm4 }
  0x12   : > { %v1719_v17 = vsub.s32 %v385_v11, %v387_v10  ;;  %v1734_v20 = vsel %vm402_vm0, %v1465_v16, 0  ;;  %v1587_v21 = vld.sshfl [vmem:[%s1717_s18] sm:$0x5f pattern:$0x76325410]  ;;  %s1747_s28 = scalar_lea.vmem %s1899_s3, %s1699_s9  ;;  %s1764_s7 = scalar_lea.vmem %s1898_s2, %s1699_s9  ;;  %vm1773_vm8 = vmor %vm1756_vm7, %vm550_vm5  ;;  %vm1297_vm10 = vcmask 123904  }
  0x13   : > { %v1588_v22 = vld.sshfl [vmem:[%s1717_s18 + $0x8] sm:$0x5f pattern:$0x76325410]  ;;  %vm552_vm6 = vsmask.f32 7448 }
  0x14   : > { %v339_v23 = vld [vmem:[%s1725_s25] sm:$0x7]  ;;  %v340_v24 = vld [vmem:[%s1725_s25 + $0x4] sm:$0x7]  ;;  %v341_v25 = vld [vmem:[%s1725_s25 + $0x8] sm:$0x7]  ;;  %v397_v33 = vcombine.low %v1587_v21, %v1588_v22 }
  0x15   : > { %v342_v26 = vld [vmem:[%s1725_s25 + $0xc] sm:$0x7]  ;;  %v451_v27 = vcombine.low %v339_v23, %v340_v24  ;;  %v521_v28 = vrot.slane %v339_v23, %v1719_v17  ;;  %v529_v30 = vrot.slane %v340_v24, %v1719_v17  ;;  %v537_v31 = vrot.slane %v341_v25, %v1719_v17  ;;  %v351_v55 = vld [vmem:[%s1764_s7] sm:$0x7]  ;;  %v352_v60 = vld [vmem:[%s1764_s7 + $0x4] sm:$0x7] }
  0x16   : > { %v452_v29 = vcombine.low %v341_v25, %v342_v26  ;;  %v545_v32 = vrot.slane %v342_v26, %v1719_v17  ;;  %1496 = vmatmul.mubr.msk.bf16.vlgmr.msra.gmra.mxu0 %vm398_vm2, %v397_v33  ;;  %v353_v1 = vld [vmem:[%s1764_s7 + $0x8] sm:$0x7]  ;;  %v354_v2 = vld [vmem:[%s1764_s7 + $0xc] sm:$0x7]  ;;  %vm1788_vm9 = vmor %vm1773_vm8, %vm552_vm6  ;;  %v684_v8 = vcombine.low %v351_v55, %v352_v60  ;;  %v828_v24 = vrot.slane %v351_v55, %v1719_v17 }
  0x17   : > { %v459_v34 = vrot.slane %v451_v27, %v1719_v17  ;;  %v522_v35 = vcombine.high %v521_v28, %v521_v28  ;;  %v555_v36 = vshrl.u32 %v521_v28, 16  ;;  %v530_v38 = vcombine.high %v529_v30, %v529_v30  ;;  %1506 = vmatpush3.bf16.msra.mxu0 %v633_v12  ;;  %1507 = vmatprep.mubr.msk.bf16.mxu0 %vm1619_vm1, %v1617_v3  ;;  %v1806_v33 = vld.sshfl [vmem:[%s1747_s28] sm:$0x5f pattern:$0x76325410] }
  0x18   : > { %v466_v37 = vrot.slane %v452_v29, %v1719_v17  ;;  %v538_v39 = vcombine.high %v537_v31, %v537_v31  ;;  %v546_v40 = vcombine.high %v545_v32, %v545_v32  ;;  %v558_v43 = vshll.u32 %v521_v28, 16  ;;  %1517 = vmatprep.subr.bf16.mxu0 %v1617_v3 }
  0x19   : > { %v557_v42 = vrot.slane %v555_v36, 6  ;;  %v564_v44 = vshll.u32 %v522_v35, 16  ;;  %v569_v45 = vshrl.u32 %v529_v30, 16  ;;  %v572_v47 = vshll.u32 %v529_v30, 16 }
  0x1a   : > { %v467_v46 = vcombine.low %v459_v34, %v466_v37  ;;  %v578_v48 = vshll.u32 %v530_v38, 16  ;;  %v583_v49 = vshrl.u32 %v537_v31, 16  ;;  %v560_v50 = vrot.slane %v558_v43, 7 }
  0x1b   : > { %v566_v51 = vrot.slane %v564_v44, 7  ;;  %v571_v52 = vrot.slane %v569_v45, 6  ;;  %v586_v53 = vshll.u32 %v537_v31, 16  ;;  %v574_v56 = vrot.slane %v572_v47, 7 }
  0x1c   : > { %1502 = vmatmul.mubr.msk.bf16.vlgmr.msra.gmra.mxu1 %vm398_vm2, %v467_v46  ;;  %v580_v57 = vrot.slane %v578_v48, 7  ;;  %v585_v58 = vrot.slane %v583_v49, 6  ;;  %v592_v59 = vshll.u32 %v538_v39, 16  ;;  %v561_v61 = vor.u32 %v560_v50, %v557_v42 }
  0x1d   : > { %v588_v62 = vrot.slane %v586_v53, 7  ;;  %v597_v63 = vshrl.u32 %v545_v32, 16  ;;  %v600_v0 = vshll.u32 %v545_v32, 16  ;;  %1512 = vmatpush3.bf16.msra.mxu1 %v1702_v13  ;;  %1513 = vmatprep.mubr.msk.bf16.mxu1 %vm1619_vm1, %v1617_v3  ;;  %v575_v4 = vor.u32 %v574_v56, %v571_v52 }
  0x1e   : > { %v594_v5 = vrot.slane %v592_v59, 7  ;;  %v606_v6 = vshll.u32 %v546_v40, 16  ;;  %1523 = vmatprep.subr.bf16.mxu1 %v1617_v3  ;;  %v562_v9 = vrot.slane %v561_v61, 2  ;;  %v685_v15 = vcombine.low %v353_v1, %v354_v2 }
  0x1f   : > { %v589_v10 = vor.u32 %v588_v62, %v585_v58  ;;  %v599_v11 = vrot.slane %v597_v63, 6  ;;  %v602_v12 = vrot.slane %v600_v0, 7  ;;  %v576_v13 = vrot.slane %v575_v4, 2 }
  0x20   : > { %v608_v14 = vrot.slane %v606_v6, 7  ;;  %v692_v16 = vrot.slane %v684_v8, %v1719_v17  ;;  %v567_v23 = vsel %vm1788_vm9, %v562_v9, %v566_v51  ;;  %v699_v26 = vrot.slane %v685_v15, %v1719_v17  ;;  %v1809_v38 = vld.sshfl [vmem:[%s1747_s28 + $0x8] sm:$0x5f pattern:$0x76325410] }
  0x21   : > { %v590_v21 = vrot.slane %v589_v10, 2  ;;  %v603_v22 = vor.u32 %v602_v12, %v599_v11  ;;  %v581_v25 = vsel %vm1788_vm9, %v576_v13, %v580_v57  ;;  %v836_v27 = vrot.slane %v352_v60, %v1719_v17  ;;  %v1446_v6 = vld [vmem:[%s1725_s25 + $0x4] sm:$0x7]  ;;  %v1447_v8 = vld [vmem:[%s1725_s25 + $0x8] sm:$0x7] }
  0x22   : > { %v844_v28 = vrot.slane %v353_v1, %v1719_v17  ;;  %v612_v31 = vcombine.low %v567_v23, %v581_v25  ;;  %v852_v32 = vrot.slane %v354_v2, %v1719_v17  ;;  %v700_v34 = vcombine.low %v692_v16, %v699_v26  ;;  %v1448_v13 = vld [vmem:[%s1725_s25 + $0xc] sm:$0x7] }
  0x23   : > { %v604_v29 = vrot.slane %v603_v22, 2  ;;  %v595_v30 = vsel %vm1788_vm9, %v590_v21, %v594_v5  ;;  %v855_v35 = vshrl.u32 %v828_v24, 16  ;;  %v858_v36 = vshll.u32 %v828_v24, 16  ;;  %v1467_v5 = vld [vmem:[%s1900_s4 + $0x1c] sm:$0xf] }
  0x24   : > { %v869_v37 = vshrl.u32 %v836_v27, 16  ;;  %v620_v40 = vrot.slane %v612_v31, %v1719_v17  ;;  %v872_v41 = vshll.u32 %v836_v27, 16  ;;  %v883_v42 = vshrl.u32 %v844_v28, 16  ;;  %1514 = vmatmul.mubr.msk.bf16.vlgmr.msra.gmra.mxu1 %vm398_vm2, %v700_v34  ;;  %v1449_v22 = vld [vmem:[%s1725_s25 + $0x10] sm:$0x7] }
  0x25   : > { %v609_v39 = vsel %vm1788_vm9, %v604_v29, %v608_v14  ;;  %v857_v44 = vrot.slane %v855_v35, 6  ;;  %v860_v45 = vrot.slane %v858_v36, 7  ;;  %v886_v49 = vshll.u32 %v844_v28, 16  ;;  %1524 = vmatpush3.bf16.msra.mxu1 %v1731_v19  ;;  %1525 = vmatprep.mubr.msk.bf16.mxu1 %vm1619_vm1, %v1617_v3 }
  0x26   : > { %v613_v43 = vcombine.low %v595_v30, %v609_v39  ;;  %v871_v46 = vrot.slane %v869_v37, 6  ;;  %v874_v47 = vrot.slane %v872_v41, 7  ;;  %v885_v48 = vrot.slane %v883_v42, 6  ;;  %1535 = vmatprep.subr.bf16.mxu1 %v1617_v3 }
  0x27   : > { %v897_v50 = vshrl.u32 %v852_v32, 16  ;;  %v900_v52 = vshll.u32 %v852_v32, 16  ;;  %v888_v53 = vrot.slane %v886_v49, 7  ;;  %v829_v55 = vcombine.high %v828_v24, %v828_v24 }
  0x28   : > { %v627_v51 = vrot.slane %v613_v43, %v1719_v17  ;;  %v837_v56 = vcombine.high %v836_v27, %v836_v27  ;;  %v772_v59 = vcombine.low %v1806_v33, %v1809_v38  ;;  %v845_v19 = vcombine.high %v844_v28, %v844_v28  ;;  %v1591_v42 = vld.sshfl [vmem:[%s1717_s18 + $0x4] sm:$0x5f pattern:$0x76325410] }
  0x29   : > { %v899_v54 = vrot.slane %v897_v50, 6  ;;  %v902_v58 = vrot.slane %v900_v52, 7  ;;  %v853_v60 = vcombine.high %v852_v32, %v852_v32  ;;  %v861_v61 = vor.u32 %v860_v45, %v857_v44  ;;  %v1592_v43 = vld.sshfl [vmem:[%s1717_s18 + $0xc] sm:$0x5f pattern:$0x76325410] }
  0x2a   : > { %v628_v57 = vcombine.low %v620_v40, %v627_v51  ;;  %v864_v62 = vshll.u32 %v829_v55, 16  ;;  %v875_v63 = vor.u32 %v874_v47, %v871_v46  ;;  %v878_v0 = vshll.u32 %v837_v56, 16  ;;  %v1469_v56 = vld [vmem:[%s1900_s4 + $0x20] sm:$0xf] }
  0x2b   : > { %v889_v1 = vor.u32 %v888_v53, %v885_v48  ;;  %v892_v2 = vshll.u32 %v845_v19, 16  ;;  %v903_v4 = vor.u32 %v902_v58, %v899_v54  ;;  %v862_v9 = vrot.slane %v861_v61, 2 }
  0x2c   : > { %1508 = vmatmul.mubr.msk.bf16.vlgmr.msra.gmra.mxu0 %vm398_vm2, %v628_v57  ;;  %v866_v10 = vrot.slane %v864_v62, 7  ;;  %v876_v11 = vrot.slane %v875_v63, 2  ;;  %v906_v12 = vshll.u32 %v853_v60, 16  ;;  %v880_v14 = vrot.slane %v878_v0, 7 }
  0x2d   : > { %1518 = vmatpush3.bf16.msra.mxu0 %v1728_v18  ;;  %1519 = vmatprep.mubr.msk.bf16.mxu0 %vm1619_vm1, %v1617_v3  ;;  %v890_v15 = vrot.slane %v889_v1, 2  ;;  %v894_v16 = vrot.slane %v892_v2, 7  ;;  %v904_v21 = vrot.slane %v903_v4, 2  ;;  %v984_v18 = vcombine.low %v1446_v6, %v1447_v8 }
  0x2e   : > { %1529 = vmatprep.subr.bf16.mxu0 %v1617_v3  ;;  %v867_v23 = vsel %vm1788_vm9, %v862_v9, %v866_v10  ;;  %v908_v24 = vrot.slane %v906_v12, 7  ;;  %v985_v25 = vcombine.low %v1448_v13, %v1449_v22  ;;  %v881_v26 = vsel %vm1788_vm9, %v876_v11, %v880_v14 }
  0x2f   : > { %v895_v27 = vsel %vm1788_vm9, %v890_v15, %v894_v16  ;;  %v1128_v28 = vrot.slane %v1446_v6, %v1719_v17  ;;  %v1136_v29 = vrot.slane %v1447_v8, %v1719_v17  ;;  %v912_v31 = vcombine.low %v867_v23, %v881_v26 }
  0x30   : > { %v909_v30 = vsel %vm1788_vm9, %v904_v21, %v908_v24  ;;  %v1077_v32 = vsel %vm402_vm0, %v1467_v5, 0  ;;  %v992_v33 = vrot.slane %v984_v18, %v1719_v17  ;;  %v1144_v35 = vrot.slane %v1448_v13, %v1719_v17 }
  0x31   : > { %v913_v34 = vcombine.low %v895_v27, %v909_v30  ;;  %v1152_v36 = vrot.slane %v1449_v22, %v1719_v17  ;;  %v1155_v37 = vshrl.u32 %v1128_v28, 16  ;;  %v920_v38 = vrot.slane %v912_v31, %v1719_v17 }
  0x32   : > { %v999_v39 = vrot.slane %v985_v25, %v1719_v17  ;;  %v1158_v40 = vshll.u32 %v1128_v28, 16  ;;  %v1169_v41 = vshrl.u32 %v1136_v29, 16  ;;  %v1172_v46 = vshll.u32 %v1136_v29, 16 }
  0x33   : > { %v927_v44 = vrot.slane %v913_v34, %v1719_v17  ;;  %v1157_v45 = vrot.slane %v1155_v37, 6  ;;  %v1183_v47 = vshrl.u32 %v1144_v35, 16  ;;  %v1186_v50 = vshll.u32 %v1144_v35, 16 }
  0x34   : > { %1520 = vmatmul.mubr.msk.bf16.vlgmr.msra.gmra.mxu0 %vm398_vm2, %v772_v59  ;;  %v1160_v48 = vrot.slane %v1158_v40, 7  ;;  %v1171_v49 = vrot.slane %v1169_v41, 6  ;;  %v1197_v51 = vshrl.u32 %v1152_v36, 16  ;;  %v1174_v53 = vrot.slane %v1172_v46, 7 }
  0x35   : > { %1530 = vmatpush3.bf16.msra.mxu0 %v1734_v20  ;;  %1531 = vmatprep.mubr.msk.bf16.mxu0 %vm1619_vm1, %v1617_v3  ;;  %v928_v52 = vcombine.low %v920_v38, %v927_v44  ;;  %v1185_v54 = vrot.slane %v1183_v47, 6  ;;  %v1200_v55 = vshll.u32 %v1152_v36, 16  ;;  %v1188_v57 = vrot.slane %v1186_v50, 7 }
  0x36   : > { %1541 = vmatprep.subr.bf16.mxu0 %v1617_v3  ;;  %v1199_v58 = vrot.slane %v1197_v51, 6  ;;  %v1000_v20 = vcombine.low %v992_v33, %v999_v39  ;;  %v1129_v19 = vcombine.high %v1128_v28, %v1128_v28  ;;  %v1137_v60 = vcombine.high %v1136_v29, %v1136_v29 }
  0x37   : > { %1526 = vmatmul.mubr.msk.bf16.vlgmr.msra.gmra.mxu1 %vm398_vm2, %v928_v52  ;;  %v1202_v59 = vrot.slane %v1200_v55, 7  ;;  %v1072_v61 = vcombine.low %v1591_v42, %v1592_v43  ;;  %v1233_v62 = vsel %vm402_vm0, %v1469_v56, 0  ;;  %v1145_v63 = vcombine.high %v1144_v35, %v1144_v35 }
  0x38   : > { %1536 = vmatpush3.bf16.msra.mxu1 %v1077_v32  ;;  %1537 = vmatprep.mubr.msk.bf16.mxu1 %vm1619_vm1, %v1617_v3  ;;  %v1153_v0 = vcombine.high %v1152_v36, %v1152_v36  ;;  %v1161_v1 = vor.u32 %v1160_v48, %v1157_v45  ;;  %v1164_v2 = vshll.u32 %v1129_v19, 16  ;;  %v1175_v4 = vor.u32 %v1174_v53, %v1171_v49 }
  0x39   : > { %v1178_v5 = vshll.u32 %v1137_v60, 16  ;;  %v1189_v6 = vor.u32 %v1188_v57, %v1185_v54  ;;  %v1192_v8 = vshll.u32 %v1145_v63, 16  ;;  %v1203_v9 = vor.u32 %v1202_v59, %v1199_v58 }
  0x3a   : > { %v1206_v10 = vshll.u32 %v1153_v0, 16  ;;  %v1162_v11 = vrot.slane %v1161_v1, 2  ;;  %v1166_v12 = vrot.slane %v1164_v2, 7  ;;  %v1176_v13 = vrot.slane %v1175_v4, 2 }
  0x3b   : > { %v1180_v14 = vrot.slane %v1178_v5, 7  ;;  %v1190_v15 = vrot.slane %v1189_v6, 2  ;;  %v1194_v16 = vrot.slane %v1192_v8, 7  ;;  %v1204_v21 = vrot.slane %v1203_v9, 2 }
  0x3c   : > { %1532 = vmatmul.mubr.msk.bf16.vlgmr.msra.gmra.mxu0 %vm398_vm2, %v1000_v20  ;;  %v1208_v22 = vrot.slane %v1206_v10, 7  ;;  %v1167_v23 = vsel %vm1788_vm9, %v1162_v11, %v1166_v12  ;;  %v1471_v10 = vld [vmem:[%s1901_s5] ss:$0 sm:$0xff] }
  0x3d   : > { %1542 = vmatpush3.bf16.msra.mxu0 %v1233_v62  ;;  %1543 = vmatprep.mubr.msk.bf16.mxu0 %vm1619_vm1, %v1617_v3  ;;  %v1181_v24 = vsel %vm1788_vm9, %v1176_v13, %v1180_v14  ;;  %v1195_v18 = vsel %vm1788_vm9, %v1190_v15, %v1194_v16 }
  0x3e   : > { %v1209_v25 = vsel %vm1788_vm9, %v1204_v21, %v1208_v22  ;;  %v1212_v26 = vcombine.low %v1167_v23, %v1181_v24 }
  0x3f   : > { %1538 = vmatmul.mubr.msk.bf16.vlgmr.msra.gmra.mxu1 %vm398_vm2, %v1072_v61  ;;  %v1213_v3 = vcombine.low %v1195_v18, %v1209_v25 }
  0x40   : > { %v1220_v27 = vrot.slane %v1212_v26, %v1719_v17 }
  0x41   : > { %v1227_v28 = vrot.slane %v1213_v3, %v1719_v17 }
  0x43   : > { %v1228_v29 = vcombine.low %v1220_v27, %v1227_v28 }
  0x45   : > { %1544 = vmatmul.mubr.msk.bf16.vlgmr.msra.gmra.mxu0 %vm398_vm2, %v1228_v29 }
  0xd6   : > { %v440_v30 = vpop.f32.mrf.mxu0 }
  0xd8   : > { %v1497_v31 = vpop.f32.mrf.mxu0 }
  0xda   : > { %v443_v33 = vpop.f32.mrf.mxu0 }
  0xdc   : > { %v508_v32 = vpop.f32.mrf.mxu1  ;;  %v1498_v35 = vpop.f32.mrf.mxu0 }
  0xdd   : > { %v509_v17 = vadd.f32 %v508_v32, %v440_v30 }
  0xde   : > { %v1503_v34 = vpop.f32.mrf.mxu1 }
  0xe0   : > { %v511_v36 = vpop.f32.mrf.mxu1 }
  0xe1   : > { %v512_v48 = vadd.f32 %v511_v36, %v443_v33 }
  0xe2   : > { %v1504_v7 = vpop.f32.mrf.mxu1 }
  0xe4   : > { %v741_v37 = vpop.f32.mrf.mxu1 }
  0xe6   : > { %v1515_v38 = vpop.f32.mrf.mxu1 }
  0xe8   : > { %v744_v39 = vpop.f32.mrf.mxu1 }
  0xea   : > { %v1516_v41 = vpop.f32.mrf.mxu1 }
  0xec   : > { %v669_v40 = vpop.f32.mrf.mxu0 }
  0xed   : > { %v676_v46 = vadd.f32 %v669_v40, %v509_v17 }
  0xee   : > { %v1509_v42 = vpop.f32.mrf.mxu0 }
  0xef   : > { %v748_v51 = vadd.f32 %v741_v37, %v676_v46 }
  0xf0   : > { %v672_v43 = vpop.f32.mrf.mxu0 }
  0xf1   : > { %v677_v52 = vadd.f32 %v672_v43, %v512_v48 }
  0xf2   : > { %v1510_v44 = vpop.f32.mrf.mxu0 }
  0xf3   : > { %v749_v58 = vadd.f32 %v744_v39, %v677_v52 }
  0xf4   : > { %v813_v45 = vpop.f32.mrf.mxu0 }
  0xf5   : > { %v820_v55 = vadd.f32 %v813_v45, %v748_v51 }
  0xf6   : > { %v1521_v47 = vpop.f32.mrf.mxu0 }
  0xf7   : > { %v969_v49 = vpop.f32.mrf.mxu1 }
  0xf8   : > { %v816_v50 = vpop.f32.mrf.mxu0  ;;  %v976_v19 = vadd.f32 %v969_v49, %v820_v55 }
  0xf9   : > { %v1527_v53 = vpop.f32.mrf.mxu1  ;;  %v821_v60 = vadd.f32 %v816_v50, %v749_v58 }
  0xfa   : > { %v1522_v54 = vpop.f32.mrf.mxu0 }
  0xfb   : > { %v972_v56 = vpop.f32.mrf.mxu1 }
  0xfc   : > { %v1041_v57 = vpop.f32.mrf.mxu0  ;;  %v977_v2 = vadd.f32 %v972_v56, %v821_v60 }
  0xfd   : > { %v1528_v20 = vpop.f32.mrf.mxu1  ;;  %v1048_v63 = vadd.f32 %v1041_v57, %v976_v19 }
  0xfe   : > { %v1533_v59 = vpop.f32.mrf.mxu0 }
  0xff   : > { %v1113_v61 = vpop.f32.mrf.mxu1 }
 0x100   : > { %v1044_v62 = vpop.f32.mrf.mxu0  ;;  %v1120_v5 = vadd.f32 %v1113_v61, %v1048_v63 }
 0x101   : > { %v1539_v0 = vpop.f32.mrf.mxu1  ;;  %v1049_v6 = vadd.f32 %v1044_v62, %v977_v2 }
 0x102   : > { %v1534_v1 = vpop.f32.mrf.mxu0 }
 0x103   : > { %v1116_v4 = vpop.f32.mrf.mxu1 }
 0x104   : > { %v1121_v13 = vadd.f32 %v1116_v4, %v1049_v6 }
 0x105   : > { %v1540_v8 = vpop.f32.mrf.mxu1  ;;  %v1269_v9 = vpop.f32.mrf.mxu0 }
 0x106   : > { %v1276_v11 = vadd.f32 %v1269_v9, %v1120_v5 }
 0x107   : > { %v1545_v12 = vpop.f32.mrf.mxu0 }
 0x108   : > { %v1285_v14 = vadd.f32 %v1471_v10, %v1276_v11 }
 0x109   : > { %v1272_v15 = vpop.f32.mrf.mxu0 }
 0x10a   : > { %v1289_v16 = vcombine.high %v1285_v14, %v1285_v14  ;;  %v1293_v21 = vpack.c.bf16 %v1285_v14, %v1285_v14  ;;  %v1277_v22 = vadd.f32 %v1272_v15, %v1121_v13 }
 0x10b   : > { %v1546_v23 = vpop.f32.mrf.mxu0 }
 0x10c   : > { %v1294_v24 = vpack.c.bf16 %v1289_v16, %v1289_v16  ;;  %1298 = vst.msk [vmem:[%s333_s17] sm:$0x3] %vm1297_vm10, %v1293_v21  ;;  %v1286_v18 = vadd.f32 %v1471_v10, %v1277_v22 }
 0x10e   : > { %1299 = vst.msk [vmem:[%s333_s17 + $0x2] sm:$0x3] %vm1297_vm10, %v1294_v24  ;;  %v1290_v25 = vcombine.high %v1286_v18, %v1286_v18  ;;  %v1295_v26 = vpack.c.bf16 %v1286_v18, %v1286_v18 }
 0x110   : > { %v1296_v3 = vpack.c.bf16 %v1290_v25, %v1290_v25  ;;  %1300 = vst.msk [vmem:[%s333_s17 + $0x4] sm:$0x3] %vm1297_vm10, %v1295_v26 }
 0x112   : > { %1301 = vst.msk [vmem:[%s333_s17 + $0x6] sm:$0x3] %vm1297_vm10, %v1296_v3 }
 0x113 PF: > { %s16_s23 = sadd.s32 1, %s1615_s23   ;;  %s1909_s21 = smov %s1611_s22 }
 0x114   : > { %p13_p5 = scmp.ge.s32.totalorder %s16_s23, 4   ;;  %s1910_s22 = smov %s1912_s24 }
 0x116   :  { %15 = sbr.rel (!%p13_p5) target bundleno = 2 (0x2), region = 97 }

// kernel: _lambda_.27
= control target key start
LH: loop header
LB: loop body
LE: loop exit
PB: predicated region body
PF: predicated region fallthrough
CT: control target
= control target key end

     0   :  { %s299_s9 = smov 0   ;;  %s313_s0 = inlined_call_operand.vmem [shape: bf16[2,16,16], index: 0, kind: input, shape index: {}]   ;;  %s314_s1 = inlined_call_operand.vmem [shape: f32[2,1,16], index: 1, kind: input, shape index: {}]   ;;  %s315_s2 = inlined_call_operand.vmem [shape: bf16[2,16,16], index: 2, kind: output, shape index: {}]  }
   0x1 LB: > { %s246_s10 = sadd.s32 4294967295, %s282_s9   ;;  %p250_p0 = scmp.ge.s32.totalorder %s282_s9, 1  ;;  %s282_s9 = sphi %s299_s9, %s12_s9  }
   0x2   : > { %p120_p1 = scmp.lt.s32.totalorder %s282_s9, 3 }
   0x4   : > { %p121_p2 = pnand %p250_p0, %p120_p1 }
   0x5   : > { %p145_p3 = scmp.lt.s32.totalorder (!%p121_p2), %s246_s10, 1 }
   0x6   : > { %124 = sbr.rel (%p121_p2) target bundleno = 22 (0x16), region = 28 }
   0xb   : > { %s317_s10 = smov (!%p145_p3, %s246_s10), 1  ;;  %vm179_vm0 = vcmask 125952  }
   0xc   : > { %s260_s11 = sshll.u32 %s317_s10, 3  ;;  %s152_s14 = scalar_lea.vmem %s314_s1, %s317_s10 }
   0xd   : > { %s149_s17 = scalar_lea.vmem %s313_s0, %s260_s11  ;;  %v255_v1 = vld [vmem:[%s152_s14] ss:$0 sm:$0xff]  ;;  %s157_s20 = scalar_lea.vmem %s315_s2, %s260_s11 }
   0xe   : > { %v265_v0 = vld [vmem:[%s149_s17] sm:$0xff]  }
   0xf   : > { %v266_v2 = vunpack.c.l.bf16 %v265_v0  ;;  %v267_v3 = vunpack.c.h.bf16 %v265_v0 }
  0x11   : > { %v169_v4 = vmul.f32 %v266_v2, %v255_v1  ;;  %v170_v5 = vmul.f32 %v267_v3, %v255_v1 }
  0x13   : > { %v262_v6 = vpack.c.bf16 %v169_v4, %v169_v4  ;;  %v263_v7 = vpack.c.bf16 %v170_v5, %v170_v5 }
  0x15   : > { %180 = vst.msk [vmem:[%s157_s20] sm:$0xf] %vm179_vm0, %v262_v6  ;;  %181 = vst.msk [vmem:[%s157_s20 + $0x4] sm:$0xf] %vm179_vm0, %v263_v7 }
  0x16 PF: > { %s12_s9 = sadd.s32 1, %s282_s9  }
  0x17   : > { %p9_p4 = scmp.ge.s32.totalorder %s12_s9, 4  }
  0x19   :  { %11 = sbr.rel (!%p9_p4) target bundleno = 1 (0x1), region = 61 }

// kernel: _lambda_.25
= control target key start
LH: loop header
LB: loop body
LE: loop exit
PB: predicated region body
PF: predicated region fallthrough
CT: control target
= control target key end

     0   :  { %s1400_s18 = smov 0   ;;  %s1402_s19 = smov 0   ;;  %s1536_s0 = inlined_call_operand.vmem [shape: bf16[2,6,6,16], index: 0, kind: input, shape index: {}]   ;;  %s1537_s1 = inlined_call_operand.vmem [shape: f32[9,1,16], index: 1, kind: input, shape index: {}]   ;;  %s1538_s2 = inlined_call_operand.vmem [shape: f32[1,16], index: 2, kind: input, shape index: {}]   ;;  %s1539_s3 = inlined_call_operand.vmem [shape: bf16[16,16], index: 3, kind: input, shape index: {}]   ;;  %s1540_s4 = inlined_call_operand.vmem [shape: bf16[2,4,4,16], index: 4, kind: output, shape index: {0}]   ;;  %s1541_s5 = inlined_call_operand.vmem [shape: f32[2,1,16], index: 5, kind: output, shape index: {1}]  }
   0x1   :  { %s1404_s20 = smov 0  }
   0x2 LB: > { %s28_s21 = sadd.s32 1, %s1362_s19  ;;  %p1172_p0 = scmp.ge.s32.totalorder %s1366_s20, 1  ;;  %s1366_s20 = sphi %s1404_s20, %s16_s20   ;;  %s1362_s19 = sphi %s1402_s19, %s1543_s19   ;;  %s1358_s18 = sphi %s1400_s18, %s1542_s18  }
   0x3   : > { %p30_p1 = scmp.ge.s32.totalorder %s28_s21, 2  ;;  %p204_p2 = scmp.lt.s32.totalorder %s1366_s20, 3 }
   0x5   : > { %s1545_s21 = smov (%p30_p1, %s28_s21), 0  ;;  %p205_p3 = pnand %p1172_p0, %p204_p2 }
   0x6   : > { %p239_p4 = scmp.lt.s32.totalorder (!%p205_p3), %s1358_s18, 1 }
   0x7   : > { %208 = sbr.rel (%p205_p3) target bundleno = 248 (0xf8), region = 36 }
   0xc   : > { %v1336_v0 = vld [vmem:[%s1539_s3] sm:$0xff]   ;;  %v1368_v1 = vmov 0.0   ;;  %vm1369_vm0 = vmmov 0   ;;  %s1547_s18 = smov (!%p239_p4, %s1358_s18), 1  ;;  %vm412_vm1 = vcmask 130048   ;;  %vm263_vm2 = vcmask 122880  }
   0xd   : > { %1285 = vmatprep.subr.bf16.mxu0 %v1368_v1  ;;  %1291 = vmatprep.subr.bf16.mxu1 %v1368_v1  ;;  %v1337_v2 = vld [vmem:[%s1539_s3] sm:$0xff]   ;;  %s1309_s26 = smul.u32 24, %s1547_s18  ;;  %s1462_s11 = scalar_lea.vmem %s1541_s5, %s1547_s18  ;;  %vm457_vm3 = vcmask 125952   ;;  %vm467_vm4 = vcmask 123904  }
   0xe   : > { %1286 = vmatpush3.bf16.msra.mxu0 %v1336_v0  ;;  %1287 = vmatprep.mubr.msk.bf16.mxu0 %vm1369_vm0, %v1368_v1  ;;  %v1340_v19 = vld [vmem:[%s1539_s3] sm:$0xff]   ;;  %264 = vst.msk [vmem:[%s1462_s11] sm:$0x1] %vm263_vm2, %v1368_v1  ;;  %s1276_s12 = sshll.u32 %s1547_s18, 3 }
   0xf   : > { %1292 = vmatpush3.bf16.msra.mxu1 %v1337_v2  ;;  %1293 = vmatprep.mubr.msk.bf16.mxu1 %vm1369_vm0, %v1368_v1  ;;  %s1432_s29 = scalar_lea.vmem %s1536_s0, %s1309_s26  ;;  %v1341_v20 = vld [vmem:[%s1539_s3] sm:$0xff]   ;;  %s1510_s15 = scalar_lea.vmem %s1540_s4, %s1276_s12 }
  0x10   : > { %1297 = vmatprep.subr.bf16.mxu0 %v1368_v1  ;;  %1303 = vmatprep.subr.bf16.mxu1 %v1368_v1  ;;  %v1181_v3 = vld [vmem:[%s1432_s29 + $0x4] sm:$0x7]  ;;  %v1205_v4 = vld [vmem:[%s1432_s29 + $0x8] sm:$0x7]  ;;  %v1437_v5 = vld [vmem:[%s1432_s29 + $0xc] sm:$0x7] }
  0x11   : > { %v1196_v6 = vcombine.low %v1181_v3, %v1181_v3  ;;  %v1220_v7 = vcombine.low %v1205_v4, %v1205_v4  ;;  %v1440_v8 = vld [vmem:[%s1432_s29 + $0x10] sm:$0x7]  ;;  %v1245_v9 = vcombine.low %v1437_v5, %v1437_v5  ;;  %v267_v29 = vld [vmem:[%s1432_s29] sm:$0x7]  ;;  %v1199_v30 = vld [vmem:[%s1432_s29 + $0x4] sm:$0x7]  ;;  %v308_v48 = vunpack.c.l.bf16 %v1181_v3 }
  0x12   : > { %v1270_v10 = vcombine.low %v1440_v8, %v1440_v8  ;;  %v268_v31 = vunpack.c.l.bf16 %v267_v29  ;;  %v470_v32 = vunpack.c.l.bf16 %v1199_v30  ;;  %v1178_v33 = vld [vmem:[%s1537_s1 + $0x1] ss:$0 sm:$0xff]  ;;  %v1176_v34 = vld [vmem:[%s1537_s1] ss:$0 sm:$0xff]  ;;  %v1180_v36 = vld [vmem:[%s1537_s1 + $0x2] ss:$0 sm:$0xff]  ;;  %v505_v49 = vunpack.c.l.bf16 %v1205_v4 }
  0x13   : > { %v400_v11 = vshrl.u32 %v1196_v6, 16  ;;  %v402_v12 = vshll.u32 %v1196_v6, 16  ;;  %v591_v13 = vshrl.u32 %v1220_v7, 16  ;;  %v593_v14 = vshll.u32 %v1220_v7, 16  ;;  %v1224_v38 = vld [vmem:[%s1432_s29 + $0x8] sm:$0x7] }
  0x14   : > { %v782_v17 = vshll.u32 %v1245_v9, 16  ;;  %v971_v18 = vshll.u32 %v1270_v10, 16  ;;  %v780_v23 = vshrl.u32 %v1245_v9, 16  ;;  %v969_v25 = vshrl.u32 %v1270_v10, 16  ;;  %v1249_v41 = vld [vmem:[%s1432_s29 + $0xc] sm:$0x7] }
  0x15   : > { %v404_v15 = vrot.slane %v402_v12, 1  ;;  %v595_v16 = vrot.slane %v593_v14, 1  ;;  %v286_v35 = vmul.f32 %v1178_v33, %v268_v31  ;;  %v487_v37 = vmul.f32 %v1178_v33, %v470_v32  ;;  %v1183_v52 = vld [vmem:[%s1537_s1 + $0x3] ss:$0 sm:$0xff]  ;;  %v1185_v53 = vld [vmem:[%s1537_s1 + $0x4] ss:$0 sm:$0xff] }
  0x16   : > { %v784_v24 = vrot.slane %v782_v17, 1  ;;  %v973_v26 = vrot.slane %v971_v18, 1  ;;  %v276_v39 = vmul.f32 %v1176_v34, %v268_v31  ;;  %v299_v40 = vmul.f32 %v1180_v36, %v268_v31  ;;  %v1187_v61 = vld [vmem:[%s1537_s1 + $0x5] ss:$0 sm:$0xff]  ;;  %v1188_v12 = vld [vmem:[%s1432_s29 + $0x8] sm:$0x7] }
  0x17   : > { %v405_v21 = vor.u32 %v404_v15, %v400_v11  ;;  %v596_v22 = vor.u32 %v595_v16, %v591_v13  ;;  %v288_v42 = vrot.slane %v286_v35, 1  ;;  %v478_v43 = vmul.f32 %v1176_v34, %v470_v32  ;;  %v1212_v16 = vld [vmem:[%s1432_s29 + $0xc] sm:$0x7]  ;;  %v1192_v30 = vld [vmem:[%s1537_s1 + $0x7] ss:$0 sm:$0xff] }
  0x18   : > { %v785_v27 = vor.u32 %v784_v24, %v780_v23  ;;  %v974_v28 = vor.u32 %v973_v26, %v969_v25  ;;  %v489_v44 = vrot.slane %v487_v37, 1  ;;  %v499_v45 = vmul.f32 %v1180_v36, %v470_v32  ;;  %v1190_v26 = vld [vmem:[%s1537_s1 + $0x6] ss:$0 sm:$0xff] }
  0x19   : > { %1288 = vmatmul.mubr.msk.bf16.vlgmr.msra.gmra.mxu0 %vm412_vm1, %v405_v21  ;;  %1294 = vmatmul.mubr.msk.bf16.vlgmr.msra.gmra.mxu1 %vm412_vm1, %v596_v22  ;;  %v659_v46 = vunpack.c.l.bf16 %v1224_v38  ;;  %v848_v47 = vunpack.c.l.bf16 %v1249_v41  ;;  %v290_v50 = vadd.f32 %v288_v42, %v276_v39  ;;  %v301_v51 = vrot.slane %v299_v40, 2  ;;  %v1194_v40 = vld [vmem:[%s1537_s1 + $0x8] ss:$0 sm:$0xff] }
  0x1a   : > { %1298 = vmatpush3.bf16.msra.mxu0 %v1340_v19  ;;  %1304 = vmatpush3.bf16.msra.mxu1 %v1341_v20  ;;  %v491_v54 = vadd.f32 %v489_v44, %v478_v43  ;;  %v501_v55 = vrot.slane %v499_v45, 2  ;;  %v317_v58 = vmul.f32 %v1183_v52, %v308_v48  ;;  %v327_v59 = vmul.f32 %v1185_v53, %v308_v48  ;;  %v1237_v45 = vld [vmem:[%s1432_s29 + $0x10] sm:$0x7] }
  0x1b   : > { %1299 = vmatprep.mubr.msk.bf16.mxu0 %vm1369_vm0, %v1368_v1  ;;  %1305 = vmatprep.mubr.msk.bf16.mxu1 %vm1369_vm0, %v1368_v1  ;;  %v676_v56 = vmul.f32 %v1178_v33, %v659_v46  ;;  %v865_v57 = vmul.f32 %v1178_v33, %v848_v47  ;;  %v303_v60 = vadd.f32 %v301_v51, %v290_v50  ;;  %v694_v19 = vunpack.c.l.bf16 %v1437_v5 }
  0x1c   : > { %v503_v62 = vadd.f32 %v501_v55, %v491_v54  ;;  %v513_v63 = vmul.f32 %v1183_v52, %v505_v49  ;;  %v522_v0 = vmul.f32 %v1185_v53, %v505_v49  ;;  %v667_v1 = vmul.f32 %v1176_v34, %v659_v46 }
  0x1d   : > { %v678_v2 = vrot.slane %v676_v56, 1  ;;  %v688_v3 = vmul.f32 %v1180_v36, %v659_v46  ;;  %v856_v4 = vmul.f32 %v1176_v34, %v848_v47  ;;  %v867_v6 = vrot.slane %v865_v57, 1 }
  0x1e   : > { %v877_v7 = vmul.f32 %v1180_v36, %v848_v47  ;;  %v329_v9 = vrot.slane %v327_v59, 1  ;;  %v340_v10 = vmul.f32 %v1187_v61, %v308_v48  ;;  %v318_v11 = vadd.f32 %v317_v58, %v303_v60 }
  0x1f   : > { %v514_v13 = vadd.f32 %v513_v63, %v503_v62  ;;  %v524_v14 = vrot.slane %v522_v0, 1  ;;  %v534_v15 = vmul.f32 %v1187_v61, %v505_v49  ;;  %v680_v17 = vadd.f32 %v678_v2, %v667_v1  ;;  %v1262_v49 = vld [vmem:[%s1432_s29 + $0x14] sm:$0x7] }
  0x20   : > { %v690_v18 = vrot.slane %v688_v3, 2  ;;  %v869_v20 = vadd.f32 %v867_v6, %v856_v4  ;;  %v879_v21 = vrot.slane %v877_v7, 2  ;;  %v883_v22 = vunpack.c.l.bf16 %v1440_v8 }
  0x21   : > { %1300 = vmatmul.mubr.msk.bf16.vlgmr.msra.gmra.mxu0 %vm412_vm1, %v785_v27  ;;  %1306 = vmatmul.mubr.msk.bf16.vlgmr.msra.gmra.mxu1 %vm412_vm1, %v974_v28  ;;  %v342_v23 = vrot.slane %v340_v10, 2  ;;  %v349_v24 = vunpack.c.l.bf16 %v1188_v12  ;;  %v331_v25 = vadd.f32 %v329_v9, %v318_v11  ;;  %v526_v27 = vadd.f32 %v524_v14, %v514_v13  ;;  %v1195_v14 = vld [vmem:[%s1538_s2] ss:$0 sm:$0xff] }
  0x22   : > { %v536_v28 = vrot.slane %v534_v15, 2  ;;  %v543_v29 = vunpack.c.l.bf16 %v1212_v16  ;;  %v692_v31 = vadd.f32 %v690_v18, %v680_v17  ;;  %v702_v5 = vmul.f32 %v1183_v52, %v694_v19 }
  0x23   : > { %v711_v32 = vmul.f32 %v1185_v53, %v694_v19  ;;  %v881_v33 = vadd.f32 %v879_v21, %v869_v20  ;;  %v891_v8 = vmul.f32 %v1183_v52, %v883_v22  ;;  %v900_v34 = vmul.f32 %v1185_v53, %v883_v22 }
  0x24   : > { %v358_v35 = vmul.f32 %v1190_v26, %v349_v24  ;;  %v344_v36 = vadd.f32 %v342_v23, %v331_v25  ;;  %v368_v37 = vmul.f32 %v1192_v30, %v349_v24  ;;  %v538_v38 = vadd.f32 %v536_v28, %v526_v27 }
  0x25   : > { %v551_v39 = vmul.f32 %v1190_v26, %v543_v29  ;;  %v560_v41 = vmul.f32 %v1192_v30, %v543_v29  ;;  %v703_v42 = vadd.f32 %v702_v5, %v692_v31  ;;  %v723_v43 = vmul.f32 %v1187_v61, %v694_v19 }
  0x26   : > { %v713_v44 = vrot.slane %v711_v32, 1  ;;  %v892_v46 = vadd.f32 %v891_v8, %v881_v33  ;;  %v902_v47 = vrot.slane %v900_v34, 1  ;;  %v912_v48 = vmul.f32 %v1187_v61, %v883_v22 }
  0x27   : > { %v359_v50 = vadd.f32 %v358_v35, %v344_v36  ;;  %v370_v51 = vrot.slane %v368_v37, 1  ;;  %v381_v52 = vmul.f32 %v1194_v40, %v349_v24  ;;  %v552_v53 = vadd.f32 %v551_v39, %v538_v38 }
  0x28   : > { %v562_v54 = vrot.slane %v560_v41, 1  ;;  %v572_v55 = vmul.f32 %v1194_v40, %v543_v29  ;;  %v725_v56 = vrot.slane %v723_v43, 2  ;;  %v732_v57 = vunpack.c.l.bf16 %v1237_v45 }
  0x29   : > { %v715_v58 = vadd.f32 %v713_v44, %v703_v42  ;;  %v904_v59 = vadd.f32 %v902_v47, %v892_v46  ;;  %v914_v60 = vrot.slane %v912_v48, 2  ;;  %v921_v62 = vunpack.c.l.bf16 %v1262_v49 }
  0x2a   : > { %v372_v63 = vadd.f32 %v370_v51, %v359_v50  ;;  %v383_v0 = vrot.slane %v381_v52, 2  ;;  %v564_v1 = vadd.f32 %v562_v54, %v552_v53  ;;  %v574_v2 = vrot.slane %v572_v55, 2 }
  0x2b   : > { %v740_v3 = vmul.f32 %v1190_v26, %v732_v57  ;;  %v749_v4 = vmul.f32 %v1192_v30, %v732_v57  ;;  %v727_v61 = vadd.f32 %v725_v56, %v715_v58  ;;  %v916_v6 = vadd.f32 %v914_v60, %v904_v59 }
  0x2c   : > { %v929_v7 = vmul.f32 %v1190_v26, %v921_v62  ;;  %v938_v9 = vmul.f32 %v1192_v30, %v921_v62  ;;  %v385_v10 = vadd.f32 %v383_v0, %v372_v63  ;;  %v576_v11 = vadd.f32 %v574_v2, %v564_v1 }
  0x2d   : > { %v751_v12 = vrot.slane %v749_v4, 1  ;;  %v761_v13 = vmul.f32 %v1194_v40, %v732_v57  ;;  %v741_v15 = vadd.f32 %v740_v3, %v727_v61  ;;  %v950_v18 = vmul.f32 %v1194_v40, %v921_v62 }
  0x2e   : > { %v930_v16 = vadd.f32 %v929_v7, %v916_v6  ;;  %v940_v17 = vrot.slane %v938_v9, 1  ;;  %v393_v19 = vadd.f32 %v1195_v14, %v385_v10  ;;  %v584_v20 = vadd.f32 %v1195_v14, %v576_v11 }
  0x2f   : > { %v753_v21 = vadd.f32 %v751_v12, %v741_v15  ;;  %v763_v22 = vrot.slane %v761_v13, 2  ;;  %v952_v24 = vrot.slane %v950_v18, 2 }
  0x30   : > { %v942_v23 = vadd.f32 %v940_v17, %v930_v16 }
  0x31   : > { %v765_v29 = vadd.f32 %v763_v22, %v753_v21 }
  0x32   : > { %v954_v30 = vadd.f32 %v952_v24, %v942_v23 }
  0x33   : > { %v773_v39 = vadd.f32 %v1195_v14, %v765_v29 }
  0x34   : > { %v962_v40 = vadd.f32 %v1195_v14, %v954_v30 }
  0xd9   : > { %v450_v25 = vpop.f32.mrf.mxu0  ;;  %v640_v26 = vpop.f32.mrf.mxu1 }
  0xda   : > { %v456_v27 = vadd.f32 %v450_v25, %v393_v19  ;;  %v646_v28 = vadd.f32 %v640_v26, %v584_v20  ;;  %v1036_v19 = vld [vmem:[%s1462_s11] sm:$0x1] }
  0xdb   : > { %v1289_v31 = vpop.f32.mrf.mxu0  ;;  %v1295_v5 = vpop.f32.mrf.mxu1 }
  0xdc   : > { %v458_v32 = vsel %vm457_vm3, %v456_v27, 0.0  ;;  %v466_v33 = vpack.c.bf16 %v456_v27, %v456_v27  ;;  %v647_v8 = vsel %vm457_vm3, %v646_v28, 0.0  ;;  %v655_v34 = vpack.c.bf16 %v646_v28, %v646_v28 }
  0xdd   : > { %v459_v35 = vrot.slane %v458_v32, 4  ;;  %v648_v36 = vrot.slane %v647_v8, 4  ;;  %v453_v37 = vpop.f32.mrf.mxu0  ;;  %v643_v38 = vpop.f32.mrf.mxu1 }
  0xde   : > { %468 = vst.msk [vmem:[%s1510_s15] sm:$0x3] %vm467_vm4, %v466_v33  ;;  %1223 = vst.msk [vmem:[%s1510_s15 + $0x2] sm:$0x3] %vm467_vm4, %v655_v34 }
  0xdf   : > { %v460_v41 = vadd.f32 %v459_v35, %v458_v32  ;;  %v649_v42 = vadd.f32 %v648_v36, %v647_v8  ;;  %v1290_v43 = vpop.f32.mrf.mxu0  ;;  %v1296_v44 = vpop.f32.mrf.mxu1 }
  0xe1   : > { %v461_v45 = vrot.slane %v460_v41, 2  ;;  %v650_v46 = vrot.slane %v649_v42, 2  ;;  %v829_v47 = vpop.f32.mrf.mxu0  ;;  %v1018_v48 = vpop.f32.mrf.mxu1 }
  0xe2   : > { %v835_v49 = vadd.f32 %v829_v47, %v773_v39  ;;  %v1024_v50 = vadd.f32 %v1018_v48, %v962_v40 }
  0xe3   : > { %v462_v51 = vadd.f32 %v461_v45, %v460_v41  ;;  %v651_v52 = vadd.f32 %v650_v46, %v649_v42  ;;  %v1301_v53 = vpop.f32.mrf.mxu0  ;;  %v1307_v54 = vpop.f32.mrf.mxu1 }
  0xe4   : > { %v836_v55 = vsel %vm457_vm3, %v835_v49, 0.0  ;;  %v844_v56 = vpack.c.bf16 %v835_v49, %v835_v49  ;;  %v1025_v57 = vsel %vm457_vm3, %v1024_v50, 0.0  ;;  %v1033_v58 = vpack.c.bf16 %v1024_v50, %v1024_v50 }
  0xe5   : > { %v463_v59 = vrot.slane %v462_v51, 1  ;;  %v652_v60 = vrot.slane %v651_v52, 1  ;;  %v837_v62 = vrot.slane %v836_v55, 4  ;;  %v1026_v63 = vrot.slane %v1025_v57, 4  ;;  %v832_v0 = vpop.f32.mrf.mxu0  ;;  %v1021_v1 = vpop.f32.mrf.mxu1 }
  0xe6   : > { %1248 = vst.msk [vmem:[%s1510_s15 + $0x4] sm:$0x3] %vm467_vm4, %v844_v56  ;;  %1273 = vst.msk [vmem:[%s1510_s15 + $0x6] sm:$0x3] %vm467_vm4, %v1033_v58 }
  0xe7   : > { %v464_v2 = vadd.f32 %v463_v59, %v462_v51  ;;  %v653_v3 = vadd.f32 %v652_v60, %v651_v52  ;;  %v838_v4 = vadd.f32 %v837_v62, %v836_v55  ;;  %v1027_v61 = vadd.f32 %v1026_v63, %v1025_v57  ;;  %v1302_v6 = vpop.f32.mrf.mxu0  ;;  %v1308_v7 = vpop.f32.mrf.mxu1 }
  0xe9   : > { %v654_v9 = vadd.f32 %v653_v3, %v464_v2  ;;  %v839_v10 = vrot.slane %v838_v4, 2  ;;  %v1028_v11 = vrot.slane %v1027_v61, 2 }
  0xeb   : > { %v840_v12 = vadd.f32 %v839_v10, %v838_v4  ;;  %v1029_v13 = vadd.f32 %v1028_v11, %v1027_v61 }
  0xed   : > { %v841_v14 = vrot.slane %v840_v12, 1  ;;  %v1030_v15 = vrot.slane %v1029_v13, 1 }
  0xef   : > { %v842_v16 = vadd.f32 %v841_v14, %v840_v12  ;;  %v1031_v18 = vadd.f32 %v1030_v15, %v1029_v13 }
  0xf1   : > { %v843_v17 = vadd.f32 %v842_v16, %v654_v9 }
  0xf3   : > { %v1032_v20 = vadd.f32 %v1031_v18, %v843_v17 }
  0xf5   : > { %v1037_v21 = vadd.f32 %v1036_v19, %v1032_v20 }
  0xf7   : > { %1039 = vst.msk [vmem:[%s1462_s11] sm:$0x1] %vm263_vm2, %v1037_v21 }
  0xf8 PF: > { %s16_s20 = sadd.s32 1, %s1366_s20   ;;  %s1542_s18 = smov %s1362_s19 }
  0xf9   : > { %p13_p5 = scmp.ge.s32.totalorder %s16_s20, 4   ;;  %s1543_s19 = smov %s1545_s21 }
  0xfb   :  { %15 = sbr.rel (!%p13_p5) target bundleno = 2 (0x2), region = 99 }

// kernel: _lambda_.23
= control target key start
LH: loop header
LB: loop body
LE: loop exit
PB: predicated region body
PF: predicated region fallthrough
CT: control target
= control target key end

     0   :  { %s3591_s21 = smov 0   ;;  %s3593_s22 = smov 0   ;;  %s5383_s0 = inlined_call_operand.vmem [shape: bf16[2,9,9,3], index: 0, kind: input, shape index: {}]   ;;  %s5384_s1 = inlined_call_operand.vmem [shape: bf16[2,9,9,3], index: 1, kind: input, shape index: {}]   ;;  %s5385_s2 = inlined_call_operand.vmem [shape: bf16[2,9,9,3], index: 2, kind: input, shape index: {}]   ;;  %s5386_s3 = inlined_call_operand.vmem [shape: bf16[2,9,9,3], index: 3, kind: input, shape index: {}]   ;;  %s5387_s4 = inlined_call_operand.vmem [shape: f32[9,3,1,8], index: 4, kind: input, shape index: {}]   ;;  %s5388_s5 = inlined_call_operand.vmem [shape: f32[1,8], index: 5, kind: input, shape index: {}]   ;;  %s5389_s6 = inlined_call_operand.vmem [shape: bf16[2,8,8,8], index: 6, kind: output, shape index: {}]  }
   0x1   :  { %s3595_s23 = smov 0  }
   0x2 LB: > { %s28_s24 = sadd.s32 1, %s3547_s22  ;;  %p2824_p0 = scmp.ge.s32.totalorder %s3551_s23, 1  ;;  %s3551_s23 = sphi %s3595_s23, %s16_s23   ;;  %s3547_s22 = sphi %s3593_s22, %s5613_s22   ;;  %s3543_s21 = sphi %s3591_s21, %s5612_s21  }
   0x3   : > { %p30_p1 = scmp.ge.s32.totalorder %s28_s24, 2  ;;  %p256_p2 = scmp.lt.s32.totalorder %s3551_s23, 3 }
   0x5   : > { %s5615_s24 = smov (%p30_p1, %s28_s24), 0  ;;  %p257_p3 = pnand %p2824_p0, %p256_p2 }
   0x7   : > { %260 = sbr.rel (%p257_p3) target bundleno = 486 (0x1e6), region = 44 }
   0xc   : > { %p305_p4 = scmp.lt.s32.totalorder %s3543_s21, 1  ;;  %v5396_v0 = vmov 2   ;;  %v5390_v1 = vmov 0   ;;  %v5400_v28 = vmov 1   ;;  %vm878_vm0 = vcmask 1046528  }
   0xd   : > { %2968 = vset.pattern.permute.xlu0 %v5396_v0  ;;  %2940 = vset.pattern.permute.xlu1 %v5390_v1  ;;  %vm2678_vm1 = vcmask 60416  }
   0xe   : > { %s5617_s21 = smov (!%p305_p4, %s3543_s21), 1 }
   0xf   : > { %s3614_s25 = smul.u32 72, %s5617_s21 }
  0x11   : > { %s3620_s28 = scalar_lea.vmem %s5383_s0, %s3614_s25  ;;  %s3626_s7 = scalar_lea.vmem %s5384_s1, %s3614_s25 }
  0x12   : > { %v347_v2 = vld [vmem:[%s3620_s28 + $0x20] ss:$8 sps:$4 sm:$0xff]   ;;  %v343_v3 = vld [vmem:[%s3620_s28 + $0x10] ss:$8 sps:$4 sm:$0xff]   ;;  %v344_v21 = vld [vmem:[%s3620_s28 + $0x14] sm:$0x1]  ;;  %s3646_s10 = scalar_lea.vmem %s5385_s2, %s3614_s25  ;;  %s3664_s13 = scalar_lea.vmem %s5386_s3, %s3614_s25 }
  0x13   : > { %v351_v4 = vld [vmem:[%s3620_s28 + $0x30] ss:$8 sps:$4 sm:$0xff]   ;;  %v427_v5 = vunpack.c.l.bf16 %v347_v2  ;;  %v428_v6 = vunpack.c.h.bf16 %v347_v2  ;;  %v425_v7 = vunpack.c.l.bf16 %v343_v3  ;;  %v426_v8 = vunpack.c.h.bf16 %v343_v3  ;;  %v357_v9 = vld [vmem:[%s3626_s7] ss:$8 sps:$4 sm:$0xff]   ;;  %v346_v22 = vld [vmem:[%s3620_s28 + $0x1c] sm:$0x1] }
  0x14   : > { %v429_v10 = vunpack.c.l.bf16 %v351_v4  ;;  %v430_v11 = vunpack.c.h.bf16 %v351_v4  ;;  %v606_v12 = vunpack.c.l.bf16 %v357_v9  ;;  %v607_v13 = vunpack.c.h.bf16 %v357_v9  ;;  %v363_v14 = vld [vmem:[%s3626_s7 + $0x30] ss:$8 sps:$4 sm:$0xff]   ;;  %v367_v26 = vld [vmem:[%s3646_s10] ss:$8 sps:$4 sm:$0xff]   ;;  %v368_v44 = vld [vmem:[%s3646_s10 + $0x4] sm:$0x1] }
  0x15   : > { %v2941_v15 = vpack.i.bf16 %v428_v6, %v427_v5  ;;  %v3633_v16 = vpack.i.bf16 %v426_v8, %v425_v7  ;;  %v612_v19 = vunpack.c.l.bf16 %v363_v14  ;;  %v613_v20 = vunpack.c.h.bf16 %v363_v14  ;;  %v339_v27 = vld [vmem:[%s3620_s28] ss:$8 sps:$4 sm:$0xff]   ;;  %v379_v32 = vld [vmem:[%s3646_s10 + $0x30] ss:$8 sps:$4 sm:$0xff]   ;;  %v370_v45 = vld [vmem:[%s3646_s10 + $0xc] sm:$0x1] }
  0x16   : > { %v3636_v17 = vpack.i.bf16 %v430_v11, %v429_v10  ;;  %v3638_v18 = vpack.i.bf16 %v607_v13, %v606_v12  ;;  %v792_v24 = vunpack.c.l.bf16 %v344_v21  ;;  %v793_v25 = vunpack.c.l.bf16 %v346_v22  ;;  %v387_v38 = vld [vmem:[%s3664_s13 + $0x10] ss:$8 sps:$4 sm:$0xff]   ;;  %v380_v52 = vld [vmem:[%s3646_s10 + $0x34] sm:$0x1]  ;;  %v382_v53 = vld [vmem:[%s3646_s10 + $0x3c] sm:$0x1] }
  0x17   : > { %2942 = vperm.xlu1 %2940, %v2941_v15   ;;  %2970 = vperm.xlu0 %2968, %v3633_v16   ;;  %v3650_v23 = vpack.i.bf16 %v613_v20, %v612_v19  ;;  %v1143_v30 = vunpack.c.l.bf16 %v367_v26  ;;  %v1144_v31 = vunpack.c.h.bf16 %v367_v26  ;;  %v423_v33 = vunpack.c.l.bf16 %v339_v27  ;;  %v359_v40 = vld [vmem:[%s3626_s7 + $0x10] ss:$8 sps:$4 sm:$0xff]   ;;  %v361_v57 = vld [vmem:[%s3626_s7 + $0x20] ss:$8 sps:$4 sm:$0xff]   ;;  %v340_v4 = vld [vmem:[%s3620_s28 + $0x4] sm:$0x1] }
  0x18   : > { %v3656_v29 = vpack.i.bf16 %v793_v25, %v792_v24  ;;  %v424_v34 = vunpack.c.h.bf16 %v339_v27  ;;  %v1149_v36 = vunpack.c.l.bf16 %v379_v32  ;;  %v1150_v37 = vunpack.c.h.bf16 %v379_v32  ;;  %v2835_v58 = vld [vmem:[%s3620_s28 + $0x18] ss:$8 sps:$4 sm:$0xff]   ;;  %v342_v5 = vld [vmem:[%s3620_s28 + $0xc] sm:$0x1]  ;;  %v348_v8 = vld [vmem:[%s3620_s28 + $0x24] sm:$0x1] }
  0x19   : > { %v3667_v35 = vpack.i.bf16 %v1144_v31, %v1143_v30  ;;  %v1329_v42 = vunpack.c.l.bf16 %v387_v38  ;;  %v1330_v43 = vunpack.c.h.bf16 %v387_v38  ;;  %v608_v46 = vunpack.c.l.bf16 %v359_v40  ;;  %v350_v9 = vld [vmem:[%s3620_s28 + $0x2c] sm:$0x1]  ;;  %v352_v13 = vld [vmem:[%s3620_s28 + $0x34] sm:$0x1]  ;;  %v354_v14 = vld [vmem:[%s3620_s28 + $0x3c] sm:$0x1] }
  0x1a   : > { %v3670_v39 = vpack.i.bf16 %v424_v34, %v423_v33  ;;  %v3674_v41 = vpack.i.bf16 %v1150_v37, %v1149_v36  ;;  %v609_v47 = vunpack.c.h.bf16 %v359_v40  ;;  %v1511_v48 = vunpack.c.l.bf16 %v368_v44  ;;  %v2847_v20 = vld [vmem:[%s3626_s7 + $0x8] ss:$8 sps:$4 sm:$0xff]   ;;  %v2832_v27 = vld [vmem:[%s3620_s28 + $0xc] sm:$0x1]  ;;  %v2834_v30 = vld [vmem:[%s3620_s28 + $0x14] sm:$0x1] }
  0x1b   : > { %2947 = vperm.xlu1 %2940, %v3636_v17   ;;  %3012 = vperm.xlu0 %2968, %v3638_v18   ;;  %v1512_v49 = vunpack.c.l.bf16 %v370_v45  ;;  %v3681_v50 = vpack.i.bf16 %v1330_v43, %v1329_v42  ;;  %v1517_v55 = vunpack.c.l.bf16 %v380_v52  ;;  %v1518_v56 = vunpack.c.l.bf16 %v382_v53  ;;  %v2844_v34 = vld [vmem:[%s3620_s28 + $0x3c] sm:$0x1]  ;;  %v2846_v36 = vld [vmem:[%s3620_s28 + $0x44] sm:$0x1]  ;;  %v371_v37 = vld [vmem:[%s3646_s10 + $0x10] ss:$8 sps:$4 sm:$0xff]  }
  0x1c   : > { %v3683_v51 = vpack.i.bf16 %v609_v47, %v608_v46  ;;  %v610_v59 = vunpack.c.l.bf16 %v361_v57  ;;  %v611_v60 = vunpack.c.h.bf16 %v361_v57  ;;  %v1865_v62 = vunpack.c.l.bf16 %v2835_v58  ;;  %v385_v57 = vld [vmem:[%s3664_s13] ss:$8 sps:$4 sm:$0xff]  }
  0x1d   : > { %v3688_v54 = vpack.i.bf16 %v1512_v49, %v1511_v48  ;;  %v3694_v61 = vpack.i.bf16 %v1518_v56, %v1517_v55  ;;  %v1866_v63 = vunpack.c.h.bf16 %v2835_v58  ;;  %v790_v6 = vunpack.c.l.bf16 %v340_v4  ;;  %v375_v48 = vld [vmem:[%s3646_s10 + $0x20] ss:$8 sps:$4 sm:$0xff]  }
  0x1e   : > { %v2990_v2 = vpack.i.bf16 %v611_v60, %v610_v59  ;;  %v791_v7 = vunpack.c.l.bf16 %v342_v5  ;;  %v794_v11 = vunpack.c.l.bf16 %v348_v8  ;;  %v795_v12 = vunpack.c.l.bf16 %v350_v9  ;;  %v391_v59 = vld [vmem:[%s3664_s13 + $0x30] ss:$8 sps:$4 sm:$0xff]  }
  0x1f   : > { %2951 = vset.pattern.permute.xlu1 %v5400_v28  ;;  %3028 = vperm.xlu0 %2968, %v3650_v23   ;;  %v3699_v3 = vpack.i.bf16 %v1866_v63, %v1865_v62  ;;  %v2047_v21 = vunpack.c.l.bf16 %v2847_v20  ;;  %v2048_v22 = vunpack.c.h.bf16 %v2847_v20  ;;  %v2231_v32 = vunpack.c.l.bf16 %v2832_v27  ;;  %v372_v63 = vld [vmem:[%s3646_s10 + $0x14] sm:$0x1] }
  0x20   : > { %2953 = vperm.xlu1 %2951, %v3633_v16   ;;  %v3717_v10 = vpack.i.bf16 %v791_v7, %v790_v6  ;;  %v2232_v33 = vunpack.c.l.bf16 %v2834_v30  ;;  %v2237_v42 = vunpack.c.l.bf16 %v2844_v34  ;;  %v2238_v45 = vunpack.c.l.bf16 %v2846_v36 }
  0x21   : > { %v3733_v24 = vpack.i.bf16 %v2048_v22, %v2047_v21  ;;  %v1145_v46 = vunpack.c.l.bf16 %v371_v37  ;;  %v1146_v47 = vunpack.c.h.bf16 %v371_v37  ;;  %v1147_v53 = vunpack.c.l.bf16 %v375_v48 }
  0x22   : > { %v3749_v44 = vpack.i.bf16 %v2232_v33, %v2231_v32  ;;  %v3753_v49 = vpack.i.bf16 %v2238_v45, %v2237_v42  ;;  %v1148_v55 = vunpack.c.h.bf16 %v375_v48  ;;  %v1328_v58 = vunpack.c.h.bf16 %v385_v57 }
  0x23   : > { %3066 = vperm.xlu0 %2968, %v3656_v29   ;;  %5453 = vst [vmem:[#allocation2_spill] sm:$0xff] %v3733_v24  ;;  %v3081_v52 = vpack.i.bf16 %v1146_v47, %v1145_v46  ;;  %v1334_v60 = vunpack.c.h.bf16 %v391_v59  ;;  %v1513_v7 = vunpack.c.l.bf16 %v372_v63 }
  0x24   : > { %2958 = vperm.xlu1 %2951, %v2941_v15   ;;  %5455 = vst [vmem:[#allocation4_spill] sm:$0xff] %v3749_v44  ;;  %5456 = vst [vmem:[#allocation5_spill] sm:$0xff] %v3753_v49  ;;  %v3086_v56 = vpack.i.bf16 %v1148_v55, %v1147_v53 }
  0x27   : > { %3108 = vperm.xlu0 %2968, %v3667_v35  }
  0x28   : > { %2962 = vset.pattern.permute.xlu1 %v5396_v0 }
  0x29   : > { %2964 = vperm.xlu1 %2962, %v3670_v39  }
  0x2b   : > { %3124 = vperm.xlu0 %2968, %v3674_v41  }
  0x2d   : > { %2975 = vperm.xlu1 %2962, %v2941_v15   ;;  %v3038_v15 = vpack.i.bf16 %v795_v12, %v794_v11 }
  0x2f   : > { %3162 = vperm.xlu0 %2968, %v3681_v50  }
  0x31   : > { %2980 = vperm.xlu1 %2962, %v3636_v17  }
  0x33   : > { %3204 = vperm.xlu0 %2968, %v3688_v54  }
  0x35   : > { %2984 = vset.pattern.permute.xlu1 %v5390_v1 }
  0x36   : > { %2986 = vperm.xlu1 %2984, %v3683_v51  }
  0x37   : > { %3220 = vperm.xlu0 %2968, %v3694_v61  }
  0x3a   : > { %2991 = vperm.xlu1 %2984, %v2990_v2  }
  0x3b   : > { %3258 = vperm.xlu0 %2968, %v3699_v3  }
  0x3e   : > { %2995 = vset.pattern.permute.xlu1 %v5400_v28 }
  0x3f   : > { %3262 = vset.pattern.permute.xlu0 %v5390_v1  ;;  %2997 = vperm.xlu1 %2995, %v3638_v18  }
  0x40   : > { %3264 = vperm.xlu0 %3262, %v3670_v39  }
  0x43   : > { %3002 = vperm.xlu1 %2995, %v2990_v2  }
  0x44   : > { %3269 = vperm.xlu0 %3262, %v3633_v16   ;;  %v796_v16 = vunpack.c.l.bf16 %v352_v13  ;;  %v2843_v13 = vld [vmem:[%s3620_s28 + $0x38] ss:$8 sps:$4 sm:$0xff]  }
  0x45   : > { %v1869_v20 = vunpack.c.l.bf16 %v2843_v13  ;;  %v1870_v21 = vunpack.c.h.bf16 %v2843_v13 }
  0x47   : > { %3007 = vperm.xlu1 %2995, %v3650_v23   ;;  %v3815_v32 = vpack.i.bf16 %v1870_v21, %v1869_v20 }
  0x48   : > { %3274 = vperm.xlu0 %3262, %v3638_v18   ;;  %v797_v18 = vunpack.c.l.bf16 %v354_v14 }
  0x4a   : > { %v3043_v19 = vpack.i.bf16 %v797_v18, %v796_v16 }
  0x4b   : > { %3016 = vset.pattern.permute.xlu1 %v5396_v0 }
  0x4c   : > { %3279 = vperm.xlu0 %3262, %v3650_v23   ;;  %3018 = vperm.xlu1 %3016, %v3683_v51   ;;  %v2853_v23 = vld [vmem:[%s3626_s7 + $0x38] ss:$8 sps:$4 sm:$0xff]  }
  0x4d   : > { %v2053_v25 = vunpack.c.l.bf16 %v2853_v23  ;;  %v2054_v26 = vunpack.c.h.bf16 %v2853_v23 }
  0x4f   : > { %v3741_v31 = vpack.i.bf16 %v2054_v26, %v2053_v25  ;;  %v2849_v25 = vld [vmem:[%s3626_s7 + $0x18] ss:$8 sps:$4 sm:$0xff]  }
  0x50   : > { %3284 = vperm.xlu0 %3262, %v3656_v29   ;;  %3023 = vperm.xlu1 %3016, %v2990_v2   ;;  %v374_v2 = vld [vmem:[%s3646_s10 + $0x1c] sm:$0x1]  ;;  %v2049_v33 = vunpack.c.l.bf16 %v2849_v25  ;;  %v2050_v34 = vunpack.c.h.bf16 %v2849_v25 }
  0x51   : > { %5454 = vst [vmem:[#allocation3_spill] sm:$0xff] %v3741_v31  ;;  %v1514_v8 = vunpack.c.l.bf16 %v374_v2 }
  0x52   : > { %v3833_v53 = vpack.i.bf16 %v2050_v34, %v2049_v33  ;;  %v376_v34 = vld [vmem:[%s3646_s10 + $0x24] sm:$0x1] }
  0x53   : > { %v3789_v12 = vpack.i.bf16 %v1514_v8, %v1513_v7 }
  0x54   : > { %3289 = vperm.xlu0 %3262, %v3667_v35   ;;  %3032 = vset.pattern.permute.xlu1 %v5390_v1 }
  0x55   : > { %3034 = vperm.xlu1 %3032, %v3717_v10  }
  0x58   : > { %3294 = vperm.xlu0 %3262, %v3674_v41  }
  0x59   : > { %3039 = vperm.xlu1 %3032, %v3038_v15  }
  0x5c   : > { %3299 = vperm.xlu0 %3262, %v3681_v50  }
  0x5d   : > { %3044 = vperm.xlu1 %3032, %v3043_v19  }
  0x60   : > { %3304 = vperm.xlu0 %3262, %v3688_v54  }
  0x61   : > { %3048 = vset.pattern.permute.xlu1 %v5400_v28 }
  0x62   : > { %3050 = vperm.xlu1 %3048, %v3656_v29   ;;  %v2831_v29 = vld [vmem:[%s3620_s28 + $0x8] ss:$8 sps:$4 sm:$0xff]  }
  0x63   : > { %v1863_v38 = vunpack.c.l.bf16 %v2831_v29  ;;  %v1864_v40 = vunpack.c.h.bf16 %v2831_v29 }
  0x64   : > { %3309 = vperm.xlu0 %3262, %v3694_v61  }
  0x65   : > { %v3746_v43 = vpack.i.bf16 %v1864_v40, %v1863_v38 }
  0x66   : > { %3055 = vperm.xlu1 %3048, %v3038_v15  }
  0x68   : > { %3314 = vperm.xlu0 %3262, %v3699_v3  }
  0x6a   : > { %3059 = vset.pattern.permute.xlu1 %v5396_v0 }
  0x6b   : > { %3061 = vperm.xlu1 %3059, %v3717_v10  }
  0x6c   : > { %3329 = vperm.xlu0 %3262, %v3733_v24  }
  0x6f   : > { %3071 = vperm.xlu1 %3059, %v3038_v15  }
  0x70   : > { %3345 = vperm.xlu0 %3262, %v3741_v31  }
  0x73   : > { %3076 = vperm.xlu1 %3059, %v3043_v19  }
  0x74   : > { %3377 = vperm.xlu0 %3262, %v3749_v44  }
  0x77   : > { %3080 = vset.pattern.permute.xlu1 %v5390_v1 }
  0x78   : > { %3393 = vperm.xlu0 %3262, %v3753_v49   ;;  %3082 = vperm.xlu1 %3080, %v3081_v52  }
  0x7c   : > { %3397 = vset.pattern.permute.xlu0 %v5400_v28  ;;  %3087 = vperm.xlu1 %3080, %v3086_v56  }
  0x7d   : > { %3399 = vperm.xlu0 %3397, %v3670_v39   ;;  %v1327_v39 = vunpack.c.l.bf16 %v385_v57 }
  0x80   : > { %3091 = vset.pattern.permute.xlu1 %v5400_v28 }
  0x81   : > { %3404 = vperm.xlu0 %3397, %v3636_v17   ;;  %3093 = vperm.xlu1 %3091, %v3667_v35   ;;  %v389_v17 = vld [vmem:[%s3664_s13 + $0x20] ss:$8 sps:$4 sm:$0xff]   ;;  %v3769_v35 = vpack.i.bf16 %v1328_v58, %v1327_v39  ;;  %v2889_v39 = vld [vmem:[%s5387_s4 + $0x11] ss:$0 sm:$0xff]  ;;  %s2911_s13 = sshll.u32 %s5617_s21, 5 }
  0x82   : > { %v1331_v4 = vunpack.c.l.bf16 %v389_v17  ;;  %v1332_v5 = vunpack.c.h.bf16 %v389_v17  ;;  %v2836_v17 = vld [vmem:[%s3620_s28 + $0x1c] sm:$0x1]  ;;  %s5349_s16 = scalar_lea.vmem %s5389_s6, %s2911_s13 }
  0x84   : > { %v3786_v11 = vpack.i.bf16 %v1332_v5, %v1331_v4  ;;  %v2233_v5 = vunpack.c.l.bf16 %v2836_v17 }
  0x85   : > { %3409 = vperm.xlu0 %3397, %v3683_v51   ;;  %3098 = vperm.xlu1 %3091, %v3086_v56   ;;  %v1333_v51 = vunpack.c.l.bf16 %v391_v59 }
  0x87   : > { %v3778_v6 = vpack.i.bf16 %v1334_v60, %v1333_v51  ;;  %v2838_v60 = vld [vmem:[%s3620_s28 + $0x24] sm:$0x1] }
  0x88   : > { %v2234_v20 = vunpack.c.l.bf16 %v2838_v60 }
  0x89   : > { %3414 = vperm.xlu0 %3397, %v3717_v10   ;;  %3103 = vperm.xlu1 %3091, %v3674_v41  }
  0x8d   : > { %3419 = vperm.xlu0 %3397, %v3043_v19   ;;  %3112 = vset.pattern.permute.xlu1 %v5396_v0  ;;  %v3802_v19 = vld [vmem:[%s5387_s4 + $0x8] ss:$0 sm:$0xff] }
  0x8e   : > { %3114 = vperm.xlu1 %3112, %v3081_v52  }
  0x91   : > { %3424 = vperm.xlu0 %3397, %v3081_v52  }
  0x92   : > { %v3771_v62 = vpop.permute.xlu1 %2942  ;;  %3119 = vperm.xlu1 %3112, %v3086_v56   ;;  %v3773_v41 = vpop.permute.xlu0 %2970 }
  0x93   : > { %v2973_v15 = vunpack.i.h.bf16 %v3773_v41  ;;  %v2972_v16 = vunpack.i.l.bf16 %v3773_v41 }
  0x95   : > { %3429 = vperm.xlu0 %3397, %v3769_v35   ;;  %v1077_v22 = vmul.f32 %v2973_v15, %v3802_v19  ;;  %v1075_v23 = vmul.f32 %v2972_v16, %v3802_v19 }
  0x96   : > { %v3780_v9 = vpop.permute.xlu1 %2947  ;;  %3128 = vset.pattern.permute.xlu1 %v5390_v1  ;;  %v3783_v10 = vpop.permute.xlu0 %3012 }
  0x97   : > { %3130 = vperm.xlu1 %3128, %v3769_v35   ;;  %v1112_v36 = vrot.slane %v1077_v22, 1  ;;  %v1109_v37 = vrot.slane %v1075_v23, 1 }
  0x99   : > { %3434 = vperm.xlu0 %3397, %v3778_v6  }
  0x9a   : > { %v3792_v14 = vpop.permute.xlu0 %3028 }
  0x9b   : > { %v3796_v18 = vpop.permute.xlu1 %2953  ;;  %3135 = vperm.xlu1 %3128, %v3786_v11  }
  0x9d   : > { %3439 = vperm.xlu0 %3397, %v3789_v12  }
  0x9e   : > { %v3067_v26 = vpop.permute.xlu0 %3066 }
  0x9f   : > { %v3069_v27 = vunpack.i.h.bf16 %v3067_v26  ;;  %v3068_v30 = vunpack.i.l.bf16 %v3067_v26  ;;  %v3812_v29 = vpop.permute.xlu1 %2958  ;;  %3140 = vperm.xlu1 %3128, %v3778_v6  }
  0xa1   : > { %v1078_v38 = vmul.f32 %v3069_v27, %v3802_v19  ;;  %v1076_v40 = vmul.f32 %v3068_v30, %v3802_v19  ;;  %3444 = vperm.xlu0 %3397, %v3746_v43  }
  0xa2   : > { %v3820_v42 = vpop.permute.xlu0 %3108 }
  0xa3   : > { %v1113_v45 = vrot.slane %v1078_v38, 1  ;;  %v1110_v46 = vrot.slane %v1076_v40, 1  ;;  %3144 = vset.pattern.permute.xlu1 %v5400_v28  ;;  %v5395_v57 = vunpack.i.h.bf16 %v3820_v42  ;;  %v5394_v58 = vunpack.i.l.bf16 %v3820_v42 }
  0xa4   : > { %3146 = vperm.xlu1 %3144, %v3681_v50   ;;  %v3824_v47 = vpop.permute.xlu1 %2964 }
  0xa5   : > { %v3827_v48 = vsel %vm878_vm0, %v1109_v37, %v1110_v46  ;;  %v3830_v52 = vsel %vm878_vm0, %v1112_v36, %v1113_v45  ;;  %3449 = vperm.xlu0 %3397, %v3815_v32   ;;  %v1793_v51 = vmul.f32 %v5395_v57, %v2889_v39  ;;  %v1791_v63 = vmul.f32 %v5394_v58, %v2889_v39  ;;  %v378_v36 = vld [vmem:[%s3646_s10 + $0x2c] sm:$0x1] }
  0xa6   : > { %5457 = vst [vmem:[#allocation6_spill] sm:$0xff] %v3827_v48  ;;  %5458 = vst [vmem:[#allocation7_spill] sm:$0xff] %v3830_v52  ;;  %v3835_v55 = vpop.permute.xlu0 %3124  ;;  %v3871_v45 = vpack.i.bf16 %v2234_v20, %v2233_v5 }
  0xa7   : > { %v5393_v7 = vunpack.i.h.bf16 %v3835_v55  ;;  %v5392_v8 = vunpack.i.l.bf16 %v3835_v55  ;;  %v1826_v21 = vrot.slane %v1793_v51, 1  ;;  %v1823_v23 = vrot.slane %v1791_v63, 1 }
  0xa8   : > { %3151 = vperm.xlu1 %3144, %v3786_v11   ;;  %v3838_v56 = vpop.permute.xlu1 %2975  ;;  %5460 = vst [vmem:[#allocation9_spill] sm:$0xff] %v3871_v45  ;;  %v1515_v63 = vunpack.c.l.bf16 %v376_v34  ;;  %v2956_v34 = vunpack.i.h.bf16 %v3796_v18 }
  0xa9   : > { %3454 = vperm.xlu0 %3397, %v3833_v53   ;;  %v1805_v37 = vmul.f32 %v5393_v7, %v2889_v39  ;;  %v1803_v38 = vmul.f32 %v5392_v8, %v2889_v39  ;;  %v2949_v8 = vunpack.i.l.bf16 %v3780_v9 }
  0xaa   : > { %v3841_v50 = vpop.permute.xlu0 %3162 }
  0xab   : > { %5459 = vst [vmem:[#allocation8_spill] sm:$0xff] %v3841_v50  ;;  %v1841_v5 = vrot.slane %v1803_v38, 1  ;;  %v1844_v20 = vrot.slane %v1805_v37, 1 }
  0xac   : > { %3155 = vset.pattern.permute.xlu1 %v5396_v0  ;;  %v3849_v59 = vpop.permute.xlu1 %2980 }
  0xad   : > { %3465 = vperm.xlu0 %3397, %v3749_v44   ;;  %3157 = vperm.xlu1 %3155, %v3769_v35   ;;  %v3030_v44 = vunpack.i.l.bf16 %v3792_v14 }
  0xae   : > { %v3205_v2 = vpop.permute.xlu0 %3204 }
  0xaf   : > { %v3207_v4 = vunpack.i.h.bf16 %v3205_v2  ;;  %v3206_v13 = vunpack.i.l.bf16 %v3205_v2  ;;  %v1516_v2 = vunpack.c.l.bf16 %v378_v36  ;;  %v5398_v36 = vunpack.i.l.bf16 %v3796_v18 }
  0xb1   : > { %v1794_v22 = vmul.f32 %v3207_v4, %v2889_v39  ;;  %3481 = vperm.xlu0 %3397, %v3753_v49   ;;  %3167 = vperm.xlu1 %3155, %v3786_v11   ;;  %v3863_v35 = vpop.permute.xlu1 %2986  ;;  %v1792_v25 = vmul.f32 %v3206_v13, %v2889_v39  ;;  %v3031_v49 = vunpack.i.h.bf16 %v3792_v14 }
  0xb2   : > { %v3221_v26 = vpop.permute.xlu0 %3220 }
  0xb3   : > { %v1827_v27 = vrot.slane %v1794_v22, 1  ;;  %v3223_v30 = vunpack.i.h.bf16 %v3221_v26  ;;  %v3222_v33 = vunpack.i.l.bf16 %v3221_v26  ;;  %v1824_v40 = vrot.slane %v1792_v25, 1 }
  0xb4   : > { %v3892_v22 = vpack.i.bf16 %v1516_v2, %v1515_v63  ;;  %v3919_v2 = vld [vmem:[%s5387_s4 + $0x6] ss:$0 sm:$0xff] }
  0xb5   : > { %v1806_v11 = vmul.f32 %v3223_v30, %v2889_v39  ;;  %v1804_v46 = vmul.f32 %v3222_v33, %v2889_v39  ;;  %3485 = vset.pattern.permute.xlu0 %v5396_v0  ;;  %3172 = vperm.xlu1 %3155, %v3778_v6   ;;  %v3875_v17 = vpop.permute.xlu1 %2991  ;;  %v3878_v51 = vsel %vm878_vm0, %v1826_v21, %v1827_v27  ;;  %v2839_v39 = vld [vmem:[%s3620_s28 + $0x28] ss:$8 sps:$4 sm:$0xff]  }
  0xb6   : > { %5461 = vst [vmem:[#allocation10_spill] sm:$0xff] %v3878_v51  ;;  %3487 = vperm.xlu0 %3485, %v3733_v24   ;;  %v3881_v60 = vpop.permute.xlu0 %3258  ;;  %v3884_v4 = vsel %vm878_vm0, %v1823_v23, %v1824_v40  ;;  %v1867_v25 = vunpack.c.l.bf16 %v2839_v39  ;;  %v1868_v26 = vunpack.c.h.bf16 %v2839_v39  ;;  %v2851_v23 = vld [vmem:[%s3626_s7 + $0x28] ss:$8 sps:$4 sm:$0xff]   ;;  %v2945_v40 = vunpack.i.h.bf16 %v3771_v62 }
  0xb7   : > { %5462 = vst [vmem:[#allocation11_spill] sm:$0xff] %v3881_v60  ;;  %5463 = vst [vmem:[#allocation12_spill] sm:$0xff] %v3884_v4  ;;  %v1842_v13 = vrot.slane %v1804_v46, 1  ;;  %v1845_v6 = vrot.slane %v1806_v11, 1  ;;  %v3914_v11 = vld [vmem:[%s5387_s4 + $0x1] ss:$0 sm:$0xff]  ;;  %v2051_v63 = vunpack.c.l.bf16 %v2851_v23  ;;  %v2944_v39 = vunpack.i.l.bf16 %v3771_v62 }
  0xb8   : > { %v3908_v38 = vpack.i.bf16 %v1868_v26, %v1867_v25  ;;  %v3930_v25 = vld [vmem:[%s5387_s4] ss:$0 sm:$0xff]  ;;  %v3950_v41 = vmul.f32 %v2945_v40, %v3919_v2  ;;  %v3014_v60 = vunpack.i.l.bf16 %v3783_v10  ;;  %v5478_v24 = vmov 2  }
  0xb9   : > { %3176 = vset.pattern.permute.xlu1 %v5390_v1  ;;  %v3898_v30 = vsel %vm878_vm0, %v1841_v5, %v1842_v13  ;;  %v3901_v33 = vsel %vm878_vm0, %v1844_v20, %v1845_v6  ;;  %v3925_v5 = vld [vmem:[%s5387_s4 + $0x2] ss:$0 sm:$0xff]  ;;  %v2052_v6 = vunpack.c.h.bf16 %v2851_v23  ;;  %v2950_v1 = vunpack.i.h.bf16 %v3780_v9 }
  0xba   : > { %3498 = vperm.xlu0 %3485, %v3871_v45   ;;  %3178 = vperm.xlu1 %3176, %v3789_v12   ;;  %v3890_v21 = vpop.permute.xlu1 %2997  ;;  %5464 = vst [vmem:[#allocation13_spill] sm:$0xff] %v3898_v30  ;;  %5465 = vst [vmem:[#allocation14_spill] sm:$0xff] %v3901_v33  ;;  %v593_v26 = vmul.f32 %v2973_v15, %v3925_v5  ;;  %v592_v62 = vmul.f32 %v2972_v16, %v3925_v5 }
  0xbb   : > { %v3894_v27 = vpop.permute.xlu0 %3264  ;;  %v536_v23 = vmul.f32 %v5398_v36, %v3914_v11  ;;  %v3956_v16 = vmul.f32 %v2944_v39, %v3919_v2  ;;  %v3015_v36 = vunpack.i.h.bf16 %v3783_v10  ;;  %v3960_v33 = vpack.i.bf16 %v2052_v6, %v2051_v63 }
  0xbc   : > { %v3966_v30 = vmul.f32 %v2949_v8, %v3919_v2  ;;  %v483_v51 = vmul.f32 %v2945_v40, %v3930_v25  ;;  %v3995_v40 = vld [vmem:[%s5387_s4 + $0x7] ss:$0 sm:$0xff] }
  0xbd   : > { %5466 = vst [vmem:[#allocation15_spill] sm:$0xff] %v3960_v33 }
  0xbe   : > { %3183 = vperm.xlu1 %3176, %v3892_v22   ;;  %v3906_v37 = vpop.permute.xlu1 %3002  ;;  %5468 = vst [vmem:[#allocation17_spill] sm:$0xff] %v3966_v30 }
  0xbf   : > { %v3270_v46 = vpop.permute.xlu0 %3269 }
  0xc0   : > { %v3272_v13 = vunpack.i.h.bf16 %v3270_v46  ;;  %v3271_v20 = vunpack.i.l.bf16 %v3270_v46  ;;  %v537_v46 = vmul.f32 %v2956_v34, %v3914_v11 }
  0xc2   : > { %v481_v7 = vmul.f32 %v3272_v13, %v3930_v25  ;;  %v480_v58 = vmul.f32 %v3271_v20, %v3930_v25  ;;  %3187 = vset.pattern.permute.xlu1 %v5400_v28  ;;  %v3947_v15 = vpop.permute.xlu1 %3007  ;;  %v3963_v28 = vmul.f32 %v2950_v1, %v3919_v2  ;;  %v852_v6 = vmul.f32 %v3272_v13, %v3919_v2 }
  0xc3   : > { %3189 = vperm.xlu1 %3187, %v3688_v54   ;;  %v3953_v9 = vpop.permute.xlu0 %3274 }
  0xc4   : > { %v545_v57 = vadd.f32 %v537_v46, %v481_v7  ;;  %v544_v0 = vadd.f32 %v536_v23, %v480_v58  ;;  %5467 = vst [vmem:[#allocation16_spill] sm:$0xff] %v3963_v28  ;;  %v482_v7 = vmul.f32 %v2944_v39, %v3930_v25  ;;  %v3982_v46 = vmul.f32 %v2950_v1, %v3930_v25 }
  0xc5   : > { %v2961_v39 = vunpack.i.h.bf16 %v3812_v29  ;;  %v850_v58 = vmul.f32 %v3271_v20, %v3919_v2  ;;  %v888_v48 = vrot.slane %v852_v6, 1 }
  0xc6   : > { %v3968_v54 = vadd.f32 %v593_v26, %v545_v57  ;;  %v3970_v4 = vadd.f32 %v592_v62, %v544_v0  ;;  %5469 = vst [vmem:[#allocation18_spill] sm:$0xff] %v3982_v46  ;;  %v3985_v0 = vmul.f32 %v2949_v8, %v3930_v25  ;;  %v3990_v57 = vld [vmem:[%s5387_s4 + $0x5] ss:$0 sm:$0xff]  ;;  %v2960_v8 = vunpack.i.l.bf16 %v3812_v29 }
  0xc7   : > { %3194 = vperm.xlu1 %3187, %v3892_v22   ;;  %v3976_v10 = vpop.permute.xlu1 %3018  ;;  %v3978_v63 = vpop.permute.xlu0 %3279  ;;  %v3999_v26 = vmul.f32 %v3015_v36, %v3990_v57  ;;  %v4002_v1 = vmul.f32 %v3014_v60, %v3990_v57  ;;  %v4012_v36 = vmul.f32 %v2956_v34, %v3995_v40  ;;  %v5474_v62 = vunpack.i.l.bf16 %v3796_v18 }
  0xc8   : > { %5470 = vst [vmem:[#allocation19_spill] sm:$0xff] %v3985_v0  ;;  %v539_v13 = vmul.f32 %v2961_v39, %v3914_v11  ;;  %v4024_v52 = vmul.f32 %v2961_v39, %v3995_v40  ;;  %v538_v14 = vmul.f32 %v2960_v8, %v3914_v11  ;;  %v2967_v34 = vunpack.i.h.bf16 %v3824_v47 }
  0xc9   : > { %5471 = vst [vmem:[#allocation20_spill] sm:$0xff] %v3999_v26  ;;  %5472 = vst [vmem:[#allocation21_spill] sm:$0xff] %v4002_v1  ;;  %v4020_v23 = vmul.f32 %v5474_v62, %v3995_v40  ;;  %v885_v31 = vrot.slane %v850_v58, 1  ;;  %v4032_v62 = vmul.f32 %v3031_v49, %v3990_v57  ;;  %v4039_v1 = vmul.f32 %v2960_v8, %v3995_v40 }
  0xca   : > { %5473 = vst [vmem:[#allocation22_spill] sm:$0xff] %v4012_v36  ;;  %v547_v6 = vadd.f32 %v539_v13, %v483_v51  ;;  %v2978_v39 = vunpack.i.h.bf16 %v3838_v56  ;;  %v2977_v8 = vunpack.i.l.bf16 %v3838_v56  ;;  %v4057_v51 = vmul.f32 %v2967_v34, %v3802_v19 }
  0xcb   : > { %3199 = vperm.xlu1 %3187, %v3694_v61   ;;  %v4015_v60 = vpop.permute.xlu1 %3023  ;;  %v3285_v29 = vpop.permute.xlu0 %3284  ;;  %5475 = vst [vmem:[#allocation23_spill] sm:$0xff] %v4020_v23  ;;  %v2966_v61 = vunpack.i.l.bf16 %v3824_v47  ;;  %5476 = vst [vmem:[#allocation24_spill] sm:$0xff] %v4032_v62  ;;  %v546_v62 = vadd.f32 %v538_v14, %v482_v7  ;;  %v5485_v56 = vunpack.i.h.bf16 %v3820_v42  ;;  %v2983_v58 = vunpack.i.h.bf16 %v3849_v59 }
  0xcc   : > { %v3287_v20 = vunpack.i.h.bf16 %v3285_v29  ;;  %v3286_v45 = vunpack.i.l.bf16 %v3285_v29  ;;  %v4035_v29 = vmul.f32 %v3030_v44, %v3990_v57  ;;  %5481 = vst [vmem:[#allocation28_spill] sm:$0xff] %v4057_v51  ;;  %v5493_v23 = vunpack.i.h.bf16 %v3835_v55 }
  0xce   : > { %v853_v26 = vmul.f32 %v3287_v20, %v3919_v2  ;;  %v851_v18 = vmul.f32 %v3286_v45, %v3919_v2  ;;  %5477 = vst [vmem:[#allocation25_spill] sm:$0xff] %v4035_v29  ;;  %v4054_v29 = vld [vmem:[%s5387_s4 + $0xb] ss:$0 sm:$0xff] }
  0xcf   : > { %3208 = vset.pattern.permute.xlu1 %v5478_v24  ;;  %v4042_v47 = vpop.permute.xlu0 %3289  ;;  %5480 = vst [vmem:[#allocation27_spill] sm:$0xff] %v4054_v29  ;;  %v4072_v14 = vmul.f32 %v5485_v56, %v4054_v29  ;;  %v4092_v56 = vld [vmem:[%s5387_s4 + $0xe] ss:$0 sm:$0xff] }
  0xd0   : > { %5479 = vst [vmem:[#allocation26_spill] sm:$0xff] %v4042_v47  ;;  %v889_v20 = vrot.slane %v853_v26, 1  ;;  %v886_v45 = vrot.slane %v851_v18, 1  ;;  %3210 = vperm.xlu1 %3208, %v3789_v12   ;;  %v4046_v49 = vpop.permute.xlu1 %3034  ;;  %v4060_v26 = vmul.f32 %v2966_v61, %v3802_v19  ;;  %v3165_v18 = vunpack.i.h.bf16 %v3841_v50  ;;  %5492 = vst [vmem:[#allocation37_spill] sm:$0xff] %v4092_v56 }
  0xd1   : > { %5486 = vst [vmem:[#allocation32_spill] sm:$0xff] %v4072_v14  ;;  %v595_v14 = vmul.f32 %v2978_v39, %v3925_v5 }
  0xd2   : > { %5482 = vst [vmem:[#allocation29_spill] sm:$0xff] %v4060_v26  ;;  %v4063_v12 = vsel %vm878_vm0, %v885_v31, %v886_v45  ;;  %v4066_v7 = vsel %vm878_vm0, %v888_v48, %v889_v20  ;;  %v5488_v31 = vunpack.i.l.bf16 %v3820_v42  ;;  %v4084_v48 = vmul.f32 %v2967_v34, %v3925_v5 }
  0xd3   : > { %5483 = vst [vmem:[#allocation30_spill] sm:$0xff] %v4063_v12  ;;  %5484 = vst [vmem:[#allocation31_spill] sm:$0xff] %v4066_v7  ;;  %v4076_v44 = vpop.permute.xlu0 %3294  ;;  %v4087_v20 = vmul.f32 %v2966_v61, %v3925_v5  ;;  %v4099_v42 = vmul.f32 %v2978_v39, %v3802_v19  ;;  %v594_v34 = vmul.f32 %v2977_v8, %v3925_v5 }
  0xd4   : > { %5487 = vst [vmem:[#allocation33_spill] sm:$0xff] %v4076_v44  ;;  %v4081_v45 = vmul.f32 %v5488_v31, %v4054_v29  ;;  %5490 = vst [vmem:[#allocation35_spill] sm:$0xff] %v4084_v48  ;;  %3215 = vperm.xlu1 %3208, %v3892_v22   ;;  %v4095_v13 = vpop.permute.xlu1 %3039  ;;  %v2982_v31 = vunpack.i.l.bf16 %v3849_v59  ;;  %v4108_v12 = vmul.f32 %v5493_v23, %v4054_v29  ;;  %v5495_v22 = vunpack.i.l.bf16 %v3835_v55  ;;  %v4156_v59 = vld [vmem:[%s3620_s28 + $0x34] sm:$0x1] }
  0xd5   : > { %5491 = vst [vmem:[#allocation36_spill] sm:$0xff] %v4087_v20  ;;  %v4116_v39 = vmul.f32 %v2977_v8, %v3802_v19  ;;  %v4119_v0 = vmul.f32 %v3165_v18, %v4092_v56  ;;  %v2994_v23 = vunpack.i.h.bf16 %v3875_v17  ;;  %v2993_v55 = vunpack.i.l.bf16 %v3875_v17  ;;  %v4141_v17 = vld [vmem:[%s5387_s4 + $0xf] ss:$0 sm:$0xff]  ;;  %5506 = vst [vmem:[#allocation46_spill] sm:$0xff] %v4156_v59 }
  0xd6   : > { %5489 = vst [vmem:[#allocation34_spill] sm:$0xff] %v4081_v45  ;;  %5494 = vst [vmem:[#allocation38_spill] sm:$0xff] %v4108_v12  ;;  %v4113_v7 = vmul.f32 %v5495_v22, %v4054_v29  ;;  %v4123_v45 = vmul.f32 %v2983_v58, %v3802_v19  ;;  %v5500_v12 = vmov 0   ;;  %v4136_v50 = vmul.f32 %v2982_v31, %v3802_v19  ;;  %v4145_v22 = vld [vmem:[%s3620_s28 + $0x2c] sm:$0x1] }
  0xd7   : > { %5497 = vst [vmem:[#allocation40_spill] sm:$0xff] %v4119_v0  ;;  %v4125_v61 = vpop.permute.xlu0 %3299  ;;  %v603_v0 = vadd.f32 %v595_v14, %v547_v6  ;;  %5502 = vst [vmem:[#allocation44_spill] sm:$0xff] %v4141_v17  ;;  %v2989_v8 = vunpack.i.h.bf16 %v3863_v35  ;;  %v2988_v56 = vunpack.i.l.bf16 %v3863_v35  ;;  %v5504_v6 = vunpack.i.h.bf16 %v4042_v47  ;;  %v4168_v35 = vld [vmem:[%s5387_s4 + $0x3] ss:$0 sm:$0xff] }
  0xd8   : > { %5496 = vst [vmem:[#allocation39_spill] sm:$0xff] %v4113_v7  ;;  %5498 = vst [vmem:[#allocation41_spill] sm:$0xff] %v4123_v45  ;;  %3224 = vset.pattern.permute.xlu1 %v5500_v12  ;;  %v4132_v18 = vpop.permute.xlu1 %3044  ;;  %v602_v7 = vadd.f32 %v594_v34, %v546_v62  ;;  %v5505_v14 = vunpack.i.l.bf16 %v4042_v47  ;;  %v4160_v29 = vmul.f32 %v2983_v58, %v3925_v5  ;;  %v3041_v58 = vunpack.i.l.bf16 %v4095_v13 }
  0xd9   : > { %5499 = vst [vmem:[#allocation42_spill] sm:$0xff] %v4125_v61  ;;  %5501 = vst [vmem:[#allocation43_spill] sm:$0xff] %v4136_v50  ;;  %3226 = vperm.xlu1 %3224, %v3746_v43   ;;  %v1569_v62 = vmul.f32 %v5504_v6, %v4141_v17  ;;  %v4163_v26 = vmul.f32 %v2982_v31, %v3925_v5  ;;  %v666_v47 = vmul.f32 %v2993_v55, %v4168_v35 }
  0xda   : > { %5503 = vst [vmem:[#allocation45_spill] sm:$0xff] %v4145_v22  ;;  %v1567_v34 = vmul.f32 %v5505_v14, %v4141_v17  ;;  %5507 = vst [vmem:[#allocation47_spill] sm:$0xff] %v4160_v29  ;;  %v667_v14 = vmul.f32 %v2994_v23, %v4168_v35  ;;  %v4183_v51 = vmul.f32 %v2988_v56, %v4168_v35  ;;  %v3042_v61 = vunpack.i.h.bf16 %v4095_v13 }
  0xdb   : > { %5508 = vst [vmem:[#allocation48_spill] sm:$0xff] %v4163_v26  ;;  %v3305_v6 = vpop.permute.xlu0 %3304  ;;  %v4180_v26 = vmul.f32 %v2989_v8, %v4168_v35  ;;  %v1602_v23 = vrot.slane %v1569_v62, 1  ;;  %v674_v50 = vadd.f32 %v666_v47, %v602_v7  ;;  %v3005_v31 = vunpack.i.h.bf16 %v3906_v37 }
  0xdc   : > { %v3307_v29 = vunpack.i.h.bf16 %v3305_v6  ;;  %v3306_v46 = vunpack.i.l.bf16 %v3305_v6  ;;  %v1599_v55 = vrot.slane %v1567_v34, 1  ;;  %v675_v36 = vadd.f32 %v667_v14, %v603_v0 }
  0xdd   : > { %3231 = vperm.xlu1 %3224, %v3908_v38   ;;  %v4176_v5 = vpop.permute.xlu1 %3050  ;;  %v3004_v8 = vunpack.i.l.bf16 %v3906_v37  ;;  %v5427_v13 = vunpack.i.h.bf16 %v4076_v44  ;;  %v857_v47 = vmul.f32 %v3042_v61, %v3919_v2  ;;  %v855_v0 = vmul.f32 %v3041_v58, %v3919_v2  ;;  %v4211_v61 = vld [vmem:[%s5387_s4 + $0x4] ss:$0 sm:$0xff] }
  0xde   : > { %v1570_v6 = vmul.f32 %v3307_v29, %v4141_v17  ;;  %v1568_v22 = vmul.f32 %v3306_v46, %v4141_v17  ;;  %v5428_v29 = vunpack.i.l.bf16 %v4076_v44  ;;  %v3025_v14 = vunpack.i.l.bf16 %v4015_v60 }
  0xdf   : > { %v3310_v45 = vpop.permute.xlu0 %3309  ;;  %v1581_v58 = vmul.f32 %v5427_v13, %v4141_v17 }
  0xe0   : > { %v1603_v59 = vrot.slane %v1570_v6, 1  ;;  %v1600_v56 = vrot.slane %v1568_v22, 1  ;;  %v3312_v30 = vunpack.i.h.bf16 %v3310_v45  ;;  %v3311_v62 = vunpack.i.l.bf16 %v3310_v45 }
  0xe1   : > { %3236 = vperm.xlu1 %3224, %v3815_v32   ;;  %v3056_v34 = vpop.permute.xlu1 %3055  ;;  %v3026_v22 = vunpack.i.h.bf16 %v4015_v60 }
  0xe2   : > { %v3058_v28 = vunpack.i.h.bf16 %v3056_v34  ;;  %v3057_v46 = vunpack.i.l.bf16 %v3056_v34  ;;  %v4199_v37 = vsel %vm878_vm0, %v1599_v55, %v1600_v56  ;;  %v4202_v45 = vsel %vm878_vm0, %v1602_v23, %v1603_v59 }
  0xe3   : > { %v4196_v7 = vpop.permute.xlu0 %3314  ;;  %5510 = vst [vmem:[#allocation50_spill] sm:$0xff] %v4199_v37  ;;  %5511 = vst [vmem:[#allocation51_spill] sm:$0xff] %v4202_v45  ;;  %v1579_v59 = vmul.f32 %v5428_v29, %v4141_v17  ;;  %v1582_v23 = vmul.f32 %v3312_v30, %v4141_v17  ;;  %v1580_v60 = vmul.f32 %v3311_v62, %v4141_v17  ;;  %v3000_v55 = vunpack.i.h.bf16 %v3890_v21 }
  0xe4   : > { %5509 = vst [vmem:[#allocation49_spill] sm:$0xff] %v4196_v7  ;;  %v970_v6 = vmul.f32 %v3058_v28, %v3995_v40  ;;  %v968_v34 = vmul.f32 %v3057_v46, %v3995_v40  ;;  %v5512_v28 = vmov 1   ;;  %v2999_v56 = vunpack.i.l.bf16 %v3890_v21 }
  0xe5   : > { %3240 = vset.pattern.permute.xlu1 %v5512_v28  ;;  %v723_v46 = vmul.f32 %v3005_v31, %v4211_v61  ;;  %v722_v37 = vmul.f32 %v3004_v8, %v4211_v61  ;;  %v3267_v29 = vunpack.i.h.bf16 %v3894_v27  ;;  %v3266_v30 = vunpack.i.l.bf16 %v3894_v27 }
  0xe6   : > { %3242 = vperm.xlu1 %3240, %v3699_v3   ;;  %v4227_v13 = vpop.permute.xlu1 %3061  ;;  %v895_v45 = vrot.slane %v857_v47, 1  ;;  %v892_v62 = vrot.slane %v855_v0, 1  ;;  %v779_v17 = vmul.f32 %v3026_v22, %v3990_v57  ;;  %v778_v21 = vmul.f32 %v3025_v14, %v3990_v57 }
  0xe7   : > { %v4231_v7 = vpop.permute.xlu0 %3329  ;;  %v1007_v44 = vrot.slane %v970_v6, 1  ;;  %v1004_v31 = vrot.slane %v968_v34, 1  ;;  %v1620_v28 = vrot.slane %v1581_v58, 1  ;;  %v1617_v8 = vrot.slane %v1579_v59, 1 }
  0xe8   : > { %v1621_v33 = vrot.slane %v1582_v23, 1  ;;  %v1618_v3 = vrot.slane %v1580_v60, 1  ;;  %v4236_v48 = vmul.f32 %v3000_v55, %v4211_v61  ;;  %v4239_v20 = vmul.f32 %v2999_v56, %v4211_v61 }
  0xe9   : > { %v730_v27 = vadd.f32 %v722_v37, %v674_v50  ;;  %v731_v47 = vadd.f32 %v723_v46, %v675_v36  ;;  %v5513_v22 = vrot.slane %v3950_v41, 1  ;;  %v5514_v6 = vrot.slane %v3956_v16, 1 }
  0xea   : > { %3247 = vperm.xlu1 %3240, %v3908_v38   ;;  %v3072_v0 = vpop.permute.xlu1 %3071  ;;  %v5515_v50 = vrot.slane %v4024_v52, 1  ;;  %v5516_v37 = vrot.slane %v4039_v1, 1  ;;  %v4259_v56 = vsel %vm878_vm0, %v1617_v8, %v1618_v3  ;;  %v4262_v46 = vsel %vm878_vm0, %v1620_v28, %v1621_v33 }
  0xeb   : > { %v896_v14 = vsel %vm878_vm0, %v5513_v22, %v895_v45  ;;  %v893_v34 = vsel %vm878_vm0, %v5514_v6, %v892_v62  ;;  %v3074_v58 = vunpack.i.h.bf16 %v3072_v0  ;;  %v3073_v59 = vunpack.i.l.bf16 %v3072_v0  ;;  %v4248_v23 = vpop.permute.xlu0 %3345 }
  0xec   : > { %v786_v60 = vadd.f32 %v778_v21, %v730_v27  ;;  %v787_v55 = vadd.f32 %v779_v17, %v731_v47  ;;  %v1008_v36 = vsel %vm878_vm0, %v5515_v50, %v1007_v44  ;;  %v1005_v41 = vsel %vm878_vm0, %v5516_v37, %v1004_v31 }
  0xed   : > { %v1082_v45 = vmul.f32 %v3074_v58, %v3802_v19  ;;  %v1080_v16 = vmul.f32 %v3073_v59, %v3802_v19  ;;  %v4265_v17 = vmul.f32 %v3267_v29, %v3930_v25  ;;  %v4268_v52 = vmul.f32 %v3267_v29, %v3919_v2 }
  0xee   : > { %v915_v44 = vadd.f32 %v893_v34, %v786_v60  ;;  %v916_v1 = vadd.f32 %v896_v14, %v787_v55  ;;  %3251 = vset.pattern.permute.xlu1 %v5478_v24  ;;  %v4271_v62 = vpop.permute.xlu1 %3076  ;;  %v4274_v21 = vmul.f32 %v3266_v30, %v3930_v25  ;;  %v4277_v31 = vmul.f32 %v3266_v30, %v3919_v2 }
  0xef   : > { %v1119_v33 = vrot.slane %v1082_v45, 1  ;;  %v1116_v28 = vrot.slane %v1080_v16, 1  ;;  %3253 = vperm.xlu1 %3251, %v3746_v43   ;;  %v4280_v8 = vpop.permute.xlu0 %3377  ;;  %v3010_v29 = vunpack.i.h.bf16 %v3947_v15  ;;  %v3009_v3 = vunpack.i.l.bf16 %v3947_v15 }
  0xf0   : > { %v1027_v27 = vadd.f32 %v1005_v41, %v915_v44  ;;  %v1028_v47 = vadd.f32 %v1008_v36, %v916_v1  ;;  %v3277_v0 = vunpack.i.h.bf16 %v3953_v9  ;;  %v3276_v25 = vunpack.i.l.bf16 %v3953_v9 }
  0xf1   : > { %v5517_v22 = vrot.slane %v4116_v39, 1  ;;  %v5518_v14 = vrot.slane %v4099_v42, 1  ;;  %v882_v6 = vrot.slane %v4268_v52, 1  ;;  %v3021_v34 = vunpack.i.h.bf16 %v3976_v10 }
  0xf2   : > { %v879_v59 = vrot.slane %v4277_v31, 1  ;;  %v3020_v60 = vunpack.i.l.bf16 %v3976_v10  ;;  %v3282_v9 = vunpack.i.h.bf16 %v3978_v63  ;;  %v3281_v39 = vunpack.i.l.bf16 %v3978_v63 }
  0xf3   : > { %v1117_v30 = vsel %vm878_vm0, %v5517_v22, %v1116_v28  ;;  %v1120_v43 = vsel %vm878_vm0, %v5518_v14, %v1119_v33  ;;  %3319 = vperm.xlu1 %3251, %v3908_v38   ;;  %v4299_v55 = vpop.permute.xlu1 %3082  ;;  %v4301_v42 = vpop.permute.xlu0 %3393  ;;  %v4304_v50 = vmul.f32 %v3010_v29, %v4211_v61  ;;  %v4307_v36 = vmul.f32 %v3009_v3, %v4211_v61 }
  0xf4   : > { %v1139_v58 = vadd.f32 %v1117_v30, %v1027_v27  ;;  %v1140_v15 = vadd.f32 %v1120_v43, %v1028_v47  ;;  %v3037_v37 = vunpack.i.h.bf16 %v4046_v49  ;;  %v3036_v10 = vunpack.i.l.bf16 %v4046_v49 }
  0xf5   : > { %v663_v41 = vmul.f32 %v3277_v0, %v4168_v35  ;;  %v662_v63 = vmul.f32 %v3276_v25, %v4168_v35  ;;  %v3047_v38 = vunpack.i.h.bf16 %v4132_v18  ;;  %v3046_v45 = vunpack.i.l.bf16 %v4132_v18 }
  0xf6   : > { %v4316_v16 = vmul.f32 %v3021_v34, %v3990_v57  ;;  %v3053_v44 = vunpack.i.h.bf16 %v4176_v5  ;;  %v4321_v1 = vadd.f32 %v4183_v51, %v3970_v4  ;;  %v4325_v49 = vadd.f32 %v4180_v26, %v3968_v54 }
  0xf7   : > { %v4328_v33 = vmul.f32 %v3020_v60, %v3990_v57  ;;  %v4331_v28 = vmul.f32 %v3282_v9, %v4168_v35  ;;  %v4334_v18 = vmul.f32 %v3281_v39, %v4168_v35  ;;  %v3064_v29 = vunpack.i.h.bf16 %v4227_v13  ;;  %3324 = vperm.xlu1 %3251, %v3815_v32   ;;  %v4338_v3 = vpop.permute.xlu1 %3087  ;;  %v4347_v35 = vld [vmem:[%s5387_s4 + $0x9] ss:$0 sm:$0xff] }
  0xf8   : > { %v849_v4 = vmul.f32 %v3037_v37, %v3919_v2  ;;  %v847_v54 = vmul.f32 %v3036_v10, %v3919_v2  ;;  %v5436_v51 = vunpack.i.h.bf16 %v4338_v3  ;;  %v5435_v57 = vunpack.i.l.bf16 %v4338_v3  ;;  %v3400_v26 = vpop.permute.xlu0 %3399 }
  0xf9   : > { %v861_v27 = vmul.f32 %v3047_v38, %v3919_v2  ;;  %v859_v32 = vmul.f32 %v3046_v45, %v3919_v2  ;;  %v3402_v47 = vunpack.i.h.bf16 %v3400_v26  ;;  %v3401_v0 = vunpack.i.l.bf16 %v3400_v26 }
  0xfa   : > { %v966_v25 = vmul.f32 %v3053_v44, %v3995_v40  ;;  %v3052_v22 = vunpack.i.l.bf16 %v4176_v5  ;;  %v1204_v30 = vmul.f32 %v5436_v51, %v4347_v35  ;;  %v1203_v14 = vmul.f32 %v5435_v57, %v4347_v35  ;;  %v5528_v51 = vld [vmem:[#allocation18_spill] sm:$0xff] }
  0xfb   : > { %v1074_v43 = vmul.f32 %v3064_v29, %v3802_v19  ;;  %v3063_v34 = vunpack.i.l.bf16 %v4227_v13  ;;  %v535_v2 = vmul.f32 %v3402_v47, %v3914_v11  ;;  %v534_v60 = vmul.f32 %v3401_v0, %v3914_v11  ;;  %3333 = vset.pattern.permute.xlu1 %v5500_v12 }
  0xfc   : > { %v883_v9 = vrot.slane %v849_v4, 1  ;;  %v880_v5 = vrot.slane %v847_v54, 1  ;;  %v4364_v39 = vadd.f32 %v1203_v14, %v1139_v58  ;;  %v4366_v37 = vadd.f32 %v1204_v30, %v1140_v15  ;;  %v4368_v10 = vpop.permute.xlu0 %3404  ;;  %3335 = vperm.xlu1 %3333, %v3833_v53   ;;  %v4371_v38 = vpop.permute.xlu1 %3093  ;;  %v5519_v14 = vld [vmem:[#allocation36_spill] sm:$0xff] }
  0xfd   : > { %v901_v45 = vrot.slane %v861_v27, 1  ;;  %v898_v13 = vrot.slane %v859_v32, 1  ;;  %v542_v44 = vadd.f32 %v534_v60, %v4274_v21  ;;  %v543_v29 = vadd.f32 %v535_v2, %v4265_v17  ;;  %v5520_v27 = vld [vmem:[#allocation35_spill] sm:$0xff] }
  0xfe   : > { %v1001_v26 = vrot.slane %v966_v25, 1  ;;  %v4376_v4 = vmul.f32 %v3052_v22, %v3995_v40  ;;  %v5438_v58 = vunpack.i.h.bf16 %v4368_v10  ;;  %v5437_v15 = vunpack.i.l.bf16 %v4368_v10 }
  0xff   : > { %v1107_v54 = vrot.slane %v1074_v43, 1  ;;  %v4381_v30 = vmul.f32 %v3063_v34, %v3802_v19  ;;  %v598_v57 = vadd.f32 %v5519_v14, %v542_v44  ;;  %v599_v32 = vadd.f32 %v5520_v27, %v543_v29  ;;  %v5521_v34 = vld [vmem:[#allocation15_spill] sm:$0xff]  ;;  %v5526_v29 = vld [vmem:[#allocation22_spill] sm:$0xff] }
 0x100   : > { %v4388_v17 = vsel %vm878_vm0, %v882_v6, %v883_v9  ;;  %v4393_v21 = vsel %vm878_vm0, %v879_v59, %v880_v5  ;;  %v541_v25 = vmul.f32 %v5438_v58, %v3914_v11  ;;  %v540_v22 = vmul.f32 %v5437_v15, %v3914_v11  ;;  %v3410_v43 = vpop.permute.xlu0 %3409  ;;  %3340 = vperm.xlu1 %3333, %v5521_v34   ;;  %v4402_v52 = vpop.permute.xlu1 %3098  ;;  %v5522_v6 = vld [vmem:[#allocation16_spill] sm:$0xff]  ;;  %v5524_v59 = vld [vmem:[#allocation17_spill] sm:$0xff] }
 0x101   : > { %v5523_v2 = vrot.slane %v5522_v6, 1  ;;  %v5525_v60 = vrot.slane %v5524_v59, 1  ;;  %v670_v5 = vadd.f32 %v662_v63, %v598_v57  ;;  %v671_v44 = vadd.f32 %v663_v41, %v599_v32  ;;  %v5529_v6 = vld [vmem:[#allocation19_spill] sm:$0xff] }
 0x102   : > { %v5527_v14 = vrot.slane %v5526_v29, 1  ;;  %v998_v27 = vrot.slane %v4376_v4, 1  ;;  %v549_v15 = vadd.f32 %v541_v25, %v5528_v51  ;;  %v548_v58 = vadd.f32 %v540_v22, %v5529_v6 }
 0x103   : > { %v4407_v31 = vsel %vm878_vm0, %v5523_v2, %v901_v45  ;;  %v4412_v9 = vsel %vm878_vm0, %v5525_v60, %v898_v13  ;;  %v1104_v45 = vrot.slane %v4381_v30, 1  ;;  %v5530_v2 = vld [vmem:[#allocation28_spill] sm:$0xff]  ;;  %v3079_v41 = vunpack.i.h.bf16 %v4271_v62  ;;  %v5533_v60 = vld [vmem:[#allocation47_spill] sm:$0xff] }
 0x104   : > { %v4417_v11 = vsel %vm878_vm0, %v5527_v14, %v1001_v26  ;;  %v5531_v59 = vrot.slane %v5530_v2, 1  ;;  %v3078_v63 = vunpack.i.l.bf16 %v4271_v62  ;;  %v961_v57 = vmul.f32 %v3402_v47, %v3995_v40  ;;  %v5532_v26 = vld [vmem:[#allocation48_spill] sm:$0xff]  ;;  %v3415_v25 = vpop.permute.xlu0 %3414  ;;  %v4434_v14 = vpop.permute.xlu1 %3103  ;;  %v5535_v62 = vld [vmem:[#allocation2_spill] sm:$0xff]  ;;  %v5549_v30 = vld [vmem:[#allocation43_spill] sm:$0xff] }
 0x105   : > { %v604_v32 = vadd.f32 %v5532_v26, %v548_v58  ;;  %v605_v29 = vadd.f32 %v5533_v60, %v549_v15  ;;  %v3412_v51 = vunpack.i.h.bf16 %v3410_v43  ;;  %v5534_v22 = vmov 1   ;;  %v4445_v15 = vld [vmem:[%s5387_s4 + $0xa] ss:$0 sm:$0xff] }
 0x106   : > { %v4426_v13 = vsel %vm878_vm0, %v5531_v59, %v1107_v54  ;;  %3349 = vset.pattern.permute.xlu1 %v5534_v22  ;;  %v959_v6 = vmul.f32 %v3401_v0, %v3995_v40  ;;  %v3411_v54 = vunpack.i.l.bf16 %v3410_v43  ;;  %v5440_v2 = vunpack.i.h.bf16 %v4402_v52 }
 0x107   : > { %v5439_v59 = vunpack.i.l.bf16 %v4402_v52  ;;  %3351 = vperm.xlu1 %3349, %v5535_v62   ;;  %v726_v47 = vadd.f32 %v4239_v20, %v670_v5  ;;  %v727_v58 = vadd.f32 %v4236_v48, %v671_v44  ;;  %v721_v26 = vmul.f32 %v3412_v51, %v4211_v61 }
 0x108   : > { %v3417_v60 = vunpack.i.h.bf16 %v3415_v25  ;;  %v676_v0 = vadd.f32 %v4334_v18, %v604_v32  ;;  %v720_v43 = vmul.f32 %v3411_v54, %v4211_v61  ;;  %v1260_v62 = vmul.f32 %v5440_v2, %v4445_v15 }
 0x109   : > { %v1259_v48 = vmul.f32 %v5439_v59, %v4445_v15  ;;  %v4457_v20 = vmul.f32 %v3079_v41, %v3802_v19  ;;  %v1084_v5 = vmul.f32 %v3078_v63, %v3802_v19  ;;  %v677_v44 = vadd.f32 %v4331_v28, %v605_v29  ;;  %v4470_v59 = vpop.permute.xlu1 %3114  ;;  %v5537_v29 = vld [vmem:[#allocation20_spill] sm:$0xff] }
 0x10a   : > { %v729_v51 = vadd.f32 %v721_v26, %v4325_v49  ;;  %v994_v18 = vrot.slane %v961_v57, 1  ;;  %v728_v61 = vadd.f32 %v720_v43, %v4321_v1  ;;  %v4467_v54 = vadd.f32 %v1260_v62, %v4366_v37  ;;  %v5536_v57 = vld [vmem:[#allocation21_spill] sm:$0xff]  ;;  %v3420_v37 = vpop.permute.xlu0 %3419  ;;  %v5538_v62 = vld [vmem:[#allocation31_spill] sm:$0xff] }
 0x10b   : > { %v4464_v32 = vadd.f32 %v1259_v48, %v4364_v39  ;;  %3356 = vperm.xlu1 %3349, %v5521_v34   ;;  %v991_v41 = vrot.slane %v959_v6, 1  ;;  %v962_v28 = vmul.f32 %v3417_v60, %v3995_v40  ;;  %v3416_v63 = vunpack.i.l.bf16 %v3415_v25  ;;  %v5540_v60 = vld [vmem:[#allocation30_spill] sm:$0xff] }
 0x10c   : > { %v785_v19 = vadd.f32 %v4316_v16, %v729_v51  ;;  %v732_v49 = vadd.f32 %v4307_v36, %v676_v0  ;;  %v784_v1 = vadd.f32 %v4328_v33, %v728_v61  ;;  %v782_v39 = vadd.f32 %v5536_v57, %v726_v47  ;;  %v5541_v0 = vld [vmem:[#allocation3_spill] sm:$0xff] }
 0x10d   : > { %v783_v26 = vadd.f32 %v5537_v29, %v727_v58  ;;  %v733_v43 = vadd.f32 %v4304_v50, %v677_v44  ;;  %v995_v2 = vrot.slane %v962_v28, 1  ;;  %v960_v6 = vmul.f32 %v3416_v63, %v3995_v40  ;;  %v4488_v58 = vpop.permute.xlu1 %3119 }
 0x10e   : > { %v914_v48 = vadd.f32 %v5538_v62, %v785_v19  ;;  %v5539_v16 = vunpack.i.h.bf16 %v4368_v10  ;;  %v913_v36 = vadd.f32 %v5540_v60, %v784_v1  ;;  %v911_v33 = vadd.f32 %v4393_v21, %v782_v39  ;;  %v5543_v39 = vld [vmem:[#allocation25_spill] sm:$0xff] }
 0x10f   : > { %v912_v47 = vadd.f32 %v4388_v17, %v783_v26  ;;  %3361 = vperm.xlu1 %3349, %v5541_v0   ;;  %v1125_v50 = vrot.slane %v4457_v20, 1  ;;  %v5542_v44 = vunpack.i.l.bf16 %v4368_v10  ;;  %v992_v61 = vrot.slane %v960_v6, 1  ;;  %v5544_v26 = vld [vmem:[#allocation24_spill] sm:$0xff] }
 0x110   : > { %v973_v25 = vmul.f32 %v5539_v16, %v3995_v40  ;;  %v996_v19 = vsel %vm878_vm0, %v994_v18, %v995_v2  ;;  %v1122_v28 = vrot.slane %v1084_v5, 1  ;;  %v3422_v1 = vunpack.i.h.bf16 %v3420_v37  ;;  %v4503_v2 = vpop.permute.xlu0 %3424  ;;  %v5545_v5 = vld [vmem:[#allocation29_spill] sm:$0xff] }
 0x111   : > { %v971_v51 = vmul.f32 %v5542_v44, %v3995_v40  ;;  %v1024_v63 = vadd.f32 %v996_v19, %v912_v47  ;;  %v3421_v57 = vunpack.i.l.bf16 %v3420_v37  ;;  %v3085_v21 = vunpack.i.h.bf16 %v4299_v55 }
 0x112   : > { %v993_v17 = vsel %vm878_vm0, %v991_v41, %v992_v61  ;;  %v788_v29 = vadd.f32 %v5543_v39, %v732_v49  ;;  %v789_v62 = vadd.f32 %v5544_v26, %v733_v43  ;;  %v1012_v20 = vrot.slane %v973_v25, 1  ;;  %v5547_v25 = vld [vmem:[#allocation23_spill] sm:$0xff] }
 0x113   : > { %v1023_v16 = vadd.f32 %v993_v17, %v911_v33  ;;  %v4500_v10 = vadd.f32 %v4426_v13, %v1024_v63  ;;  %v974_v6 = vmul.f32 %v3422_v1, %v3995_v40  ;;  %3365 = vset.pattern.permute.xlu1 %v5478_v24  ;;  %v5546_v18 = vrot.slane %v5545_v5, 1  ;;  %v4514_v13 = vpop.permute.xlu1 %3130  ;;  %v5551_v63 = vld [vmem:[#allocation41_spill] sm:$0xff] }
 0x114   : > { %v3084_v49 = vunpack.i.l.bf16 %v4299_v55  ;;  %v1009_v37 = vrot.slane %v971_v51, 1  ;;  %v972_v43 = vmul.f32 %v3421_v57, %v3995_v40  ;;  %3367 = vperm.xlu1 %3365, %v3833_v53   ;;  %v5548_v60 = vrot.slane %v5547_v25, 1  ;;  %v5577_v55 = vld [vmem:[#allocation40_spill] sm:$0xff] }
 0x115   : > { %v1105_v41 = vsel %vm878_vm0, %v5546_v18, %v1104_v45  ;;  %v5550_v47 = vrot.slane %v5549_v30, 1  ;;  %v1013_v61 = vrot.slane %v974_v6, 1  ;;  %v918_v51 = vadd.f32 %v4407_v31, %v789_v62 }
 0x116   : > { %v999_v33 = vsel %vm878_vm0, %v5548_v60, %v998_v27  ;;  %v1135_v45 = vadd.f32 %v1105_v41, %v1023_v16  ;;  %v1010_v19 = vrot.slane %v972_v43, 1  ;;  %v3427_v40 = vunpack.i.h.bf16 %v4503_v2  ;;  %v5553_v41 = vld [vmem:[#allocation6_spill] sm:$0xff]  ;;  %v5554_v43 = vld [vmem:[#allocation7_spill] sm:$0xff] }
 0x117   : > { %v1123_v44 = vsel %vm878_vm0, %v5550_v47, %v1122_v28  ;;  %v3426_v53 = vunpack.i.l.bf16 %v4503_v2  ;;  %v5552_v1 = vrot.slane %v5551_v63, 1  ;;  %v1202_v27 = vmul.f32 %v3085_v21, %v4347_v35 }
 0x118   : > { %v917_v57 = vadd.f32 %v4412_v9, %v788_v29  ;;  %v1014_v28 = vsel %vm878_vm0, %v1012_v20, %v1013_v61  ;;  %v1201_v31 = vmul.f32 %v3084_v49, %v4347_v35  ;;  %v3096_v17 = vunpack.i.h.bf16 %v4371_v38  ;;  %3372 = vperm.xlu1 %3365, %v5521_v34   ;;  %v5557_v61 = vld [vmem:[#allocation45_spill] sm:$0xff] }
 0x119   : > { %v1126_v4 = vsel %vm878_vm0, %v5552_v1, %v1125_v50  ;;  %v1011_v39 = vsel %vm878_vm0, %v1009_v37, %v1010_v19  ;;  %v1030_v26 = vadd.f32 %v1014_v28, %v918_v51  ;;  %v3136_v50 = vpop.permute.xlu1 %3135  ;;  %v3117_v16 = vunpack.i.h.bf16 %v4470_v59  ;;  %v5559_v51 = vld [vmem:[#allocation46_spill] sm:$0xff] }
 0x11a   : > { %v1029_v62 = vadd.f32 %v1011_v39, %v917_v57  ;;  %v1025_v6 = vadd.f32 %v999_v33, %v913_v36  ;;  %v1026_v9 = vadd.f32 %v4417_v11, %v914_v48  ;;  %v3116_v20 = vunpack.i.l.bf16 %v4470_v59  ;;  %v5555_v11 = vld [vmem:[#allocation26_spill] sm:$0xff]  ;;  %v5562_v39 = vld [vmem:[#allocation27_spill] sm:$0xff] }
 0x11b   : > { %v4543_v29 = vadd.f32 %v1126_v4, %v1030_v26  ;;  %v1258_v5 = vmul.f32 %v3427_v40, %v4445_v15  ;;  %v1257_v18 = vmul.f32 %v3426_v53, %v4445_v15  ;;  %v5442_v36 = vunpack.i.h.bf16 %v4488_v58 }
 0x11c   : > { %v1141_v34 = vadd.f32 %v1123_v44, %v1029_v62  ;;  %v1137_v37 = vadd.f32 %v5553_v41, %v1025_v6  ;;  %v1138_v25 = vadd.f32 %v5554_v43, %v1026_v9  ;;  %v5556_v48 = vunpack.i.h.bf16 %v5555_v11  ;;  %3381 = vset.pattern.permute.xlu1 %v5500_v12  ;;  %v5563_v62 = vld [vmem:[#allocation9_spill] sm:$0xff] }
 0x11d   : > { %v3095_v33 = vunpack.i.l.bf16 %v4371_v38  ;;  %v5441_v30 = vunpack.i.l.bf16 %v4488_v58  ;;  %v4561_v47 = vpop.permute.xlu1 %3140  ;;  %v5558_v44 = vunpack.c.l.bf16 %v5557_v61  ;;  %v5560_v19 = vunpack.c.l.bf16 %v5559_v51  ;;  %3383 = vperm.xlu1 %3381, %v5563_v62   ;;  %v2879_v61 = vld [vmem:[%s5387_s4 + $0xc] ss:$0 sm:$0xff] }
 0x11e   : > { %v1200_v60 = vmul.f32 %v5556_v48, %v4347_v35  ;;  %v5561_v1 = vunpack.i.l.bf16 %v5555_v11  ;;  %v1209_v57 = vadd.f32 %v1201_v31, %v1137_v37  ;;  %v1210_v28 = vadd.f32 %v1202_v27, %v1138_v25 }
 0x11f   : > { %v4567_v63 = vpack.i.bf16 %v5560_v19, %v5558_v44  ;;  %v1316_v26 = vmul.f32 %v5442_v36, %v5562_v39  ;;  %v1256_v12 = vmul.f32 %v3096_v17, %v4445_v15  ;;  %v1314_v6 = vmul.f32 %v3117_v16, %v5562_v39  ;;  %v5564_v19 = vld [vmem:[#allocation33_spill] sm:$0xff] }
 0x120   : > { %v1199_v4 = vmul.f32 %v5561_v1, %v4347_v35  ;;  %v1315_v9 = vmul.f32 %v5441_v30, %v5562_v39  ;;  %v1313_v27 = vmul.f32 %v3116_v20, %v5562_v39  ;;  %v1265_v31 = vadd.f32 %v1257_v18, %v1209_v57  ;;  %v5569_v30 = vld [vmem:[#allocation32_spill] sm:$0xff] }
 0x121   : > { %v1266_v41 = vadd.f32 %v1258_v5, %v1210_v28  ;;  %v1324_v37 = vadd.f32 %v1316_v26, %v4467_v54  ;;  %v1255_v43 = vmul.f32 %v3095_v33, %v4445_v15  ;;  %v3133_v11 = vunpack.i.h.bf16 %v4514_v13  ;;  %3388 = vperm.xlu1 %3381, %v4567_v63   ;;  %v3147_v54 = vpop.permute.xlu1 %3146 }
 0x122   : > { %v1323_v25 = vadd.f32 %v1315_v9, %v4464_v32  ;;  %v3132_v48 = vunpack.i.l.bf16 %v4514_v13  ;;  %v1321_v44 = vadd.f32 %v1313_v27, %v1265_v31  ;;  %v1207_v18 = vadd.f32 %v1199_v4, %v1135_v45  ;;  %v5567_v45 = vld [vmem:[#allocation42_spill] sm:$0xff] }
 0x123   : > { %v1322_v51 = vadd.f32 %v1314_v6, %v1266_v41  ;;  %v1208_v5 = vadd.f32 %v1200_v60, %v4500_v10  ;;  %v5565_v1 = vunpack.i.h.bf16 %v5564_v19  ;;  %v5566_v57 = vunpack.i.l.bf16 %v5564_v19  ;;  %v5568_v41 = vld [vmem:[#allocation34_spill] sm:$0xff] }
 0x124   : > { %v1384_v28 = vmul.f32 %v3133_v11, %v2879_v61  ;;  %v1383_v39 = vmul.f32 %v3132_v48, %v2879_v61  ;;  %v1263_v26 = vadd.f32 %v1255_v43, %v1207_v18  ;;  %v3138_v27 = vunpack.i.h.bf16 %v3136_v50  ;;  %v5571_v11 = vld [vmem:[#allocation8_spill] sm:$0xff] }
 0x125   : > { %v1206_v32 = vmul.f32 %v5565_v1, %v4347_v35  ;;  %v1205_v13 = vmul.f32 %v5566_v57, %v4347_v35  ;;  %v1264_v9 = vadd.f32 %v1256_v12, %v1208_v5  ;;  %v3137_v6 = vunpack.i.l.bf16 %v3136_v50  ;;  %3458 = vset.pattern.permute.xlu1 %v5478_v24  ;;  %v3152_v43 = vpop.permute.xlu1 %3151  ;;  %v5570_v12 = vld [vmem:[#allocation37_spill] sm:$0xff] }
 0x126   : > { %v3302_v4 = vunpack.i.h.bf16 %v5567_v45  ;;  %v3301_v10 = vunpack.i.l.bf16 %v5567_v45  ;;  %v3106_v60 = vunpack.i.h.bf16 %v4434_v14  ;;  %v3105_v31 = vunpack.i.l.bf16 %v4434_v14  ;;  %3460 = vperm.xlu1 %3458, %v5541_v0  }
 0x127   : > { %v1319_v1 = vadd.f32 %v5568_v41, %v1263_v26  ;;  %v1320_v36 = vadd.f32 %v5569_v30, %v1264_v9  ;;  %v1388_v19 = vmul.f32 %v3138_v27, %v2879_v61  ;;  %v1387_v35 = vmul.f32 %v3137_v6, %v2879_v61 }
 0x128   : > { %v5572_v50 = vunpack.i.l.bf16 %v5571_v11  ;;  %v3143_v18 = vunpack.i.h.bf16 %v4561_v47  ;;  %v3142_v5 = vunpack.i.l.bf16 %v4561_v47  ;;  %v1261_v27 = vmul.f32 %v3105_v31, %v4445_v15 }
 0x129   : > { %v4619_v57 = vadd.f32 %v1383_v39, %v1319_v1  ;;  %v4621_v26 = vadd.f32 %v1384_v28, %v1320_v36  ;;  %v1395_v30 = vadd.f32 %v1387_v35, %v1323_v25  ;;  %v1396_v9 = vadd.f32 %v1388_v19, %v1324_v37  ;;  %v3158_v36 = vpop.permute.xlu1 %3157  ;;  %v5574_v19 = vld [vmem:[#allocation38_spill] sm:$0xff] }
 0x12a   : > { %v1497_v48 = vmul.f32 %v5572_v50, %v5570_v12  ;;  %v1213_v6 = vadd.f32 %v1205_v13, %v1141_v34  ;;  %v1386_v45 = vmul.f32 %v3302_v4, %v2879_v61  ;;  %v1385_v41 = vmul.f32 %v3301_v10, %v2879_v61  ;;  %3469 = vset.pattern.permute.xlu1 %v5534_v22  ;;  %v4635_v34 = vld [vmem:[%s5387_s4 + $0xd] ss:$0 sm:$0xff] }
 0x12b   : > { %v1262_v11 = vmul.f32 %v3106_v60, %v4445_v15  ;;  %v1214_v47 = vadd.f32 %v1206_v32, %v4543_v29  ;;  %v1389_v39 = vmul.f32 %v3142_v5, %v2879_v61  ;;  %v3149_v1 = vunpack.i.h.bf16 %v3147_v54  ;;  %3471 = vperm.xlu1 %3469, %v5563_v62   ;;  %v3430_v29 = vpop.permute.xlu0 %3429  ;;  %v5573_v32 = vld [vmem:[#allocation39_spill] sm:$0xff] }
 0x12c   : > { %v1269_v0 = vadd.f32 %v1261_v27, %v1213_v6  ;;  %v3380_v37 = vunpack.i.h.bf16 %v4280_v8  ;;  %v1390_v25 = vmul.f32 %v3143_v18, %v2879_v61  ;;  %v3379_v15 = vunpack.i.l.bf16 %v4280_v8  ;;  %v4645_v61 = vld [vmem:[%s5387_s4 + $0x18] ss:$0 sm:$0xff]  ;;  %v5575_v18 = vld [vmem:[#allocation44_spill] sm:$0xff] }
 0x12d   : > { %v1270_v13 = vadd.f32 %v1262_v11, %v1214_v47  ;;  %v1442_v4 = vmul.f32 %v3149_v1, %v4635_v34  ;;  %v3148_v22 = vunpack.i.l.bf16 %v3147_v54  ;;  %v3432_v10 = vunpack.i.h.bf16 %v3430_v29  ;;  %v3168_v6 = vpop.permute.xlu1 %3167  ;;  %v5576_v11 = vld [vmem:[#allocation49_spill] sm:$0xff] }
 0x12e   : > { %v1325_v28 = vadd.f32 %v5573_v32, %v1269_v0  ;;  %v1393_v50 = vadd.f32 %v1385_v41, %v1321_v44  ;;  %v1394_v5 = vadd.f32 %v1386_v45, %v1322_v51  ;;  %v4650_v8 = vmul.f32 %v3085_v21, %v5575_v18 }
 0x12f   : > { %v1326_v35 = vadd.f32 %v5574_v19, %v1270_v13  ;;  %v3431_v62 = vunpack.i.l.bf16 %v3430_v29  ;;  %v1441_v54 = vmul.f32 %v3148_v22, %v4635_v34  ;;  %v4658_v44 = vmul.f32 %v3084_v49, %v5575_v18  ;;  %3476 = vperm.xlu1 %3469, %v4567_v63  }
 0x130   : > { %v4652_v27 = vadd.f32 %v1389_v39, %v1325_v28  ;;  %v1450_v45 = vadd.f32 %v1442_v4, %v1394_v5  ;;  %v3154_v41 = vunpack.i.h.bf16 %v3152_v43  ;;  %v3317_v21 = vunpack.i.h.bf16 %v5576_v11  ;;  %v4696_v5 = vld [vmem:[%s5387_s4 + $0x10] ss:$0 sm:$0xff] }
 0x131   : > { %v4660_v51 = vadd.f32 %v1390_v25, %v1326_v35  ;;  %v3316_v47 = vunpack.i.l.bf16 %v5576_v11  ;;  %v1449_v0 = vadd.f32 %v1441_v54, %v1393_v50  ;;  %v3153_v39 = vunpack.i.l.bf16 %v3152_v43  ;;  %v3173_v43 = vpop.permute.xlu1 %3172 }
 0x132   : > { %v4666_v1 = vmul.f32 %v3380_v37, %v4645_v61  ;;  %v1440_v13 = vmul.f32 %v3432_v10, %v4635_v34  ;;  %v4670_v49 = vadd.f32 %v5577_v55, %v1450_v45  ;;  %v1444_v25 = vmul.f32 %v3154_v41, %v4635_v34  ;;  %v5580_v45 = vld [vmem:[#allocation4_spill] sm:$0xff] }
 0x133   : > { %v4674_v29 = vmul.f32 %v3379_v15, %v4645_v61  ;;  %v1439_v32 = vmul.f32 %v3431_v62, %v4635_v34  ;;  %v4677_v28 = vadd.f32 %v1497_v48, %v1449_v0  ;;  %v1443_v4 = vmul.f32 %v3153_v39, %v4635_v34  ;;  %3491 = vset.pattern.permute.xlu1 %v5478_v24  ;;  %v3435_v62 = vpop.permute.xlu0 %3434 }
 0x134   : > { %v1608_v37 = vrot.slane %v4650_v8, 1  ;;  %v1605_v22 = vrot.slane %v4658_v44, 1  ;;  %v1452_v10 = vadd.f32 %v1444_v25, %v1396_v9  ;;  %v3160_v19 = vunpack.i.h.bf16 %v3158_v36  ;;  %3493 = vperm.xlu1 %3491, %v5580_v45  }
 0x135   : > { %v5578_v35 = vunpack.i.h.bf16 %v4338_v3  ;;  %v5579_v48 = vunpack.i.l.bf16 %v4338_v3  ;;  %v1451_v9 = vadd.f32 %v1443_v4, %v1395_v30  ;;  %v3159_v54 = vunpack.i.l.bf16 %v3158_v36 }
 0x136   : > { %v3437_v24 = vunpack.i.h.bf16 %v3435_v62  ;;  %v3436_v41 = vunpack.i.l.bf16 %v3435_v62  ;;  %v1496_v0 = vmul.f32 %v3160_v19, %v5570_v12  ;;  %v1448_v39 = vadd.f32 %v1440_v13, %v4621_v26  ;;  %v3179_v13 = vpop.permute.xlu1 %3178  ;;  %v5583_v62 = vld [vmem:[#allocation51_spill] sm:$0xff] }
 0x137   : > { %v4686_v15 = vmul.f32 %v5578_v35, %v5575_v18  ;;  %v4691_v50 = vmul.f32 %v5579_v48, %v5575_v18  ;;  %v1447_v3 = vadd.f32 %v1439_v32, %v4619_v57  ;;  %v1495_v55 = vmul.f32 %v3159_v54, %v5570_v12 }
 0x138   : > { %v3170_v25 = vunpack.i.h.bf16 %v3168_v6  ;;  %v3169_v35 = vunpack.i.l.bf16 %v3168_v6  ;;  %v4706_v48 = vmul.f32 %v3096_v17, %v4696_v5  ;;  %v4711_v30 = vmul.f32 %v3095_v33, %v4696_v5  ;;  %3503 = vperm.xlu1 %3491, %v4567_v63  }
 0x139   : > { %v5581_v36 = vunpack.i.h.bf16 %v4402_v52  ;;  %v1504_v57 = vadd.f32 %v1496_v0, %v1448_v39  ;;  %v5582_v6 = vunpack.i.l.bf16 %v4402_v52  ;;  %v1503_v4 = vadd.f32 %v1495_v55, %v1447_v3  ;;  %v5584_v0 = vld [vmem:[#allocation50_spill] sm:$0xff] }
 0x13a   : > { %v1500_v17 = vmul.f32 %v3170_v25, %v5570_v12  ;;  %v1499_v19 = vmul.f32 %v3169_v35, %v5570_v12  ;;  %v4729_v38 = vmul.f32 %v3106_v60, %v4696_v5  ;;  %v4734_v33 = vmul.f32 %v3105_v31, %v4696_v5  ;;  %v3184_v25 = vpop.permute.xlu1 %3183 }
 0x13b   : > { %v4716_v26 = vmul.f32 %v5581_v36, %v4696_v5  ;;  %v4721_v32 = vmul.f32 %v5582_v6, %v4696_v5  ;;  %v1446_v52 = vmul.f32 %v3437_v24, %v4635_v34  ;;  %v4738_v54 = vadd.f32 %v5583_v62, %v1504_v57  ;;  %v5585_v36 = vld [vmem:[#allocation5_spill] sm:$0xff] }
 0x13c   : > { %v1445_v45 = vmul.f32 %v3436_v41, %v4635_v34  ;;  %v4742_v39 = vadd.f32 %v5584_v0, %v1503_v4  ;;  %v4744_v63 = vadd.f32 %v1499_v19, %v1451_v9  ;;  %v1508_v3 = vadd.f32 %v1500_v17, %v1452_v10  ;;  %3508 = vperm.xlu1 %3491, %v5585_v36   ;;  %v4772_v17 = vld [vmem:[%s5387_s4 + $0x11] ss:$0 sm:$0xff] }
 0x13d   : > { %v1614_v60 = vrot.slane %v4686_v15, 1  ;;  %v1611_v55 = vrot.slane %v4691_v50, 1  ;;  %v1714_v14 = vrot.slane %v4706_v48, 1  ;;  %v3175_v31 = vunpack.i.h.bf16 %v3173_v43 }
 0x13e   : > { %v1711_v24 = vrot.slane %v4711_v30, 1  ;;  %v1726_v35 = vrot.slane %v4716_v26, 1  ;;  %v1723_v34 = vrot.slane %v4721_v32, 1  ;;  %v3174_v41 = vunpack.i.l.bf16 %v3173_v43 }
 0x13f   : > { %v1732_v9 = vrot.slane %v4729_v38, 1  ;;  %v1729_v10 = vrot.slane %v4734_v33, 1  ;;  %v1502_v15 = vmul.f32 %v3175_v31, %v5570_v12  ;;  %v1454_v50 = vadd.f32 %v1446_v52, %v4660_v51  ;;  %v2891_v38 = vld [vmem:[%s5387_s4 + $0x12] ss:$0 sm:$0xff] }
 0x140   : > { %v4760_v57 = vmul.f32 %v3427_v40, %v4696_v5  ;;  %v4765_v6 = vmul.f32 %v3426_v53, %v4696_v5  ;;  %v1453_v43 = vadd.f32 %v1445_v45, %v4652_v27  ;;  %v1501_v4 = vmul.f32 %v3174_v41, %v5570_v12  ;;  %v3440_v40 = vpop.permute.xlu0 %3439  ;;  %v3190_v45 = vpop.permute.xlu1 %3189 }
 0x141   : > { %v4777_v51 = vmul.f32 %v4772_v17, %v3117_v16  ;;  %v1510_v19 = vadd.f32 %v1502_v15, %v1454_v50  ;;  %v3181_v52 = vunpack.i.h.bf16 %v3179_v13  ;;  %v3180_v2 = vunpack.i.l.bf16 %v3179_v13 }
 0x142   : > { %v4782_v53 = vmul.f32 %v4772_v17, %v3116_v20  ;;  %v3442_v12 = vunpack.i.h.bf16 %v3440_v40  ;;  %v3441_v27 = vunpack.i.l.bf16 %v3440_v40  ;;  %v1509_v62 = vadd.f32 %v1501_v4, %v1453_v43 }
 0x143   : > { %v4785_v0 = vadd.f32 %v4262_v46, %v1510_v19  ;;  %v1574_v31 = vmul.f32 %v3181_v52, %v5575_v18  ;;  %v1572_v16 = vmul.f32 %v3180_v2, %v5575_v18  ;;  %v3186_v41 = vunpack.i.h.bf16 %v3184_v25 }
 0x144   : > { %v1720_v36 = vrot.slane %v4760_v57, 1  ;;  %v1717_v13 = vrot.slane %v4765_v6, 1  ;;  %v4792_v59 = vadd.f32 %v4259_v56, %v1509_v62  ;;  %v3185_v20 = vunpack.i.l.bf16 %v3184_v25  ;;  %v3195_v2 = vpop.permute.xlu1 %3194 }
 0x145   : > { %v1609_v15 = vrot.slane %v1574_v31, 1  ;;  %v1606_v50 = vrot.slane %v1572_v16, 1  ;;  %v1578_v43 = vmul.f32 %v3186_v41, %v5575_v18  ;;  %v3192_v4 = vunpack.i.h.bf16 %v3190_v45 }
 0x146   : > { %v1686_v46 = vmul.f32 %v3442_v12, %v4696_v5  ;;  %v1684_v40 = vmul.f32 %v3441_v27, %v4696_v5  ;;  %v1576_v19 = vmul.f32 %v3185_v20, %v5575_v18  ;;  %v3191_v52 = vunpack.i.l.bf16 %v3190_v45 }
 0x147   : > { %v1607_v57 = vsel %vm878_vm0, %v1605_v22, %v1606_v50  ;;  %v1610_v56 = vsel %vm878_vm0, %v1608_v37, %v1609_v15  ;;  %v1615_v25 = vrot.slane %v1578_v43, 1  ;;  %v1682_v6 = vmul.f32 %v3192_v4, %v4696_v5 }
 0x148   : > { %v1633_v62 = vadd.f32 %v1607_v57, %v4677_v28  ;;  %v1634_v12 = vadd.f32 %v1610_v56, %v4670_v49  ;;  %v1612_v27 = vrot.slane %v1576_v19, 1  ;;  %v1680_v18 = vmul.f32 %v3191_v52, %v4696_v5  ;;  %v3200_v20 = vpop.permute.xlu1 %3199 }
 0x149   : > { %v1616_v45 = vsel %vm878_vm0, %v1614_v60, %v1615_v25  ;;  %v1715_v31 = vrot.slane %v1682_v6, 1  ;;  %v3197_v44 = vunpack.i.h.bf16 %v3195_v2  ;;  %v3196_v16 = vunpack.i.l.bf16 %v3195_v2  ;;  %v5586_v2 = vld [vmem:[#allocation10_spill] sm:$0xff] }
 0x14a   : > { %v1721_v22 = vrot.slane %v1686_v46, 1  ;;  %v1613_v8 = vsel %vm878_vm0, %v1611_v55, %v1612_v27  ;;  %v1636_v41 = vadd.f32 %v1616_v45, %v1508_v3  ;;  %v1712_v37 = vrot.slane %v1680_v18, 1 }
 0x14b   : > { %v1635_v15 = vadd.f32 %v1613_v8, %v4744_v63  ;;  %v1716_v49 = vsel %vm878_vm0, %v1714_v14, %v1715_v31  ;;  %v1690_v28 = vmul.f32 %v3197_v44, %v4696_v5  ;;  %v1688_v50 = vmul.f32 %v3196_v16, %v4696_v5 }
 0x14c   : > { %v1713_v60 = vsel %vm878_vm0, %v1711_v24, %v1712_v37  ;;  %v3202_v43 = vunpack.i.h.bf16 %v3200_v20  ;;  %v3201_v4 = vunpack.i.l.bf16 %v3200_v20  ;;  %v1744_v3 = vadd.f32 %v1716_v49, %v4738_v54  ;;  %v5590_v37 = vld [vmem:[#allocation13_spill] sm:$0xff] }
 0x14d   : > { %v1718_v55 = vrot.slane %v1684_v40, 1  ;;  %v1727_v46 = vrot.slane %v1690_v28, 1  ;;  %v1724_v19 = vrot.slane %v1688_v50, 1  ;;  %v1743_v63 = vadd.f32 %v1713_v60, %v4742_v39  ;;  %v3211_v39 = vpop.permute.xlu1 %3210  ;;  %v5587_v40 = vld [vmem:[#allocation12_spill] sm:$0xff] }
 0x14e   : > { %v1832_v48 = vrot.slane %v4777_v51, 1  ;;  %v1694_v14 = vmul.f32 %v3202_v43, %v4696_v5  ;;  %v1692_v52 = vmul.f32 %v3201_v4, %v4696_v5  ;;  %v4825_v57 = vadd.f32 %v5586_v2, %v1744_v3 }
 0x14f   : > { %v1829_v30 = vrot.slane %v4782_v53, 1  ;;  %v1725_v54 = vsel %vm878_vm0, %v1723_v34, %v1724_v19  ;;  %v1728_v24 = vsel %vm878_vm0, %v1726_v35, %v1727_v46  ;;  %v1855_v51 = vadd.f32 %v5587_v40, %v1743_v63 }
 0x150   : > { %v1733_v56 = vrot.slane %v1694_v14, 1  ;;  %v1730_v25 = vrot.slane %v1692_v52, 1  ;;  %v3213_v6 = vunpack.i.h.bf16 %v3211_v39  ;;  %v3212_v5 = vunpack.i.l.bf16 %v3211_v39 }
 0x151   : > { %v1719_v27 = vsel %vm878_vm0, %v1717_v13, %v1718_v55  ;;  %v1722_v18 = vsel %vm878_vm0, %v1720_v36, %v1721_v22  ;;  %v1747_v53 = vadd.f32 %v1725_v54, %v1635_v15  ;;  %v1748_v45 = vadd.f32 %v1728_v24, %v1636_v41  ;;  %v3216_v16 = vpop.permute.xlu1 %3215  ;;  %v5591_v15 = vld [vmem:[#allocation14_spill] sm:$0xff] }
 0x152   : > { %v1731_v32 = vsel %vm878_vm0, %v1729_v10, %v1730_v25  ;;  %v1734_v26 = vsel %vm878_vm0, %v1732_v9, %v1733_v56  ;;  %v1798_v35 = vmul.f32 %v4772_v17, %v3213_v6  ;;  %v1796_v34 = vmul.f32 %v4772_v17, %v3212_v5 }
 0x153   : > { %v5588_v31 = vunpack.i.h.bf16 %v4488_v58  ;;  %v5589_v36 = vunpack.i.l.bf16 %v4488_v58  ;;  %v1749_v33 = vadd.f32 %v1731_v32, %v4792_v59  ;;  %v1750_v10 = vadd.f32 %v1734_v26, %v4785_v0 }
 0x154   : > { %v1833_v9 = vrot.slane %v1798_v35, 1  ;;  %v1830_v22 = vrot.slane %v1796_v34, 1  ;;  %v3218_v8 = vunpack.i.h.bf16 %v3216_v16  ;;  %v3217_v41 = vunpack.i.l.bf16 %v3216_v16 }
 0x155   : > { %v1801_v13 = vmul.f32 %v4772_v17, %v5588_v31  ;;  %v1799_v44 = vmul.f32 %v4772_v17, %v5589_v36  ;;  %v1861_v20 = vadd.f32 %v5590_v37, %v1749_v33  ;;  %v1862_v49 = vadd.f32 %v5591_v15, %v1750_v10  ;;  %v3227_v63 = vpop.permute.xlu1 %3226  ;;  %v5592_v37 = vld [vmem:[#allocation11_spill] sm:$0xff] }
 0x156   : > { %v1745_v58 = vadd.f32 %v1719_v27, %v1633_v62  ;;  %v1746_v28 = vadd.f32 %v1722_v18, %v1634_v12  ;;  %v1831_v50 = vsel %vm878_vm0, %v1829_v30, %v1830_v22  ;;  %v1834_v59 = vsel %vm878_vm0, %v1832_v48, %v1833_v9 }
 0x157   : > { %v1802_v0 = vmul.f32 %v4772_v17, %v3218_v8  ;;  %v1800_v60 = vmul.f32 %v4772_v17, %v3217_v41  ;;  %v1922_v43 = vmul.f32 %v3317_v21, %v2891_v38  ;;  %v1921_v4 = vmul.f32 %v3316_v47, %v2891_v38 }
 0x158   : > { %v1857_v3 = vadd.f32 %v1831_v50, %v1745_v58  ;;  %v1858_v55 = vadd.f32 %v1834_v59, %v1746_v28  ;;  %v1838_v46 = vrot.slane %v1801_v13, 1  ;;  %v1835_v19 = vrot.slane %v1799_v44, 1  ;;  %v4899_v59 = vpop.permute.xlu0 %3444 }
 0x159   : > { %v1839_v62 = vrot.slane %v1802_v0, 1  ;;  %v1836_v12 = vrot.slane %v1800_v60, 1  ;;  %v3229_v14 = vunpack.i.h.bf16 %v3227_v63  ;;  %v3228_v52 = vunpack.i.l.bf16 %v3227_v63  ;;  %v4874_v27 = vpop.permute.xlu1 %3231 }
 0x15a   : > { %v1929_v48 = vadd.f32 %v1921_v4, %v1857_v3  ;;  %v1930_v2 = vadd.f32 %v1922_v43, %v1858_v55  ;;  %v2323_v30 = vrot.slane %v4666_v1, 1  ;;  %v2320_v17 = vrot.slane %v4674_v29, 1 }
 0x15b   : > { %v1837_v54 = vsel %vm878_vm0, %v1835_v19, %v1836_v12  ;;  %v1840_v24 = vsel %vm878_vm0, %v1838_v46, %v1839_v62  ;;  %v1920_v39 = vmul.f32 %v3229_v14, %v2891_v38  ;;  %v2289_v40 = vmul.f32 %v3229_v14, %v4645_v61  ;;  %v4913_v19 = vld [vmem:[%s5387_s4 + $0x13] ss:$0 sm:$0xff] }
 0x15c   : > { %v1919_v56 = vmul.f32 %v3228_v52, %v2891_v38  ;;  %v2287_v25 = vmul.f32 %v3228_v52, %v4645_v61  ;;  %v3396_v6 = vunpack.i.h.bf16 %v4301_v42  ;;  %v3395_v5 = vunpack.i.l.bf16 %v4301_v42 }
 0x15d   : > { %v1859_v18 = vadd.f32 %v1837_v54, %v1747_v53  ;;  %v1860_v1 = vadd.f32 %v1840_v24, %v1748_v45  ;;  %v2322_v32 = vrot.slane %v2289_v40, 1  ;;  %v1928_v26 = vadd.f32 %v1920_v39, %v4825_v57  ;;  %v3237_v45 = vpop.permute.xlu1 %3236  ;;  %v4937_v54 = vpop.permute.xlu0 %3449 }
 0x15e   : > { %v1927_v29 = vadd.f32 %v1919_v56, %v1855_v51  ;;  %v2319_v35 = vrot.slane %v2287_v25, 1  ;;  %v3234_v34 = vunpack.i.h.bf16 %v4874_v27  ;;  %v3233_v31 = vunpack.i.l.bf16 %v4874_v27 }
 0x15f   : > { %v4880_v13 = vsel %vm878_vm0, %v2322_v32, %v2323_v30  ;;  %v2302_v42 = vmul.f32 %v3396_v6, %v4645_v61  ;;  %v2300_v53 = vmul.f32 %v3395_v5, %v4645_v61  ;;  %v3239_v44 = vunpack.i.h.bf16 %v3237_v45 }
 0x160   : > { %v4883_v36 = vsel %vm878_vm0, %v2319_v35, %v2320_v17  ;;  %v1924_v51 = vmul.f32 %v3234_v34, %v2891_v38  ;;  %v1923_v57 = vmul.f32 %v3233_v31, %v2891_v38  ;;  %v3238_v16 = vunpack.i.l.bf16 %v3237_v45  ;;  %v4960_v35 = vld [vmem:[%s5387_s4 + $0x15] ss:$0 sm:$0xff] }
 0x161   : > { %v1926_v9 = vmul.f32 %v3239_v44, %v2891_v38  ;;  %v2301_v22 = vmul.f32 %v3239_v44, %v4645_v61  ;;  %v3261_v15 = vunpack.i.h.bf16 %v5592_v37  ;;  %v3260_v58 = vunpack.i.l.bf16 %v5592_v37  ;;  %v4901_v3 = vpop.permute.xlu1 %3242 }
 0x162   : > { %v4891_v33 = vadd.f32 %v1923_v57, %v1859_v18  ;;  %v4893_v10 = vadd.f32 %v1924_v51, %v1860_v1  ;;  %v1925_v8 = vmul.f32 %v3238_v16, %v2891_v38  ;;  %v2299_v41 = vmul.f32 %v3238_v16, %v4645_v61  ;;  %v4906_v38 = vld [vmem:[%s5387_s4 + $0x14] ss:$0 sm:$0xff] }
 0x163   : > { %v2341_v28 = vrot.slane %v2302_v42, 1  ;;  %v2338_v50 = vrot.slane %v2300_v53, 1  ;;  %v2340_v0 = vrot.slane %v2301_v22, 1  ;;  %v1934_v43 = vadd.f32 %v1926_v9, %v1862_v49 }
 0x164   : > { %v1933_v60 = vadd.f32 %v1925_v8, %v1861_v20  ;;  %v2337_v4 = vrot.slane %v2299_v41, 1  ;;  %v5452_v55 = vunpack.i.h.bf16 %v4901_v3  ;;  %v5447_v46 = vunpack.i.l.bf16 %v4901_v3 }
 0x165   : > { %v4919_v49 = vsel %vm878_vm0, %v2340_v0, %v2341_v28  ;;  %v2034_v63 = vmul.f32 %v3261_v15, %v4906_v38  ;;  %v2033_v14 = vmul.f32 %v3260_v58, %v4906_v38  ;;  %v4933_v52 = vpop.permute.xlu1 %3247  ;;  %v3447_v30 = vunpack.i.h.bf16 %v4899_v59 }
 0x166   : > { %v4916_v20 = vsel %vm878_vm0, %v2337_v4, %v2338_v50  ;;  %v1978_v62 = vmul.f32 %v5452_v55, %v4913_v19  ;;  %v1977_v12 = vmul.f32 %v5447_v46, %v4913_v19  ;;  %v3446_v17 = vunpack.i.l.bf16 %v4899_v59 }
 0x167   : > { %v1976_v25 = vmul.f32 %v3447_v30, %v4913_v19  ;;  %v3332_v18 = vunpack.i.h.bf16 %v4231_v7  ;;  %v3331_v1 = vunpack.i.l.bf16 %v4231_v7  ;;  %v3452_v42 = vunpack.i.h.bf16 %v4937_v54 }
 0x168   : > { %v1985_v24 = vadd.f32 %v1977_v12, %v1929_v48  ;;  %v1986_v39 = vadd.f32 %v1978_v62, %v1930_v2  ;;  %v1975_v6 = vmul.f32 %v3446_v17, %v4913_v19  ;;  %v4953_v48 = vpop.permute.xlu0 %3454  ;;  %v3451_v53 = vunpack.i.l.bf16 %v4937_v54 }
 0x169   : > { %v1984_v57 = vadd.f32 %v1976_v25, %v1928_v26  ;;  %v2104_v16 = vmul.f32 %v3332_v18, %v4960_v35  ;;  %v2103_v9 = vmul.f32 %v3331_v1, %v4960_v35  ;;  %v1982_v41 = vmul.f32 %v3452_v42, %v4913_v19 }
 0x16a   : > { %v4939_v40 = vadd.f32 %v2033_v14, %v1985_v24  ;;  %v4941_v56 = vadd.f32 %v2034_v63, %v1986_v39  ;;  %v4949_v5 = vpop.permute.xlu1 %3253  ;;  %v1983_v7 = vadd.f32 %v1975_v6, %v1927_v29  ;;  %v1981_v29 = vmul.f32 %v3451_v53, %v4913_v19 }
 0x16b   : > { %v5446_v2 = vunpack.i.h.bf16 %v4949_v5  ;;  %v5445_v32 = vunpack.i.l.bf16 %v4949_v5  ;;  %v3348_v4 = vunpack.i.h.bf16 %v4248_v23  ;;  %v3347_v62 = vunpack.i.l.bf16 %v4248_v23 }
 0x16c   : > { %v4980_v26 = vpop.permute.xlu0 %3465  ;;  %v1989_v24 = vadd.f32 %v1981_v29, %v1933_v60  ;;  %v1990_v39 = vadd.f32 %v1982_v41, %v1934_v43 }
 0x16d   : > { %v2032_v51 = vmul.f32 %v5446_v2, %v4906_v38  ;;  %v2031_v45 = vmul.f32 %v5445_v32, %v4906_v38  ;;  %v2110_v18 = vmul.f32 %v3348_v4, %v4960_v35  ;;  %v2109_v23 = vmul.f32 %v3347_v62, %v4960_v35  ;;  %v5017_v62 = vld [vmem:[%s5387_s4 + $0x16] ss:$0 sm:$0xff] }
 0x16e   : > { %v4970_v44 = vpop.permute.xlu1 %3319  ;;  %v5012_v4 = vmul.f32 %v3317_v21, %v4645_v61  ;;  %v3467_v59 = vunpack.i.l.bf16 %v4980_v26 }
 0x16f   : > { %v2039_v22 = vadd.f32 %v2031_v45, %v1983_v7  ;;  %v2040_v8 = vadd.f32 %v2032_v51, %v1984_v57  ;;  %v5451_v32 = vunpack.i.l.bf16 %v4970_v44 }
 0x170   : > { %v3482_v1 = vpop.permute.xlu0 %3481 }
 0x171   : > { %v2111_v50 = vadd.f32 %v2103_v9, %v2039_v22  ;;  %v2112_v0 = vadd.f32 %v2104_v16, %v2040_v8  ;;  %v5007_v22 = vld [vmem:[%s5387_s4 + $0x17] ss:$0 sm:$0xff] }
 0x172   : > { %v4982_v28 = vpop.permute.xlu1 %3324 }
 0x173   : > { %v5444_v12 = vunpack.i.h.bf16 %v4982_v28  ;;  %v5443_v63 = vunpack.i.l.bf16 %v4982_v28 }
 0x174   : > { %v3488_v60 = vpop.permute.xlu0 %3487 }
 0x175   : > { %v2038_v14 = vmul.f32 %v5444_v12, %v4906_v38  ;;  %v2037_v25 = vmul.f32 %v5443_v63, %v4906_v38  ;;  %v3490_v43 = vunpack.i.h.bf16 %v3488_v60  ;;  %v3489_v9 = vunpack.i.l.bf16 %v3488_v60 }
 0x176   : > { %v5450_v12 = vunpack.i.h.bf16 %v4970_v44 }
 0x177   : > { %v4994_v6 = vpop.permute.xlu1 %3335  ;;  %v2045_v51 = vadd.f32 %v2037_v25, %v1989_v24  ;;  %v2046_v7 = vadd.f32 %v2038_v14, %v1990_v39  ;;  %v5022_v14 = vld [vmem:[%s5387_s4 + $0x1a] ss:$0 sm:$0xff]  ;;  %v5027_v24 = vld [vmem:[%s5387_s4 + $0x19] ss:$0 sm:$0xff]  ;;  %v2216_v39 = vmul.f32 %v3490_v43, %v5007_v22  ;;  %v2215_v21 = vmul.f32 %v3489_v9, %v5007_v22 }
 0x178   : > { %v5048_v9 = vmul.f32 %v3261_v15, %v5022_v14  ;;  %v5053_v11 = vmul.f32 %v3446_v17, %v5027_v24  ;;  %v5070_v37 = vmul.f32 %v3452_v42, %v5027_v24  ;;  %v5449_v42 = vunpack.i.l.bf16 %v4933_v52 }
 0x179   : > { %v4998_v57 = vadd.f32 %v2109_v23, %v2045_v51  ;;  %v5000_v45 = vadd.f32 %v2110_v18, %v2046_v7  ;;  %v5036_v23 = vmul.f32 %v3316_v47, %v4645_v61  ;;  %v5041_v51 = vmul.f32 %v3447_v30, %v5027_v24 }
 0x17a   : > { %v5058_v47 = vmul.f32 %v3260_v58, %v5022_v14  ;;  %v2328_v30 = vrot.slane %v5012_v4, 1  ;;  %v5075_v58 = vmul.f32 %v3451_v53, %v5027_v24  ;;  %v3338_v63 = vunpack.i.h.bf16 %v4994_v6 }
 0x17b   : > { %v5002_v16 = vpop.permute.xlu1 %3340  ;;  %v3337_v54 = vunpack.i.l.bf16 %v4994_v6  ;;  %v3457_v53 = vunpack.i.h.bf16 %v4953_v48 }
 0x17d   : > { %v2162_v46 = vmul.f32 %v3457_v53, %v5017_v62  ;;  %v2295_v53 = vmul.f32 %v3233_v31, %v4645_v61 }
 0x182   : > { %v3352_v8 = vpop.permute.xlu1 %3351 }
 0x183   : > { %v3354_v41 = vunpack.i.h.bf16 %v3352_v8  ;;  %v3353_v29 = vunpack.i.l.bf16 %v3352_v8  ;;  %v3499_v8 = vpop.permute.xlu0 %3498 }
 0x185   : > { %v2160_v25 = vmul.f32 %v3354_v41, %v5017_v62  ;;  %v2159_v18 = vmul.f32 %v3353_v29, %v5017_v62  ;;  %v2325_v41 = vrot.slane %v5036_v23, 1  ;;  %v3468_v29 = vunpack.i.h.bf16 %v4980_v26 }
 0x186   : > { %v5043_v7 = vpop.permute.xlu1 %3356  ;;  %v2106_v26 = vmul.f32 %v3338_v63, %v4960_v35  ;;  %v3343_v63 = vunpack.i.h.bf16 %v5002_v16 }
 0x187   : > { %v2167_v60 = vadd.f32 %v2159_v18, %v2111_v50  ;;  %v2168_v43 = vadd.f32 %v2160_v25, %v2112_v0  ;;  %v3484_v25 = vunpack.i.h.bf16 %v3482_v1  ;;  %v3483_v18 = vunpack.i.l.bf16 %v3482_v1 }
 0x189   : > { %v2223_v50 = vadd.f32 %v2215_v21, %v2167_v60  ;;  %v2224_v0 = vadd.f32 %v2216_v39, %v2168_v43  ;;  %v3501_v60 = vunpack.i.h.bf16 %v3499_v8  ;;  %v5448_v43 = vunpack.i.h.bf16 %v4933_v52 }
 0x18a   : > { %v5065_v17 = vpop.permute.xlu1 %3361  ;;  %v5101_v6 = vmul.f32 %v3484_v25, %v5027_v24  ;;  %v2105_v25 = vmul.f32 %v3337_v54, %v4960_v35  ;;  %v3342_v54 = vunpack.i.l.bf16 %v5002_v16  ;;  %v2297_v16 = vmul.f32 %v3234_v34, %v4645_v61 }
 0x18b   : > { %v5078_v39 = vadd.f32 %v4883_v36, %v2223_v50  ;;  %v5081_v21 = vadd.f32 %v4880_v13, %v2224_v0  ;;  %v3456_v36 = vunpack.i.l.bf16 %v4953_v48  ;;  %v5091_v13 = vmul.f32 %v3468_v29, %v5027_v24 }
 0x18c   : > { %v5094_v50 = vmul.f32 %v3467_v59, %v5027_v24  ;;  %v5104_v48 = vmul.f32 %v3483_v18, %v5027_v24  ;;  %v5107_v29 = vmul.f32 %v3501_v60, %v5022_v14  ;;  %v3500_v59 = vunpack.i.l.bf16 %v3499_v8 }
 0x18d   : > { %v1980_v1 = vmul.f32 %v5448_v43, %v4913_v19  ;;  %v1979_v0 = vmul.f32 %v5449_v42, %v4913_v19  ;;  %v2161_v18 = vmul.f32 %v3456_v36, %v5017_v62  ;;  %v2036_v43 = vmul.f32 %v5450_v12, %v4906_v38 }
 0x18e   : > { %v2035_v19 = vmul.f32 %v5451_v32, %v4906_v38  ;;  %v5133_v8 = vmul.f32 %v3500_v59, %v5022_v14  ;;  %v2113_v38 = vadd.f32 %v2105_v25, %v4939_v40  ;;  %v2114_v32 = vadd.f32 %v2106_v26, %v4941_v56 }
 0x18f   : > { %v3368_v2 = vpop.permute.xlu1 %3367  ;;  %v1987_v12 = vadd.f32 %v1979_v0, %v4891_v33  ;;  %v1988_v60 = vadd.f32 %v1980_v1, %v4893_v10  ;;  %v2108_v33 = vmul.f32 %v3343_v63, %v4960_v35  ;;  %v2107_v10 = vmul.f32 %v3342_v54, %v4960_v35 }
 0x190   : > { %v3370_v15 = vunpack.i.h.bf16 %v3368_v2  ;;  %v3369_v36 = vunpack.i.l.bf16 %v3368_v2  ;;  %v3359_v40 = vunpack.i.h.bf16 %v5043_v7  ;;  %v3358_v56 = vunpack.i.l.bf16 %v5043_v7 }
 0x191   : > { %v2043_v59 = vadd.f32 %v2035_v19, %v1987_v12  ;;  %v2044_v55 = vadd.f32 %v2036_v43, %v1988_v60  ;;  %v3364_v26 = vunpack.i.h.bf16 %v5065_v17  ;;  %v3363_v34 = vunpack.i.l.bf16 %v5065_v17 }
 0x192   : > { %v2169_v0 = vadd.f32 %v2161_v18, %v2113_v38  ;;  %v2170_v27 = vadd.f32 %v2162_v46, %v2114_v32  ;;  %v2218_v2 = vmul.f32 %v3370_v15, %v5007_v22  ;;  %v2217_v12 = vmul.f32 %v3369_v36, %v5007_v22 }
 0x193   : > { %v3373_v42 = vpop.permute.xlu1 %3372  ;;  %v2115_v35 = vadd.f32 %v2107_v10, %v2043_v59  ;;  %v2116_v19 = vadd.f32 %v2108_v33, %v2044_v55  ;;  %v2164_v54 = vmul.f32 %v3359_v40, %v5017_v62  ;;  %v2163_v17 = vmul.f32 %v3358_v56, %v5017_v62 }
 0x194   : > { %v3375_v43 = vunpack.i.h.bf16 %v3373_v42  ;;  %v3374_v60 = vunpack.i.l.bf16 %v3373_v42  ;;  %v2166_v46 = vmul.f32 %v3364_v26, %v5017_v62  ;;  %v2165_v32 = vmul.f32 %v3363_v34, %v5017_v62 }
 0x195   : > { %v2225_v42 = vadd.f32 %v2217_v12, %v2169_v0  ;;  %v2226_v59 = vadd.f32 %v2218_v2, %v2170_v27  ;;  %v2171_v26 = vadd.f32 %v2163_v17, %v2115_v35  ;;  %v2172_v34 = vadd.f32 %v2164_v54, %v2116_v19 }
 0x196   : > { %v2220_v55 = vmul.f32 %v3375_v43, %v5007_v22  ;;  %v2219_v33 = vmul.f32 %v3374_v60, %v5007_v22  ;;  %v2173_v23 = vadd.f32 %v2165_v32, %v4998_v57  ;;  %v2552_v54 = vrot.slane %v5048_v9, 1 }
 0x197   : > { %v2549_v17 = vrot.slane %v5058_v47, 1  ;;  %v2550_v57 = vrot.slane %v5133_v8, 1  ;;  %v5594_v32 = vrot.slane %v5091_v13, 1  ;;  %v5597_v8 = vrot.slane %v5094_v50, 1 }
 0x198   : > { %v3384_v1 = vpop.permute.xlu1 %3383  ;;  %v2227_v4 = vadd.f32 %v2219_v33, %v2171_v26  ;;  %v2228_v60 = vadd.f32 %v2220_v55, %v2172_v34  ;;  %v5599_v13 = vrot.slane %v5104_v48, 1  ;;  %v5603_v50 = vrot.slane %v5107_v29, 1 }
 0x199   : > { %v3386_v31 = vunpack.i.h.bf16 %v3384_v1  ;;  %v3385_v25 = vunpack.i.l.bf16 %v3384_v1  ;;  %v5604_v34 = vunpack.i.h.bf16 %v4933_v52  ;;  %v5605_v29 = vunpack.i.l.bf16 %v4933_v52 }
 0x19a   : > { %v5609_v52 = vunpack.i.l.bf16 %v4970_v44 }
 0x19b   : > { %v2294_v63 = vmul.f32 %v3386_v31, %v4645_v61  ;;  %v2292_v7 = vmul.f32 %v3385_v25, %v4645_v61  ;;  %v2334_v31 = vrot.slane %v2297_v16, 1  ;;  %v2331_v25 = vrot.slane %v2295_v53, 1 }
 0x19c   : > { %v3389_v18 = vpop.permute.xlu1 %3388 }
 0x19d   : > { %v2329_v15 = vrot.slane %v2294_v63, 1  ;;  %v2326_v38 = vrot.slane %v2292_v7, 1  ;;  %v3391_v36 = vunpack.i.h.bf16 %v3389_v18  ;;  %v3390_v1 = vunpack.i.l.bf16 %v3389_v18 }
 0x19e   : > { %v5595_v18 = vrot.slane %v5041_v51, 1  ;;  %v5600_v51 = vrot.slane %v5075_v58, 1  ;;  %v2551_v58 = vsel %vm878_vm0, %v2549_v17, %v2550_v57 }
 0x19f   : > { %v2330_v10 = vsel %vm878_vm0, %v2328_v30, %v2329_v15  ;;  %v2327_v40 = vsel %vm878_vm0, %v2325_v41, %v2326_v38  ;;  %v2298_v62 = vmul.f32 %v3391_v36, %v4645_v61  ;;  %v2296_v56 = vmul.f32 %v3390_v1, %v4645_v61 }
 0x1a0   : > { %v2353_v0 = vadd.f32 %v2327_v40, %v2225_v42  ;;  %v2354_v27 = vadd.f32 %v2330_v10, %v2226_v59  ;;  %v2174_v41 = vadd.f32 %v2166_v46, %v5000_v45  ;;  %v5593_v45 = vunpack.i.h.bf16 %v4901_v3 }
 0x1a1   : > { %v2335_v2 = vrot.slane %v2298_v62, 1  ;;  %v2332_v12 = vrot.slane %v2296_v56, 1  ;;  %v3461_v43 = vpop.permute.xlu1 %3460  ;;  %v5190_v15 = vsel %vm878_vm0, %v5595_v18, %v5594_v32  ;;  %v5598_v1 = vrot.slane %v5053_v11, 1 }
 0x1a2   : > { %v3463_v30 = vunpack.i.h.bf16 %v3461_v43  ;;  %v3462_v63 = vunpack.i.l.bf16 %v3461_v43  ;;  %v2405_v46 = vmul.f32 %v5593_v45, %v5027_v24  ;;  %v2451_v59 = vsel %vm878_vm0, %v5600_v51, %v5599_v13 }
 0x1a3   : > { %v2333_v7 = vsel %vm878_vm0, %v2331_v25, %v2332_v12  ;;  %v2336_v61 = vsel %vm878_vm0, %v2334_v31, %v2335_v2  ;;  %v2433_v42 = vsel %vm878_vm0, %v5598_v1, %v5597_v8  ;;  %v5602_v10 = vrot.slane %v5070_v37, 1 }
 0x1a4   : > { %v5173_v35 = vadd.f32 %v2333_v7, %v2227_v4  ;;  %v5175_v19 = vadd.f32 %v2336_v61, %v2228_v60  ;;  %v2222_v53 = vmul.f32 %v3463_v30, %v5007_v22  ;;  %v2221_v16 = vmul.f32 %v3462_v63, %v5007_v22 }
 0x1a5   : > { %v5596_v22 = vunpack.i.l.bf16 %v4901_v3  ;;  %v5601_v3 = vrot.slane %v5101_v6, 1  ;;  %v2554_v11 = vsel %vm878_vm0, %v2552_v54, %v5603_v50  ;;  %v2440_v56 = vrot.slane %v2405_v46, 1 }
 0x1a6   : > { %v2229_v9 = vadd.f32 %v2221_v16, %v2173_v23  ;;  %v2230_v36 = vadd.f32 %v2222_v53, %v2174_v41  ;;  %v3472_v47 = vpop.permute.xlu1 %3471  ;;  %v2409_v31 = vmul.f32 %v5604_v34, %v5027_v24  ;;  %v2407_v25 = vmul.f32 %v5605_v29, %v5027_v24 }
 0x1a7   : > { %v2403_v38 = vmul.f32 %v5596_v22, %v5027_v24  ;;  %v3474_v55 = vunpack.i.h.bf16 %v3472_v47  ;;  %v3473_v33 = vunpack.i.l.bf16 %v3472_v47  ;;  %v5210_v40 = vsel %vm878_vm0, %v5602_v10, %v5601_v3 }
 0x1a8   : > { %v2357_v62 = vadd.f32 %v4916_v20, %v2229_v9  ;;  %v5217_v48 = vadd.f32 %v4919_v49, %v2230_v36  ;;  %v5606_v20 = vunpack.i.h.bf16 %v4949_v5  ;;  %v5607_v30 = vunpack.i.l.bf16 %v4949_v5 }
 0x1a9   : > { %v2406_v26 = vmul.f32 %v3474_v55, %v5027_v24  ;;  %v2404_v6 = vmul.f32 %v3473_v33, %v5027_v24  ;;  %v2437_v37 = vrot.slane %v2403_v38, 1  ;;  %v5608_v23 = vunpack.i.h.bf16 %v4970_v44  ;;  %v5261_v38 = vld [vmem:[%s5388_s5] ss:$0 sm:$0xff] }
 0x1aa   : > { %v2513_v49 = vmul.f32 %v5606_v20, %v5022_v14  ;;  %v3477_v2 = vpop.permute.xlu1 %3476  ;;  %v2511_v63 = vmul.f32 %v5607_v30, %v5022_v14  ;;  %v5242_v7 = vmul.f32 %v5609_v52, %v5022_v14  ;;  %v5610_v61 = vunpack.i.h.bf16 %v4982_v28 }
 0x1ab   : > { %v2441_v12 = vrot.slane %v2406_v26, 1  ;;  %v2438_v43 = vrot.slane %v2404_v6, 1  ;;  %v3479_v4 = vunpack.i.h.bf16 %v3477_v2  ;;  %v3478_v60 = vunpack.i.l.bf16 %v3477_v2 }
 0x1ac   : > { %v5237_v41 = vmul.f32 %v5608_v23, %v5022_v14  ;;  %v5247_v53 = vmul.f32 %v5610_v61, %v5022_v14  ;;  %v2446_v57 = vrot.slane %v2409_v31, 1  ;;  %v5611_v45 = vunpack.i.l.bf16 %v4982_v28 }
 0x1ad   : > { %v2439_v16 = vsel %vm878_vm0, %v2437_v37, %v2438_v43  ;;  %v2442_v5 = vsel %vm878_vm0, %v2440_v56, %v2441_v12  ;;  %v2410_v54 = vmul.f32 %v3479_v4, %v5027_v24  ;;  %v2408_v17 = vmul.f32 %v3478_v60, %v5027_v24 }
 0x1ae   : > { %v5256_v44 = vmul.f32 %v5611_v45, %v5022_v14  ;;  %v2465_v46 = vadd.f32 %v2439_v16, %v2353_v0  ;;  %v2466_v32 = vadd.f32 %v2442_v5, %v2354_v27  ;;  %v2443_v18 = vrot.slane %v2407_v25, 1 }
 0x1af   : > { %v2546_v22 = vrot.slane %v2513_v49, 1  ;;  %v2447_v9 = vrot.slane %v2410_v54, 1  ;;  %v2444_v36 = vrot.slane %v2408_v17, 1  ;;  %v3494_v47 = vpop.permute.xlu1 %3493  ;;  %v2543_v51 = vrot.slane %v2511_v63, 1 }
 0x1b0   : > { %v2577_v8 = vadd.f32 %v2551_v58, %v2465_v46  ;;  %v2578_v24 = vadd.f32 %v2554_v11, %v2466_v32  ;;  %v3496_v1 = vunpack.i.h.bf16 %v3494_v47  ;;  %v3495_v13 = vunpack.i.l.bf16 %v3494_v47 }
 0x1b1   : > { %v2558_v28 = vrot.slane %v5237_v41, 1  ;;  %v2555_v0 = vrot.slane %v5242_v7, 1  ;;  %v2564_v27 = vrot.slane %v5247_v53, 1  ;;  %v2561_v55 = vrot.slane %v5256_v44, 1 }
 0x1b2   : > { %v5268_v33 = vadd.f32 %v5261_v38, %v2577_v8  ;;  %v5271_v3 = vadd.f32 %v5261_v38, %v2578_v24  ;;  %v2463_v10 = vadd.f32 %v2433_v42, %v5078_v39  ;;  %v2445_v50 = vsel %vm878_vm0, %v2443_v18, %v2444_v36 }
 0x1b3   : > { %v2448_v11 = vsel %vm878_vm0, %v2446_v57, %v2447_v9  ;;  %v2514_v58 = vmul.f32 %v3496_v1, %v5022_v14  ;;  %v2512_v56 = vmul.f32 %v3495_v13, %v5022_v14  ;;  %v3504_v26 = vpop.permute.xlu1 %3503  ;;  %v2469_v29 = vadd.f32 %v2451_v59, %v2357_v62 }
 0x1b4   : > { %v2600_v6 = vmul.f32 %v5268_v33, %v5268_v33  ;;  %v2601_v37 = vmul.f32 %v5271_v3, %v5271_v3  ;;  %v3506_v34 = vunpack.i.h.bf16 %v3504_v26  ;;  %v3505_v31 = vunpack.i.l.bf16 %v3504_v26 }
 0x1b5   : > { %v2547_v25 = vrot.slane %v2514_v58, 1  ;;  %v2464_v39 = vadd.f32 %v5190_v15, %v5081_v21  ;;  %v2544_v42 = vrot.slane %v2512_v56, 1  ;;  %v2467_v43 = vadd.f32 %v2445_v50, %v5173_v35 }
 0x1b6   : > { %v2608_v20 = vmul.f32 %v2600_v6, %v5268_v33  ;;  %v2609_v49 = vmul.f32 %v2601_v37, %v5271_v3  ;;  %v2522_v2 = vmul.f32 %v3506_v34, %v5022_v14  ;;  %v2520_v12 = vmul.f32 %v3505_v31, %v5022_v14 }
 0x1b7   : > { %v2468_v4 = vadd.f32 %v2448_v11, %v5175_v19  ;;  %v2545_v60 = vsel %vm878_vm0, %v2543_v51, %v2544_v42  ;;  %v2548_v59 = vsel %vm878_vm0, %v2546_v22, %v2547_v25  ;;  %v3509_v62 = vpop.permute.xlu1 %3508  ;;  %v2470_v36 = vadd.f32 %v5210_v40, %v5217_v48 }
 0x1b8   : > { %v2616_v30 = vmul.f32 0.044715, %v2608_v20  ;;  %v2617_v21 = vmul.f32 0.044715, %v2609_v49  ;;  %v2575_v15 = vadd.f32 %v2545_v60, %v2463_v10  ;;  %v2576_v63 = vadd.f32 %v2548_v59, %v2464_v39 }
 0x1b9   : > { %v2559_v23 = vrot.slane %v2522_v2, 1  ;;  %v2556_v41 = vrot.slane %v2520_v12, 1  ;;  %v3511_v52 = vunpack.i.h.bf16 %v3509_v62  ;;  %v3510_v7 = vunpack.i.l.bf16 %v3509_v62 }
 0x1ba   : > { %v2624_v61 = vadd.f32 %v2616_v30, %v5268_v33  ;;  %v2625_v53 = vadd.f32 %v2617_v21, %v5271_v3  ;;  %v5295_v35 = vadd.f32 %v5261_v38, %v2575_v15  ;;  %v5298_v19 = vadd.f32 %v5261_v38, %v2576_v63 }
 0x1bb   : > { %v2557_v16 = vsel %vm878_vm0, %v2555_v0, %v2556_v41  ;;  %v2560_v5 = vsel %vm878_vm0, %v2558_v28, %v2559_v23  ;;  %v2526_v54 = vmul.f32 %v3511_v52, %v5022_v14  ;;  %v2524_v17 = vmul.f32 %v3510_v7, %v5022_v14 }
 0x1bc   : > { %v2632_v57 = vmul.f32 0.7978846, %v2624_v61  ;;  %v2633_v45 = vmul.f32 0.7978846, %v2625_v53  ;;  %v2598_v44 = vmul.f32 %v5295_v35, %v5295_v35  ;;  %v2599_v46 = vmul.f32 %v5298_v19, %v5298_v19 }
 0x1bd   : > { %v2579_v32 = vadd.f32 %v2557_v16, %v2467_v43  ;;  %v2580_v18 = vadd.f32 %v2560_v5, %v2468_v4  ;;  %v2565_v22 = vrot.slane %v2526_v54, 1  ;;  %v2562_v9 = vrot.slane %v2524_v17, 1 }
 0x1be   : > { %3512 = vtanh.f32 %v2632_v57  ;;  %v2606_v47 = vmul.f32 %v2598_v44, %v5295_v35  ;;  %v2607_v14 = vmul.f32 %v2599_v46, %v5298_v19 }
 0x1bf   : > { %3514 = vtanh.f32 %v2633_v45  ;;  %v5313_v8 = vadd.f32 %v5261_v38, %v2579_v32  ;;  %v5316_v24 = vadd.f32 %v5261_v38, %v2580_v18  ;;  %v2563_v1 = vsel %vm878_vm0, %v2561_v55, %v2562_v9 }
 0x1c0   : > { %v2614_v13 = vmul.f32 0.044715, %v2606_v47  ;;  %v2615_v51 = vmul.f32 0.044715, %v2607_v14  ;;  %v2566_v28 = vsel %vm878_vm0, %v2564_v27, %v2565_v22  ;;  %v2581_v0 = vadd.f32 %v2563_v1, %v2469_v29 }
 0x1c1   : > { %v2602_v40 = vmul.f32 %v5313_v8, %v5313_v8  ;;  %v2603_v48 = vmul.f32 %v5316_v24, %v5316_v24  ;;  %v2582_v10 = vadd.f32 %v2566_v28, %v2470_v36 }
 0x1c2   : > { %v2622_v50 = vadd.f32 %v2614_v13, %v5295_v35  ;;  %v2623_v11 = vadd.f32 %v2615_v51, %v5298_v19  ;;  %v5327_v58 = vadd.f32 %v5261_v38, %v2581_v0 }
 0x1c3   : > { %v2610_v55 = vmul.f32 %v2602_v40, %v5313_v8  ;;  %v2611_v56 = vmul.f32 %v2603_v48, %v5316_v24  ;;  %v5332_v27 = vadd.f32 %v5261_v38, %v2582_v10 }
 0x1c4   : > { %v2630_v26 = vmul.f32 0.7978846, %v2622_v50  ;;  %v2631_v6 = vmul.f32 0.7978846, %v2623_v11  ;;  %v2604_v37 = vmul.f32 %v5327_v58, %v5327_v58 }
 0x1c5   : > { %v2618_v34 = vmul.f32 0.044715, %v2610_v55  ;;  %v2619_v31 = vmul.f32 0.044715, %v2611_v56  ;;  %v2605_v29 = vmul.f32 %v5332_v27, %v5332_v27 }
 0x1c6   : > { %3516 = vtanh.f32 %v2630_v26  ;;  %v2612_v25 = vmul.f32 %v2604_v37, %v5327_v58 }
 0x1c7   : > { %3518 = vtanh.f32 %v2631_v6  ;;  %v2626_v39 = vadd.f32 %v2618_v34, %v5313_v8  ;;  %v2627_v42 = vadd.f32 %v2619_v31, %v5316_v24  ;;  %v2613_v38 = vmul.f32 %v2605_v29, %v5332_v27 }
 0x1c8   : > { %v2620_v20 = vmul.f32 0.044715, %v2612_v25 }
 0x1c9   : > { %v2634_v49 = vmul.f32 0.7978846, %v2626_v39  ;;  %v2635_v2 = vmul.f32 0.7978846, %v2627_v42  ;;  %v2621_v12 = vmul.f32 0.044715, %v2613_v38 }
 0x1ca   : > { %v2628_v43 = vadd.f32 %v2620_v20, %v5327_v58 }
 0x1cb   : > { %v3513_v4 = vpop.eup %3512  ;;  %3520 = vtanh.f32 %v2634_v49  ;;  %v2629_v60 = vadd.f32 %v2621_v12, %v5332_v27 }
 0x1cc   : > { %v3515_v59 = vpop.eup %3514  ;;  %v2648_v62 = vadd.f32 1.0, %v3513_v4  ;;  %3522 = vtanh.f32 %v2635_v2  ;;  %v2636_v30 = vmul.f32 0.7978846, %v2628_v43 }
 0x1cd   : > { %v2649_v21 = vadd.f32 1.0, %v3515_v59  ;;  %v2637_v15 = vmul.f32 0.7978846, %v2629_v60 }
 0x1ce   : > { %v2656_v63 = vmul.f32 0.5, %v2648_v62  ;;  %3524 = vtanh.f32 %v2636_v30 }
 0x1cf   : > { %v2657_v23 = vmul.f32 0.5, %v2649_v21  ;;  %3526 = vtanh.f32 %v2637_v15 }
 0x1d0   : > { %v2664_v41 = vmul.f32 %v2656_v63, %v5268_v33 }
 0x1d1   : > { %v2665_v52 = vmul.f32 %v2657_v23, %v5271_v3 }
 0x1d2   : > { %v2672_v7 = vpack.c.bf16 %v2664_v41, %v2664_v41 }
 0x1d3   : > { %v3517_v61 = vpop.eup %3516  ;;  %v2673_v53 = vpack.c.bf16 %v2665_v52, %v2665_v52 }
 0x1d4   : > { %v3519_v16 = vpop.eup %3518  ;;  %2681 = vst.msk [vmem:[%s5349_s16 + $0x8] sm:$0xf] %vm2678_vm1, %v2672_v7  ;;  %v2646_v5 = vadd.f32 1.0, %v3517_v61 }
 0x1d5   : > { %2682 = vst.msk [vmem:[%s5349_s16 + $0xc] sm:$0xf] %vm2678_vm1, %v2673_v53  ;;  %v2647_v33 = vadd.f32 1.0, %v3519_v16 }
 0x1d6   : > { %v2654_v54 = vmul.f32 0.5, %v2646_v5 }
 0x1d7   : > { %v2655_v17 = vmul.f32 0.5, %v2647_v33 }
 0x1d8   : > { %v3521_v57 = vpop.eup %3520  ;;  %v2662_v45 = vmul.f32 %v2654_v54, %v5295_v35 }
 0x1d9   : > { %v3523_v44 = vpop.eup %3522  ;;  %v2663_v3 = vmul.f32 %v2655_v17, %v5298_v19  ;;  %v2650_v46 = vadd.f32 1.0, %v3521_v57 }
 0x1da   : > { %v2670_v32 = vpack.c.bf16 %v2662_v45, %v2662_v45  ;;  %v2651_v18 = vadd.f32 1.0, %v3523_v44 }
 0x1db   : > { %v3525_v22 = vpop.eup %3524  ;;  %v2671_v9 = vpack.c.bf16 %v2663_v3, %v2663_v3  ;;  %v2658_v36 = vmul.f32 0.5, %v2650_v46 }
 0x1dc   : > { %v3527_v47 = vpop.eup %3526  ;;  %2679 = vst.msk [vmem:[%s5349_s16] sm:$0xf] %vm2678_vm1, %v2670_v32  ;;  %v2659_v14 = vmul.f32 0.5, %v2651_v18  ;;  %v2652_v1 = vadd.f32 1.0, %v3525_v22 }
 0x1dd   : > { %2680 = vst.msk [vmem:[%s5349_s16 + $0x4] sm:$0xf] %vm2678_vm1, %v2671_v9  ;;  %v2666_v35 = vmul.f32 %v2658_v36, %v5313_v8  ;;  %v2653_v19 = vadd.f32 1.0, %v3527_v47 }
 0x1de   : > { %v2667_v13 = vmul.f32 %v2659_v14, %v5316_v24  ;;  %v2660_v51 = vmul.f32 0.5, %v2652_v1 }
 0x1df   : > { %v2674_v28 = vpack.c.bf16 %v2666_v35, %v2666_v35  ;;  %v2661_v0 = vmul.f32 0.5, %v2653_v19 }
 0x1e0   : > { %v2675_v40 = vpack.c.bf16 %v2667_v13, %v2667_v13  ;;  %v2668_v48 = vmul.f32 %v2660_v51, %v5327_v58 }
 0x1e1   : > { %2683 = vst.msk [vmem:[%s5349_s16 + $0x10] sm:$0xf] %vm2678_vm1, %v2674_v28  ;;  %v2669_v10 = vmul.f32 %v2661_v0, %v5332_v27 }
 0x1e2   : > { %2684 = vst.msk [vmem:[%s5349_s16 + $0x14] sm:$0xf] %vm2678_vm1, %v2675_v40  ;;  %v2676_v50 = vpack.c.bf16 %v2668_v48, %v2668_v48 }
 0x1e3   : > { %v2677_v11 = vpack.c.bf16 %v2669_v10, %v2669_v10 }
 0x1e4   : > { %2685 = vst.msk [vmem:[%s5349_s16 + $0x18] sm:$0xf] %vm2678_vm1, %v2676_v50 }
 0x1e5   : > { %2686 = vst.msk [vmem:[%s5349_s16 + $0x1c] sm:$0xf] %vm2678_vm1, %v2677_v11 }
 0x1e6 PF: > { %s16_s23 = sadd.s32 1, %s3551_s23   ;;  %s5612_s21 = smov %s3547_s22 }
 0x1e7   : > { %p13_p5 = scmp.ge.s32.totalorder %s16_s23, 4   ;;  %s5613_s22 = smov %s5615_s24 }
 0x1e9   :  { %15 = sbr.rel (!%p13_p5) target bundleno = 2 (0x2), region = 115 }

// kernel: _lambda_.29
= control target key start
LH: loop header
LB: loop body
LE: loop exit
PB: predicated region body
PF: predicated region fallthrough
CT: control target
= control target key end

     0   :  { %vm55_vm0 = vcmask 261120   ;;  %vm139_vm1 = vcmask 125952   ;;  %s250_s1 = inlined_call_operand.vmem [shape: bf16[32,16], index: 1, kind: input, shape index: {}]   ;;  %s251_s0 = inlined_call_operand.vmem [shape: bf16[32,32], index: 0, kind: input, shape index: {}]   ;;  %s252_s3 = inlined_call_operand.vmem [shape: bf16[32,16], index: 3, kind: input, shape index: {}]   ;;  %s253_s2 = inlined_call_operand.vmem [shape: f32[1,16], index: 2, kind: input, shape index: {}]   ;;  %s254_s4 = inlined_call_operand.vmem [shape: bf16[32,16], index: 4, kind: output, shape index: {}]  }
   0x1   :  { %v184_v0 = vld [vmem:[%s250_s1 + $0x8] sm:$0xff]   ;;  %v185_v1 = vld [vmem:[%s250_s1] sm:$0xff]  }
   0x2   :  { %176 = vmatprep.subr.bf16.mxu0 %v184_v0  ;;  %v186_v2 = vld [vmem:[%s251_s0] sm:$0xff]   ;;  %v187_v3 = vld [vmem:[%s251_s0 + $0x8] sm:$0xff]  }
   0x3   :  { %177 = vmatpush3.bf16.msra.mxu0 %v184_v0  ;;  %180 = vmatprep.mubr.msk.bf16.mxu0 %vm55_vm0, %v186_v2  ;;  %v171_v4 = vld [vmem:[%s252_s3 + $0x8] sm:$0xff]   ;;  %v148_v5 = vld [vmem:[%s253_s2] ss:$0 sm:$0xff] }
   0x4   :  { %178 = vmatprep.subr.bf16.mxu0 %v185_v1  ;;  %v164_v6 = vld [vmem:[%s252_s3] sm:$0xff]   ;;  %v169_v7 = vunpack.c.l.bf16 %v171_v4  ;;  %v170_v14 = vunpack.c.h.bf16 %v171_v4 }
   0x5   :  { %v165_v10 = vunpack.c.l.bf16 %v164_v6  ;;  %v166_v19 = vunpack.c.h.bf16 %v164_v6 }
   0x7   :  { %179 = vmatpush3.bf16.msra.mxu0 %v185_v1 }
   0xa   :  { %181 = vmatmul.mubr.msk.bf16.vlgmr.msra.gmra.mxu0 %vm55_vm0, %v187_v3 }
  0xca   :  { %v182_v8 = vpop.f32.mrf.mxu0 }
  0xcb   :  { %v105_v9 = vadd.f32 %v182_v8, %v148_v5 }
  0xcc   :  { %v96_v11 = vpop.f32.mrf.mxu0 }
  0xcd   :  { %v121_v12 = vadd.f32 %v169_v7, %v105_v9  ;;  %v97_v13 = vadd.f32 %v148_v5, %v96_v11 }
  0xce   :  { %v183_v15 = vpop.f32.mrf.mxu0 }
  0xcf   :  { %v161_v16 = vpack.c.bf16 %v121_v12, %v121_v12  ;;  %v119_v17 = vadd.f32 %v165_v10, %v97_v13  ;;  %v108_v18 = vadd.f32 %v183_v15, %v148_v5 }
  0xd0   :  { %v99_v20 = vpop.f32.mrf.mxu0 }
  0xd1   :  { %142 = vst.msk [vmem:[%s254_s4 + $0x8] sm:$0xf] %vm139_vm1, %v161_v16  ;;  %v159_v21 = vpack.c.bf16 %v119_v17, %v119_v17  ;;  %v122_v22 = vadd.f32 %v170_v14, %v108_v18  ;;  %v100_v23 = vadd.f32 %v148_v5, %v99_v20 }
  0xd3   :  { %140 = vst.msk [vmem:[%s254_s4] sm:$0xf] %vm139_vm1, %v159_v21  ;;  %v162_v24 = vpack.c.bf16 %v122_v22, %v122_v22  ;;  %v120_v25 = vadd.f32 %v166_v19, %v100_v23 }
  0xd5   :  { %143 = vst.msk [vmem:[%s254_s4 + $0xc] sm:$0xf] %vm139_vm1, %v162_v24  ;;  %v160_v26 = vpack.c.bf16 %v120_v25, %v120_v25 }
  0xd7   :  { %141 = vst.msk [vmem:[%s254_s4 + $0x4] sm:$0xf] %vm139_vm1, %v160_v26 }

// kernel: _lambda_.28
= control target key start
LH: loop header
LB: loop body
LE: loop exit
PB: predicated region body
PF: predicated region fallthrough
CT: control target
= control target key end

     0   :  { %vm44_vm0 = vcmask 130048   ;;  %vm152_vm1 = vcmask 257024   ;;  %s239_s1 = inlined_call_operand.vmem [shape: bf16[16,32], index: 1, kind: input, shape index: {}]   ;;  %s240_s0 = inlined_call_operand.vmem [shape: bf16[32,16], index: 0, kind: input, shape index: {}]   ;;  %s241_s2 = inlined_call_operand.vmem [shape: f32[1,32], index: 2, kind: input, shape index: {}]   ;;  %s242_s3 = inlined_call_operand.vmem [shape: bf16[32,32], index: 3, kind: output, shape index: {}]  }
   0x1   :  { %v184_v0 = vld [vmem:[%s239_s1] sm:$0xff]   ;;  %v186_v2 = vld [vmem:[%s240_s0 + $0x8] sm:$0xff]  }
   0x2   :  { %v185_v1 = vld [vmem:[%s240_s0] sm:$0xff]   ;;  %178 = vmatprep.subr.bf16.mxu0 %v184_v0 }
   0x3   :  { %179 = vmatpush3.bf16.msra.mxu0 %v184_v0  ;;  %180 = vmatprep.mubr.msk.bf16.mxu0 %vm44_vm0, %v185_v1  ;;  %v161_v3 = vld [vmem:[%s241_s2] ss:$0 sm:$0xff] }
   0x6   :  { %181 = vmatmul.mubr.msk.bf16.vlgmr.msra.gmra.mxu0 %vm44_vm0, %v186_v2 }
  0xc6   :  { %v182_v4 = vpop.f32.mrf.mxu0 }
  0xc7   :  { %v94_v5 = vadd.f32 %v182_v4, %v161_v3 }
  0xc8   :  { %v85_v6 = vpop.f32.mrf.mxu0 }
  0xc9   :  { %v102_v7 = vmul.f32 %v94_v5, %v94_v5  ;;  %v86_v8 = vadd.f32 %v161_v3, %v85_v6 }
  0xca   :  { %v183_v9 = vpop.f32.mrf.mxu0 }
  0xcb   :  { %v106_v10 = vmul.f32 %v102_v7, %v94_v5  ;;  %v100_v11 = vmul.f32 %v86_v8, %v86_v8  ;;  %v97_v12 = vadd.f32 %v183_v9, %v161_v3 }
  0xcc   :  { %v88_v13 = vpop.f32.mrf.mxu0 }
  0xcd   :  { %v110_v14 = vmul.f32 0.044715, %v106_v10  ;;  %v104_v15 = vmul.f32 %v100_v11, %v86_v8  ;;  %v103_v16 = vmul.f32 %v97_v12, %v97_v12  ;;  %v89_v17 = vadd.f32 %v161_v3, %v88_v13 }
  0xcf   :  { %v114_v18 = vadd.f32 %v110_v14, %v94_v5  ;;  %v108_v19 = vmul.f32 0.044715, %v104_v15  ;;  %v107_v20 = vmul.f32 %v103_v16, %v97_v12  ;;  %v101_v21 = vmul.f32 %v89_v17, %v89_v17 }
  0xd1   :  { %v118_v22 = vmul.f32 0.7978846, %v114_v18  ;;  %v112_v23 = vadd.f32 %v108_v19, %v86_v8  ;;  %v111_v24 = vmul.f32 0.044715, %v107_v20  ;;  %v105_v25 = vmul.f32 %v101_v21, %v89_v17 }
  0xd3   :  { %187 = vtanh.f32 %v118_v22  ;;  %v116_v26 = vmul.f32 0.7978846, %v112_v23  ;;  %v115_v27 = vadd.f32 %v111_v24, %v97_v12  ;;  %v109_v28 = vmul.f32 0.044715, %v105_v25 }
  0xd5   :  { %189 = vtanh.f32 %v116_v26  ;;  %v119_v29 = vmul.f32 0.7978846, %v115_v27  ;;  %v113_v30 = vadd.f32 %v109_v28, %v89_v17 }
  0xd7   :  { %191 = vtanh.f32 %v119_v29  ;;  %v117_v31 = vmul.f32 0.7978846, %v113_v30 }
  0xd9   :  { %193 = vtanh.f32 %v117_v31 }
  0xe0   :  { %v188_v32 = vpop.eup %187 }
  0xe1   :  { %v126_v33 = vadd.f32 1.0, %v188_v32 }
  0xe2   :  { %v190_v34 = vpop.eup %189 }
  0xe3   :  { %v130_v35 = vmul.f32 0.5, %v126_v33  ;;  %v124_v36 = vadd.f32 1.0, %v190_v34 }
  0xe4   :  { %v192_v37 = vpop.eup %191 }
  0xe5   :  { %v134_v38 = vmul.f32 %v130_v35, %v94_v5  ;;  %v128_v39 = vmul.f32 0.5, %v124_v36  ;;  %v127_v40 = vadd.f32 1.0, %v192_v37 }
  0xe6   :  { %v194_v41 = vpop.eup %193 }
  0xe7   :  { %v173_v42 = vpack.c.bf16 %v134_v38, %v134_v38  ;;  %v132_v43 = vmul.f32 %v128_v39, %v86_v8  ;;  %v131_v44 = vmul.f32 0.5, %v127_v40  ;;  %v125_v45 = vadd.f32 1.0, %v194_v41 }
  0xe9   :  { %155 = vst.msk [vmem:[%s242_s3 + $0x8] sm:$0xf] %vm152_vm1, %v173_v42  ;;  %v171_v46 = vpack.c.bf16 %v132_v43, %v132_v43  ;;  %v135_v47 = vmul.f32 %v131_v44, %v97_v12  ;;  %v129_v48 = vmul.f32 0.5, %v125_v45 }
  0xeb   :  { %153 = vst.msk [vmem:[%s242_s3] sm:$0xf] %vm152_vm1, %v171_v46  ;;  %v174_v49 = vpack.c.bf16 %v135_v47, %v135_v47  ;;  %v133_v50 = vmul.f32 %v129_v48, %v89_v17 }
  0xed   :  { %156 = vst.msk [vmem:[%s242_s3 + $0xc] sm:$0xf] %vm152_vm1, %v174_v49  ;;  %v172_v51 = vpack.c.bf16 %v133_v50, %v133_v50 }
  0xef   :  { %154 = vst.msk [vmem:[%s242_s3 + $0x4] sm:$0xf] %vm152_vm1, %v172_v51 }

// kernel: _lambda_.30
= control target key start
LH: loop header
LB: loop body
LE: loop exit
PB: predicated region body
PF: predicated region fallthrough
CT: control target
= control target key end

     0   :  { %s1291_s15 = smov 0   ;;  %s1293_s16 = smov 0   ;;  %s1406_s0 = inlined_call_operand.vmem [shape: bf16[2,6,6,16], index: 0, kind: input, shape index: {}]   ;;  %s1407_s1 = inlined_call_operand.vmem [shape: f32[9,1,16], index: 1, kind: input, shape index: {}]   ;;  %s1408_s2 = inlined_call_operand.vmem [shape: f32[1,16], index: 2, kind: input, shape index: {}]   ;;  %s1409_s3 = inlined_call_operand.vmem [shape: bf16[16,16], index: 3, kind: input, shape index: {}]   ;;  %s1410_s4 = inlined_call_operand.vmem [shape: bf16[2,4,4,16], index: 4, kind: output, shape index: {}]  }
   0x1   :  { %s1295_s17 = smov 0  }
   0x2 LB: > { %s26_s18 = sadd.s32 1, %s1258_s16  ;;  %p1068_p0 = scmp.ge.s32.totalorder %s1262_s17, 1  ;;  %s1262_s17 = sphi %s1295_s17, %s14_s17   ;;  %s1258_s16 = sphi %s1293_s16, %s1412_s16   ;;  %s1254_s15 = sphi %s1291_s15, %s1411_s15  }
   0x3   : > { %p28_p1 = scmp.ge.s32.totalorder %s26_s18, 2  ;;  %p176_p2 = scmp.lt.s32.totalorder %s1262_s17, 3 }
   0x5   : > { %s1414_s18 = smov (%p28_p1, %s26_s18), 0  ;;  %p177_p3 = pnand %p1068_p0, %p176_p2 }
   0x6   : > { %p206_p4 = scmp.lt.s32.totalorder (!%p177_p3), %s1254_s15, 1 }
   0x7   : > { %180 = sbr.rel (%p177_p3) target bundleno = 232 (0xe8), region = 36 }
   0xc   : > { %v1232_v0 = vld [vmem:[%s1409_s3] sm:$0xff]   ;;  %v1264_v1 = vmov 0.0   ;;  %vm1265_vm0 = vmmov 0   ;;  %s1416_s15 = smov (!%p206_p4, %s1254_s15), 1  ;;  %vm370_vm1 = vcmask 130048   ;;  %vm416_vm2 = vcmask 123904  }
   0xd   : > { %1181 = vmatprep.subr.bf16.mxu0 %v1264_v1  ;;  %1187 = vmatprep.subr.bf16.mxu1 %v1264_v1  ;;  %v1233_v2 = vld [vmem:[%s1409_s3] sm:$0xff]   ;;  %s1205_s23 = smul.u32 24, %s1416_s15  ;;  %s1172_s29 = sshll.u32 %s1416_s15, 3 }
   0xe   : > { %1182 = vmatpush3.bf16.msra.mxu0 %v1232_v0  ;;  %1183 = vmatprep.mubr.msk.bf16.mxu0 %vm1265_vm0, %v1264_v1  ;;  %v1236_v19 = vld [vmem:[%s1409_s3] sm:$0xff]   ;;  %s219_s6 = scalar_lea.vmem %s1410_s4, %s1172_s29 }
   0xf   : > { %1188 = vmatpush3.bf16.msra.mxu1 %v1233_v2  ;;  %1189 = vmatprep.mubr.msk.bf16.mxu1 %vm1265_vm0, %v1264_v1  ;;  %s1323_s26 = scalar_lea.vmem %s1406_s0, %s1205_s23  ;;  %v1237_v20 = vld [vmem:[%s1409_s3] sm:$0xff]  }
  0x10   : > { %1193 = vmatprep.subr.bf16.mxu0 %v1264_v1  ;;  %1199 = vmatprep.subr.bf16.mxu1 %v1264_v1  ;;  %v1077_v3 = vld [vmem:[%s1323_s26 + $0x4] sm:$0x7]  ;;  %v1101_v4 = vld [vmem:[%s1323_s26 + $0x8] sm:$0x7]  ;;  %v1328_v5 = vld [vmem:[%s1323_s26 + $0xc] sm:$0x7] }
  0x11   : > { %v1092_v6 = vcombine.low %v1077_v3, %v1077_v3  ;;  %v1116_v7 = vcombine.low %v1101_v4, %v1101_v4  ;;  %v1331_v8 = vld [vmem:[%s1323_s26 + $0x10] sm:$0x7]  ;;  %v1141_v9 = vcombine.low %v1328_v5, %v1328_v5  ;;  %v225_v29 = vld [vmem:[%s1323_s26] sm:$0x7]  ;;  %v1095_v30 = vld [vmem:[%s1323_s26 + $0x4] sm:$0x7]  ;;  %v266_v48 = vunpack.c.l.bf16 %v1077_v3 }
  0x12   : > { %v1166_v10 = vcombine.low %v1331_v8, %v1331_v8  ;;  %v226_v31 = vunpack.c.l.bf16 %v225_v29  ;;  %v419_v32 = vunpack.c.l.bf16 %v1095_v30  ;;  %v1074_v33 = vld [vmem:[%s1407_s1 + $0x1] ss:$0 sm:$0xff]  ;;  %v1072_v34 = vld [vmem:[%s1407_s1] ss:$0 sm:$0xff]  ;;  %v1076_v36 = vld [vmem:[%s1407_s1 + $0x2] ss:$0 sm:$0xff]  ;;  %v454_v49 = vunpack.c.l.bf16 %v1101_v4 }
  0x13   : > { %v358_v11 = vshrl.u32 %v1092_v6, 16  ;;  %v360_v12 = vshll.u32 %v1092_v6, 16  ;;  %v540_v13 = vshrl.u32 %v1116_v7, 16  ;;  %v542_v14 = vshll.u32 %v1116_v7, 16  ;;  %v1120_v38 = vld [vmem:[%s1323_s26 + $0x8] sm:$0x7] }
  0x14   : > { %v723_v17 = vshll.u32 %v1141_v9, 16  ;;  %v904_v18 = vshll.u32 %v1166_v10, 16  ;;  %v721_v23 = vshrl.u32 %v1141_v9, 16  ;;  %v902_v25 = vshrl.u32 %v1166_v10, 16  ;;  %v1145_v41 = vld [vmem:[%s1323_s26 + $0xc] sm:$0x7] }
  0x15   : > { %v362_v15 = vrot.slane %v360_v12, 1  ;;  %v544_v16 = vrot.slane %v542_v14, 1  ;;  %v244_v35 = vmul.f32 %v1074_v33, %v226_v31  ;;  %v436_v37 = vmul.f32 %v1074_v33, %v419_v32  ;;  %v1079_v52 = vld [vmem:[%s1407_s1 + $0x3] ss:$0 sm:$0xff]  ;;  %v1081_v53 = vld [vmem:[%s1407_s1 + $0x4] ss:$0 sm:$0xff] }
  0x16   : > { %v725_v24 = vrot.slane %v723_v17, 1  ;;  %v906_v26 = vrot.slane %v904_v18, 1  ;;  %v234_v39 = vmul.f32 %v1072_v34, %v226_v31  ;;  %v257_v40 = vmul.f32 %v1076_v36, %v226_v31  ;;  %v1083_v61 = vld [vmem:[%s1407_s1 + $0x5] ss:$0 sm:$0xff]  ;;  %v1084_v12 = vld [vmem:[%s1323_s26 + $0x8] sm:$0x7] }
  0x17   : > { %v363_v21 = vor.u32 %v362_v15, %v358_v11  ;;  %v545_v22 = vor.u32 %v544_v16, %v540_v13  ;;  %v246_v42 = vrot.slane %v244_v35, 1  ;;  %v427_v43 = vmul.f32 %v1072_v34, %v419_v32  ;;  %v1108_v16 = vld [vmem:[%s1323_s26 + $0xc] sm:$0x7]  ;;  %v1088_v30 = vld [vmem:[%s1407_s1 + $0x7] ss:$0 sm:$0xff] }
  0x18   : > { %v726_v27 = vor.u32 %v725_v24, %v721_v23  ;;  %v907_v28 = vor.u32 %v906_v26, %v902_v25  ;;  %v438_v44 = vrot.slane %v436_v37, 1  ;;  %v448_v45 = vmul.f32 %v1076_v36, %v419_v32  ;;  %v1086_v26 = vld [vmem:[%s1407_s1 + $0x6] ss:$0 sm:$0xff] }
  0x19   : > { %1184 = vmatmul.mubr.msk.bf16.vlgmr.msra.gmra.mxu0 %vm370_vm1, %v363_v21  ;;  %1190 = vmatmul.mubr.msk.bf16.vlgmr.msra.gmra.mxu1 %vm370_vm1, %v545_v22  ;;  %v600_v46 = vunpack.c.l.bf16 %v1120_v38  ;;  %v781_v47 = vunpack.c.l.bf16 %v1145_v41  ;;  %v248_v50 = vadd.f32 %v246_v42, %v234_v39  ;;  %v259_v51 = vrot.slane %v257_v40, 2  ;;  %v1090_v40 = vld [vmem:[%s1407_s1 + $0x8] ss:$0 sm:$0xff] }
  0x1a   : > { %1194 = vmatpush3.bf16.msra.mxu0 %v1236_v19  ;;  %1200 = vmatpush3.bf16.msra.mxu1 %v1237_v20  ;;  %v440_v54 = vadd.f32 %v438_v44, %v427_v43  ;;  %v450_v55 = vrot.slane %v448_v45, 2  ;;  %v275_v58 = vmul.f32 %v1079_v52, %v266_v48  ;;  %v285_v59 = vmul.f32 %v1081_v53, %v266_v48  ;;  %v1133_v45 = vld [vmem:[%s1323_s26 + $0x10] sm:$0x7] }
  0x1b   : > { %1195 = vmatprep.mubr.msk.bf16.mxu0 %vm1265_vm0, %v1264_v1  ;;  %1201 = vmatprep.mubr.msk.bf16.mxu1 %vm1265_vm0, %v1264_v1  ;;  %v617_v56 = vmul.f32 %v1074_v33, %v600_v46  ;;  %v798_v57 = vmul.f32 %v1074_v33, %v781_v47  ;;  %v261_v60 = vadd.f32 %v259_v51, %v248_v50  ;;  %v635_v19 = vunpack.c.l.bf16 %v1328_v5 }
  0x1c   : > { %v452_v62 = vadd.f32 %v450_v55, %v440_v54  ;;  %v462_v63 = vmul.f32 %v1079_v52, %v454_v49  ;;  %v471_v0 = vmul.f32 %v1081_v53, %v454_v49  ;;  %v608_v1 = vmul.f32 %v1072_v34, %v600_v46 }
  0x1d   : > { %v619_v2 = vrot.slane %v617_v56, 1  ;;  %v629_v3 = vmul.f32 %v1076_v36, %v600_v46  ;;  %v789_v4 = vmul.f32 %v1072_v34, %v781_v47  ;;  %v800_v6 = vrot.slane %v798_v57, 1 }
  0x1e   : > { %v810_v7 = vmul.f32 %v1076_v36, %v781_v47  ;;  %v287_v9 = vrot.slane %v285_v59, 1  ;;  %v298_v10 = vmul.f32 %v1083_v61, %v266_v48  ;;  %v276_v11 = vadd.f32 %v275_v58, %v261_v60 }
  0x1f   : > { %v463_v13 = vadd.f32 %v462_v63, %v452_v62  ;;  %v473_v14 = vrot.slane %v471_v0, 1  ;;  %v483_v15 = vmul.f32 %v1083_v61, %v454_v49  ;;  %v621_v17 = vadd.f32 %v619_v2, %v608_v1  ;;  %v1158_v49 = vld [vmem:[%s1323_s26 + $0x14] sm:$0x7] }
  0x20   : > { %v631_v18 = vrot.slane %v629_v3, 2  ;;  %v802_v20 = vadd.f32 %v800_v6, %v789_v4  ;;  %v812_v21 = vrot.slane %v810_v7, 2  ;;  %v816_v22 = vunpack.c.l.bf16 %v1331_v8 }
  0x21   : > { %1196 = vmatmul.mubr.msk.bf16.vlgmr.msra.gmra.mxu0 %vm370_vm1, %v726_v27  ;;  %1202 = vmatmul.mubr.msk.bf16.vlgmr.msra.gmra.mxu1 %vm370_vm1, %v907_v28  ;;  %v300_v23 = vrot.slane %v298_v10, 2  ;;  %v307_v24 = vunpack.c.l.bf16 %v1084_v12  ;;  %v289_v25 = vadd.f32 %v287_v9, %v276_v11  ;;  %v475_v27 = vadd.f32 %v473_v14, %v463_v13  ;;  %v1091_v14 = vld [vmem:[%s1408_s2] ss:$0 sm:$0xff] }
  0x22   : > { %v485_v28 = vrot.slane %v483_v15, 2  ;;  %v492_v29 = vunpack.c.l.bf16 %v1108_v16  ;;  %v633_v31 = vadd.f32 %v631_v18, %v621_v17  ;;  %v643_v5 = vmul.f32 %v1079_v52, %v635_v19 }
  0x23   : > { %v652_v32 = vmul.f32 %v1081_v53, %v635_v19  ;;  %v814_v33 = vadd.f32 %v812_v21, %v802_v20  ;;  %v824_v8 = vmul.f32 %v1079_v52, %v816_v22  ;;  %v833_v34 = vmul.f32 %v1081_v53, %v816_v22 }
  0x24   : > { %v316_v35 = vmul.f32 %v1086_v26, %v307_v24  ;;  %v302_v36 = vadd.f32 %v300_v23, %v289_v25  ;;  %v326_v37 = vmul.f32 %v1088_v30, %v307_v24  ;;  %v487_v38 = vadd.f32 %v485_v28, %v475_v27 }
  0x25   : > { %v500_v39 = vmul.f32 %v1086_v26, %v492_v29  ;;  %v509_v41 = vmul.f32 %v1088_v30, %v492_v29  ;;  %v644_v42 = vadd.f32 %v643_v5, %v633_v31  ;;  %v664_v43 = vmul.f32 %v1083_v61, %v635_v19 }
  0x26   : > { %v654_v44 = vrot.slane %v652_v32, 1  ;;  %v825_v46 = vadd.f32 %v824_v8, %v814_v33  ;;  %v835_v47 = vrot.slane %v833_v34, 1  ;;  %v845_v48 = vmul.f32 %v1083_v61, %v816_v22 }
  0x27   : > { %v317_v50 = vadd.f32 %v316_v35, %v302_v36  ;;  %v328_v51 = vrot.slane %v326_v37, 1  ;;  %v339_v52 = vmul.f32 %v1090_v40, %v307_v24  ;;  %v501_v53 = vadd.f32 %v500_v39, %v487_v38 }
  0x28   : > { %v511_v54 = vrot.slane %v509_v41, 1  ;;  %v521_v55 = vmul.f32 %v1090_v40, %v492_v29  ;;  %v666_v56 = vrot.slane %v664_v43, 2  ;;  %v673_v57 = vunpack.c.l.bf16 %v1133_v45 }
  0x29   : > { %v656_v58 = vadd.f32 %v654_v44, %v644_v42  ;;  %v837_v59 = vadd.f32 %v835_v47, %v825_v46  ;;  %v847_v60 = vrot.slane %v845_v48, 2  ;;  %v854_v62 = vunpack.c.l.bf16 %v1158_v49 }
  0x2a   : > { %v330_v63 = vadd.f32 %v328_v51, %v317_v50  ;;  %v341_v0 = vrot.slane %v339_v52, 2  ;;  %v513_v1 = vadd.f32 %v511_v54, %v501_v53  ;;  %v523_v2 = vrot.slane %v521_v55, 2 }
  0x2b   : > { %v681_v3 = vmul.f32 %v1086_v26, %v673_v57  ;;  %v690_v4 = vmul.f32 %v1088_v30, %v673_v57  ;;  %v668_v61 = vadd.f32 %v666_v56, %v656_v58  ;;  %v849_v6 = vadd.f32 %v847_v60, %v837_v59 }
  0x2c   : > { %v862_v7 = vmul.f32 %v1086_v26, %v854_v62  ;;  %v871_v9 = vmul.f32 %v1088_v30, %v854_v62  ;;  %v343_v10 = vadd.f32 %v341_v0, %v330_v63  ;;  %v525_v11 = vadd.f32 %v523_v2, %v513_v1 }
  0x2d   : > { %v692_v12 = vrot.slane %v690_v4, 1  ;;  %v702_v13 = vmul.f32 %v1090_v40, %v673_v57  ;;  %v682_v15 = vadd.f32 %v681_v3, %v668_v61  ;;  %v883_v18 = vmul.f32 %v1090_v40, %v854_v62 }
  0x2e   : > { %v863_v16 = vadd.f32 %v862_v7, %v849_v6  ;;  %v873_v17 = vrot.slane %v871_v9, 1  ;;  %v351_v19 = vadd.f32 %v1091_v14, %v343_v10  ;;  %v533_v20 = vadd.f32 %v1091_v14, %v525_v11 }
  0x2f   : > { %v694_v21 = vadd.f32 %v692_v12, %v682_v15  ;;  %v704_v22 = vrot.slane %v702_v13, 2  ;;  %v885_v24 = vrot.slane %v883_v18, 2 }
  0x30   : > { %v875_v23 = vadd.f32 %v873_v17, %v863_v16 }
  0x31   : > { %v706_v29 = vadd.f32 %v704_v22, %v694_v21 }
  0x32   : > { %v887_v30 = vadd.f32 %v885_v24, %v875_v23 }
  0x33   : > { %v714_v35 = vadd.f32 %v1091_v14, %v706_v29 }
  0x34   : > { %v895_v36 = vadd.f32 %v1091_v14, %v887_v30 }
  0xd9   : > { %v408_v25 = vpop.f32.mrf.mxu0  ;;  %v589_v26 = vpop.f32.mrf.mxu1 }
  0xda   : > { %v414_v27 = vadd.f32 %v408_v25, %v351_v19  ;;  %v595_v28 = vadd.f32 %v589_v26, %v533_v20 }
  0xdb   : > { %v1185_v31 = vpop.f32.mrf.mxu0  ;;  %v1191_v5 = vpop.f32.mrf.mxu1 }
  0xdc   : > { %v415_v32 = vpack.c.bf16 %v414_v27, %v414_v27  ;;  %v596_v33 = vpack.c.bf16 %v595_v28, %v595_v28 }
  0xdd   : > { %v411_v8 = vpop.f32.mrf.mxu0  ;;  %v592_v34 = vpop.f32.mrf.mxu1 }
  0xde   : > { %417 = vst.msk [vmem:[%s219_s6] sm:$0x3] %vm416_vm2, %v415_v32  ;;  %1119 = vst.msk [vmem:[%s219_s6 + $0x2] sm:$0x3] %vm416_vm2, %v596_v33 }
  0xdf   : > { %v1186_v37 = vpop.f32.mrf.mxu0  ;;  %v1192_v38 = vpop.f32.mrf.mxu1 }
  0xe1   : > { %v770_v39 = vpop.f32.mrf.mxu0  ;;  %v951_v40 = vpop.f32.mrf.mxu1 }
  0xe2   : > { %v776_v41 = vadd.f32 %v770_v39, %v714_v35  ;;  %v957_v42 = vadd.f32 %v951_v40, %v895_v36 }
  0xe3   : > { %v1197_v43 = vpop.f32.mrf.mxu0  ;;  %v1203_v44 = vpop.f32.mrf.mxu1 }
  0xe4   : > { %v777_v45 = vpack.c.bf16 %v776_v41, %v776_v41  ;;  %v958_v46 = vpack.c.bf16 %v957_v42, %v957_v42 }
  0xe5   : > { %v773_v47 = vpop.f32.mrf.mxu0  ;;  %v954_v48 = vpop.f32.mrf.mxu1 }
  0xe6   : > { %1144 = vst.msk [vmem:[%s219_s6 + $0x4] sm:$0x3] %vm416_vm2, %v777_v45  ;;  %1169 = vst.msk [vmem:[%s219_s6 + $0x6] sm:$0x3] %vm416_vm2, %v958_v46 }
  0xe7   : > { %v1198_v49 = vpop.f32.mrf.mxu0  ;;  %v1204_v50 = vpop.f32.mrf.mxu1 }
  0xe8 PF: > { %s14_s17 = sadd.s32 1, %s1262_s17   ;;  %s1411_s15 = smov %s1258_s16 }
  0xe9   : > { %p11_p5 = scmp.ge.s32.totalorder %s14_s17, 4   ;;  %s1412_s16 = smov %s1414_s18 }
  0xeb   :  { %13 = sbr.rel (!%p11_p5) target bundleno = 2 (0x2), region = 83 }

// kernel: _lambda_.35
= control target key start
LH: loop header
LB: loop body
LE: loop exit
PB: predicated region body
PF: predicated region fallthrough
CT: control target
= control target key end

     0   :  { %s250_s9 = smov 0   ;;  %s278_s0 = inlined_call_operand.vmem [shape: bf16[2,4,16], index: 0, kind: input, shape index: {}]   ;;  %s279_s1 = inlined_call_operand.vmem [shape: f32[2,1,16], index: 1, kind: input, shape index: {}]   ;;  %s280_s2 = inlined_call_operand.vmem [shape: bf16[2,4,16], index: 2, kind: output, shape index: {}]  }
   0x1 LB: > { %s228_s10 = sadd.s32 4294967295, %s252_s9   ;;  %p232_p0 = scmp.ge.s32.totalorder %s252_s9, 1  ;;  %s252_s9 = sphi %s250_s9, %s12_s9  }
   0x2   : > { %p119_p1 = scmp.lt.s32.totalorder %s252_s9, 3 }
   0x4   : > { %p120_p2 = pnand %p232_p0, %p119_p1 }
   0x5   : > { %p142_p3 = scmp.lt.s32.totalorder (!%p120_p2), %s228_s10, 1 }
   0x6   : > { %123 = sbr.rel (%p120_p2) target bundleno = 22 (0x16), region = 28 }
   0xb   : > { %s282_s10 = smov (!%p142_p3, %s228_s10), 1  ;;  %vm164_vm0 = vcmask 123904  }
   0xc   : > { %s233_s11 = sshll.u32 %s282_s10, 1  ;;  %s148_s14 = scalar_lea.vmem %s279_s1, %s282_s10 }
   0xd   : > { %s145_s17 = scalar_lea.vmem %s278_s0, %s233_s11  ;;  %v235_v1 = vld [vmem:[%s148_s14] ss:$0 sm:$0xff]  ;;  %s152_s20 = scalar_lea.vmem %s280_s2, %s233_s11 }
   0xe   : > { %v153_v0 = vld [vmem:[%s145_s17] sm:$0x3] }
   0xf   : > { %v154_v2 = vunpack.c.l.bf16 %v153_v0 }
  0x11   : > { %v162_v3 = vmul.f32 %v235_v1, %v154_v2 }
  0x13   : > { %v163_v4 = vpack.c.bf16 %v162_v3, %v162_v3 }
  0x15   : > { %165 = vst.msk [vmem:[%s152_s20] sm:$0x3] %vm164_vm0, %v163_v4 }
  0x16 PF: > { %s12_s9 = sadd.s32 1, %s252_s9  }
  0x17   : > { %p9_p4 = scmp.ge.s32.totalorder %s12_s9, 4  }
  0x19   :  { %11 = sbr.rel (!%p9_p4) target bundleno = 1 (0x1), region = 61 }

// kernel: _lambda_.36
= control target key start
LH: loop header
LB: loop body
LE: loop exit
PB: predicated region body
PF: predicated region fallthrough
CT: control target
= control target key end

     0   :  { %v96_v0 = vmov 0.0   ;;  %vm97_vm0 = vmmov 0   ;;  %vm31_vm1 = vcmask 130048   ;;  %vm76_vm2 = vcmask 257024   ;;  %s130_s1 = inlined_call_operand.vmem [shape: bf16[16,32], index: 1, kind: input, shape index: {}]   ;;  %s131_s0 = inlined_call_operand.vmem [shape: bf16[8,16], index: 0, kind: input, shape index: {}]   ;;  %s132_s2 = inlined_call_operand.vmem [shape: f32[1,32], index: 2, kind: input, shape index: {}]   ;;  %s133_s3 = inlined_call_operand.vmem [shape: bf16[8,32], index: 3, kind: output, shape index: {}]  }
   0x1   :  { %87 = vmatprep.subr.bf16.mxu0 %v96_v0  ;;  %v95_v1 = vld [vmem:[%s130_s1] sm:$0xff]   ;;  %89 = vmatprep.mubr.msk.bf16.mxu0 %vm97_vm0, %v96_v0 }
   0x2   :  { %88 = vmatpush3.bf16.msra.mxu0 %v95_v1  ;;  %v15_v2 = vld [vmem:[%s131_s0] sm:$0xf] }
   0x3   :  { %v82_v3 = vld [vmem:[%s132_s2] ss:$0 sm:$0xff] }
   0x5   :  { %90 = vmatmul.mubr.msk.bf16.vlgmr.msra.gmra.mxu0 %vm31_vm1, %v15_v2 }
  0xc5   :  { %v69_v4 = vpop.f32.mrf.mxu0 }
  0xc6   :  { %v70_v5 = vadd.f32 %v82_v3, %v69_v4 }
  0xc7   :  { %v91_v6 = vpop.f32.mrf.mxu0 }
  0xc8   :  { %v75_v7 = vpack.c.bf16 %v70_v5, %v70_v5 }
  0xc9   :  { %v72_v8 = vpop.f32.mrf.mxu0 }
  0xca   :  { %77 = vst.msk [vmem:[%s133_s3] sm:$0xf] %vm76_vm2, %v75_v7 }
  0xcb   :  { %v92_v9 = vpop.f32.mrf.mxu0 }

// kernel: _lambda_.33
= control target key start
LH: loop header
LB: loop body
LE: loop exit
PB: predicated region body
PF: predicated region fallthrough
CT: control target
= control target key end

     0   :  { %s980_s24 = smov 0   ;;  %s982_s25 = smov 0   ;;  %s1085_s0 = inlined_call_operand.vmem [shape: bf16[2,3,3,16], index: 0, kind: input, shape index: {}]   ;;  %s1086_s1 = inlined_call_operand.vmem [shape: bf16[2,3,3,16], index: 1, kind: input, shape index: {}]   ;;  %s1087_s2 = inlined_call_operand.vmem [shape: bf16[2,3,3,16], index: 2, kind: input, shape index: {}]   ;;  %s1088_s3 = inlined_call_operand.vmem [shape: bf16[2,3,3,16], index: 3, kind: input, shape index: {}]   ;;  %s1089_s4 = inlined_call_operand.vmem [shape: f32[9,1,16], index: 4, kind: input, shape index: {}]   ;;  %s1090_s5 = inlined_call_operand.vmem [shape: f32[1,16], index: 5, kind: input, shape index: {}]   ;;  %s1091_s6 = inlined_call_operand.vmem [shape: bf16[2,2,2,16], index: 6, kind: output, shape index: {0}]   ;;  %s1092_s7 = inlined_call_operand.vmem [shape: f32[2,1,16], index: 7, kind: output, shape index: {1}]  }
   0x1   :  { %s984_s26 = smov 0  }
   0x2 LB: > { %s30_s27 = sadd.s32 1, %s933_s25  ;;  %p830_p0 = scmp.ge.s32.totalorder %s937_s26, 1  ;;  %s937_s26 = sphi %s984_s26, %s18_s26   ;;  %s933_s25 = sphi %s982_s25, %s1094_s25   ;;  %s929_s24 = sphi %s980_s24, %s1093_s24  }
   0x3   : > { %p32_p1 = scmp.ge.s32.totalorder %s30_s27, 2  ;;  %p284_p2 = scmp.lt.s32.totalorder %s937_s26, 3 }
   0x5   : > { %s1096_s27 = smov (%p32_p1, %s30_s27), 0  ;;  %p285_p3 = pnand %p830_p0, %p284_p2 }
   0x6   : > { %p337_p4 = scmp.lt.s32.totalorder (!%p285_p3), %s929_s24, 1 }
   0x7   : > { %288 = sbr.rel (%p285_p3) target bundleno = 61 (0x3d), region = 44 }
   0xc   : > { %s1098_s24 = smov (!%p337_p4, %s929_s24), 1  ;;  %vm374_vm0 = vcmask 122880   ;;  %v939_v0 = vmov 0.0   ;;  %v836_v1 = vld [vmem:[%s1089_s4] ss:$0 sm:$0xff]  ;;  %vm510_vm1 = vcmask 123904  }
   0xd   : > { %s889_s28 = smul.u32 6, %s1098_s24  ;;  %s1005_s8 = scalar_lea.vmem %s1092_s7, %s1098_s24  ;;  %v838_v3 = vld [vmem:[%s1089_s4 + $0x2] ss:$0 sm:$0xff]  ;;  %v845_v8 = vld [vmem:[%s1089_s4 + $0x5] ss:$0 sm:$0xff] }
   0xe   : > { %375 = vst.msk [vmem:[%s1005_s8] sm:$0x1] %vm374_vm0, %v939_v0  ;;  %v841_v9 = vld [vmem:[%s1089_s4 + $0x1] ss:$0 sm:$0xff]  ;;  %v843_v18 = vld [vmem:[%s1089_s4 + $0x3] ss:$0 sm:$0xff] }
   0xf   : > { %s1012_s11 = scalar_lea.vmem %s1085_s0, %s889_s28  ;;  %s1017_s14 = scalar_lea.vmem %s1086_s1, %s889_s28  ;;  %v848_v29 = vld [vmem:[%s1089_s4 + $0x4] ss:$0 sm:$0xff]  ;;  %v853_v30 = vld [vmem:[%s1089_s4 + $0x8] ss:$0 sm:$0xff]  ;;  %v851_v42 = vld [vmem:[%s1089_s4 + $0x6] ss:$0 sm:$0xff] }
  0x10   : > { %s351_s19 = scalar_lea.vmem %s1087_s2, %s889_s28  ;;  %s1028_s22 = scalar_lea.vmem %s1088_s3, %s889_s28  ;;  %v378_v2 = vld [vmem:[%s1012_s11] sm:$0x3]  ;;  %v859_v11 = vld [vmem:[%s1012_s11 + $0x2] sm:$0x3]  ;;  %v876_v35 = vld [vmem:[%s1012_s11 + $0x4] sm:$0x3] }
  0x11   : > { %v405_v4 = vld [vmem:[%s1017_s14] sm:$0x3]  ;;  %v379_v5 = vunpack.c.l.bf16 %v378_v2  ;;  %v864_v12 = vld [vmem:[%s1017_s14 + $0x2] sm:$0x3]  ;;  %v523_v22 = vunpack.c.l.bf16 %v859_v11  ;;  %v600_v48 = vunpack.c.l.bf16 %v876_v35  ;;  %v857_v52 = vld [vmem:[%s1089_s4 + $0x7] ss:$0 sm:$0xff] }
  0x12   : > { %v406_v6 = vunpack.c.l.bf16 %v405_v4  ;;  %v419_v7 = vld [vmem:[%s351_s19] sm:$0x3]  ;;  %v849_v16 = vld [vmem:[%s1012_s11 + $0x2] sm:$0x3]  ;;  %v547_v23 = vunpack.c.l.bf16 %v864_v12  ;;  %v882_v56 = vld [vmem:[%s1017_s14 + $0x4] sm:$0x3] }
  0x13   : > { %v420_v10 = vunpack.c.l.bf16 %v419_v7  ;;  %v387_v13 = vmul.f32 %v836_v1, %v379_v5  ;;  %v397_v14 = vmul.f32 %v838_v3, %v379_v5  ;;  %v447_v15 = vld [vmem:[%s1028_s22] sm:$0x3]  ;;  %v867_v17 = vld [vmem:[%s351_s19 + $0x2] sm:$0x3]  ;;  %v463_v25 = vunpack.c.l.bf16 %v849_v16 }
  0x14   : > { %v415_v21 = vmul.f32 %v841_v9, %v406_v6  ;;  %v448_v24 = vunpack.c.l.bf16 %v447_v15  ;;  %v560_v26 = vunpack.c.l.bf16 %v867_v17  ;;  %v531_v31 = vmul.f32 %v836_v1, %v523_v22  ;;  %v873_v33 = vld [vmem:[%s1028_s22 + $0x2] sm:$0x3]  ;;  %v858_v5 = vld [vmem:[%s1090_s5] ss:$0 sm:$0xff] }
  0x15   : > { %v439_v19 = vmul.f32 %v845_v8, %v420_v10  ;;  %v839_v20 = vrot.slane %v397_v14, 9  ;;  %v429_v28 = vmul.f32 %v843_v18, %v420_v10  ;;  %v540_v32 = vmul.f32 %v838_v3, %v523_v22  ;;  %v855_v37 = vld [vmem:[%s1017_s14 + $0x2] sm:$0x3]  ;;  %s835_s14 = sshll.u32 %s1098_s24, 1 }
  0x16   : > { %v555_v39 = vmul.f32 %v841_v9, %v547_v23  ;;  %v577_v40 = vmul.f32 %v845_v8, %v560_v26  ;;  %v457_v41 = vmul.f32 %v848_v29, %v448_v24  ;;  %v482_v43 = vmul.f32 %v853_v30, %v463_v25  ;;  %s364_s9 = scalar_lea.vmem %s1091_s6, %s835_s14 }
  0x17   : > { %v402_v27 = vadd.f32 %v839_v20, %v387_v13  ;;  %v846_v34 = vrot.slane %v439_v19, 9  ;;  %v863_v38 = vrot.slane %v540_v32, 9  ;;  %v586_v44 = vunpack.c.l.bf16 %v873_v33 }
  0x18   : > { %v568_v47 = vmul.f32 %v843_v18, %v560_v26  ;;  %v491_v49 = vunpack.c.l.bf16 %v855_v37  ;;  %v472_v51 = vmul.f32 %v851_v42, %v463_v25  ;;  %v872_v54 = vrot.slane %v577_v40, 9 }
  0x19   : > { %v416_v36 = vadd.f32 %v415_v21, %v402_v27  ;;  %v545_v46 = vadd.f32 %v863_v38, %v531_v31  ;;  %v854_v55 = vrot.slane %v482_v43, 9  ;;  %v594_v59 = vmul.f32 %v848_v29, %v586_v44  ;;  %v655_v29 = vld [vmem:[%s1005_s8] sm:$0x1] }
  0x1a   : > { %v617_v60 = vmul.f32 %v853_v30, %v600_v48  ;;  %v500_v61 = vmul.f32 %v857_v52, %v491_v49  ;;  %v608_v0 = vmul.f32 %v851_v42, %v600_v48  ;;  %v626_v1 = vunpack.c.l.bf16 %v882_v56 }
  0x1b   : > { %v430_v45 = vadd.f32 %v429_v28, %v416_v36  ;;  %v556_v53 = vadd.f32 %v555_v39, %v545_v46 }
  0x1c   : > { %v881_v4 = vrot.slane %v617_v60, 9  ;;  %v634_v8 = vmul.f32 %v857_v52, %v626_v1 }
  0x1d   : > { %v444_v50 = vadd.f32 %v846_v34, %v430_v45  ;;  %v569_v58 = vadd.f32 %v568_v47, %v556_v53 }
  0x1f   : > { %v458_v57 = vadd.f32 %v457_v41, %v444_v50  ;;  %v582_v63 = vadd.f32 %v872_v54, %v569_v58 }
  0x21   : > { %v473_v62 = vadd.f32 %v472_v51, %v458_v57  ;;  %v595_v3 = vadd.f32 %v594_v59, %v582_v63 }
  0x23   : > { %v487_v2 = vadd.f32 %v854_v55, %v473_v62  ;;  %v609_v7 = vadd.f32 %v608_v0, %v595_v3 }
  0x25   : > { %v501_v6 = vadd.f32 %v500_v61, %v487_v2  ;;  %v622_v10 = vadd.f32 %v881_v4, %v609_v7 }
  0x27   : > { %v509_v9 = vadd.f32 %v858_v5, %v501_v6  ;;  %v635_v12 = vadd.f32 %v634_v8, %v622_v10 }
  0x29   : > { %v511_v11 = vsel %vm510_vm1, %v509_v9, 0.0  ;;  %v519_v13 = vpack.c.bf16 %v509_v9, %v509_v9  ;;  %v643_v15 = vadd.f32 %v858_v5, %v635_v12 }
  0x2a   : > { %v512_v14 = vrot.slane %v511_v11, 4 }
  0x2b   : > { %521 = vst.msk [vmem:[%s364_s9] sm:$0x1] %vm374_vm0, %v519_v13  ;;  %v644_v17 = vsel %vm510_vm1, %v643_v15, 0.0  ;;  %v652_v18 = vpack.c.bf16 %v643_v15, %v643_v15 }
  0x2c   : > { %v513_v16 = vadd.f32 %v512_v14, %v511_v11  ;;  %v645_v20 = vrot.slane %v644_v17, 4 }
  0x2d   : > { %886 = vst.msk [vmem:[%s364_s9 + $0x1] sm:$0x1] %vm374_vm0, %v652_v18 }
  0x2e   : > { %v514_v19 = vrot.slane %v513_v16, 2  ;;  %v646_v22 = vadd.f32 %v645_v20, %v644_v17 }
  0x30   : > { %v515_v21 = vadd.f32 %v514_v19, %v513_v16  ;;  %v647_v24 = vrot.slane %v646_v22, 2 }
  0x32   : > { %v516_v23 = vrot.slane %v515_v21, 1  ;;  %v648_v25 = vadd.f32 %v647_v24, %v646_v22 }
  0x34   : > { %v517_v26 = vadd.f32 %v516_v23, %v515_v21  ;;  %v649_v27 = vrot.slane %v648_v25, 1 }
  0x36   : > { %v650_v28 = vadd.f32 %v649_v27, %v648_v25 }
  0x38   : > { %v651_v30 = vadd.f32 %v650_v28, %v517_v26 }
  0x3a   : > { %v656_v31 = vadd.f32 %v655_v29, %v651_v30 }
  0x3c   : > { %657 = vst.msk [vmem:[%s1005_s8] sm:$0x1] %vm374_vm0, %v656_v31 }
  0x3d PF: > { %s18_s26 = sadd.s32 1, %s937_s26   ;;  %s1093_s24 = smov %s933_s25 }
  0x3e   : > { %p15_p5 = scmp.ge.s32.totalorder %s18_s26, 4   ;;  %s1094_s25 = smov %s1096_s27 }
  0x40   :  { %17 = sbr.rel (!%p15_p5) target bundleno = 2 (0x2), region = 118 }

// kernel: _lambda_.38
= control target key start
LH: loop header
LB: loop body
LE: loop exit
PB: predicated region body
PF: predicated region fallthrough
CT: control target
= control target key end

     0   :  { %v141_v0 = vmov 0.0   ;;  %vm142_vm0 = vmmov 0   ;;  %vm58_vm1 = vcmask 523264   ;;  %vm106_vm2 = vcmask 257024   ;;  %s192_s1 = inlined_call_operand.vmem [shape: bf16[64,32], index: 1, kind: input, shape index: {}]   ;;  %s193_s0 = inlined_call_operand.vmem [shape: bf16[8,64], index: 0, kind: input, shape index: {}]   ;;  %s194_s3 = inlined_call_operand.vmem [shape: bf16[8,32], index: 3, kind: input, shape index: {}]   ;;  %s195_s2 = inlined_call_operand.vmem [shape: f32[1,32], index: 2, kind: input, shape index: {}]   ;;  %s196_s4 = inlined_call_operand.vmem [shape: bf16[8,32], index: 4, kind: output, shape index: {}]  }
   0x1   :  { %123 = vmatprep.subr.bf16.mxu0 %v141_v0  ;;  %v137_v1 = vld [vmem:[%s192_s1 + $0x18] sm:$0xff]   ;;  %131 = vmatprep.mubr.msk.bf16.mxu0 %vm142_vm0, %v141_v0  ;;  %v138_v2 = vld [vmem:[%s192_s1 + $0x10] sm:$0xff]   ;;  %v139_v3 = vld [vmem:[%s192_s1 + $0x8] sm:$0xff]  }
   0x2   :  { %124 = vmatpush3.bf16.msra.mxu0 %v137_v1  ;;  %v140_v4 = vld [vmem:[%s192_s1] sm:$0xff]  }
   0x3   :  { %125 = vmatprep.subr.bf16.mxu0 %v141_v0  ;;  %v18_v5 = vld [vmem:[%s193_s0] sm:$0xf] }
   0x4   :  { %v102_v6 = vld [vmem:[%s194_s3] sm:$0xf] }
   0x5   :  { %v112_v7 = vld [vmem:[%s195_s2] ss:$0 sm:$0xff]  ;;  %v103_v8 = vunpack.c.l.bf16 %v102_v6 }
   0x6   :  { %126 = vmatpush3.bf16.msra.mxu0 %v138_v2 }
   0x7   :  { %127 = vmatprep.subr.bf16.mxu0 %v141_v0 }
   0xa   :  { %128 = vmatpush3.bf16.msra.mxu0 %v139_v3 }
   0xb   :  { %129 = vmatprep.subr.bf16.mxu0 %v141_v0 }
   0xe   :  { %130 = vmatpush3.bf16.msra.mxu0 %v140_v4 }
  0x11   :  { %132 = vmatmul.mubr.msk.bf16.vlgmr.msra.gmra.mxu0 %vm58_vm1, %v18_v5 }
  0xd1   :  { %v96_v9 = vpop.f32.mrf.mxu0 }
  0xd2   :  { %v97_v10 = vadd.f32 %v112_v7, %v96_v9 }
  0xd3   :  { %v133_v11 = vpop.f32.mrf.mxu0 }
  0xd4   :  { %v104_v12 = vadd.f32 %v103_v8, %v97_v10 }
  0xd5   :  { %v99_v13 = vpop.f32.mrf.mxu0 }
  0xd6   :  { %v105_v14 = vpack.c.bf16 %v104_v12, %v104_v12 }
  0xd7   :  { %v134_v15 = vpop.f32.mrf.mxu0 }
  0xd8   :  { %107 = vst.msk [vmem:[%s196_s4] sm:$0xf] %vm106_vm2, %v105_v14 }

// kernel: _lambda_.40
= control target key start
LH: loop header
LB: loop body
LE: loop exit
PB: predicated region body
PF: predicated region fallthrough
CT: control target
= control target key end

     0   :  { %v235_v0 = vmov 0.0   ;;  %vm236_vm0 = vmmov 0   ;;  %vm32_vm1 = vcmask 261120   ;;  %vm115_vm2 = vcmask 64512   ;;  %s294_s1 = inlined_call_operand.vmem [shape: f32[32,8], index: 1, kind: input, shape index: {}]   ;;  %s295_s0 = inlined_call_operand.vmem [shape: f32[2,32], index: 0, kind: input, shape index: {}]   ;;  %s296_s3 = inlined_call_operand.vmem [shape: f32[8,32], index: 3, kind: input, shape index: {}]   ;;  %s297_s2 = inlined_call_operand.vmem [shape: f32[1,8], index: 2, kind: input, shape index: {}]   ;;  %s298_s4 = inlined_call_operand.vmem [shape: f32[1,32], index: 4, kind: input, shape index: {}]   ;;  %s299_s5 = inlined_call_operand.vmem [shape: f32[2,32], index: 5, kind: output, shape index: {}]  }
   0x1   :  { %213 = vmatprep.subr.mxu0 %v235_v0  ;;  %v24_v1 = vld [vmem:[%s294_s1 + $0x18] sm:$0xff]  ;;  %v23_v2 = vld [vmem:[%s294_s1 + $0x10] sm:$0xff]  ;;  %221 = vmatprep.mubr.msk.f32.mxu0 %vm236_vm0, %v235_v0  ;;  %v22_v3 = vld [vmem:[%s294_s1 + $0x8] sm:$0xff]  ;;  %vm195_vm3 = vcmask 254976  }
   0x2   :  { %214 = vmatpush3.msra.mxu0 %v24_v1  ;;  %224 = vmatprep.subr.mxu1 %v235_v0  ;;  %v21_v4 = vld [vmem:[%s294_s1] sm:$0xff] }
   0x3   :  { %215 = vmatprep.subr.mxu0 %v235_v0  ;;  %226 = vmatprep.mubr.msk.f32.mxu1 %vm236_vm0, %v235_v0  ;;  %v20_v5 = vld [vmem:[%s295_s0] sm:$0x3] }
   0x4   :  { %216 = vmatpush3.msra.mxu0 %v23_v2  ;;  %v107_v6 = vld [vmem:[%s296_s3] sm:$0xff] }
   0x5   :  { %217 = vmatprep.subr.mxu0 %v235_v0  ;;  %225 = vmatpush3.msra.mxu1 %v107_v6  ;;  %v201_v7 = vld [vmem:[%s297_s2] ss:$0 sm:$0xff] }
   0x6   :  { %218 = vmatpush3.msra.mxu0 %v22_v3  ;;  %v203_v12 = vld [vmem:[%s298_s4] ss:$0 sm:$0xff] }
   0x7   :  { %219 = vmatprep.subr.mxu0 %v235_v0 }
   0x8   :  { %220 = vmatpush3.msra.mxu0 %v21_v4 }
   0x9   :  { %222 = vmatmul.mubr.msk.f32.vlgmr.msra.gmra.mxu0 %vm32_vm1, %v20_v5 }
  0xc9   :  { %v102_v8 = vpop.f32.mrf.mxu0 }
  0xca   :  { %v103_v9 = vadd.f32 %v201_v7, %v102_v8 }
  0xcb   :  { %v223_v10 = vpop.f32.mrf.mxu0 }
  0xcc   :  { %v106_v11 = vmax.f32 %v103_v9, 0.0 }
  0xce   :  { %227 = vmatmul.mubr.msk.f32.vlgmr.msra.gmra.mxu1 %vm115_vm2, %v106_v11 }
 0x18e   :  { %v185_v13 = vpop.f32.mrf.mxu1 }
 0x18f   :  { %v186_v14 = vadd.f32 %v203_v12, %v185_v13 }
 0x190   :  { %v228_v15 = vpop.f32.mrf.mxu1 }
 0x191   :  { %v205_v16 = vmul.f32 -1.442695, %v186_v14 }
 0x193   :  { %231 = vpow2.f32 %v205_v16 }
 0x1a0   :  { %v232_v17 = vpop.eup %231 }
 0x1a1   :  { %v192_v18 = vadd.f32 1.0, %v232_v17 }
 0x1a3   :  { %233 = vrcp.f32 %v192_v18 }
 0x1b0   :  { %v234_v19 = vpop.eup %233 }
 0x1b1   :  { %196 = vst.msk [vmem:[%s299_s5] sm:$0x3] %vm195_vm3, %v234_v19 }

// kernel: _lambda_.37
= control target key start
LH: loop header
LB: loop body
LE: loop exit
PB: predicated region body
PF: predicated region fallthrough
CT: control target
= control target key end

     0   :  { %v120_v0 = vmov 0.0   ;;  %vm121_vm0 = vmmov 0   ;;  %vm39_vm1 = vcmask 261120   ;;  %vm93_vm2 = vcmask 519168   ;;  %s157_s1 = inlined_call_operand.vmem [shape: bf16[32,64], index: 1, kind: input, shape index: {}]   ;;  %s158_s0 = inlined_call_operand.vmem [shape: bf16[8,32], index: 0, kind: input, shape index: {}]   ;;  %s159_s2 = inlined_call_operand.vmem [shape: f32[1,64], index: 2, kind: input, shape index: {}]   ;;  %s160_s3 = inlined_call_operand.vmem [shape: bf16[8,64], index: 3, kind: output, shape index: {}]  }
   0x1   :  { %106 = vmatprep.subr.bf16.mxu0 %v120_v0  ;;  %v116_v1 = vld [vmem:[%s157_s1 + $0x8] sm:$0xff]   ;;  %110 = vmatprep.mubr.msk.bf16.mxu0 %vm121_vm0, %v120_v0  ;;  %v117_v2 = vld [vmem:[%s157_s1] sm:$0xff]  }
   0x2   :  { %107 = vmatpush3.bf16.msra.mxu0 %v116_v1  ;;  %v15_v3 = vld [vmem:[%s158_s0] sm:$0xf] }
   0x3   :  { %108 = vmatprep.subr.bf16.mxu0 %v120_v0  ;;  %v99_v4 = vld [vmem:[%s159_s2] ss:$0 sm:$0xff] }
   0x6   :  { %109 = vmatpush3.bf16.msra.mxu0 %v117_v2 }
   0x9   :  { %111 = vmatmul.mubr.msk.bf16.vlgmr.msra.gmra.mxu0 %vm39_vm1, %v15_v3 }
  0xc9   :  { %v77_v5 = vpop.f32.mrf.mxu0 }
  0xca   :  { %v78_v6 = vadd.f32 %v99_v4, %v77_v5 }
  0xcb   :  { %v112_v7 = vpop.f32.mrf.mxu0 }
  0xcc   :  { %v83_v8 = vmul.f32 %v78_v6, %v78_v6 }
  0xcd   :  { %v80_v9 = vpop.f32.mrf.mxu0 }
  0xce   :  { %v84_v10 = vmul.f32 %v83_v8, %v78_v6 }
  0xcf   :  { %v113_v11 = vpop.f32.mrf.mxu0 }
  0xd0   :  { %v85_v12 = vmul.f32 0.044715, %v84_v10 }
  0xd2   :  { %v86_v13 = vadd.f32 %v85_v12, %v78_v6 }
  0xd4   :  { %v87_v14 = vmul.f32 0.7978846, %v86_v13 }
  0xd6   :  { %118 = vtanh.f32 %v87_v14 }
  0xe3   :  { %v119_v15 = vpop.eup %118 }
  0xe4   :  { %v89_v16 = vadd.f32 1.0, %v119_v15 }
  0xe6   :  { %v90_v17 = vmul.f32 0.5, %v89_v16 }
  0xe8   :  { %v91_v18 = vmul.f32 %v90_v17, %v78_v6 }
  0xea   :  { %v92_v19 = vpack.c.bf16 %v91_v18, %v91_v18 }
  0xec   :  { %94 = vst.msk [vmem:[%s160_s3] sm:$0xf] %vm93_vm2, %v92_v19 }

// kernel: _lambda_.41
= control target key start
LH: loop header
LB: loop body
LE: loop exit
PB: predicated region body
PF: predicated region fallthrough
CT: control target
= control target key end

     0   :  { %s250_s9 = smov 0   ;;  %s278_s0 = inlined_call_operand.vmem [shape: bf16[2,4,32], index: 0, kind: input, shape index: {}]   ;;  %s279_s1 = inlined_call_operand.vmem [shape: f32[2,1,32], index: 1, kind: input, shape index: {}]   ;;  %s280_s2 = inlined_call_operand.vmem [shape: bf16[2,4,32], index: 2, kind: output, shape index: {}]  }
   0x1 LB: > { %s228_s10 = sadd.s32 4294967295, %s252_s9   ;;  %p232_p0 = scmp.ge.s32.totalorder %s252_s9, 1  ;;  %s252_s9 = sphi %s250_s9, %s12_s9  }
   0x2   : > { %p119_p1 = scmp.lt.s32.totalorder %s252_s9, 3 }
   0x4   : > { %p120_p2 = pnand %p232_p0, %p119_p1 }
   0x5   : > { %p142_p3 = scmp.lt.s32.totalorder (!%p120_p2), %s228_s10, 1 }
   0x6   : > { %123 = sbr.rel (%p120_p2) target bundleno = 22 (0x16), region = 28 }
   0xb   : > { %s282_s10 = smov (!%p142_p3, %s228_s10), 1  ;;  %vm164_vm0 = vcmask 254976  }
   0xc   : > { %s233_s11 = sshll.u32 %s282_s10, 1  ;;  %s148_s14 = scalar_lea.vmem %s279_s1, %s282_s10 }
   0xd   : > { %s145_s17 = scalar_lea.vmem %s278_s0, %s233_s11  ;;  %v235_v1 = vld [vmem:[%s148_s14] ss:$0 sm:$0xff]  ;;  %s152_s20 = scalar_lea.vmem %s280_s2, %s233_s11 }
   0xe   : > { %v153_v0 = vld [vmem:[%s145_s17] sm:$0x3] }
   0xf   : > { %v154_v2 = vunpack.c.l.bf16 %v153_v0 }
  0x11   : > { %v162_v3 = vmul.f32 %v235_v1, %v154_v2 }
  0x13   : > { %v163_v4 = vpack.c.bf16 %v162_v3, %v162_v3 }
  0x15   : > { %165 = vst.msk [vmem:[%s152_s20] sm:$0x3] %vm164_vm0, %v163_v4 }
  0x16 PF: > { %s12_s9 = sadd.s32 1, %s252_s9  }
  0x17   : > { %p9_p4 = scmp.ge.s32.totalorder %s12_s9, 4  }
  0x19   :  { %11 = sbr.rel (!%p9_p4) target bundleno = 1 (0x1), region = 61 }

// kernel: _lambda_.39
= control target key start
LH: loop header
LB: loop body
LE: loop exit
PB: predicated region body
PF: predicated region fallthrough
CT: control target
= control target key end

     0   :  { %s992_s18 = smov 0   ;;  %s994_s19 = smov 0   ;;  %s1099_s0 = inlined_call_operand.vmem [shape: bf16[2,4,4,32], index: 0, kind: input, shape index: {}]   ;;  %s1100_s1 = inlined_call_operand.vmem [shape: f32[9,1,32], index: 1, kind: input, shape index: {}]   ;;  %s1101_s2 = inlined_call_operand.vmem [shape: f32[1,32], index: 2, kind: input, shape index: {}]   ;;  %s1102_s3 = inlined_call_operand.vmem [shape: bf16[32,32], index: 3, kind: input, shape index: {}]   ;;  %s1103_s4 = inlined_call_operand.vmem [shape: bf16[2,2,2,32], index: 4, kind: output, shape index: {0}]   ;;  %s1104_s5 = inlined_call_operand.vmem [shape: f32[2,1,32], index: 5, kind: output, shape index: {1}]  }
   0x1   :  { %s996_s20 = smov 0  }
   0x2 LB: > { %s28_s21 = sadd.s32 1, %s953_s19  ;;  %p815_p0 = scmp.ge.s32.totalorder %s957_s20, 1  ;;  %s957_s20 = sphi %s996_s20, %s16_s20   ;;  %s953_s19 = sphi %s994_s19, %s1106_s19   ;;  %s949_s18 = sphi %s992_s18, %s1105_s18  }
   0x3   : > { %p30_p1 = scmp.ge.s32.totalorder %s28_s21, 2  ;;  %p204_p2 = scmp.lt.s32.totalorder %s957_s20, 3 }
   0x5   : > { %s1108_s21 = smov (%p30_p1, %s28_s21), 0  ;;  %p205_p3 = pnand %p815_p0, %p204_p2 }
   0x6   : > { %p238_p4 = scmp.lt.s32.totalorder (!%p205_p3), %s949_s18, 1 }
   0x7   : > { %208 = sbr.rel (%p205_p3) target bundleno = 241 (0xf1), region = 36 }
   0xc   : > { %v931_v0 = vld [vmem:[%s1102_s3 + $0x8] sm:$0xff]   ;;  %v959_v1 = vmov 0.0   ;;  %v406_v3 = vlaneseq  ;;  %v933_v4 = vld [vmem:[%s1102_s3] sm:$0xff]   ;;  %vm960_vm0 = vmmov 0   ;;  %s1110_s18 = smov (!%p238_p4, %s949_s18), 1  ;;  %vm429_vm1 = vcmask 261120  }
   0xd   : > { %888 = vmatprep.subr.bf16.mxu0 %v959_v1  ;;  %896 = vmatprep.subr.bf16.mxu1 %v959_v1  ;;  %v932_v2 = vld [vmem:[%s1102_s3 + $0x8] sm:$0xff]   ;;  %v934_v5 = vld [vmem:[%s1102_s3] sm:$0xff]   ;;  %v961_v6 = vmov 1983009808   ;;  %s881_s30 = sshll.u32 %s1110_s18, 3  ;;  %vm261_vm2 = vcmask 253952   ;;  %s1073_s9 = scalar_lea.vmem %s1104_s5, %s1110_s18 }
   0xe   : > { %889 = vmatpush3.bf16.msra.mxu0 %v931_v0  ;;  %892 = vmatprep.mubr.msk.bf16.mxu0 %vm960_vm0, %v959_v1  ;;  %v404_v7 = vunpack.c.l.s4 %v961_v6  ;;  %v407_v8 = vshrl.u32 %v406_v3, 7  ;;  %s1034_s8 = scalar_lea.vmem %s1099_s0, %s881_s30  ;;  %v821_v10 = vld [vmem:[%s1100_s1 + $0x1] ss:$0 sm:$0xff]  ;;  %v819_v16 = vld [vmem:[%s1100_s1] ss:$0 sm:$0xff]  ;;  %s818_s11 = sshll.u32 %s1110_s18, 1 }
   0xf   : > { %897 = vmatpush3.bf16.msra.mxu1 %v932_v2  ;;  %890 = vmatprep.subr.bf16.mxu0 %v959_v1  ;;  %v826_v11 = vld [vmem:[%s1034_s8 + $0x2] sm:$0x3]  ;;  %v856_v12 = vld [vmem:[%s1034_s8 + $0x4] sm:$0x3]  ;;  %v265_v13 = vld [vmem:[%s1034_s8] sm:$0x3]  ;;  %s250_s14 = scalar_lea.vmem %s1103_s4, %s818_s11 }
  0x10   : > { %898 = vmatprep.subr.bf16.mxu1 %v959_v1  ;;  %900 = vmatprep.mubr.msk.bf16.mxu1 %vm960_vm0, %v959_v1  ;;  %v405_v9 = vunpack.c.0.s8 %v404_v7  ;;  %v266_v15 = vunpack.c.l.bf16 %v265_v13  ;;  %v824_v17 = vld [vmem:[%s1100_s1 + $0x2] ss:$0 sm:$0xff]  ;;  %v308_v18 = vunpack.c.l.bf16 %v826_v11  ;;  %v830_v22 = vld [vmem:[%s1100_s1 + $0x4] ss:$0 sm:$0xff]  ;;  %v828_v25 = vld [vmem:[%s1100_s1 + $0x3] ss:$0 sm:$0xff]  ;;  %v524_v63 = vunpack.c.l.bf16 %v856_v12 }
  0x11   : > { %v833_v26 = vld [vmem:[%s1100_s1 + $0x5] ss:$0 sm:$0xff]  ;;  %v839_v43 = vld [vmem:[%s1100_s1 + $0x7] ss:$0 sm:$0xff]  ;;  %v837_v46 = vld [vmem:[%s1100_s1 + $0x6] ss:$0 sm:$0xff] }
  0x12   : > { %891 = vmatpush3.bf16.msra.mxu0 %v933_v4  ;;  %v408_v14 = vsub.s32 %v405_v9, %v407_v8  ;;  %v284_v21 = vmul.f32 %v821_v10, %v266_v15  ;;  %v274_v23 = vmul.f32 %v819_v16, %v266_v15  ;;  %v298_v24 = vmul.f32 %v824_v17, %v266_v15  ;;  %v835_v31 = vld [vmem:[%s1034_s8 + $0x4] sm:$0x3]  ;;  %v842_v47 = vld [vmem:[%s1100_s1 + $0x8] ss:$0 sm:$0xff]  ;;  %v848_v60 = vld [vmem:[%s1034_s8 + $0x2] sm:$0x3] }
  0x13   : > { %899 = vmatpush3.bf16.msra.mxu1 %v934_v5  ;;  %v327_v34 = vmul.f32 %v830_v22, %v308_v18  ;;  %v317_v38 = vmul.f32 %v828_v25, %v308_v18  ;;  %v341_v39 = vmul.f32 %v833_v26, %v308_v18  ;;  %v351_v40 = vunpack.c.l.bf16 %v835_v31  ;;  %262 = vst.msk [vmem:[%s1073_s9] sm:$0x1] %vm261_vm2, %v959_v1 }
  0x14   : > { %v409_v19 = vrot.slane %v826_v11, %v408_v14  ;;  %v619_v20 = vrot.slane %v856_v12, %v408_v14  ;;  %v822_v32 = vrot.slane %v284_v21, 9  ;;  %v825_v33 = vrot.slane %v298_v24, 10  ;;  %v865_v14 = vld [vmem:[%s1034_s8 + $0x6] sm:$0x3] }
  0x15   : > { %v831_v45 = vrot.slane %v327_v34, 9  ;;  %v834_v49 = vrot.slane %v341_v39, 10  ;;  %v370_v50 = vmul.f32 %v839_v43, %v351_v40  ;;  %v360_v52 = vmul.f32 %v837_v46, %v351_v40 }
  0x16   : > { %v411_v27 = vshrl.u32 %v409_v19, 16  ;;  %v413_v28 = vshll.u32 %v409_v19, 16  ;;  %v621_v29 = vshrl.u32 %v619_v20, 16  ;;  %v623_v30 = vshll.u32 %v619_v20, 16 }
  0x17   : > { %v289_v37 = vadd.f32 %v822_v32, %v274_v23  ;;  %v384_v53 = vmul.f32 %v842_v47, %v351_v40  ;;  %v840_v55 = vrot.slane %v370_v50, 9  ;;  %v487_v61 = vunpack.c.l.bf16 %v848_v60 }
  0x18   : > { %v415_v35 = vrot.slane %v413_v28, 1  ;;  %v625_v36 = vrot.slane %v623_v30, 1  ;;  %v532_v7 = vmul.f32 %v828_v25, %v524_v63  ;;  %v541_v8 = vmul.f32 %v830_v22, %v524_v63  ;;  %v844_v22 = vld [vmem:[%s1101_s2] ss:$0 sm:$0xff] }
  0x19   : > { %v303_v44 = vadd.f32 %v825_v33, %v289_v37  ;;  %v843_v57 = vrot.slane %v384_v53, 10  ;;  %v504_v62 = vmul.f32 %v821_v10, %v487_v61  ;;  %v495_v0 = vmul.f32 %v819_v16, %v487_v61 }
  0x1a   : > { %v416_v41 = vor.u32 %v415_v35, %v411_v27  ;;  %v626_v42 = vor.u32 %v625_v36, %v621_v29  ;;  %v517_v3 = vmul.f32 %v824_v17, %v487_v61  ;;  %v861_v11 = vrot.slane %v541_v8, 9  ;;  %v694_v53 = vld [vmem:[%s1073_s9] sm:$0x1] }
  0x1b   : > { %v318_v48 = vadd.f32 %v317_v38, %v303_v44  ;;  %v852_v2 = vrot.slane %v504_v62, 9  ;;  %v554_v13 = vmul.f32 %v833_v26, %v524_v63  ;;  %v564_v19 = vunpack.c.l.bf16 %v865_v14 }
  0x1c   : > { %893 = vmatmul.mubr.msk.bf16.vlgmr.msra.gmra.mxu0 %vm429_vm1, %v416_v41  ;;  %901 = vmatmul.mubr.msk.bf16.vlgmr.msra.gmra.mxu1 %vm429_vm1, %v626_v42  ;;  %v855_v5 = vrot.slane %v517_v3, 10  ;;  %vm474_vm3 = vcmask 254976  }
  0x1d   : > { %v332_v51 = vadd.f32 %v831_v45, %v318_v48  ;;  %v509_v4 = vadd.f32 %v852_v2, %v495_v0  ;;  %v864_v18 = vrot.slane %v554_v13, 10  ;;  %v572_v10 = vmul.f32 %v837_v46, %v564_v19 }
  0x1e   : > { %v581_v12 = vmul.f32 %v839_v43, %v564_v19  ;;  %v594_v17 = vmul.f32 %v842_v47, %v564_v19 }
  0x1f   : > { %v346_v54 = vadd.f32 %v834_v49, %v332_v51  ;;  %v522_v6 = vadd.f32 %v855_v5, %v509_v4 }
  0x20   : > { %v870_v21 = vrot.slane %v581_v12, 9  ;;  %v873_v24 = vrot.slane %v594_v17, 10 }
  0x21   : > { %v361_v56 = vadd.f32 %v360_v52, %v346_v54  ;;  %v533_v9 = vadd.f32 %v532_v7, %v522_v6 }
  0x23   : > { %v375_v58 = vadd.f32 %v840_v55, %v361_v56  ;;  %v546_v15 = vadd.f32 %v861_v11, %v533_v9 }
  0x25   : > { %v389_v59 = vadd.f32 %v843_v57, %v375_v58  ;;  %v559_v20 = vadd.f32 %v864_v18, %v546_v15 }
  0x27   : > { %v573_v16 = vadd.f32 %v572_v10, %v559_v20  ;;  %v397_v25 = vadd.f32 %v844_v22, %v389_v59 }
  0x29   : > { %v586_v23 = vadd.f32 %v870_v21, %v573_v16 }
  0x2b   : > { %v599_v27 = vadd.f32 %v873_v24, %v586_v23 }
  0x2d   : > { %v607_v26 = vadd.f32 %v844_v22, %v599_v27 }
  0xdc   : > { %v467_v28 = vpop.f32.mrf.mxu0  ;;  %v676_v29 = vpop.f32.mrf.mxu1 }
  0xdd   : > { %v473_v30 = vadd.f32 %v467_v28, %v397_v25  ;;  %v682_v31 = vadd.f32 %v676_v29, %v607_v26 }
  0xde   : > { %v894_v32 = vpop.f32.mrf.mxu0  ;;  %v902_v33 = vpop.f32.mrf.mxu1 }
  0xdf   : > { %v475_v34 = vsel %vm474_vm3, %v473_v30, 0.0  ;;  %v483_v1 = vpack.c.bf16 %v473_v30, %v473_v30  ;;  %v683_v35 = vsel %vm474_vm3, %v682_v31, 0.0  ;;  %v691_v36 = vpack.c.bf16 %v682_v31, %v682_v31 }
  0xe0   : > { %v476_v37 = vrot.slane %v475_v34, 4  ;;  %v684_v38 = vrot.slane %v683_v35, 4  ;;  %v470_v39 = vpop.f32.mrf.mxu0  ;;  %v679_v40 = vpop.f32.mrf.mxu1 }
  0xe1   : > { %485 = vst.msk [vmem:[%s250_s14] sm:$0x1] %vm261_vm2, %v483_v1  ;;  %878 = vst.msk [vmem:[%s250_s14 + $0x1] sm:$0x1] %vm261_vm2, %v691_v36 }
  0xe2   : > { %v477_v41 = vadd.f32 %v476_v37, %v475_v34  ;;  %v685_v42 = vadd.f32 %v684_v38, %v683_v35  ;;  %v895_v43 = vpop.f32.mrf.mxu0  ;;  %v903_v44 = vpop.f32.mrf.mxu1 }
  0xe4   : > { %v478_v45 = vrot.slane %v477_v41, 2  ;;  %v686_v46 = vrot.slane %v685_v42, 2 }
  0xe6   : > { %v479_v47 = vadd.f32 %v478_v45, %v477_v41  ;;  %v687_v48 = vadd.f32 %v686_v46, %v685_v42 }
  0xe8   : > { %v480_v49 = vrot.slane %v479_v47, 1  ;;  %v688_v50 = vrot.slane %v687_v48, 1 }
  0xea   : > { %v481_v51 = vadd.f32 %v480_v49, %v479_v47  ;;  %v689_v52 = vadd.f32 %v688_v50, %v687_v48 }
  0xec   : > { %v690_v54 = vadd.f32 %v689_v52, %v481_v51 }
  0xee   : > { %v695_v55 = vadd.f32 %v694_v53, %v690_v54 }
  0xf0   : > { %696 = vst.msk [vmem:[%s1073_s9] sm:$0x1] %vm261_vm2, %v695_v55 }
  0xf1 PF: > { %s16_s20 = sadd.s32 1, %s957_s20   ;;  %s1105_s18 = smov %s953_s19 }
  0xf2   : > { %p13_p5 = scmp.ge.s32.totalorder %s16_s20, 4   ;;  %s1106_s19 = smov %s1108_s21 }
  0xf4   :  { %15 = sbr.rel (!%p13_p5) target bundleno = 2 (0x2), region = 95 }

// kernel: _lambda_.44
= control target key start
LH: loop header
LB: loop body
LE: loop exit
PB: predicated region body
PF: predicated region fallthrough
CT: control target
= control target key end

     0   :  { %s205_s6 = smov 0   ;;  %s216_s0 = inlined_call_operand.vmem [shape: bf16[2,4,32], index: 0, kind: input, shape index: {}]   ;;  %s217_s1 = inlined_call_operand.vmem [shape: f32[2,1,32], index: 1, kind: output, shape index: {}]  }
   0x1 LB: > { %s171_s7 = sadd.s32 4294967295, %s193_s6   ;;  %p175_p0 = scmp.ge.s32.totalorder %s193_s6, 1  ;;  %s193_s6 = sphi %s205_s6, %s11_s6  }
   0x2   : > { %p86_p1 = scmp.lt.s32.totalorder %s193_s6, 3 }
   0x4   : > { %p87_p2 = pnand %p175_p0, %p86_p1 }
   0x5   : > { %p103_p3 = scmp.lt.s32.totalorder (!%p87_p2), %s171_s7, 1 }
   0x6   : > { %90 = sbr.rel (%p87_p2) target bundleno = 33 (0x21), region = 24 }
   0xb   : > { %s219_s7 = smov (!%p103_p3, %s171_s7), 1  ;;  %vm112_vm0 = vcmask 257024   ;;  %vm122_vm1 = vcmask 253952  }
   0xc   : > { %s176_s8 = sshll.u32 %s219_s7, 1  ;;  %s109_s14 = scalar_lea.vmem %s217_s1, %s219_s7 }
   0xd   : > { %s106_s11 = scalar_lea.vmem %s216_s0, %s176_s8 }
   0xe   : > { %v110_v0 = vld [vmem:[%s106_s11] sm:$0x3] }
   0xf   : > { %v111_v1 = vunpack.c.l.bf16 %v110_v0 }
  0x11   : > { %v113_v2 = vsel %vm112_vm0, %v111_v1, 0.0 }
  0x12   : > { %v114_v3 = vrot.slane %v113_v2, 4 }
  0x14   : > { %v115_v4 = vadd.f32 %v114_v3, %v113_v2 }
  0x16   : > { %v116_v5 = vrot.slane %v115_v4, 2 }
  0x18   : > { %v117_v6 = vadd.f32 %v116_v5, %v115_v4 }
  0x1a   : > { %v118_v7 = vrot.slane %v117_v6, 1 }
  0x1c   : > { %v119_v8 = vadd.f32 %v118_v7, %v117_v6 }
  0x1e   : > { %v121_v9 = vmul.f32 0.25, %v119_v8 }
  0x20   : > { %123 = vst.msk [vmem:[%s109_s14] sm:$0x1] %vm122_vm1, %v121_v9 }
  0x21 PF: > { %s11_s6 = sadd.s32 1, %s193_s6  }
  0x22   : > { %p8_p4 = scmp.ge.s32.totalorder %s11_s6, 4  }
  0x24   :  { %10 = sbr.rel (!%p8_p4) target bundleno = 1 (0x1), region = 54 }

// kernel: _lambda_.45
= control target key start
LH: loop header
LB: loop body
LE: loop exit
PB: predicated region body
PF: predicated region fallthrough
CT: control target
= control target key end

     0   :  { %v142_v1 = vmov 0.0   ;;  %vm143_vm0 = vmmov 0   ;;  %s180_s0 = inlined_call_operand.vmem [shape: bf16[2,32], index: 0, kind: input, shape index: {}]   ;;  %s181_s1 = inlined_call_operand.vmem [shape: bf16[32,10], index: 1, kind: input, shape index: {}]   ;;  %s182_s2 = inlined_call_operand.vmem [shape: f32[1,10], index: 2, kind: input, shape index: {}]   ;;  %s183_s3 = inlined_call_operand.hbm [shape: f32[2,10], index: 3, kind: output, shape index: {}]  }
   0x1   :  { %v118_v0 = vld [vmem:[%s181_s1 + $0x8] sm:$0xff]   ;;  %107 = vmatprep.subr.bf16.mxu0 %v142_v1  ;;  %v119_v2 = vld [vmem:[%s181_s1] sm:$0xff]   ;;  %111 = vmatprep.mubr.msk.bf16.mxu0 %vm143_vm0, %v142_v1 }
   0x2   :  { %108 = vmatpush3.bf16.msra.mxu0 %v118_v0 }
   0x3   :  { %109 = vmatprep.subr.bf16.mxu0 %v142_v1 }
   0x4   :  { %8 = vsyncpa [#allocation3], 0  ;;  %v16_v3 = vld [vmem:[%s180_s0] sm:$0x1]  ;;  %vm40_vm1 = vcmask 261120   ;;  %s144_s20 = smov [#allocation2]  }
   0x5   :  { %v100_v4 = vld [vmem:[%s182_s2] ss:$0 sm:$0xff]  ;;  %s92_s21 = sshll.u32 %s144_s20, 4  ;;  %vm84_vm2 = vcmask 74752   ;;  %s93_s21 = int_to_ptr.vmem [resolvable:$true] %s92_s21 }
   0x6   :  { %110 = vmatpush3.bf16.msra.mxu0 %v119_v2  ;;  %s120_s1 = scalar_lea.vmem %s93_s21, 32  ;;  %p125_p1 = scmp.lt.s32.totalorder %s93_s21, %s93_s21 }
   0x7   :  { %p121_p0 = scmp.ne.s32.totalorder %s93_s21, %s120_s1  ;;  %p126_p2 = scmp.lt.s32.totalorder %s120_s1, %s120_s1 }
   0x9   :  { %112 = vmatmul.mubr.msk.bf16.vlgmr.msra.gmra.mxu0 %vm40_vm1, %v16_v3  ;;  %p127_p3 = por %p126_p2, %p125_p1 }
   0xb   :  { %p128_p4 = pnand %p127_p3, %p121_p0 }
  0xc9   :  { %v78_v5 = vpop.f32.mrf.mxu0 }
  0xca   :  { %v79_v6 = vadd.f32 %v100_v4, %v78_v5 }
  0xcb   :  { %v113_v7 = vpop.f32.mrf.mxu0 }
  0xcc   :  { %85 = vst.msk [vmem:[#allocation2] sm:$0x3] %vm84_vm2, %v79_v6 }
  0xcd   :  { %v81_v8 = vpop.f32.mrf.mxu0 }
  0xce   :  { %131 = shalt.err (!%p128_p4)
}
  0xcf   :  { %95 = dma.vmem_to_hbm [thread:$0]  %s93_s21, 32, %s183_s3, [#allocation3]   ;;  %v114_v9 = vpop.f32.mrf.mxu0 }
  0xd0   :  { %140 = dma.done.wait [#allocation3], 32  }
  0xd1   :  { %141 = vsyncadd [#allocation3], 4294967264 }
  0xd2   :  { %99 = vsyncpa [#allocation3], 1 }

</bundles_post_ra>
